<compile_context>
chip_gen: v7x
topology: tpu7x:2x2x1
jax: 0.10.0
libtpu: 0.0.40
codegen_flags: <defaults>
</compile_context>

<pallas_src>
import math
import functools

import jax
import jax.numpy as jnp
from jax import lax
from jax.experimental import pallas as pl
from jax.experimental.pallas import tpu as pltpu

# ------------------------- hyper-params (from the module) -------------------
D_MODEL = 16
N_HEAD = 8
HEAD_DIM = D_MODEL // N_HEAD
N_LAYERS = 6
D_FF = D_MODEL * 4
LN_EPS = 1e-5
EMB_SCALE = math.sqrt(D_MODEL)
ATTN_SCALE = 1.0 / math.sqrt(HEAD_DIM)
V_PAD = 128  # lane-dense padded vocab for the final projection


# --------------------------- BlockSpec helpers --------------------------------
def _layer_spec(shape):
    """Stacked per-layer weight [NL, a, b]: stream one layer per grid step."""
    nd = len(shape)
    block = (1,) + tuple(shape[1:])
    return pl.BlockSpec(block, lambda l, _nd=nd: (l,) + (0,) * (_nd - 1))


def _const_spec(shape):
    """Whole array, same block every grid step (stays resident)."""
    nd = len(shape)
    return pl.BlockSpec(tuple(shape), lambda l, _nd=nd: (0,) * _nd)


# --------------------------- in-kernel compute helpers ------------------------
def _layernorm(x, g, b):
    mu = jnp.mean(x, axis=-1, keepdims=True)
    var = jnp.mean((x - mu) ** 2, axis=-1, keepdims=True)
    return (x - mu) * lax.rsqrt(var + LN_EPS) * g + b


def _linear(x, w, b):
    return jnp.dot(x, w, preferred_element_type=jnp.float32) + b


def _mha(q, k, v, n_batch, lq, lk):
    """q: [n_batch*lq, D]; k, v: [n_batch*lk, D] -> [n_batch*lq, D].
    Batch/head handled with static Python loops fully inside the kernel
    (no HBM round-trips / relayout transposes between kernels)."""
    out_rows = []
    for b in range(n_batch):
        qb = q[b * lq:(b + 1) * lq, :]
        kb = k[b * lk:(b + 1) * lk, :]
        vb = v[b * lk:(b + 1) * lk, :]
        heads = []
        for h in range(N_HEAD):
            lo, hi = h * HEAD_DIM, (h + 1) * HEAD_DIM
            qh, kh, vh = qb[:, lo:hi], kb[:, lo:hi], vb[:, lo:hi]
            # scores = qh @ kh.T (contract over head_dim) without explicit transpose
            s = lax.dot_general(qh, kh, (((1,), (1,)), ((), ())),
                                preferred_element_type=jnp.float32) * ATTN_SCALE
            s = s - jnp.max(s, axis=-1, keepdims=True)
            p = jnp.exp(s)
            p = p / jnp.sum(p, axis=-1, keepdims=True)
            heads.append(jnp.dot(p, vh, preferred_element_type=jnp.float32))
        out_rows.append(jnp.concatenate(heads, axis=-1))
    return jnp.concatenate(out_rows, axis=0)


# ------------------------------- fused kernels --------------------------------
def _encoder_kernel(emb_ref, wqkv_ref, bqkv_ref, wo_ref, bo_ref,
                    w1_ref, b1_ref, w2_ref, b2_ref, ln_ref, norm_ref,
                    o_ref, *, n_batch, seq_len):
    l = pl.program_id(0)

    # activation lives in the (VMEM-resident) output ref across all layers
    @pl.when(l == 0)
    def _():
        o_ref[...] = emb_ref[...] * EMB_SCALE   # Embeddings: lut(x) * sqrt(d_model)

    x = o_ref[...]
    ln = ln_ref[0]                              # [4, D]: g1, b1, g2, b2

    # ---- self attention (fused QKV projection) ----
    qkv = _linear(x, wqkv_ref[0], bqkv_ref[0])  # [N, 3D]
    q = qkv[:, :D_MODEL]
    k = qkv[:, D_MODEL:2 * D_MODEL]
    v = qkv[:, 2 * D_MODEL:]
    a = _mha(q, k, v, n_batch, seq_len, seq_len)
    a = _linear(a, wo_ref[0], bo_ref[0])
    x = _layernorm(x + a, ln[0:1, :], ln[1:2, :])       # post-LN (norm_first=False)

    # ---- feed forward (relu; dropout = identity in eval) ----
    h = jnp.maximum(_linear(x, w1_ref[0], b1_ref[0]), 0.0)
    f = _linear(h, w2_ref[0], b2_ref[0])
    x = _layernorm(x + f, ln[2:3, :], ln[3:4, :])

    o_ref[...] = x

    @pl.when(l == pl.num_programs(0) - 1)
    def _():
        # TransformerEncoder final LayerNorm
        o_ref[...] = _layernorm(x, norm_ref[0:1, :], norm_ref[1:2, :])


def _decoder_kernel(emb_ref, mem_ref,
                    wqkv_ref, bqkv_ref, wo_s_ref, bo_s_ref,
                    wq_c_ref, bq_c_ref, wkv_c_ref, bkv_c_ref, wo_c_ref, bo_c_ref,
                    w1_ref, b1_ref, w2_ref, b2_ref, ln_ref,
                    norm_ref, fcw_ref, fcb_ref,
                    o_ref, x_scr, *, n_batch, tgt_len, src_len):
    l = pl.program_id(0)

    @pl.when(l == 0)
    def _():
        x_scr[...] = emb_ref[...] * EMB_SCALE

    x = x_scr[...]
    mem = mem_ref[...]
    ln = ln_ref[0]                              # [6, D]: g1,b1,g2,b2,g3,b3

    # ---- self attention ----
    # TODO(synk): no causal (subsequent-position) mask, matching the reference
    # forward which calls nn.Transformer without tgt_mask.
    qkv = _linear(x, wqkv_ref[0], bqkv_ref[0])
    q = qkv[:, :D_MODEL]
    k = qkv[:, D_MODEL:2 * D_MODEL]
    v = qkv[:, 2 * D_MODEL:]
    a = _mha(q, k, v, n_batch, tgt_len, tgt_len)
    a = _linear(a, wo_s_ref[0], bo_s_ref[0])
    x = _layernorm(x + a, ln[0:1, :], ln[1:2, :])

    # ---- cross attention over encoder memory (fused KV projection) ----
    qc = _linear(x, wq_c_ref[0], bq_c_ref[0])
    kvc = _linear(mem, wkv_c_ref[0], bkv_c_ref[0])
    kc = kvc[:, :D_MODEL]
    vc = kvc[:, D_MODEL:]
    a = _mha(qc, kc, vc, n_batch, tgt_len, src_len)
    a = _linear(a, wo_c_ref[0], bo_c_ref[0])
    x = _layernorm(x + a, ln[2:3, :], ln[3:4, :])

    # ---- feed forward ----
    h = jnp.maximum(_linear(x, w1_ref[0], b1_ref[0]), 0.0)
    f = _linear(h, w2_ref[0], b2_ref[0])
    x = _layernorm(x + f, ln[4:5, :], ln[5:6, :])

    x_scr[...] = x

    @pl.when(l == pl.num_programs(0) - 1)
    def _():
        # TransformerDecoder final LayerNorm + lane-dense vocab projection
        y = _layernorm(x, norm_ref[0:1, :], norm_ref[1:2, :])
        o_ref[...] = _linear(y, fcw_ref[...], fcb_ref[...])


# ------------------------------- forward pass ---------------------------------
@jax.jit
def transformer_forward(params, src, tgt):
    """src/tgt: [B, L] int32 token ids -> score [B, L_tgt, V]."""
    B, Ls = src.shape
    _, Lt = tgt.shape
    n_src, n_tgt = B * Ls, B * Lt

    # embedding gather stays as JAX glue (sqrt(d_model) scale is done in-kernel)
    src_e = jnp.take(params["src_emb"], src.reshape(-1), axis=0)  # [B*Ls, D]
    tgt_e = jnp.take(params["tgt_emb"], tgt.reshape(-1), axis=0)  # [B*Lt, D]

    enc = params["enc"]
    memory = pl.pallas_call(
        functools.partial(_encoder_kernel, n_batch=B, seq_len=Ls),
        out_shape=jax.ShapeDtypeStruct((n_src, D_MODEL), jnp.float32),
        grid_spec=pltpu.PrefetchScalarGridSpec(
            num_scalar_prefetch=0,
            grid=(N_LAYERS,),
            in_specs=[
                _const_spec((n_src, D_MODEL)),
                _layer_spec(enc["wqkv"].shape),
                _layer_spec(enc["bqkv"].shape),
                _layer_spec(enc["wo"].shape),
                _layer_spec(enc["bo"].shape),
                _layer_spec(enc["w1"].shape),
                _layer_spec(enc["b1"].shape),
                _layer_spec(enc["w2"].shape),
                _layer_spec(enc["b2"].shape),
                _layer_spec(enc["ln"].shape),
                _const_spec(enc["norm"].shape),
            ],
            out_specs=pl.BlockSpec((n_src, D_MODEL), lambda l: (0, 0)),
        ),
        compiler_params=pltpu.CompilerParams(
            dimension_semantics=("arbitrary",)),
    )(src_e, enc["wqkv"], enc["bqkv"], enc["wo"], enc["bo"],
      enc["w1"], enc["b1"], enc["w2"], enc["b2"], enc["ln"], enc["norm"])

    V = params["fc_w"].shape[1]
    fc_w = jnp.pad(params["fc_w"], ((0, 0), (0, V_PAD - V)))            # [D, 128]
    fc_b = jnp.pad(params["fc_b"], (0, V_PAD - V)).reshape(1, V_PAD)    # [1, 128]

    dec = params["dec"]
    score_pad = pl.pallas_call(
        functools.partial(_decoder_kernel, n_batch=B, tgt_len=Lt, src_len=Ls),
        out_shape=jax.ShapeDtypeStruct((n_tgt, V_PAD), jnp.float32),
        grid_spec=pltpu.PrefetchScalarGridSpec(
            num_scalar_prefetch=0,
            grid=(N_LAYERS,),
            in_specs=[
                _const_spec((n_tgt, D_MODEL)),
                _const_spec((n_src, D_MODEL)),
                _layer_spec(dec["wqkv"].shape),
                _layer_spec(dec["bqkv"].shape),
                _layer_spec(dec["wo_s"].shape),
                _layer_spec(dec["bo_s"].shape),
                _layer_spec(dec["wq_c"].shape),
                _layer_spec(dec["bq_c"].shape),
                _layer_spec(dec["wkv_c"].shape),
                _layer_spec(dec["bkv_c"].shape),
                _layer_spec(dec["wo_c"].shape),
                _layer_spec(dec["bo_c"].shape),
                _layer_spec(dec["w1"].shape),
                _layer_spec(dec["b1"].shape),
                _layer_spec(dec["w2"].shape),
                _layer_spec(dec["b2"].shape),
                _layer_spec(dec["ln"].shape),
                _const_spec(dec["norm"].shape),
                _const_spec((D_MODEL, V_PAD)),
                _const_spec((1, V_PAD)),
            ],
            out_specs=pl.BlockSpec((n_tgt, V_PAD), lambda l: (0, 0)),
            scratch_shapes=[pltpu.VMEM((n_tgt, D_MODEL), jnp.float32)],
        ),
        compiler_params=pltpu.CompilerParams(
            dimension_semantics=("arbitrary",)),
    )(tgt_e, memory,
      dec["wqkv"], dec["bqkv"], dec["wo_s"], dec["bo_s"],
      dec["wq_c"], dec["bq_c"], dec["wkv_c"], dec["bkv_c"], dec["wo_c"], dec["bo_c"],
      dec["w1"], dec["b1"], dec["w2"], dec["b2"], dec["ln"],
      dec["norm"], fc_w, fc_b)

    return score_pad[:, :V].reshape(B, Lt, V)


# ------------------------------ parameter init --------------------------------
def init_params(key, vocab):
    NL, D, DFF = N_LAYERS, D_MODEL, D_FF

    def nrm(k, shape, scale=0.02):
        return scale * jax.random.normal(k, shape, jnp.float32)

    def ln_stack(n_norms):
        g = jnp.ones((NL, 1, D), jnp.float32)
        b = jnp.zeros((NL, 1, D), jnp.float32)
        return jnp.concatenate([g, b] * n_norms, axis=1)   # [NL, 2*n_norms, D]

    final_norm = jnp.concatenate(
        [jnp.ones((1, D), jnp.float32), jnp.zeros((1, D), jnp.float32)], axis=0)

    ks = iter(jax.random.split(key, 16))
    enc = {
        "wqkv": nrm(next(ks), (NL, D, 3 * D)),
        "bqkv": jnp.zeros((NL, 1, 3 * D), jnp.float32),
        "wo":   nrm(next(ks), (NL, D, D)),
        "bo":   jnp.zeros((NL, 1, D), jnp.float32),
        "w1":   nrm(next(ks), (NL, D, DFF)),
        "b1":   jnp.zeros((NL, 1, DFF), jnp.float32),
        "w2":   nrm(next(ks), (NL, DFF, D)),
        "b2":   jnp.zeros((NL, 1, D), jnp.float32),
        "ln":   ln_stack(2),
        "norm": final_norm,
    }
    dec = {
        "wqkv":  nrm(next(ks), (NL, D, 3 * D)),
        "bqkv":  jnp.zeros((NL, 1, 3 * D), jnp.float32),
        "wo_s":  nrm(next(ks), (NL, D, D)),
        "bo_s":  jnp.zeros((NL, 1, D), jnp.float32),
        "wq_c":  nrm(next(ks), (NL, D, D)),
        "bq_c":  jnp.zeros((NL, 1, D), jnp.float32),
        "wkv_c": nrm(next(ks), (NL, D, 2 * D)),
        "bkv_c": jnp.zeros((NL, 1, 2 * D), jnp.float32),
        "wo_c":  nrm(next(ks), (NL, D, D)),
        "bo_c":  jnp.zeros((NL, 1, D), jnp.float32),
        "w1":    nrm(next(ks), (NL, D, DFF)),
        "b1":    jnp.zeros((NL, 1, DFF), jnp.float32),
        "w2":    nrm(next(ks), (NL, DFF, D)),
        "b2":    jnp.zeros((NL, 1, D), jnp.float32),
        "ln":    ln_stack(3),
        "norm":  final_norm,
    }
    return {
        "src_emb": nrm(next(ks), (vocab, D)),
        "tgt_emb": nrm(next(ks), (vocab, D)),
        "fc_w":    nrm(next(ks), (D, vocab)),
        "fc_b":    jnp.zeros((vocab,), jnp.float32),
        "enc": enc,
        "dec": dec,
    }


# ----------------------------------- main --------------------------------------
if __name__ == "__main__":
    # vocab like char_to_id for '0'-'9' + '+' + a couple extras
    VOCAB = 13
    B, L_SRC, L_TGT = 2, 8, 8

    key = jax.random.PRNGKey(0)
    k_par, k_src, k_tgt = jax.random.split(key, 3)
    params = init_params(k_par, VOCAB)

    src = jax.random.randint(k_src, (B, L_SRC), 0, VOCAB, dtype=jnp.int32)
    tgt = jax.random.randint(k_tgt, (B, L_TGT), 0, VOCAB, dtype=jnp.int32)

    # TODO(synk): dropout (p=0.1) is treated as identity (eval-mode forward).
    score = transformer_forward(params, src, tgt)
    jax.block_until_ready(score)
    assert score.shape == (B, L_TGT, VOCAB)
    print("KERNEL_OK")
</pallas_src>

<mosaic_0001>
module attributes {stable_mosaic.version = 11 : i64} {
  func.func @_encoder_kernel(%arg0: i32, %arg1: memref<16x16xf32, #tpu.memory_space<vmem>>, %arg2: memref<1x16x48xf32, #tpu.memory_space<vmem>>, %arg3: memref<1x1x48xf32, #tpu.memory_space<vmem>>, %arg4: memref<1x16x16xf32, #tpu.memory_space<vmem>>, %arg5: memref<1x1x16xf32, #tpu.memory_space<vmem>>, %arg6: memref<1x16x64xf32, #tpu.memory_space<vmem>>, %arg7: memref<1x1x64xf32, #tpu.memory_space<vmem>>, %arg8: memref<1x64x16xf32, #tpu.memory_space<vmem>>, %arg9: memref<1x1x16xf32, #tpu.memory_space<vmem>>, %arg10: memref<1x4x16xf32, #tpu.memory_space<vmem>>, %arg11: memref<2x16xf32, #tpu.memory_space<vmem>>, %arg12: memref<16x16xf32, #tpu.memory_space<vmem>>) attributes {dimension_semantics = [#tpu.dimension_semantics<arbitrary>], iteration_bounds = array<i64: 6>, scalar_prefetch = 0 : i64, scratch_operands = 0 : i64, tpu.core_type = #tpu.core_type<tc>, window_params = [{pipeline_mode = #tpu.pipeline_mode<synchronous>, transform_indices = @transform_0, window_bounds = array<i64: 16, 16>}, {transform_indices = @transform_1, window_bounds = array<i64: 1, 16, 48>}, {transform_indices = @transform_2, window_bounds = array<i64: 1, 1, 48>}, {transform_indices = @transform_3, window_bounds = array<i64: 1, 16, 16>}, {transform_indices = @transform_4, window_bounds = array<i64: 1, 1, 16>}, {transform_indices = @transform_5, window_bounds = array<i64: 1, 16, 64>}, {transform_indices = @transform_6, window_bounds = array<i64: 1, 1, 64>}, {transform_indices = @transform_7, window_bounds = array<i64: 1, 64, 16>}, {transform_indices = @transform_8, window_bounds = array<i64: 1, 1, 16>}, {transform_indices = @transform_9, window_bounds = array<i64: 1, 4, 16>}, {pipeline_mode = #tpu.pipeline_mode<synchronous>, transform_indices = @transform_10, window_bounds = array<i64: 2, 16>}, {pipeline_mode = #tpu.pipeline_mode<synchronous>, transform_indices = @transform_11, window_bounds = array<i64: 16, 16>}]} {
    %c0_i32 = arith.constant 0 : i32
    %0 = arith.cmpi eq, %arg0, %c0_i32 : i32
    %1 = arith.extui %0 : i1 to i32
    %c0_i32_0 = arith.constant 0 : i32
    %2 = arith.cmpi ne, %1, %c0_i32_0 : i32
    scf.if %2 {
      %c0_126 = arith.constant 0 : index
      %c0_127 = arith.constant 0 : index
      %358 = vector.load %arg1[%c0_126, %c0_127] : memref<16x16xf32, #tpu.memory_space<vmem>>, vector<16x16xf32>
      %cst_128 = arith.constant 4.000000e+00 : f32
      %359 = vector.broadcast %cst_128 : f32 to vector<16x16xf32>
      %360 = arith.mulf %358, %359 : vector<16x16xf32>
      %c0_129 = arith.constant 0 : index
      %c0_130 = arith.constant 0 : index
      %361 = vector.load %arg12[%c0_129, %c0_130] : memref<16x16xf32, #tpu.memory_space<vmem>>, vector<16x16xf32>
      tpu.vector_store %arg12[%c0_129, %c0_130], %360 {strides = array<i32>} : memref<16x16xf32, #tpu.memory_space<vmem>>, vector<16x16xf32>,
    } else {
    }
    %c0 = arith.constant 0 : index
    %c0_1 = arith.constant 0 : index
    %3 = vector.load %arg12[%c0, %c0_1] : memref<16x16xf32, #tpu.memory_space<vmem>>, vector<16x16xf32>
    %c0_2 = arith.constant 0 : index
    %c0_3 = arith.constant 0 : index
    %c0_4 = arith.constant 0 : index
    %4 = vector.load %arg10[%c0_2, %c0_3, %c0_4] : memref<1x4x16xf32, #tpu.memory_space<vmem>>, vector<1x4x16xf32>
    %5 = vector.shape_cast %4 : vector<1x4x16xf32> to vector<4x16xf32>
    %c0_5 = arith.constant 0 : index
    %c0_6 = arith.constant 0 : index
    %c0_7 = arith.constant 0 : index
    %6 = vector.load %arg2[%c0_5, %c0_6, %c0_7] : memref<1x16x48xf32, #tpu.memory_space<vmem>>, vector<1x16x48xf32>
    %7 = vector.shape_cast %6 : vector<1x16x48xf32> to vector<16x48xf32>
    %c0_8 = arith.constant 0 : index
    %c0_9 = arith.constant 0 : index
    %c0_10 = arith.constant 0 : index
    %8 = vector.load %arg3[%c0_8, %c0_9, %c0_10] : memref<1x1x48xf32, #tpu.memory_space<vmem>>, vector<1x1x48xf32>
    %9 = vector.shape_cast %8 : vector<1x1x48xf32> to vector<1x48xf32>
    %cst = arith.constant dense<0.000000e+00> : vector<16x48xf32>
    %10 = tpu.matmul %3, %7, %cst {dimension_numbers = #tpu.dot_dimension_numbers<[1], [0], [0], [1], [0, 0, 1, 1], [], []>} : vector<16x16xf32>, vector<16x48xf32>, vector<16x48xf32> -> vector<16x48xf32>
    %11 = vector.broadcast %9 : vector<1x48xf32> to vector<16x48xf32>
    %12 = arith.addf %10, %11 : vector<16x48xf32>
    %13 = vector.extract_strided_slice %12 {offsets = [0, 0], sizes = [16, 16], strides = [1, 1]} : vector<16x48xf32> to vector<16x16xf32>
    %14 = vector.extract_strided_slice %12 {offsets = [0, 16], sizes = [16, 16], strides = [1, 1]} : vector<16x48xf32> to vector<16x16xf32>
    %15 = vector.extract_strided_slice %12 {offsets = [0, 32], sizes = [16, 16], strides = [1, 1]} : vector<16x48xf32> to vector<16x16xf32>
    %16 = vector.extract_strided_slice %13 {offsets = [0, 0], sizes = [8, 16], strides = [1, 1]} : vector<16x16xf32> to vector<8x16xf32>
    %17 = vector.extract_strided_slice %14 {offsets = [0, 0], sizes = [8, 16], strides = [1, 1]} : vector<16x16xf32> to vector<8x16xf32>
    %18 = vector.extract_strided_slice %15 {offsets = [0, 0], sizes = [8, 16], strides = [1, 1]} : vector<16x16xf32> to vector<8x16xf32>
    %19 = vector.extract_strided_slice %16 {offsets = [0, 0], sizes = [8, 2], strides = [1, 1]} : vector<8x16xf32> to vector<8x2xf32>
    %20 = vector.extract_strided_slice %17 {offsets = [0, 0], sizes = [8, 2], strides = [1, 1]} : vector<8x16xf32> to vector<8x2xf32>
    %21 = vector.extract_strided_slice %18 {offsets = [0, 0], sizes = [8, 2], strides = [1, 1]} : vector<8x16xf32> to vector<8x2xf32>
    %cst_11 = arith.constant dense<0.000000e+00> : vector<8x8xf32>
    %22 = tpu.matmul %19, %20, %cst_11 {dimension_numbers = #tpu.dot_dimension_numbers<[1], [1], [0], [0], [0, 0, 1, 0], [], []>} : vector<8x2xf32>, vector<8x2xf32>, vector<8x8xf32> -> vector<8x8xf32>
    %cst_12 = arith.constant 0.707106769 : f32
    %23 = vector.broadcast %cst_12 : f32 to vector<8x8xf32>
    %24 = arith.mulf %22, %23 : vector<8x8xf32>
    %cst_13 = arith.constant dense<0xFF800000> : vector<8xf32>
    %25 = vector.multi_reduction <maximumf>, %24, %cst_13 [1] : vector<8x8xf32> to vector<8xf32>
    %26 = vector.shape_cast %25 : vector<8xf32> to vector<8x1xf32>
    %27 = vector.broadcast %26 : vector<8x1xf32> to vector<8x8xf32>
    %28 = arith.subf %24, %27 : vector<8x8xf32>
    %29 = math.exp %28 : vector<8x8xf32>
    %cst_14 = arith.constant dense<0.000000e+00> : vector<8xf32>
    %30 = vector.multi_reduction <add>, %29, %cst_14 [1] : vector<8x8xf32> to vector<8xf32>
    %31 = vector.shape_cast %30 : vector<8xf32> to vector<8x1xf32>
    %32 = vector.broadcast %31 : vector<8x1xf32> to vector<8x8xf32>
    %33 = arith.divf %29, %32 : vector<8x8xf32>
    %cst_15 = arith.constant dense<0.000000e+00> : vector<8x2xf32>
    %34 = tpu.matmul %33, %21, %cst_15 {dimension_numbers = #tpu.dot_dimension_numbers<[1], [0], [0], [1], [0, 0, 1, 1], [], []>} : vector<8x8xf32>, vector<8x2xf32>, vector<8x2xf32> -> vector<8x2xf32>
    %35 = vector.extract_strided_slice %16 {offsets = [0, 2], sizes = [8, 2], strides = [1, 1]} : vector<8x16xf32> to vector<8x2xf32>
    %36 = vector.extract_strided_slice %17 {offsets = [0, 2], sizes = [8, 2], strides = [1, 1]} : vector<8x16xf32> to vector<8x2xf32>
    %37 = vector.extract_strided_slice %18 {offsets = [0, 2], sizes = [8, 2], strides = [1, 1]} : vector<8x16xf32> to vector<8x2xf32>
    %cst_16 = arith.constant dense<0.000000e+00> : vector<8x8xf32>
    %38 = tpu.matmul %35, %36, %cst_16 {dimension_numbers = #tpu.dot_dimension_numbers<[1], [1], [0], [0], [0, 0, 1, 0], [], []>} : vector<8x2xf32>, vector<8x2xf32>, vector<8x8xf32> -> vector<8x8xf32>
    %cst_17 = arith.constant 0.707106769 : f32
    %39 = vector.broadcast %cst_17 : f32 to vector<8x8xf32>
    %40 = arith.mulf %38, %39 : vector<8x8xf32>
    %cst_18 = arith.constant dense<0xFF800000> : vector<8xf32>
    %41 = vector.multi_reduction <maximumf>, %40, %cst_18 [1] : vector<8x8xf32> to vector<8xf32>
    %42 = vector.shape_cast %41 : vector<8xf32> to vector<8x1xf32>
    %43 = vector.broadcast %42 : vector<8x1xf32> to vector<8x8xf32>
    %44 = arith.subf %40, %43 : vector<8x8xf32>
    %45 = math.exp %44 : vector<8x8xf32>
    %cst_19 = arith.constant dense<0.000000e+00> : vector<8xf32>
    %46 = vector.multi_reduction <add>, %45, %cst_19 [1] : vector<8x8xf32> to vector<8xf32>
    %47 = vector.shape_cast %46 : vector<8xf32> to vector<8x1xf32>
    %48 = vector.broadcast %47 : vector<8x1xf32> to vector<8x8xf32>
    %49 = arith.divf %45, %48 : vector<8x8xf32>
    %cst_20 = arith.constant dense<0.000000e+00> : vector<8x2xf32>
    %50 = tpu.matmul %49, %37, %cst_20 {dimension_numbers = #tpu.dot_dimension_numbers<[1], [0], [0], [1], [0, 0, 1, 1], [], []>} : vector<8x8xf32>, vector<8x2xf32>, vector<8x2xf32> -> vector<8x2xf32>
    %51 = vector.extract_strided_slice %16 {offsets = [0, 4], sizes = [8, 2], strides = [1, 1]} : vector<8x16xf32> to vector<8x2xf32>
    %52 = vector.extract_strided_slice %17 {offsets = [0, 4], sizes = [8, 2], strides = [1, 1]} : vector<8x16xf32> to vector<8x2xf32>
    %53 = vector.extract_strided_slice %18 {offsets = [0, 4], sizes = [8, 2], strides = [1, 1]} : vector<8x16xf32> to vector<8x2xf32>
    %cst_21 = arith.constant dense<0.000000e+00> : vector<8x8xf32>
    %54 = tpu.matmul %51, %52, %cst_21 {dimension_numbers = #tpu.dot_dimension_numbers<[1], [1], [0], [0], [0, 0, 1, 0], [], []>} : vector<8x2xf32>, vector<8x2xf32>, vector<8x8xf32> -> vector<8x8xf32>
    %cst_22 = arith.constant 0.707106769 : f32
    %55 = vector.broadcast %cst_22 : f32 to vector<8x8xf32>
    %56 = arith.mulf %54, %55 : vector<8x8xf32>
    %cst_23 = arith.constant dense<0xFF800000> : vector<8xf32>
    %57 = vector.multi_reduction <maximumf>, %56, %cst_23 [1] : vector<8x8xf32> to vector<8xf32>
    %58 = vector.shape_cast %57 : vector<8xf32> to vector<8x1xf32>
    %59 = vector.broadcast %58 : vector<8x1xf32> to vector<8x8xf32>
    %60 = arith.subf %56, %59 : vector<8x8xf32>
    %61 = math.exp %60 : vector<8x8xf32>
    %cst_24 = arith.constant dense<0.000000e+00> : vector<8xf32>
    %62 = vector.multi_reduction <add>, %61, %cst_24 [1] : vector<8x8xf32> to vector<8xf32>
    %63 = vector.shape_cast %62 : vector<8xf32> to vector<8x1xf32>
    %64 = vector.broadcast %63 : vector<8x1xf32> to vector<8x8xf32>
    %65 = arith.divf %61, %64 : vector<8x8xf32>
    %cst_25 = arith.constant dense<0.000000e+00> : vector<8x2xf32>
    %66 = tpu.matmul %65, %53, %cst_25 {dimension_numbers = #tpu.dot_dimension_numbers<[1], [0], [0], [1], [0, 0, 1, 1], [], []>} : vector<8x8xf32>, vector<8x2xf32>, vector<8x2xf32> -> vector<8x2xf32>
    %67 = vector.extract_strided_slice %16 {offsets = [0, 6], sizes = [8, 2], strides = [1, 1]} : vector<8x16xf32> to vector<8x2xf32>
    %68 = vector.extract_strided_slice %17 {offsets = [0, 6], sizes = [8, 2], strides = [1, 1]} : vector<8x16xf32> to vector<8x2xf32>
    %69 = vector.extract_strided_slice %18 {offsets = [0, 6], sizes = [8, 2], strides = [1, 1]} : vector<8x16xf32> to vector<8x2xf32>
    %cst_26 = arith.constant dense<0.000000e+00> : vector<8x8xf32>
    %70 = tpu.matmul %67, %68, %cst_26 {dimension_numbers = #tpu.dot_dimension_numbers<[1], [1], [0], [0], [0, 0, 1, 0], [], []>} : vector<8x2xf32>, vector<8x2xf32>, vector<8x8xf32> -> vector<8x8xf32>
    %cst_27 = arith.constant 0.707106769 : f32
    %71 = vector.broadcast %cst_27 : f32 to vector<8x8xf32>
    %72 = arith.mulf %70, %71 : vector<8x8xf32>
    %cst_28 = arith.constant dense<0xFF800000> : vector<8xf32>
    %73 = vector.multi_reduction <maximumf>, %72, %cst_28 [1] : vector<8x8xf32> to vector<8xf32>
    %74 = vector.shape_cast %73 : vector<8xf32> to vector<8x1xf32>
    %75 = vector.broadcast %74 : vector<8x1xf32> to vector<8x8xf32>
    %76 = arith.subf %72, %75 : vector<8x8xf32>
    %77 = math.exp %76 : vector<8x8xf32>
    %cst_29 = arith.constant dense<0.000000e+00> : vector<8xf32>
    %78 = vector.multi_reduction <add>, %77, %cst_29 [1] : vector<8x8xf32> to vector<8xf32>
    %79 = vector.shape_cast %78 : vector<8xf32> to vector<8x1xf32>
    %80 = vector.broadcast %79 : vector<8x1xf32> to vector<8x8xf32>
    %81 = arith.divf %77, %80 : vector<8x8xf32>
    %cst_30 = arith.constant dense<0.000000e+00> : vector<8x2xf32>
    %82 = tpu.matmul %81, %69, %cst_30 {dimension_numbers = #tpu.dot_dimension_numbers<[1], [0], [0], [1], [0, 0, 1, 1], [], []>} : vector<8x8xf32>, vector<8x2xf32>, vector<8x2xf32> -> vector<8x2xf32>
    %83 = vector.extract_strided_slice %16 {offsets = [0, 8], sizes = [8, 2], strides = [1, 1]} : vector<8x16xf32> to vector<8x2xf32>
    %84 = vector.extract_strided_slice %17 {offsets = [0, 8], sizes = [8, 2], strides = [1, 1]} : vector<8x16xf32> to vector<8x2xf32>
    %85 = vector.extract_strided_slice %18 {offsets = [0, 8], sizes = [8, 2], strides = [1, 1]} : vector<8x16xf32> to vector<8x2xf32>
    %cst_31 = arith.constant dense<0.000000e+00> : vector<8x8xf32>
    %86 = tpu.matmul %83, %84, %cst_31 {dimension_numbers = #tpu.dot_dimension_numbers<[1], [1], [0], [0], [0, 0, 1, 0], [], []>} : vector<8x2xf32>, vector<8x2xf32>, vector<8x8xf32> -> vector<8x8xf32>
    %cst_32 = arith.constant 0.707106769 : f32
    %87 = vector.broadcast %cst_32 : f32 to vector<8x8xf32>
    %88 = arith.mulf %86, %87 : vector<8x8xf32>
    %cst_33 = arith.constant dense<0xFF800000> : vector<8xf32>
    %89 = vector.multi_reduction <maximumf>, %88, %cst_33 [1] : vector<8x8xf32> to vector<8xf32>
    %90 = vector.shape_cast %89 : vector<8xf32> to vector<8x1xf32>
    %91 = vector.broadcast %90 : vector<8x1xf32> to vector<8x8xf32>
    %92 = arith.subf %88, %91 : vector<8x8xf32>
    %93 = math.exp %92 : vector<8x8xf32>
    %cst_34 = arith.constant dense<0.000000e+00> : vector<8xf32>
    %94 = vector.multi_reduction <add>, %93, %cst_34 [1] : vector<8x8xf32> to vector<8xf32>
    %95 = vector.shape_cast %94 : vector<8xf32> to vector<8x1xf32>
    %96 = vector.broadcast %95 : vector<8x1xf32> to vector<8x8xf32>
    %97 = arith.divf %93, %96 : vector<8x8xf32>
    %cst_35 = arith.constant dense<0.000000e+00> : vector<8x2xf32>
    %98 = tpu.matmul %97, %85, %cst_35 {dimension_numbers = #tpu.dot_dimension_numbers<[1], [0], [0], [1], [0, 0, 1, 1], [], []>} : vector<8x8xf32>, vector<8x2xf32>, vector<8x2xf32> -> vector<8x2xf32>
    %99 = vector.extract_strided_slice %16 {offsets = [0, 10], sizes = [8, 2], strides = [1, 1]} : vector<8x16xf32> to vector<8x2xf32>
    %100 = vector.extract_strided_slice %17 {offsets = [0, 10], sizes = [8, 2], strides = [1, 1]} : vector<8x16xf32> to vector<8x2xf32>
    %101 = vector.extract_strided_slice %18 {offsets = [0, 10], sizes = [8, 2], strides = [1, 1]} : vector<8x16xf32> to vector<8x2xf32>
    %cst_36 = arith.constant dense<0.000000e+00> : vector<8x8xf32>
    %102 = tpu.matmul %99, %100, %cst_36 {dimension_numbers = #tpu.dot_dimension_numbers<[1], [1], [0], [0], [0, 0, 1, 0], [], []>} : vector<8x2xf32>, vector<8x2xf32>, vector<8x8xf32> -> vector<8x8xf32>
    %cst_37 = arith.constant 0.707106769 : f32
    %103 = vector.broadcast %cst_37 : f32 to vector<8x8xf32>
    %104 = arith.mulf %102, %103 : vector<8x8xf32>
    %cst_38 = arith.constant dense<0xFF800000> : vector<8xf32>
    %105 = vector.multi_reduction <maximumf>, %104, %cst_38 [1] : vector<8x8xf32> to vector<8xf32>
    %106 = vector.shape_cast %105 : vector<8xf32> to vector<8x1xf32>
    %107 = vector.broadcast %106 : vector<8x1xf32> to vector<8x8xf32>
    %108 = arith.subf %104, %107 : vector<8x8xf32>
    %109 = math.exp %108 : vector<8x8xf32>
    %cst_39 = arith.constant dense<0.000000e+00> : vector<8xf32>
    %110 = vector.multi_reduction <add>, %109, %cst_39 [1] : vector<8x8xf32> to vector<8xf32>
    %111 = vector.shape_cast %110 : vector<8xf32> to vector<8x1xf32>
    %112 = vector.broadcast %111 : vector<8x1xf32> to vector<8x8xf32>
    %113 = arith.divf %109, %112 : vector<8x8xf32>
    %cst_40 = arith.constant dense<0.000000e+00> : vector<8x2xf32>
    %114 = tpu.matmul %113, %101, %cst_40 {dimension_numbers = #tpu.dot_dimension_numbers<[1], [0], [0], [1], [0, 0, 1, 1], [], []>} : vector<8x8xf32>, vector<8x2xf32>, vector<8x2xf32> -> vector<8x2xf32>
    %115 = vector.extract_strided_slice %16 {offsets = [0, 12], sizes = [8, 2], strides = [1, 1]} : vector<8x16xf32> to vector<8x2xf32>
    %116 = vector.extract_strided_slice %17 {offsets = [0, 12], sizes = [8, 2], strides = [1, 1]} : vector<8x16xf32> to vector<8x2xf32>
    %117 = vector.extract_strided_slice %18 {offsets = [0, 12], sizes = [8, 2], strides = [1, 1]} : vector<8x16xf32> to vector<8x2xf32>
    %cst_41 = arith.constant dense<0.000000e+00> : vector<8x8xf32>
    %118 = tpu.matmul %115, %116, %cst_41 {dimension_numbers = #tpu.dot_dimension_numbers<[1], [1], [0], [0], [0, 0, 1, 0], [], []>} : vector<8x2xf32>, vector<8x2xf32>, vector<8x8xf32> -> vector<8x8xf32>
    %cst_42 = arith.constant 0.707106769 : f32
    %119 = vector.broadcast %cst_42 : f32 to vector<8x8xf32>
    %120 = arith.mulf %118, %119 : vector<8x8xf32>
    %cst_43 = arith.constant dense<0xFF800000> : vector<8xf32>
    %121 = vector.multi_reduction <maximumf>, %120, %cst_43 [1] : vector<8x8xf32> to vector<8xf32>
    %122 = vector.shape_cast %121 : vector<8xf32> to vector<8x1xf32>
    %123 = vector.broadcast %122 : vector<8x1xf32> to vector<8x8xf32>
    %124 = arith.subf %120, %123 : vector<8x8xf32>
    %125 = math.exp %124 : vector<8x8xf32>
    %cst_44 = arith.constant dense<0.000000e+00> : vector<8xf32>
    %126 = vector.multi_reduction <add>, %125, %cst_44 [1] : vector<8x8xf32> to vector<8xf32>
    %127 = vector.shape_cast %126 : vector<8xf32> to vector<8x1xf32>
    %128 = vector.broadcast %127 : vector<8x1xf32> to vector<8x8xf32>
    %129 = arith.divf %125, %128 : vector<8x8xf32>
    %cst_45 = arith.constant dense<0.000000e+00> : vector<8x2xf32>
    %130 = tpu.matmul %129, %117, %cst_45 {dimension_numbers = #tpu.dot_dimension_numbers<[1], [0], [0], [1], [0, 0, 1, 1], [], []>} : vector<8x8xf32>, vector<8x2xf32>, vector<8x2xf32> -> vector<8x2xf32>
    %131 = vector.extract_strided_slice %16 {offsets = [0, 14], sizes = [8, 2], strides = [1, 1]} : vector<8x16xf32> to vector<8x2xf32>
    %132 = vector.extract_strided_slice %17 {offsets = [0, 14], sizes = [8, 2], strides = [1, 1]} : vector<8x16xf32> to vector<8x2xf32>
    %133 = vector.extract_strided_slice %18 {offsets = [0, 14], sizes = [8, 2], strides = [1, 1]} : vector<8x16xf32> to vector<8x2xf32>
    %cst_46 = arith.constant dense<0.000000e+00> : vector<8x8xf32>
    %134 = tpu.matmul %131, %132, %cst_46 {dimension_numbers = #tpu.dot_dimension_numbers<[1], [1], [0], [0], [0, 0, 1, 0], [], []>} : vector<8x2xf32>, vector<8x2xf32>, vector<8x8xf32> -> vector<8x8xf32>
    %cst_47 = arith.constant 0.707106769 : f32
    %135 = vector.broadcast %cst_47 : f32 to vector<8x8xf32>
    %136 = arith.mulf %134, %135 : vector<8x8xf32>
    %cst_48 = arith.constant dense<0xFF800000> : vector<8xf32>
    %137 = vector.multi_reduction <maximumf>, %136, %cst_48 [1] : vector<8x8xf32> to vector<8xf32>
    %138 = vector.shape_cast %137 : vector<8xf32> to vector<8x1xf32>
    %139 = vector.broadcast %138 : vector<8x1xf32> to vector<8x8xf32>
    %140 = arith.subf %136, %139 : vector<8x8xf32>
    %141 = math.exp %140 : vector<8x8xf32>
    %cst_49 = arith.constant dense<0.000000e+00> : vector<8xf32>
    %142 = vector.multi_reduction <add>, %141, %cst_49 [1] : vector<8x8xf32> to vector<8xf32>
    %143 = vector.shape_cast %142 : vector<8xf32> to vector<8x1xf32>
    %144 = vector.broadcast %143 : vector<8x1xf32> to vector<8x8xf32>
    %145 = arith.divf %141, %144 : vector<8x8xf32>
    %cst_50 = arith.constant dense<0.000000e+00> : vector<8x2xf32>
    %146 = tpu.matmul %145, %133, %cst_50 {dimension_numbers = #tpu.dot_dimension_numbers<[1], [0], [0], [1], [0, 0, 1, 1], [], []>} : vector<8x8xf32>, vector<8x2xf32>, vector<8x2xf32> -> vector<8x2xf32>
    %147 = tpu.concatenate %34, %50, %66, %82, %98, %114, %130, %146 in 1 : vector<8x2xf32>, vector<8x2xf32>, vector<8x2xf32>, vector<8x2xf32>, vector<8x2xf32>, vector<8x2xf32>, vector<8x2xf32>, vector<8x2xf32> -> vector<8x16xf32>
    %148 = vector.extract_strided_slice %13 {offsets = [8, 0], sizes = [8, 16], strides = [1, 1]} : vector<16x16xf32> to vector<8x16xf32>
    %149 = vector.extract_strided_slice %14 {offsets = [8, 0], sizes = [8, 16], strides = [1, 1]} : vector<16x16xf32> to vector<8x16xf32>
    %150 = vector.extract_strided_slice %15 {offsets = [8, 0], sizes = [8, 16], strides = [1, 1]} : vector<16x16xf32> to vector<8x16xf32>
    %151 = vector.extract_strided_slice %148 {offsets = [0, 0], sizes = [8, 2], strides = [1, 1]} : vector<8x16xf32> to vector<8x2xf32>
    %152 = vector.extract_strided_slice %149 {offsets = [0, 0], sizes = [8, 2], strides = [1, 1]} : vector<8x16xf32> to vector<8x2xf32>
    %153 = vector.extract_strided_slice %150 {offsets = [0, 0], sizes = [8, 2], strides = [1, 1]} : vector<8x16xf32> to vector<8x2xf32>
    %cst_51 = arith.constant dense<0.000000e+00> : vector<8x8xf32>
    %154 = tpu.matmul %151, %152, %cst_51 {dimension_numbers = #tpu.dot_dimension_numbers<[1], [1], [0], [0], [0, 0, 1, 0], [], []>} : vector<8x2xf32>, vector<8x2xf32>, vector<8x8xf32> -> vector<8x8xf32>
    %cst_52 = arith.constant 0.707106769 : f32
    %155 = vector.broadcast %cst_52 : f32 to vector<8x8xf32>
    %156 = arith.mulf %154, %155 : vector<8x8xf32>
    %cst_53 = arith.constant dense<0xFF800000> : vector<8xf32>
    %157 = vector.multi_reduction <maximumf>, %156, %cst_53 [1] : vector<8x8xf32> to vector<8xf32>
    %158 = vector.shape_cast %157 : vector<8xf32> to vector<8x1xf32>
    %159 = vector.broadcast %158 : vector<8x1xf32> to vector<8x8xf32>
    %160 = arith.subf %156, %159 : vector<8x8xf32>
    %161 = math.exp %160 : vector<8x8xf32>
    %cst_54 = arith.constant dense<0.000000e+00> : vector<8xf32>
    %162 = vector.multi_reduction <add>, %161, %cst_54 [1] : vector<8x8xf32> to vector<8xf32>
    %163 = vector.shape_cast %162 : vector<8xf32> to vector<8x1xf32>
    %164 = vector.broadcast %163 : vector<8x1xf32> to vector<8x8xf32>
    %165 = arith.divf %161, %164 : vector<8x8xf32>
    %cst_55 = arith.constant dense<0.000000e+00> : vector<8x2xf32>
    %166 = tpu.matmul %165, %153, %cst_55 {dimension_numbers = #tpu.dot_dimension_numbers<[1], [0], [0], [1], [0, 0, 1, 1], [], []>} : vector<8x8xf32>, vector<8x2xf32>, vector<8x2xf32> -> vector<8x2xf32>
    %167 = vector.extract_strided_slice %148 {offsets = [0, 2], sizes = [8, 2], strides = [1, 1]} : vector<8x16xf32> to vector<8x2xf32>
    %168 = vector.extract_strided_slice %149 {offsets = [0, 2], sizes = [8, 2], strides = [1, 1]} : vector<8x16xf32> to vector<8x2xf32>
    %169 = vector.extract_strided_slice %150 {offsets = [0, 2], sizes = [8, 2], strides = [1, 1]} : vector<8x16xf32> to vector<8x2xf32>
    %cst_56 = arith.constant dense<0.000000e+00> : vector<8x8xf32>
    %170 = tpu.matmul %167, %168, %cst_56 {dimension_numbers = #tpu.dot_dimension_numbers<[1], [1], [0], [0], [0, 0, 1, 0], [], []>} : vector<8x2xf32>, vector<8x2xf32>, vector<8x8xf32> -> vector<8x8xf32>
    %cst_57 = arith.constant 0.707106769 : f32
    %171 = vector.broadcast %cst_57 : f32 to vector<8x8xf32>
    %172 = arith.mulf %170, %171 : vector<8x8xf32>
    %cst_58 = arith.constant dense<0xFF800000> : vector<8xf32>
    %173 = vector.multi_reduction <maximumf>, %172, %cst_58 [1] : vector<8x8xf32> to vector<8xf32>
    %174 = vector.shape_cast %173 : vector<8xf32> to vector<8x1xf32>
    %175 = vector.broadcast %174 : vector<8x1xf32> to vector<8x8xf32>
    %176 = arith.subf %172, %175 : vector<8x8xf32>
    %177 = math.exp %176 : vector<8x8xf32>
    %cst_59 = arith.constant dense<0.000000e+00> : vector<8xf32>
    %178 = vector.multi_reduction <add>, %177, %cst_59 [1] : vector<8x8xf32> to vector<8xf32>
    %179 = vector.shape_cast %178 : vector<8xf32> to vector<8x1xf32>
    %180 = vector.broadcast %179 : vector<8x1xf32> to vector<8x8xf32>
    %181 = arith.divf %177, %180 : vector<8x8xf32>
    %cst_60 = arith.constant dense<0.000000e+00> : vector<8x2xf32>
    %182 = tpu.matmul %181, %169, %cst_60 {dimension_numbers = #tpu.dot_dimension_numbers<[1], [0], [0], [1], [0, 0, 1, 1], [], []>} : vector<8x8xf32>, vector<8x2xf32>, vector<8x2xf32> -> vector<8x2xf32>
    %183 = vector.extract_strided_slice %148 {offsets = [0, 4], sizes = [8, 2], strides = [1, 1]} : vector<8x16xf32> to vector<8x2xf32>
    %184 = vector.extract_strided_slice %149 {offsets = [0, 4], sizes = [8, 2], strides = [1, 1]} : vector<8x16xf32> to vector<8x2xf32>
    %185 = vector.extract_strided_slice %150 {offsets = [0, 4], sizes = [8, 2], strides = [1, 1]} : vector<8x16xf32> to vector<8x2xf32>
    %cst_61 = arith.constant dense<0.000000e+00> : vector<8x8xf32>
    %186 = tpu.matmul %183, %184, %cst_61 {dimension_numbers = #tpu.dot_dimension_numbers<[1], [1], [0], [0], [0, 0, 1, 0], [], []>} : vector<8x2xf32>, vector<8x2xf32>, vector<8x8xf32> -> vector<8x8xf32>
    %cst_62 = arith.constant 0.707106769 : f32
    %187 = vector.broadcast %cst_62 : f32 to vector<8x8xf32>
    %188 = arith.mulf %186, %187 : vector<8x8xf32>
    %cst_63 = arith.constant dense<0xFF800000> : vector<8xf32>
    %189 = vector.multi_reduction <maximumf>, %188, %cst_63 [1] : vector<8x8xf32> to vector<8xf32>
    %190 = vector.shape_cast %189 : vector<8xf32> to vector<8x1xf32>
    %191 = vector.broadcast %190 : vector<8x1xf32> to vector<8x8xf32>
    %192 = arith.subf %188, %191 : vector<8x8xf32>
    %193 = math.exp %192 : vector<8x8xf32>
    %cst_64 = arith.constant dense<0.000000e+00> : vector<8xf32>
    %194 = vector.multi_reduction <add>, %193, %cst_64 [1] : vector<8x8xf32> to vector<8xf32>
    %195 = vector.shape_cast %194 : vector<8xf32> to vector<8x1xf32>
    %196 = vector.broadcast %195 : vector<8x1xf32> to vector<8x8xf32>
    %197 = arith.divf %193, %196 : vector<8x8xf32>
    %cst_65 = arith.constant dense<0.000000e+00> : vector<8x2xf32>
    %198 = tpu.matmul %197, %185, %cst_65 {dimension_numbers = #tpu.dot_dimension_numbers<[1], [0], [0], [1], [0, 0, 1, 1], [], []>} : vector<8x8xf32>, vector<8x2xf32>, vector<8x2xf32> -> vector<8x2xf32>
    %199 = vector.extract_strided_slice %148 {offsets = [0, 6], sizes = [8, 2], strides = [1, 1]} : vector<8x16xf32> to vector<8x2xf32>
    %200 = vector.extract_strided_slice %149 {offsets = [0, 6], sizes = [8, 2], strides = [1, 1]} : vector<8x16xf32> to vector<8x2xf32>
    %201 = vector.extract_strided_slice %150 {offsets = [0, 6], sizes = [8, 2], strides = [1, 1]} : vector<8x16xf32> to vector<8x2xf32>
    %cst_66 = arith.constant dense<0.000000e+00> : vector<8x8xf32>
    %202 = tpu.matmul %199, %200, %cst_66 {dimension_numbers = #tpu.dot_dimension_numbers<[1], [1], [0], [0], [0, 0, 1, 0], [], []>} : vector<8x2xf32>, vector<8x2xf32>, vector<8x8xf32> -> vector<8x8xf32>
    %cst_67 = arith.constant 0.707106769 : f32
    %203 = vector.broadcast %cst_67 : f32 to vector<8x8xf32>
    %204 = arith.mulf %202, %203 : vector<8x8xf32>
    %cst_68 = arith.constant dense<0xFF800000> : vector<8xf32>
    %205 = vector.multi_reduction <maximumf>, %204, %cst_68 [1] : vector<8x8xf32> to vector<8xf32>
    %206 = vector.shape_cast %205 : vector<8xf32> to vector<8x1xf32>
    %207 = vector.broadcast %206 : vector<8x1xf32> to vector<8x8xf32>
    %208 = arith.subf %204, %207 : vector<8x8xf32>
    %209 = math.exp %208 : vector<8x8xf32>
    %cst_69 = arith.constant dense<0.000000e+00> : vector<8xf32>
    %210 = vector.multi_reduction <add>, %209, %cst_69 [1] : vector<8x8xf32> to vector<8xf32>
    %211 = vector.shape_cast %210 : vector<8xf32> to vector<8x1xf32>
    %212 = vector.broadcast %211 : vector<8x1xf32> to vector<8x8xf32>
    %213 = arith.divf %209, %212 : vector<8x8xf32>
    %cst_70 = arith.constant dense<0.000000e+00> : vector<8x2xf32>
    %214 = tpu.matmul %213, %201, %cst_70 {dimension_numbers = #tpu.dot_dimension_numbers<[1], [0], [0], [1], [0, 0, 1, 1], [], []>} : vector<8x8xf32>, vector<8x2xf32>, vector<8x2xf32> -> vector<8x2xf32>
    %215 = vector.extract_strided_slice %148 {offsets = [0, 8], sizes = [8, 2], strides = [1, 1]} : vector<8x16xf32> to vector<8x2xf32>
    %216 = vector.extract_strided_slice %149 {offsets = [0, 8], sizes = [8, 2], strides = [1, 1]} : vector<8x16xf32> to vector<8x2xf32>
    %217 = vector.extract_strided_slice %150 {offsets = [0, 8], sizes = [8, 2], strides = [1, 1]} : vector<8x16xf32> to vector<8x2xf32>
    %cst_71 = arith.constant dense<0.000000e+00> : vector<8x8xf32>
    %218 = tpu.matmul %215, %216, %cst_71 {dimension_numbers = #tpu.dot_dimension_numbers<[1], [1], [0], [0], [0, 0, 1, 0], [], []>} : vector<8x2xf32>, vector<8x2xf32>, vector<8x8xf32> -> vector<8x8xf32>
    %cst_72 = arith.constant 0.707106769 : f32
    %219 = vector.broadcast %cst_72 : f32 to vector<8x8xf32>
    %220 = arith.mulf %218, %219 : vector<8x8xf32>
    %cst_73 = arith.constant dense<0xFF800000> : vector<8xf32>
    %221 = vector.multi_reduction <maximumf>, %220, %cst_73 [1] : vector<8x8xf32> to vector<8xf32>
    %222 = vector.shape_cast %221 : vector<8xf32> to vector<8x1xf32>
    %223 = vector.broadcast %222 : vector<8x1xf32> to vector<8x8xf32>
    %224 = arith.subf %220, %223 : vector<8x8xf32>
    %225 = math.exp %224 : vector<8x8xf32>
    %cst_74 = arith.constant dense<0.000000e+00> : vector<8xf32>
    %226 = vector.multi_reduction <add>, %225, %cst_74 [1] : vector<8x8xf32> to vector<8xf32>
    %227 = vector.shape_cast %226 : vector<8xf32> to vector<8x1xf32>
    %228 = vector.broadcast %227 : vector<8x1xf32> to vector<8x8xf32>
    %229 = arith.divf %225, %228 : vector<8x8xf32>
    %cst_75 = arith.constant dense<0.000000e+00> : vector<8x2xf32>
    %230 = tpu.matmul %229, %217, %cst_75 {dimension_numbers = #tpu.dot_dimension_numbers<[1], [0], [0], [1], [0, 0, 1, 1], [], []>} : vector<8x8xf32>, vector<8x2xf32>, vector<8x2xf32> -> vector<8x2xf32>
    %231 = vector.extract_strided_slice %148 {offsets = [0, 10], sizes = [8, 2], strides = [1, 1]} : vector<8x16xf32> to vector<8x2xf32>
    %232 = vector.extract_strided_slice %149 {offsets = [0, 10], sizes = [8, 2], strides = [1, 1]} : vector<8x16xf32> to vector<8x2xf32>
    %233 = vector.extract_strided_slice %150 {offsets = [0, 10], sizes = [8, 2], strides = [1, 1]} : vector<8x16xf32> to vector<8x2xf32>
    %cst_76 = arith.constant dense<0.000000e+00> : vector<8x8xf32>
    %234 = tpu.matmul %231, %232, %cst_76 {dimension_numbers = #tpu.dot_dimension_numbers<[1], [1], [0], [0], [0, 0, 1, 0], [], []>} : vector<8x2xf32>, vector<8x2xf32>, vector<8x8xf32> -> vector<8x8xf32>
    %cst_77 = arith.constant 0.707106769 : f32
    %235 = vector.broadcast %cst_77 : f32 to vector<8x8xf32>
    %236 = arith.mulf %234, %235 : vector<8x8xf32>
    %cst_78 = arith.constant dense<0xFF800000> : vector<8xf32>
    %237 = vector.multi_reduction <maximumf>, %236, %cst_78 [1] : vector<8x8xf32> to vector<8xf32>
    %238 = vector.shape_cast %237 : vector<8xf32> to vector<8x1xf32>
    %239 = vector.broadcast %238 : vector<8x1xf32> to vector<8x8xf32>
    %240 = arith.subf %236, %239 : vector<8x8xf32>
    %241 = math.exp %240 : vector<8x8xf32>
    %cst_79 = arith.constant dense<0.000000e+00> : vector<8xf32>
    %242 = vector.multi_reduction <add>, %241, %cst_79 [1] : vector<8x8xf32> to vector<8xf32>
    %243 = vector.shape_cast %242 : vector<8xf32> to vector<8x1xf32>
    %244 = vector.broadcast %243 : vector<8x1xf32> to vector<8x8xf32>
    %245 = arith.divf %241, %244 : vector<8x8xf32>
    %cst_80 = arith.constant dense<0.000000e+00> : vector<8x2xf32>
    %246 = tpu.matmul %245, %233, %cst_80 {dimension_numbers = #tpu.dot_dimension_numbers<[1], [0], [0], [1], [0, 0, 1, 1], [], []>} : vector<8x8xf32>, vector<8x2xf32>, vector<8x2xf32> -> vector<8x2xf32>
    %247 = vector.extract_strided_slice %148 {offsets = [0, 12], sizes = [8, 2], strides = [1, 1]} : vector<8x16xf32> to vector<8x2xf32>
    %248 = vector.extract_strided_slice %149 {offsets = [0, 12], sizes = [8, 2], strides = [1, 1]} : vector<8x16xf32> to vector<8x2xf32>
    %249 = vector.extract_strided_slice %150 {offsets = [0, 12], sizes = [8, 2], strides = [1, 1]} : vector<8x16xf32> to vector<8x2xf32>
    %cst_81 = arith.constant dense<0.000000e+00> : vector<8x8xf32>
    %250 = tpu.matmul %247, %248, %cst_81 {dimension_numbers = #tpu.dot_dimension_numbers<[1], [1], [0], [0], [0, 0, 1, 0], [], []>} : vector<8x2xf32>, vector<8x2xf32>, vector<8x8xf32> -> vector<8x8xf32>
    %cst_82 = arith.constant 0.707106769 : f32
    %251 = vector.broadcast %cst_82 : f32 to vector<8x8xf32>
    %252 = arith.mulf %250, %251 : vector<8x8xf32>
    %cst_83 = arith.constant dense<0xFF800000> : vector<8xf32>
    %253 = vector.multi_reduction <maximumf>, %252, %cst_83 [1] : vector<8x8xf32> to vector<8xf32>
    %254 = vector.shape_cast %253 : vector<8xf32> to vector<8x1xf32>
    %255 = vector.broadcast %254 : vector<8x1xf32> to vector<8x8xf32>
    %256 = arith.subf %252, %255 : vector<8x8xf32>
    %257 = math.exp %256 : vector<8x8xf32>
    %cst_84 = arith.constant dense<0.000000e+00> : vector<8xf32>
    %258 = vector.multi_reduction <add>, %257, %cst_84 [1] : vector<8x8xf32> to vector<8xf32>
    %259 = vector.shape_cast %258 : vector<8xf32> to vector<8x1xf32>
    %260 = vector.broadcast %259 : vector<8x1xf32> to vector<8x8xf32>
    %261 = arith.divf %257, %260 : vector<8x8xf32>
    %cst_85 = arith.constant dense<0.000000e+00> : vector<8x2xf32>
    %262 = tpu.matmul %261, %249, %cst_85 {dimension_numbers = #tpu.dot_dimension_numbers<[1], [0], [0], [1], [0, 0, 1, 1], [], []>} : vector<8x8xf32>, vector<8x2xf32>, vector<8x2xf32> -> vector<8x2xf32>
    %263 = vector.extract_strided_slice %148 {offsets = [0, 14], sizes = [8, 2], strides = [1, 1]} : vector<8x16xf32> to vector<8x2xf32>
    %264 = vector.extract_strided_slice %149 {offsets = [0, 14], sizes = [8, 2], strides = [1, 1]} : vector<8x16xf32> to vector<8x2xf32>
    %265 = vector.extract_strided_slice %150 {offsets = [0, 14], sizes = [8, 2], strides = [1, 1]} : vector<8x16xf32> to vector<8x2xf32>
    %cst_86 = arith.constant dense<0.000000e+00> : vector<8x8xf32>
    %266 = tpu.matmul %263, %264, %cst_86 {dimension_numbers = #tpu.dot_dimension_numbers<[1], [1], [0], [0], [0, 0, 1, 0], [], []>} : vector<8x2xf32>, vector<8x2xf32>, vector<8x8xf32> -> vector<8x8xf32>
    %cst_87 = arith.constant 0.707106769 : f32
    %267 = vector.broadcast %cst_87 : f32 to vector<8x8xf32>
    %268 = arith.mulf %266, %267 : vector<8x8xf32>
    %cst_88 = arith.constant dense<0xFF800000> : vector<8xf32>
    %269 = vector.multi_reduction <maximumf>, %268, %cst_88 [1] : vector<8x8xf32> to vector<8xf32>
    %270 = vector.shape_cast %269 : vector<8xf32> to vector<8x1xf32>
    %271 = vector.broadcast %270 : vector<8x1xf32> to vector<8x8xf32>
    %272 = arith.subf %268, %271 : vector<8x8xf32>
    %273 = math.exp %272 : vector<8x8xf32>
    %cst_89 = arith.constant dense<0.000000e+00> : vector<8xf32>
    %274 = vector.multi_reduction <add>, %273, %cst_89 [1] : vector<8x8xf32> to vector<8xf32>
    %275 = vector.shape_cast %274 : vector<8xf32> to vector<8x1xf32>
    %276 = vector.broadcast %275 : vector<8x1xf32> to vector<8x8xf32>
    %277 = arith.divf %273, %276 : vector<8x8xf32>
    %cst_90 = arith.constant dense<0.000000e+00> : vector<8x2xf32>
    %278 = tpu.matmul %277, %265, %cst_90 {dimension_numbers = #tpu.dot_dimension_numbers<[1], [0], [0], [1], [0, 0, 1, 1], [], []>} : vector<8x8xf32>, vector<8x2xf32>, vector<8x2xf32> -> vector<8x2xf32>
    %279 = tpu.concatenate %166, %182, %198, %214, %230, %246, %262, %278 in 1 : vector<8x2xf32>, vector<8x2xf32>, vector<8x2xf32>, vector<8x2xf32>, vector<8x2xf32>, vector<8x2xf32>, vector<8x2xf32>, vector<8x2xf32> -> vector<8x16xf32>
    %280 = tpu.concatenate %147, %279 in 0 : vector<8x16xf32>, vector<8x16xf32> -> vector<16x16xf32>
    %c0_91 = arith.constant 0 : index
    %c0_92 = arith.constant 0 : index
    %c0_93 = arith.constant 0 : index
    %281 = vector.load %arg4[%c0_91, %c0_92, %c0_93] : memref<1x16x16xf32, #tpu.memory_space<vmem>>, vector<1x16x16xf32>
    %282 = vector.shape_cast %281 : vector<1x16x16xf32> to vector<16x16xf32>
    %c0_94 = arith.constant 0 : index
    %c0_95 = arith.constant 0 : index
    %c0_96 = arith.constant 0 : index
    %283 = vector.load %arg5[%c0_94, %c0_95, %c0_96] : memref<1x1x16xf32, #tpu.memory_space<vmem>>, vector<1x1x16xf32>
    %284 = vector.shape_cast %283 : vector<1x1x16xf32> to vector<1x16xf32>
    %cst_97 = arith.constant dense<0.000000e+00> : vector<16x16xf32>
    %285 = tpu.matmul %280, %282, %cst_97 {dimension_numbers = #tpu.dot_dimension_numbers<[1], [0], [0], [1], [0, 0, 1, 1], [], []>} : vector<16x16xf32>, vector<16x16xf32>, vector<16x16xf32> -> vector<16x16xf32>
    %286 = vector.broadcast %284 : vector<1x16xf32> to vector<16x16xf32>
    %287 = arith.addf %285, %286 : vector<16x16xf32>
    %288 = arith.addf %3, %287 : vector<16x16xf32>
    %289 = vector.extract_strided_slice %5 {offsets = [0, 0], sizes = [1, 16], strides = [1, 1]} : vector<4x16xf32> to vector<1x16xf32>
    %290 = vector.extract_strided_slice %5 {offsets = [1, 0], sizes = [1, 16], strides = [1, 1]} : vector<4x16xf32> to vector<1x16xf32>
    %cst_98 = arith.constant dense<0.000000e+00> : vector<16xf32>
    %291 = vector.multi_reduction <add>, %288, %cst_98 [1] : vector<16x16xf32> to vector<16xf32>
    %292 = vector.shape_cast %291 : vector<16xf32> to vector<16x1xf32>
    %cst_99 = arith.constant 1.600000e+01 : f32
    %293 = vector.broadcast %cst_99 : f32 to vector<16x1xf32>
    %294 = arith.divf %292, %293 : vector<16x1xf32>
    %295 = vector.broadcast %294 : vector<16x1xf32> to vector<16x16xf32>
    %296 = arith.subf %288, %295 : vector<16x16xf32>
    %297 = arith.mulf %296, %296 : vector<16x16xf32>
    %cst_100 = arith.constant dense<0.000000e+00> : vector<16xf32>
    %298 = vector.multi_reduction <add>, %297, %cst_100 [1] : vector<16x16xf32> to vector<16xf32>
    %299 = vector.shape_cast %298 : vector<16xf32> to vector<16x1xf32>
    %cst_101 = arith.constant 1.600000e+01 : f32
    %300 = vector.broadcast %cst_101 : f32 to vector<16x1xf32>
    %301 = arith.divf %299, %300 : vector<16x1xf32>
    %302 = vector.broadcast %294 : vector<16x1xf32> to vector<16x16xf32>
    %303 = arith.subf %288, %302 : vector<16x16xf32>
    %cst_102 = arith.constant 9.99999974E-6 : f32
    %304 = vector.broadcast %cst_102 : f32 to vector<16x1xf32>
    %305 = arith.addf %301, %304 : vector<16x1xf32>
    %306 = math.rsqrt %305 : vector<16x1xf32>
    %307 = vector.broadcast %306 : vector<16x1xf32> to vector<16x16xf32>
    %308 = arith.mulf %303, %307 : vector<16x16xf32>
    %309 = vector.broadcast %289 : vector<1x16xf32> to vector<16x16xf32>
    %310 = arith.mulf %308, %309 : vector<16x16xf32>
    %311 = vector.broadcast %290 : vector<1x16xf32> to vector<16x16xf32>
    %312 = arith.addf %310, %311 : vector<16x16xf32>
    %c0_103 = arith.constant 0 : index
    %c0_104 = arith.constant 0 : index
    %c0_105 = arith.constant 0 : index
    %313 = vector.load %arg6[%c0_103, %c0_104, %c0_105] : memref<1x16x64xf32, #tpu.memory_space<vmem>>, vector<1x16x64xf32>
    %314 = vector.shape_cast %313 : vector<1x16x64xf32> to vector<16x64xf32>
    %c0_106 = arith.constant 0 : index
    %c0_107 = arith.constant 0 : index
    %c0_108 = arith.constant 0 : index
    %315 = vector.load %arg7[%c0_106, %c0_107, %c0_108] : memref<1x1x64xf32, #tpu.memory_space<vmem>>, vector<1x1x64xf32>
    %316 = vector.shape_cast %315 : vector<1x1x64xf32> to vector<1x64xf32>
    %cst_109 = arith.constant dense<0.000000e+00> : vector<16x64xf32>
    %317 = tpu.matmul %312, %314, %cst_109 {dimension_numbers = #tpu.dot_dimension_numbers<[1], [0], [0], [1], [0, 0, 1, 1], [], []>} : vector<16x16xf32>, vector<16x64xf32>, vector<16x64xf32> -> vector<16x64xf32>
    %318 = vector.broadcast %316 : vector<1x64xf32> to vector<16x64xf32>
    %319 = arith.addf %317, %318 : vector<16x64xf32>
    %cst_110 = arith.constant 0.000000e+00 : f32
    %320 = vector.broadcast %cst_110 : f32 to vector<16x64xf32>
    %321 = arith.maximumf %319, %320 : vector<16x64xf32>
    %c0_111 = arith.constant 0 : index
    %c0_112 = arith.constant 0 : index
    %c0_113 = arith.constant 0 : index
    %322 = vector.load %arg8[%c0_111, %c0_112, %c0_113] : memref<1x64x16xf32, #tpu.memory_space<vmem>>, vector<1x64x16xf32>
    %323 = vector.shape_cast %322 : vector<1x64x16xf32> to vector<64x16xf32>
    %c0_114 = arith.constant 0 : index
    %c0_115 = arith.constant 0 : index
    %c0_116 = arith.constant 0 : index
    %324 = vector.load %arg9[%c0_114, %c0_115, %c0_116] : memref<1x1x16xf32, #tpu.memory_space<vmem>>, vector<1x1x16xf32>
    %325 = vector.shape_cast %324 : vector<1x1x16xf32> to vector<1x16xf32>
    %cst_117 = arith.constant dense<0.000000e+00> : vector<16x16xf32>
    %326 = tpu.matmul %321, %323, %cst_117 {dimension_numbers = #tpu.dot_dimension_numbers<[1], [0], [0], [1], [0, 0, 1, 1], [], []>} : vector<16x64xf32>, vector<64x16xf32>, vector<16x16xf32> -> vector<16x16xf32>
    %327 = vector.broadcast %325 : vector<1x16xf32> to vector<16x16xf32>
    %328 = arith.addf %326, %327 : vector<16x16xf32>
    %329 = arith.addf %312, %328 : vector<16x16xf32>
    %330 = vector.extract_strided_slice %5 {offsets = [2, 0], sizes = [1, 16], strides = [1, 1]} : vector<4x16xf32> to vector<1x16xf32>
    %331 = vector.extract_strided_slice %5 {offsets = [3, 0], sizes = [1, 16], strides = [1, 1]} : vector<4x16xf32> to vector<1x16xf32>
    %cst_118 = arith.constant dense<0.000000e+00> : vector<16xf32>
    %332 = vector.multi_reduction <add>, %329, %cst_118 [1] : vector<16x16xf32> to vector<16xf32>
    %333 = vector.shape_cast %332 : vector<16xf32> to vector<16x1xf32>
    %cst_119 = arith.constant 1.600000e+01 : f32
    %334 = vector.broadcast %cst_119 : f32 to vector<16x1xf32>
    %335 = arith.divf %333, %334 : vector<16x1xf32>
    %336 = vector.broadcast %335 : vector<16x1xf32> to vector<16x16xf32>
    %337 = arith.subf %329, %336 : vector<16x16xf32>
    %338 = arith.mulf %337, %337 : vector<16x16xf32>
    %cst_120 = arith.constant dense<0.000000e+00> : vector<16xf32>
    %339 = vector.multi_reduction <add>, %338, %cst_120 [1] : vector<16x16xf32> to vector<16xf32>
    %340 = vector.shape_cast %339 : vector<16xf32> to vector<16x1xf32>
    %cst_121 = arith.constant 1.600000e+01 : f32
    %341 = vector.broadcast %cst_121 : f32 to vector<16x1xf32>
    %342 = arith.divf %340, %341 : vector<16x1xf32>
    %343 = vector.broadcast %335 : vector<16x1xf32> to vector<16x16xf32>
    %344 = arith.subf %329, %343 : vector<16x16xf32>
    %cst_122 = arith.constant 9.99999974E-6 : f32
    %345 = vector.broadcast %cst_122 : f32 to vector<16x1xf32>
    %346 = arith.addf %342, %345 : vector<16x1xf32>
    %347 = math.rsqrt %346 : vector<16x1xf32>
    %348 = vector.broadcast %347 : vector<16x1xf32> to vector<16x16xf32>
    %349 = arith.mulf %344, %348 : vector<16x16xf32>
    %350 = vector.broadcast %330 : vector<1x16xf32> to vector<16x16xf32>
    %351 = arith.mulf %349, %350 : vector<16x16xf32>
    %352 = vector.broadcast %331 : vector<1x16xf32> to vector<16x16xf32>
    %353 = arith.addf %351, %352 : vector<16x16xf32>
    %c0_123 = arith.constant 0 : index
    %c0_124 = arith.constant 0 : index
    %354 = vector.load %arg12[%c0_123, %c0_124] : memref<16x16xf32, #tpu.memory_space<vmem>>, vector<16x16xf32>
    tpu.vector_store %arg12[%c0_123, %c0_124], %353 {strides = array<i32>} : memref<16x16xf32, #tpu.memory_space<vmem>>, vector<16x16xf32>,
    %c5_i32 = arith.constant 5 : i32
    %355 = arith.cmpi eq, %arg0, %c5_i32 : i32
    %356 = arith.extui %355 : i1 to i32
    %c0_i32_125 = arith.constant 0 : i32
    %357 = arith.cmpi ne, %356, %c0_i32_125 : i32
    scf.if %357 {
      %c0_126 = arith.constant 0 : index
      %c0_127 = arith.constant 0 : index
      %358 = vector.load %arg11[%c0_126, %c0_127] : memref<2x16xf32, #tpu.memory_space<vmem>>, vector<1x16xf32>
      %c1 = arith.constant 1 : index
      %c0_128 = arith.constant 0 : index
      %359 = vector.load %arg11[%c1, %c0_128] : memref<2x16xf32, #tpu.memory_space<vmem>>, vector<1x16xf32>
      %cst_129 = arith.constant dense<0.000000e+00> : vector<16xf32>
      %360 = vector.multi_reduction <add>, %353, %cst_129 [1] : vector<16x16xf32> to vector<16xf32>
      %361 = vector.shape_cast %360 : vector<16xf32> to vector<16x1xf32>
      %cst_130 = arith.constant 1.600000e+01 : f32
      %362 = vector.broadcast %cst_130 : f32 to vector<16x1xf32>
      %363 = arith.divf %361, %362 : vector<16x1xf32>
      %364 = vector.broadcast %363 : vector<16x1xf32> to vector<16x16xf32>
      %365 = arith.subf %353, %364 : vector<16x16xf32>
      %366 = arith.mulf %365, %365 : vector<16x16xf32>
      %cst_131 = arith.constant dense<0.000000e+00> : vector<16xf32>
      %367 = vector.multi_reduction <add>, %366, %cst_131 [1] : vector<16x16xf32> to vector<16xf32>
      %368 = vector.shape_cast %367 : vector<16xf32> to vector<16x1xf32>
      %cst_132 = arith.constant 1.600000e+01 : f32
      %369 = vector.broadcast %cst_132 : f32 to vector<16x1xf32>
      %370 = arith.divf %368, %369 : vector<16x1xf32>
      %371 = vector.broadcast %363 : vector<16x1xf32> to vector<16x16xf32>
      %372 = arith.subf %353, %371 : vector<16x16xf32>
      %cst_133 = arith.constant 9.99999974E-6 : f32
      %373 = vector.broadcast %cst_133 : f32 to vector<16x1xf32>
      %374 = arith.addf %370, %373 : vector<16x1xf32>
      %375 = math.rsqrt %374 : vector<16x1xf32>
      %376 = vector.broadcast %375 : vector<16x1xf32> to vector<16x16xf32>
      %377 = arith.mulf %372, %376 : vector<16x16xf32>
      %378 = vector.broadcast %358 : vector<1x16xf32> to vector<16x16xf32>
      %379 = arith.mulf %377, %378 : vector<16x16xf32>
      %380 = vector.broadcast %359 : vector<1x16xf32> to vector<16x16xf32>
      %381 = arith.addf %379, %380 : vector<16x16xf32>
      %c0_134 = arith.constant 0 : index
      %c0_135 = arith.constant 0 : index
      %382 = vector.load %arg12[%c0_134, %c0_135] : memref<16x16xf32, #tpu.memory_space<vmem>>, vector<16x16xf32>
      tpu.vector_store %arg12[%c0_134, %c0_135], %381 {strides = array<i32>} : memref<16x16xf32, #tpu.memory_space<vmem>>, vector<16x16xf32>,
    } else {
    }
    return
  }
  func.func @transform_0(%arg0: i32) -> (i32, i32) {
    %c0_i32 = arith.constant 0 : i32
    %c0_i32_0 = arith.constant 0 : i32
    %c0_i32_1 = arith.constant 0 : i32
    return %c0_i32, %c0_i32_0 : i32, i32
  }
  func.func @transform_1(%arg0: i32) -> (i32, i32, i32) {
    %c0_i32 = arith.constant 0 : i32
    %c0_i32_0 = arith.constant 0 : i32
    %c0_i32_1 = arith.constant 0 : i32
    return %arg0, %c0_i32, %c0_i32_0 : i32, i32, i32
  }
  func.func @transform_2(%arg0: i32) -> (i32, i32, i32) {
    %c0_i32 = arith.constant 0 : i32
    %c0_i32_0 = arith.constant 0 : i32
    %c0_i32_1 = arith.constant 0 : i32
    return %arg0, %c0_i32, %c0_i32_0 : i32, i32, i32
  }
  func.func @transform_3(%arg0: i32) -> (i32, i32, i32) {
    %c0_i32 = arith.constant 0 : i32
    %c0_i32_0 = arith.constant 0 : i32
    %c0_i32_1 = arith.constant 0 : i32
    return %arg0, %c0_i32, %c0_i32_0 : i32, i32, i32
  }
  func.func @transform_4(%arg0: i32) -> (i32, i32, i32) {
    %c0_i32 = arith.constant 0 : i32
    %c0_i32_0 = arith.constant 0 : i32
    %c0_i32_1 = arith.constant 0 : i32
    return %arg0, %c0_i32, %c0_i32_0 : i32, i32, i32
  }
  func.func @transform_5(%arg0: i32) -> (i32, i32, i32) {
    %c0_i32 = arith.constant 0 : i32
    %c0_i32_0 = arith.constant 0 : i32
    %c0_i32_1 = arith.constant 0 : i32
    return %arg0, %c0_i32, %c0_i32_0 : i32, i32, i32
  }
  func.func @transform_6(%arg0: i32) -> (i32, i32, i32) {
    %c0_i32 = arith.constant 0 : i32
    %c0_i32_0 = arith.constant 0 : i32
    %c0_i32_1 = arith.constant 0 : i32
    return %arg0, %c0_i32, %c0_i32_0 : i32, i32, i32
  }
  func.func @transform_7(%arg0: i32) -> (i32, i32, i32) {
    %c0_i32 = arith.constant 0 : i32
    %c0_i32_0 = arith.constant 0 : i32
    %c0_i32_1 = arith.constant 0 : i32
    return %arg0, %c0_i32, %c0_i32_0 : i32, i32, i32
  }
  func.func @transform_8(%arg0: i32) -> (i32, i32, i32) {
    %c0_i32 = arith.constant 0 : i32
    %c0_i32_0 = arith.constant 0 : i32
    %c0_i32_1 = arith.constant 0 : i32
    return %arg0, %c0_i32, %c0_i32_0 : i32, i32, i32
  }
  func.func @transform_9(%arg0: i32) -> (i32, i32, i32) {
    %c0_i32 = arith.constant 0 : i32
    %c0_i32_0 = arith.constant 0 : i32
    %c0_i32_1 = arith.constant 0 : i32
    return %arg0, %c0_i32, %c0_i32_0 : i32, i32, i32
  }
  func.func @transform_10(%arg0: i32) -> (i32, i32) {
    %c0_i32 = arith.constant 0 : i32
    %c0_i32_0 = arith.constant 0 : i32
    %c0_i32_1 = arith.constant 0 : i32
    return %c0_i32, %c0_i32_0 : i32, i32
  }
  func.func @transform_11(%arg0: i32) -> (i32, i32) {
    %c0_i32 = arith.constant 0 : i32
    %c0_i32_0 = arith.constant 0 : i32
    %c0_i32_1 = arith.constant 0 : i32
    return %c0_i32, %c0_i32_0 : i32, i32
  }
}

module attributes {stable_mosaic.version = 11 : i64} {
  func.func @_decoder_kernel(%arg0: i32, %arg1: memref<16x16xf32, #tpu.memory_space<vmem>>, %arg2: memref<16x16xf32, #tpu.memory_space<vmem>>, %arg3: memref<1x16x48xf32, #tpu.memory_space<vmem>>, %arg4: memref<1x1x48xf32, #tpu.memory_space<vmem>>, %arg5: memref<1x16x16xf32, #tpu.memory_space<vmem>>, %arg6: memref<1x1x16xf32, #tpu.memory_space<vmem>>, %arg7: memref<1x16x16xf32, #tpu.memory_space<vmem>>, %arg8: memref<1x1x16xf32, #tpu.memory_space<vmem>>, %arg9: memref<1x16x32xf32, #tpu.memory_space<vmem>>, %arg10: memref<1x1x32xf32, #tpu.memory_space<vmem>>, %arg11: memref<1x16x16xf32, #tpu.memory_space<vmem>>, %arg12: memref<1x1x16xf32, #tpu.memory_space<vmem>>, %arg13: memref<1x16x64xf32, #tpu.memory_space<vmem>>, %arg14: memref<1x1x64xf32, #tpu.memory_space<vmem>>, %arg15: memref<1x64x16xf32, #tpu.memory_space<vmem>>, %arg16: memref<1x1x16xf32, #tpu.memory_space<vmem>>, %arg17: memref<1x6x16xf32, #tpu.memory_space<vmem>>, %arg18: memref<2x16xf32, #tpu.memory_space<vmem>>, %arg19: memref<16x128xf32, #tpu.memory_space<vmem>>, %arg20: memref<1x128xf32, #tpu.memory_space<vmem>>, %arg21: memref<16x128xf32, #tpu.memory_space<vmem>>, %arg22: memref<16x16xf32, #tpu.memory_space<vmem>>) attributes {dimension_semantics = [#tpu.dimension_semantics<arbitrary>], iteration_bounds = array<i64: 6>, scalar_prefetch = 0 : i64, scratch_operands = 1 : i64, tpu.core_type = #tpu.core_type<tc>, window_params = [{pipeline_mode = #tpu.pipeline_mode<synchronous>, transform_indices = @transform_0, window_bounds = array<i64: 16, 16>}, {pipeline_mode = #tpu.pipeline_mode<synchronous>, transform_indices = @transform_1, window_bounds = array<i64: 16, 16>}, {transform_indices = @transform_2, window_bounds = array<i64: 1, 16, 48>}, {transform_indices = @transform_3, window_bounds = array<i64: 1, 1, 48>}, {transform_indices = @transform_4, window_bounds = array<i64: 1, 16, 16>}, {transform_indices = @transform_5, window_bounds = array<i64: 1, 1, 16>}, {transform_indices = @transform_6, window_bounds = array<i64: 1, 16, 16>}, {transform_indices = @transform_7, window_bounds = array<i64: 1, 1, 16>}, {transform_indices = @transform_8, window_bounds = array<i64: 1, 16, 32>}, {transform_indices = @transform_9, window_bounds = array<i64: 1, 1, 32>}, {transform_indices = @transform_10, window_bounds = array<i64: 1, 16, 16>}, {transform_indices = @transform_11, window_bounds = array<i64: 1, 1, 16>}, {transform_indices = @transform_12, window_bounds = array<i64: 1, 16, 64>}, {transform_indices = @transform_13, window_bounds = array<i64: 1, 1, 64>}, {transform_indices = @transform_14, window_bounds = array<i64: 1, 64, 16>}, {transform_indices = @transform_15, window_bounds = array<i64: 1, 1, 16>}, {transform_indices = @transform_16, window_bounds = array<i64: 1, 6, 16>}, {pipeline_mode = #tpu.pipeline_mode<synchronous>, transform_indices = @transform_17, window_bounds = array<i64: 2, 16>}, {pipeline_mode = #tpu.pipeline_mode<synchronous>, transform_indices = @transform_18, window_bounds = array<i64: 16, 128>}, {pipeline_mode = #tpu.pipeline_mode<synchronous>, transform_indices = @transform_19, window_bounds = array<i64: 1, 128>}, {pipeline_mode = #tpu.pipeline_mode<synchronous>, transform_indices = @transform_20, window_bounds = array<i64: 16, 128>}]} {
    %c0_i32 = arith.constant 0 : i32
    %0 = arith.cmpi eq, %arg0, %c0_i32 : i32
    %1 = arith.extui %0 : i1 to i32
    %c0_i32_0 = arith.constant 0 : i32
    %2 = arith.cmpi ne, %1, %c0_i32_0 : i32
    scf.if %2 {
      %c0_234 = arith.constant 0 : index
      %c0_235 = arith.constant 0 : index
      %672 = vector.load %arg1[%c0_234, %c0_235] : memref<16x16xf32, #tpu.memory_space<vmem>>, vector<16x16xf32>
      %cst_236 = arith.constant 4.000000e+00 : f32
      %673 = vector.broadcast %cst_236 : f32 to vector<16x16xf32>
      %674 = arith.mulf %672, %673 : vector<16x16xf32>
      %c0_237 = arith.constant 0 : index
      %c0_238 = arith.constant 0 : index
      %675 = vector.load %arg22[%c0_237, %c0_238] : memref<16x16xf32, #tpu.memory_space<vmem>>, vector<16x16xf32>
      tpu.vector_store %arg22[%c0_237, %c0_238], %674 {strides = array<i32>} : memref<16x16xf32, #tpu.memory_space<vmem>>, vector<16x16xf32>,
    } else {
    }
    %c0 = arith.constant 0 : index
    %c0_1 = arith.constant 0 : index
    %3 = vector.load %arg22[%c0, %c0_1] : memref<16x16xf32, #tpu.memory_space<vmem>>, vector<16x16xf32>
    %c0_2 = arith.constant 0 : index
    %c0_3 = arith.constant 0 : index
    %4 = vector.load %arg2[%c0_2, %c0_3] : memref<16x16xf32, #tpu.memory_space<vmem>>, vector<16x16xf32>
    %c0_4 = arith.constant 0 : index
    %c0_5 = arith.constant 0 : index
    %c0_6 = arith.constant 0 : index
    %5 = vector.load %arg17[%c0_4, %c0_5, %c0_6] : memref<1x6x16xf32, #tpu.memory_space<vmem>>, vector<1x6x16xf32>
    %6 = vector.shape_cast %5 : vector<1x6x16xf32> to vector<6x16xf32>
    %c0_7 = arith.constant 0 : index
    %c0_8 = arith.constant 0 : index
    %c0_9 = arith.constant 0 : index
    %7 = vector.load %arg3[%c0_7, %c0_8, %c0_9] : memref<1x16x48xf32, #tpu.memory_space<vmem>>, vector<1x16x48xf32>
    %8 = vector.shape_cast %7 : vector<1x16x48xf32> to vector<16x48xf32>
    %c0_10 = arith.constant 0 : index
    %c0_11 = arith.constant 0 : index
    %c0_12 = arith.constant 0 : index
    %9 = vector.load %arg4[%c0_10, %c0_11, %c0_12] : memref<1x1x48xf32, #tpu.memory_space<vmem>>, vector<1x1x48xf32>
    %10 = vector.shape_cast %9 : vector<1x1x48xf32> to vector<1x48xf32>
    %cst = arith.constant dense<0.000000e+00> : vector<16x48xf32>
    %11 = tpu.matmul %3, %8, %cst {dimension_numbers = #tpu.dot_dimension_numbers<[1], [0], [0], [1], [0, 0, 1, 1], [], []>} : vector<16x16xf32>, vector<16x48xf32>, vector<16x48xf32> -> vector<16x48xf32>
    %12 = vector.broadcast %10 : vector<1x48xf32> to vector<16x48xf32>
    %13 = arith.addf %11, %12 : vector<16x48xf32>
    %14 = vector.extract_strided_slice %13 {offsets = [0, 0], sizes = [16, 16], strides = [1, 1]} : vector<16x48xf32> to vector<16x16xf32>
    %15 = vector.extract_strided_slice %13 {offsets = [0, 16], sizes = [16, 16], strides = [1, 1]} : vector<16x48xf32> to vector<16x16xf32>
    %16 = vector.extract_strided_slice %13 {offsets = [0, 32], sizes = [16, 16], strides = [1, 1]} : vector<16x48xf32> to vector<16x16xf32>
    %17 = vector.extract_strided_slice %14 {offsets = [0, 0], sizes = [8, 16], strides = [1, 1]} : vector<16x16xf32> to vector<8x16xf32>
    %18 = vector.extract_strided_slice %15 {offsets = [0, 0], sizes = [8, 16], strides = [1, 1]} : vector<16x16xf32> to vector<8x16xf32>
    %19 = vector.extract_strided_slice %16 {offsets = [0, 0], sizes = [8, 16], strides = [1, 1]} : vector<16x16xf32> to vector<8x16xf32>
    %20 = vector.extract_strided_slice %17 {offsets = [0, 0], sizes = [8, 2], strides = [1, 1]} : vector<8x16xf32> to vector<8x2xf32>
    %21 = vector.extract_strided_slice %18 {offsets = [0, 0], sizes = [8, 2], strides = [1, 1]} : vector<8x16xf32> to vector<8x2xf32>
    %22 = vector.extract_strided_slice %19 {offsets = [0, 0], sizes = [8, 2], strides = [1, 1]} : vector<8x16xf32> to vector<8x2xf32>
    %cst_13 = arith.constant dense<0.000000e+00> : vector<8x8xf32>
    %23 = tpu.matmul %20, %21, %cst_13 {dimension_numbers = #tpu.dot_dimension_numbers<[1], [1], [0], [0], [0, 0, 1, 0], [], []>} : vector<8x2xf32>, vector<8x2xf32>, vector<8x8xf32> -> vector<8x8xf32>
    %cst_14 = arith.constant 0.707106769 : f32
    %24 = vector.broadcast %cst_14 : f32 to vector<8x8xf32>
    %25 = arith.mulf %23, %24 : vector<8x8xf32>
    %cst_15 = arith.constant dense<0xFF800000> : vector<8xf32>
    %26 = vector.multi_reduction <maximumf>, %25, %cst_15 [1] : vector<8x8xf32> to vector<8xf32>
    %27 = vector.shape_cast %26 : vector<8xf32> to vector<8x1xf32>
    %28 = vector.broadcast %27 : vector<8x1xf32> to vector<8x8xf32>
    %29 = arith.subf %25, %28 : vector<8x8xf32>
    %30 = math.exp %29 : vector<8x8xf32>
    %cst_16 = arith.constant dense<0.000000e+00> : vector<8xf32>
    %31 = vector.multi_reduction <add>, %30, %cst_16 [1] : vector<8x8xf32> to vector<8xf32>
    %32 = vector.shape_cast %31 : vector<8xf32> to vector<8x1xf32>
    %33 = vector.broadcast %32 : vector<8x1xf32> to vector<8x8xf32>
    %34 = arith.divf %30, %33 : vector<8x8xf32>
    %cst_17 = arith.constant dense<0.000000e+00> : vector<8x2xf32>
    %35 = tpu.matmul %34, %22, %cst_17 {dimension_numbers = #tpu.dot_dimension_numbers<[1], [0], [0], [1], [0, 0, 1, 1], [], []>} : vector<8x8xf32>, vector<8x2xf32>, vector<8x2xf32> -> vector<8x2xf32>
    %36 = vector.extract_strided_slice %17 {offsets = [0, 2], sizes = [8, 2], strides = [1, 1]} : vector<8x16xf32> to vector<8x2xf32>
    %37 = vector.extract_strided_slice %18 {offsets = [0, 2], sizes = [8, 2], strides = [1, 1]} : vector<8x16xf32> to vector<8x2xf32>
    %38 = vector.extract_strided_slice %19 {offsets = [0, 2], sizes = [8, 2], strides = [1, 1]} : vector<8x16xf32> to vector<8x2xf32>
    %cst_18 = arith.constant dense<0.000000e+00> : vector<8x8xf32>
    %39 = tpu.matmul %36, %37, %cst_18 {dimension_numbers = #tpu.dot_dimension_numbers<[1], [1], [0], [0], [0, 0, 1, 0], [], []>} : vector<8x2xf32>, vector<8x2xf32>, vector<8x8xf32> -> vector<8x8xf32>
    %cst_19 = arith.constant 0.707106769 : f32
    %40 = vector.broadcast %cst_19 : f32 to vector<8x8xf32>
    %41 = arith.mulf %39, %40 : vector<8x8xf32>
    %cst_20 = arith.constant dense<0xFF800000> : vector<8xf32>
    %42 = vector.multi_reduction <maximumf>, %41, %cst_20 [1] : vector<8x8xf32> to vector<8xf32>
    %43 = vector.shape_cast %42 : vector<8xf32> to vector<8x1xf32>
    %44 = vector.broadcast %43 : vector<8x1xf32> to vector<8x8xf32>
    %45 = arith.subf %41, %44 : vector<8x8xf32>
    %46 = math.exp %45 : vector<8x8xf32>
    %cst_21 = arith.constant dense<0.000000e+00> : vector<8xf32>
    %47 = vector.multi_reduction <add>, %46, %cst_21 [1] : vector<8x8xf32> to vector<8xf32>
    %48 = vector.shape_cast %47 : vector<8xf32> to vector<8x1xf32>
    %49 = vector.broadcast %48 : vector<8x1xf32> to vector<8x8xf32>
    %50 = arith.divf %46, %49 : vector<8x8xf32>
    %cst_22 = arith.constant dense<0.000000e+00> : vector<8x2xf32>
    %51 = tpu.matmul %50, %38, %cst_22 {dimension_numbers = #tpu.dot_dimension_numbers<[1], [0], [0], [1], [0, 0, 1, 1], [], []>} : vector<8x8xf32>, vector<8x2xf32>, vector<8x2xf32> -> vector<8x2xf32>
    %52 = vector.extract_strided_slice %17 {offsets = [0, 4], sizes = [8, 2], strides = [1, 1]} : vector<8x16xf32> to vector<8x2xf32>
    %53 = vector.extract_strided_slice %18 {offsets = [0, 4], sizes = [8, 2], strides = [1, 1]} : vector<8x16xf32> to vector<8x2xf32>
    %54 = vector.extract_strided_slice %19 {offsets = [0, 4], sizes = [8, 2], strides = [1, 1]} : vector<8x16xf32> to vector<8x2xf32>
    %cst_23 = arith.constant dense<0.000000e+00> : vector<8x8xf32>
    %55 = tpu.matmul %52, %53, %cst_23 {dimension_numbers = #tpu.dot_dimension_numbers<[1], [1], [0], [0], [0, 0, 1, 0], [], []>} : vector<8x2xf32>, vector<8x2xf32>, vector<8x8xf32> -> vector<8x8xf32>
    %cst_24 = arith.constant 0.707106769 : f32
    %56 = vector.broadcast %cst_24 : f32 to vector<8x8xf32>
    %57 = arith.mulf %55, %56 : vector<8x8xf32>
    %cst_25 = arith.constant dense<0xFF800000> : vector<8xf32>
    %58 = vector.multi_reduction <maximumf>, %57, %cst_25 [1] : vector<8x8xf32> to vector<8xf32>
    %59 = vector.shape_cast %58 : vector<8xf32> to vector<8x1xf32>
    %60 = vector.broadcast %59 : vector<8x1xf32> to vector<8x8xf32>
    %61 = arith.subf %57, %60 : vector<8x8xf32>
    %62 = math.exp %61 : vector<8x8xf32>
    %cst_26 = arith.constant dense<0.000000e+00> : vector<8xf32>
    %63 = vector.multi_reduction <add>, %62, %cst_26 [1] : vector<8x8xf32> to vector<8xf32>
    %64 = vector.shape_cast %63 : vector<8xf32> to vector<8x1xf32>
    %65 = vector.broadcast %64 : vector<8x1xf32> to vector<8x8xf32>
    %66 = arith.divf %62, %65 : vector<8x8xf32>
    %cst_27 = arith.constant dense<0.000000e+00> : vector<8x2xf32>
    %67 = tpu.matmul %66, %54, %cst_27 {dimension_numbers = #tpu.dot_dimension_numbers<[1], [0], [0], [1], [0, 0, 1, 1], [], []>} : vector<8x8xf32>, vector<8x2xf32>, vector<8x2xf32> -> vector<8x2xf32>
    %68 = vector.extract_strided_slice %17 {offsets = [0, 6], sizes = [8, 2], strides = [1, 1]} : vector<8x16xf32> to vector<8x2xf32>
    %69 = vector.extract_strided_slice %18 {offsets = [0, 6], sizes = [8, 2], strides = [1, 1]} : vector<8x16xf32> to vector<8x2xf32>
    %70 = vector.extract_strided_slice %19 {offsets = [0, 6], sizes = [8, 2], strides = [1, 1]} : vector<8x16xf32> to vector<8x2xf32>
    %cst_28 = arith.constant dense<0.000000e+00> : vector<8x8xf32>
    %71 = tpu.matmul %68, %69, %cst_28 {dimension_numbers = #tpu.dot_dimension_numbers<[1], [1], [0], [0], [0, 0, 1, 0], [], []>} : vector<8x2xf32>, vector<8x2xf32>, vector<8x8xf32> -> vector<8x8xf32>
    %cst_29 = arith.constant 0.707106769 : f32
    %72 = vector.broadcast %cst_29 : f32 to vector<8x8xf32>
    %73 = arith.mulf %71, %72 : vector<8x8xf32>
    %cst_30 = arith.constant dense<0xFF800000> : vector<8xf32>
    %74 = vector.multi_reduction <maximumf>, %73, %cst_30 [1] : vector<8x8xf32> to vector<8xf32>
    %75 = vector.shape_cast %74 : vector<8xf32> to vector<8x1xf32>
    %76 = vector.broadcast %75 : vector<8x1xf32> to vector<8x8xf32>
    %77 = arith.subf %73, %76 : vector<8x8xf32>
    %78 = math.exp %77 : vector<8x8xf32>
    %cst_31 = arith.constant dense<0.000000e+00> : vector<8xf32>
    %79 = vector.multi_reduction <add>, %78, %cst_31 [1] : vector<8x8xf32> to vector<8xf32>
    %80 = vector.shape_cast %79 : vector<8xf32> to vector<8x1xf32>
    %81 = vector.broadcast %80 : vector<8x1xf32> to vector<8x8xf32>
    %82 = arith.divf %78, %81 : vector<8x8xf32>
    %cst_32 = arith.constant dense<0.000000e+00> : vector<8x2xf32>
    %83 = tpu.matmul %82, %70, %cst_32 {dimension_numbers = #tpu.dot_dimension_numbers<[1], [0], [0], [1], [0, 0, 1, 1], [], []>} : vector<8x8xf32>, vector<8x2xf32>, vector<8x2xf32> -> vector<8x2xf32>
    %84 = vector.extract_strided_slice %17 {offsets = [0, 8], sizes = [8, 2], strides = [1, 1]} : vector<8x16xf32> to vector<8x2xf32>
    %85 = vector.extract_strided_slice %18 {offsets = [0, 8], sizes = [8, 2], strides = [1, 1]} : vector<8x16xf32> to vector<8x2xf32>
    %86 = vector.extract_strided_slice %19 {offsets = [0, 8], sizes = [8, 2], strides = [1, 1]} : vector<8x16xf32> to vector<8x2xf32>
    %cst_33 = arith.constant dense<0.000000e+00> : vector<8x8xf32>
    %87 = tpu.matmul %84, %85, %cst_33 {dimension_numbers = #tpu.dot_dimension_numbers<[1], [1], [0], [0], [0, 0, 1, 0], [], []>} : vector<8x2xf32>, vector<8x2xf32>, vector<8x8xf32> -> vector<8x8xf32>
    %cst_34 = arith.constant 0.707106769 : f32
    %88 = vector.broadcast %cst_34 : f32 to vector<8x8xf32>
    %89 = arith.mulf %87, %88 : vector<8x8xf32>
    %cst_35 = arith.constant dense<0xFF800000> : vector<8xf32>
    %90 = vector.multi_reduction <maximumf>, %89, %cst_35 [1] : vector<8x8xf32> to vector<8xf32>
    %91 = vector.shape_cast %90 : vector<8xf32> to vector<8x1xf32>
    %92 = vector.broadcast %91 : vector<8x1xf32> to vector<8x8xf32>
    %93 = arith.subf %89, %92 : vector<8x8xf32>
    %94 = math.exp %93 : vector<8x8xf32>
    %cst_36 = arith.constant dense<0.000000e+00> : vector<8xf32>
    %95 = vector.multi_reduction <add>, %94, %cst_36 [1] : vector<8x8xf32> to vector<8xf32>
    %96 = vector.shape_cast %95 : vector<8xf32> to vector<8x1xf32>
    %97 = vector.broadcast %96 : vector<8x1xf32> to vector<8x8xf32>
    %98 = arith.divf %94, %97 : vector<8x8xf32>
    %cst_37 = arith.constant dense<0.000000e+00> : vector<8x2xf32>
    %99 = tpu.matmul %98, %86, %cst_37 {dimension_numbers = #tpu.dot_dimension_numbers<[1], [0], [0], [1], [0, 0, 1, 1], [], []>} : vector<8x8xf32>, vector<8x2xf32>, vector<8x2xf32> -> vector<8x2xf32>
    %100 = vector.extract_strided_slice %17 {offsets = [0, 10], sizes = [8, 2], strides = [1, 1]} : vector<8x16xf32> to vector<8x2xf32>
    %101 = vector.extract_strided_slice %18 {offsets = [0, 10], sizes = [8, 2], strides = [1, 1]} : vector<8x16xf32> to vector<8x2xf32>
    %102 = vector.extract_strided_slice %19 {offsets = [0, 10], sizes = [8, 2], strides = [1, 1]} : vector<8x16xf32> to vector<8x2xf32>
    %cst_38 = arith.constant dense<0.000000e+00> : vector<8x8xf32>
    %103 = tpu.matmul %100, %101, %cst_38 {dimension_numbers = #tpu.dot_dimension_numbers<[1], [1], [0], [0], [0, 0, 1, 0], [], []>} : vector<8x2xf32>, vector<8x2xf32>, vector<8x8xf32> -> vector<8x8xf32>
    %cst_39 = arith.constant 0.707106769 : f32
    %104 = vector.broadcast %cst_39 : f32 to vector<8x8xf32>
    %105 = arith.mulf %103, %104 : vector<8x8xf32>
    %cst_40 = arith.constant dense<0xFF800000> : vector<8xf32>
    %106 = vector.multi_reduction <maximumf>, %105, %cst_40 [1] : vector<8x8xf32> to vector<8xf32>
    %107 = vector.shape_cast %106 : vector<8xf32> to vector<8x1xf32>
    %108 = vector.broadcast %107 : vector<8x1xf32> to vector<8x8xf32>
    %109 = arith.subf %105, %108 : vector<8x8xf32>
    %110 = math.exp %109 : vector<8x8xf32>
    %cst_41 = arith.constant dense<0.000000e+00> : vector<8xf32>
    %111 = vector.multi_reduction <add>, %110, %cst_41 [1] : vector<8x8xf32> to vector<8xf32>
    %112 = vector.shape_cast %111 : vector<8xf32> to vector<8x1xf32>
    %113 = vector.broadcast %112 : vector<8x1xf32> to vector<8x8xf32>
    %114 = arith.divf %110, %113 : vector<8x8xf32>
    %cst_42 = arith.constant dense<0.000000e+00> : vector<8x2xf32>
    %115 = tpu.matmul %114, %102, %cst_42 {dimension_numbers = #tpu.dot_dimension_numbers<[1], [0], [0], [1], [0, 0, 1, 1], [], []>} : vector<8x8xf32>, vector<8x2xf32>, vector<8x2xf32> -> vector<8x2xf32>
    %116 = vector.extract_strided_slice %17 {offsets = [0, 12], sizes = [8, 2], strides = [1, 1]} : vector<8x16xf32> to vector<8x2xf32>
    %117 = vector.extract_strided_slice %18 {offsets = [0, 12], sizes = [8, 2], strides = [1, 1]} : vector<8x16xf32> to vector<8x2xf32>
    %118 = vector.extract_strided_slice %19 {offsets = [0, 12], sizes = [8, 2], strides = [1, 1]} : vector<8x16xf32> to vector<8x2xf32>
    %cst_43 = arith.constant dense<0.000000e+00> : vector<8x8xf32>
    %119 = tpu.matmul %116, %117, %cst_43 {dimension_numbers = #tpu.dot_dimension_numbers<[1], [1], [0], [0], [0, 0, 1, 0], [], []>} : vector<8x2xf32>, vector<8x2xf32>, vector<8x8xf32> -> vector<8x8xf32>
    %cst_44 = arith.constant 0.707106769 : f32
    %120 = vector.broadcast %cst_44 : f32 to vector<8x8xf32>
    %121 = arith.mulf %119, %120 : vector<8x8xf32>
    %cst_45 = arith.constant dense<0xFF800000> : vector<8xf32>
    %122 = vector.multi_reduction <maximumf>, %121, %cst_45 [1] : vector<8x8xf32> to vector<8xf32>
    %123 = vector.shape_cast %122 : vector<8xf32> to vector<8x1xf32>
    %124 = vector.broadcast %123 : vector<8x1xf32> to vector<8x8xf32>
    %125 = arith.subf %121, %124 : vector<8x8xf32>
    %126 = math.exp %125 : vector<8x8xf32>
    %cst_46 = arith.constant dense<0.000000e+00> : vector<8xf32>
    %127 = vector.multi_reduction <add>, %126, %cst_46 [1] : vector<8x8xf32> to vector<8xf32>
    %128 = vector.shape_cast %127 : vector<8xf32> to vector<8x1xf32>
    %129 = vector.broadcast %128 : vector<8x1xf32> to vector<8x8xf32>
    %130 = arith.divf %126, %129 : vector<8x8xf32>
    %cst_47 = arith.constant dense<0.000000e+00> : vector<8x2xf32>
    %131 = tpu.matmul %130, %118, %cst_47 {dimension_numbers = #tpu.dot_dimension_numbers<[1], [0], [0], [1], [0, 0, 1, 1], [], []>} : vector<8x8xf32>, vector<8x2xf32>, vector<8x2xf32> -> vector<8x2xf32>
    %132 = vector.extract_strided_slice %17 {offsets = [0, 14], sizes = [8, 2], strides = [1, 1]} : vector<8x16xf32> to vector<8x2xf32>
    %133 = vector.extract_strided_slice %18 {offsets = [0, 14], sizes = [8, 2], strides = [1, 1]} : vector<8x16xf32> to vector<8x2xf32>
    %134 = vector.extract_strided_slice %19 {offsets = [0, 14], sizes = [8, 2], strides = [1, 1]} : vector<8x16xf32> to vector<8x2xf32>
    %cst_48 = arith.constant dense<0.000000e+00> : vector<8x8xf32>
    %135 = tpu.matmul %132, %133, %cst_48 {dimension_numbers = #tpu.dot_dimension_numbers<[1], [1], [0], [0], [0, 0, 1, 0], [], []>} : vector<8x2xf32>, vector<8x2xf32>, vector<8x8xf32> -> vector<8x8xf32>
    %cst_49 = arith.constant 0.707106769 : f32
    %136 = vector.broadcast %cst_49 : f32 to vector<8x8xf32>
    %137 = arith.mulf %135, %136 : vector<8x8xf32>
    %cst_50 = arith.constant dense<0xFF800000> : vector<8xf32>
    %138 = vector.multi_reduction <maximumf>, %137, %cst_50 [1] : vector<8x8xf32> to vector<8xf32>
    %139 = vector.shape_cast %138 : vector<8xf32> to vector<8x1xf32>
    %140 = vector.broadcast %139 : vector<8x1xf32> to vector<8x8xf32>
    %141 = arith.subf %137, %140 : vector<8x8xf32>
    %142 = math.exp %141 : vector<8x8xf32>
    %cst_51 = arith.constant dense<0.000000e+00> : vector<8xf32>
    %143 = vector.multi_reduction <add>, %142, %cst_51 [1] : vector<8x8xf32> to vector<8xf32>
    %144 = vector.shape_cast %143 : vector<8xf32> to vector<8x1xf32>
    %145 = vector.broadcast %144 : vector<8x1xf32> to vector<8x8xf32>
    %146 = arith.divf %142, %145 : vector<8x8xf32>
    %cst_52 = arith.constant dense<0.000000e+00> : vector<8x2xf32>
    %147 = tpu.matmul %146, %134, %cst_52 {dimension_numbers = #tpu.dot_dimension_numbers<[1], [0], [0], [1], [0, 0, 1, 1], [], []>} : vector<8x8xf32>, vector<8x2xf32>, vector<8x2xf32> -> vector<8x2xf32>
    %148 = tpu.concatenate %35, %51, %67, %83, %99, %115, %131, %147 in 1 : vector<8x2xf32>, vector<8x2xf32>, vector<8x2xf32>, vector<8x2xf32>, vector<8x2xf32>, vector<8x2xf32>, vector<8x2xf32>, vector<8x2xf32> -> vector<8x16xf32>
    %149 = vector.extract_strided_slice %14 {offsets = [8, 0], sizes = [8, 16], strides = [1, 1]} : vector<16x16xf32> to vector<8x16xf32>
    %150 = vector.extract_strided_slice %15 {offsets = [8, 0], sizes = [8, 16], strides = [1, 1]} : vector<16x16xf32> to vector<8x16xf32>
    %151 = vector.extract_strided_slice %16 {offsets = [8, 0], sizes = [8, 16], strides = [1, 1]} : vector<16x16xf32> to vector<8x16xf32>
    %152 = vector.extract_strided_slice %149 {offsets = [0, 0], sizes = [8, 2], strides = [1, 1]} : vector<8x16xf32> to vector<8x2xf32>
    %153 = vector.extract_strided_slice %150 {offsets = [0, 0], sizes = [8, 2], strides = [1, 1]} : vector<8x16xf32> to vector<8x2xf32>
    %154 = vector.extract_strided_slice %151 {offsets = [0, 0], sizes = [8, 2], strides = [1, 1]} : vector<8x16xf32> to vector<8x2xf32>
    %cst_53 = arith.constant dense<0.000000e+00> : vector<8x8xf32>
    %155 = tpu.matmul %152, %153, %cst_53 {dimension_numbers = #tpu.dot_dimension_numbers<[1], [1], [0], [0], [0, 0, 1, 0], [], []>} : vector<8x2xf32>, vector<8x2xf32>, vector<8x8xf32> -> vector<8x8xf32>
    %cst_54 = arith.constant 0.707106769 : f32
    %156 = vector.broadcast %cst_54 : f32 to vector<8x8xf32>
    %157 = arith.mulf %155, %156 : vector<8x8xf32>
    %cst_55 = arith.constant dense<0xFF800000> : vector<8xf32>
    %158 = vector.multi_reduction <maximumf>, %157, %cst_55 [1] : vector<8x8xf32> to vector<8xf32>
    %159 = vector.shape_cast %158 : vector<8xf32> to vector<8x1xf32>
    %160 = vector.broadcast %159 : vector<8x1xf32> to vector<8x8xf32>
    %161 = arith.subf %157, %160 : vector<8x8xf32>
    %162 = math.exp %161 : vector<8x8xf32>
    %cst_56 = arith.constant dense<0.000000e+00> : vector<8xf32>
    %163 = vector.multi_reduction <add>, %162, %cst_56 [1] : vector<8x8xf32> to vector<8xf32>
    %164 = vector.shape_cast %163 : vector<8xf32> to vector<8x1xf32>
    %165 = vector.broadcast %164 : vector<8x1xf32> to vector<8x8xf32>
    %166 = arith.divf %162, %165 : vector<8x8xf32>
    %cst_57 = arith.constant dense<0.000000e+00> : vector<8x2xf32>
    %167 = tpu.matmul %166, %154, %cst_57 {dimension_numbers = #tpu.dot_dimension_numbers<[1], [0], [0], [1], [0, 0, 1, 1], [], []>} : vector<8x8xf32>, vector<8x2xf32>, vector<8x2xf32> -> vector<8x2xf32>
    %168 = vector.extract_strided_slice %149 {offsets = [0, 2], sizes = [8, 2], strides = [1, 1]} : vector<8x16xf32> to vector<8x2xf32>
    %169 = vector.extract_strided_slice %150 {offsets = [0, 2], sizes = [8, 2], strides = [1, 1]} : vector<8x16xf32> to vector<8x2xf32>
    %170 = vector.extract_strided_slice %151 {offsets = [0, 2], sizes = [8, 2], strides = [1, 1]} : vector<8x16xf32> to vector<8x2xf32>
    %cst_58 = arith.constant dense<0.000000e+00> : vector<8x8xf32>
    %171 = tpu.matmul %168, %169, %cst_58 {dimension_numbers = #tpu.dot_dimension_numbers<[1], [1], [0], [0], [0, 0, 1, 0], [], []>} : vector<8x2xf32>, vector<8x2xf32>, vector<8x8xf32> -> vector<8x8xf32>
    %cst_59 = arith.constant 0.707106769 : f32
    %172 = vector.broadcast %cst_59 : f32 to vector<8x8xf32>
    %173 = arith.mulf %171, %172 : vector<8x8xf32>
    %cst_60 = arith.constant dense<0xFF800000> : vector<8xf32>
    %174 = vector.multi_reduction <maximumf>, %173, %cst_60 [1] : vector<8x8xf32> to vector<8xf32>
    %175 = vector.shape_cast %174 : vector<8xf32> to vector<8x1xf32>
    %176 = vector.broadcast %175 : vector<8x1xf32> to vector<8x8xf32>
    %177 = arith.subf %173, %176 : vector<8x8xf32>
    %178 = math.exp %177 : vector<8x8xf32>
    %cst_61 = arith.constant dense<0.000000e+00> : vector<8xf32>
    %179 = vector.multi_reduction <add>, %178, %cst_61 [1] : vector<8x8xf32> to vector<8xf32>
    %180 = vector.shape_cast %179 : vector<8xf32> to vector<8x1xf32>
    %181 = vector.broadcast %180 : vector<8x1xf32> to vector<8x8xf32>
    %182 = arith.divf %178, %181 : vector<8x8xf32>
    %cst_62 = arith.constant dense<0.000000e+00> : vector<8x2xf32>
    %183 = tpu.matmul %182, %170, %cst_62 {dimension_numbers = #tpu.dot_dimension_numbers<[1], [0], [0], [1], [0, 0, 1, 1], [], []>} : vector<8x8xf32>, vector<8x2xf32>, vector<8x2xf32> -> vector<8x2xf32>
    %184 = vector.extract_strided_slice %149 {offsets = [0, 4], sizes = [8, 2], strides = [1, 1]} : vector<8x16xf32> to vector<8x2xf32>
    %185 = vector.extract_strided_slice %150 {offsets = [0, 4], sizes = [8, 2], strides = [1, 1]} : vector<8x16xf32> to vector<8x2xf32>
    %186 = vector.extract_strided_slice %151 {offsets = [0, 4], sizes = [8, 2], strides = [1, 1]} : vector<8x16xf32> to vector<8x2xf32>
    %cst_63 = arith.constant dense<0.000000e+00> : vector<8x8xf32>
    %187 = tpu.matmul %184, %185, %cst_63 {dimension_numbers = #tpu.dot_dimension_numbers<[1], [1], [0], [0], [0, 0, 1, 0], [], []>} : vector<8x2xf32>, vector<8x2xf32>, vector<8x8xf32> -> vector<8x8xf32>
    %cst_64 = arith.constant 0.707106769 : f32
    %188 = vector.broadcast %cst_64 : f32 to vector<8x8xf32>
    %189 = arith.mulf %187, %188 : vector<8x8xf32>
    %cst_65 = arith.constant dense<0xFF800000> : vector<8xf32>
    %190 = vector.multi_reduction <maximumf>, %189, %cst_65 [1] : vector<8x8xf32> to vector<8xf32>
    %191 = vector.shape_cast %190 : vector<8xf32> to vector<8x1xf32>
    %192 = vector.broadcast %191 : vector<8x1xf32> to vector<8x8xf32>
    %193 = arith.subf %189, %192 : vector<8x8xf32>
    %194 = math.exp %193 : vector<8x8xf32>
    %cst_66 = arith.constant dense<0.000000e+00> : vector<8xf32>
    %195 = vector.multi_reduction <add>, %194, %cst_66 [1] : vector<8x8xf32> to vector<8xf32>
    %196 = vector.shape_cast %195 : vector<8xf32> to vector<8x1xf32>
    %197 = vector.broadcast %196 : vector<8x1xf32> to vector<8x8xf32>
    %198 = arith.divf %194, %197 : vector<8x8xf32>
    %cst_67 = arith.constant dense<0.000000e+00> : vector<8x2xf32>
    %199 = tpu.matmul %198, %186, %cst_67 {dimension_numbers = #tpu.dot_dimension_numbers<[1], [0], [0], [1], [0, 0, 1, 1], [], []>} : vector<8x8xf32>, vector<8x2xf32>, vector<8x2xf32> -> vector<8x2xf32>
    %200 = vector.extract_strided_slice %149 {offsets = [0, 6], sizes = [8, 2], strides = [1, 1]} : vector<8x16xf32> to vector<8x2xf32>
    %201 = vector.extract_strided_slice %150 {offsets = [0, 6], sizes = [8, 2], strides = [1, 1]} : vector<8x16xf32> to vector<8x2xf32>
    %202 = vector.extract_strided_slice %151 {offsets = [0, 6], sizes = [8, 2], strides = [1, 1]} : vector<8x16xf32> to vector<8x2xf32>
    %cst_68 = arith.constant dense<0.000000e+00> : vector<8x8xf32>
    %203 = tpu.matmul %200, %201, %cst_68 {dimension_numbers = #tpu.dot_dimension_numbers<[1], [1], [0], [0], [0, 0, 1, 0], [], []>} : vector<8x2xf32>, vector<8x2xf32>, vector<8x8xf32> -> vector<8x8xf32>
    %cst_69 = arith.constant 0.707106769 : f32
    %204 = vector.broadcast %cst_69 : f32 to vector<8x8xf32>
    %205 = arith.mulf %203, %204 : vector<8x8xf32>
    %cst_70 = arith.constant dense<0xFF800000> : vector<8xf32>
    %206 = vector.multi_reduction <maximumf>, %205, %cst_70 [1] : vector<8x8xf32> to vector<8xf32>
    %207 = vector.shape_cast %206 : vector<8xf32> to vector<8x1xf32>
    %208 = vector.broadcast %207 : vector<8x1xf32> to vector<8x8xf32>
    %209 = arith.subf %205, %208 : vector<8x8xf32>
    %210 = math.exp %209 : vector<8x8xf32>
    %cst_71 = arith.constant dense<0.000000e+00> : vector<8xf32>
    %211 = vector.multi_reduction <add>, %210, %cst_71 [1] : vector<8x8xf32> to vector<8xf32>
    %212 = vector.shape_cast %211 : vector<8xf32> to vector<8x1xf32>
    %213 = vector.broadcast %212 : vector<8x1xf32> to vector<8x8xf32>
    %214 = arith.divf %210, %213 : vector<8x8xf32>
    %cst_72 = arith.constant dense<0.000000e+00> : vector<8x2xf32>
    %215 = tpu.matmul %214, %202, %cst_72 {dimension_numbers = #tpu.dot_dimension_numbers<[1], [0], [0], [1], [0, 0, 1, 1], [], []>} : vector<8x8xf32>, vector<8x2xf32>, vector<8x2xf32> -> vector<8x2xf32>
    %216 = vector.extract_strided_slice %149 {offsets = [0, 8], sizes = [8, 2], strides = [1, 1]} : vector<8x16xf32> to vector<8x2xf32>
    %217 = vector.extract_strided_slice %150 {offsets = [0, 8], sizes = [8, 2], strides = [1, 1]} : vector<8x16xf32> to vector<8x2xf32>
    %218 = vector.extract_strided_slice %151 {offsets = [0, 8], sizes = [8, 2], strides = [1, 1]} : vector<8x16xf32> to vector<8x2xf32>
    %cst_73 = arith.constant dense<0.000000e+00> : vector<8x8xf32>
    %219 = tpu.matmul %216, %217, %cst_73 {dimension_numbers = #tpu.dot_dimension_numbers<[1], [1], [0], [0], [0, 0, 1, 0], [], []>} : vector<8x2xf32>, vector<8x2xf32>, vector<8x8xf32> -> vector<8x8xf32>
    %cst_74 = arith.constant 0.707106769 : f32
    %220 = vector.broadcast %cst_74 : f32 to vector<8x8xf32>
    %221 = arith.mulf %219, %220 : vector<8x8xf32>
    %cst_75 = arith.constant dense<0xFF800000> : vector<8xf32>
    %222 = vector.multi_reduction <maximumf>, %221, %cst_75 [1] : vector<8x8xf32> to vector<8xf32>
    %223 = vector.shape_cast %222 : vector<8xf32> to vector<8x1xf32>
    %224 = vector.broadcast %223 : vector<8x1xf32> to vector<8x8xf32>
    %225 = arith.subf %221, %224 : vector<8x8xf32>
    %226 = math.exp %225 : vector<8x8xf32>
    %cst_76 = arith.constant dense<0.000000e+00> : vector<8xf32>
    %227 = vector.multi_reduction <add>, %226, %cst_76 [1] : vector<8x8xf32> to vector<8xf32>
    %228 = vector.shape_cast %227 : vector<8xf32> to vector<8x1xf32>
    %229 = vector.broadcast %228 : vector<8x1xf32> to vector<8x8xf32>
    %230 = arith.divf %226, %229 : vector<8x8xf32>
    %cst_77 = arith.constant dense<0.000000e+00> : vector<8x2xf32>
    %231 = tpu.matmul %230, %218, %cst_77 {dimension_numbers = #tpu.dot_dimension_numbers<[1], [0], [0], [1], [0, 0, 1, 1], [], []>} : vector<8x8xf32>, vector<8x2xf32>, vector<8x2xf32> -> vector<8x2xf32>
    %232 = vector.extract_strided_slice %149 {offsets = [0, 10], sizes = [8, 2], strides = [1, 1]} : vector<8x16xf32> to vector<8x2xf32>
    %233 = vector.extract_strided_slice %150 {offsets = [0, 10], sizes = [8, 2], strides = [1, 1]} : vector<8x16xf32> to vector<8x2xf32>
    %234 = vector.extract_strided_slice %151 {offsets = [0, 10], sizes = [8, 2], strides = [1, 1]} : vector<8x16xf32> to vector<8x2xf32>
    %cst_78 = arith.constant dense<0.000000e+00> : vector<8x8xf32>
    %235 = tpu.matmul %232, %233, %cst_78 {dimension_numbers = #tpu.dot_dimension_numbers<[1], [1], [0], [0], [0, 0, 1, 0], [], []>} : vector<8x2xf32>, vector<8x2xf32>, vector<8x8xf32> -> vector<8x8xf32>
    %cst_79 = arith.constant 0.707106769 : f32
    %236 = vector.broadcast %cst_79 : f32 to vector<8x8xf32>
    %237 = arith.mulf %235, %236 : vector<8x8xf32>
    %cst_80 = arith.constant dense<0xFF800000> : vector<8xf32>
    %238 = vector.multi_reduction <maximumf>, %237, %cst_80 [1] : vector<8x8xf32> to vector<8xf32>
    %239 = vector.shape_cast %238 : vector<8xf32> to vector<8x1xf32>
    %240 = vector.broadcast %239 : vector<8x1xf32> to vector<8x8xf32>
    %241 = arith.subf %237, %240 : vector<8x8xf32>
    %242 = math.exp %241 : vector<8x8xf32>
    %cst_81 = arith.constant dense<0.000000e+00> : vector<8xf32>
    %243 = vector.multi_reduction <add>, %242, %cst_81 [1] : vector<8x8xf32> to vector<8xf32>
    %244 = vector.shape_cast %243 : vector<8xf32> to vector<8x1xf32>
    %245 = vector.broadcast %244 : vector<8x1xf32> to vector<8x8xf32>
    %246 = arith.divf %242, %245 : vector<8x8xf32>
    %cst_82 = arith.constant dense<0.000000e+00> : vector<8x2xf32>
    %247 = tpu.matmul %246, %234, %cst_82 {dimension_numbers = #tpu.dot_dimension_numbers<[1], [0], [0], [1], [0, 0, 1, 1], [], []>} : vector<8x8xf32>, vector<8x2xf32>, vector<8x2xf32> -> vector<8x2xf32>
    %248 = vector.extract_strided_slice %149 {offsets = [0, 12], sizes = [8, 2], strides = [1, 1]} : vector<8x16xf32> to vector<8x2xf32>
    %249 = vector.extract_strided_slice %150 {offsets = [0, 12], sizes = [8, 2], strides = [1, 1]} : vector<8x16xf32> to vector<8x2xf32>
    %250 = vector.extract_strided_slice %151 {offsets = [0, 12], sizes = [8, 2], strides = [1, 1]} : vector<8x16xf32> to vector<8x2xf32>
    %cst_83 = arith.constant dense<0.000000e+00> : vector<8x8xf32>
    %251 = tpu.matmul %248, %249, %cst_83 {dimension_numbers = #tpu.dot_dimension_numbers<[1], [1], [0], [0], [0, 0, 1, 0], [], []>} : vector<8x2xf32>, vector<8x2xf32>, vector<8x8xf32> -> vector<8x8xf32>
    %cst_84 = arith.constant 0.707106769 : f32
    %252 = vector.broadcast %cst_84 : f32 to vector<8x8xf32>
    %253 = arith.mulf %251, %252 : vector<8x8xf32>
    %cst_85 = arith.constant dense<0xFF800000> : vector<8xf32>
    %254 = vector.multi_reduction <maximumf>, %253, %cst_85 [1] : vector<8x8xf32> to vector<8xf32>
    %255 = vector.shape_cast %254 : vector<8xf32> to vector<8x1xf32>
    %256 = vector.broadcast %255 : vector<8x1xf32> to vector<8x8xf32>
    %257 = arith.subf %253, %256 : vector<8x8xf32>
    %258 = math.exp %257 : vector<8x8xf32>
    %cst_86 = arith.constant dense<0.000000e+00> : vector<8xf32>
    %259 = vector.multi_reduction <add>, %258, %cst_86 [1] : vector<8x8xf32> to vector<8xf32>
    %260 = vector.shape_cast %259 : vector<8xf32> to vector<8x1xf32>
    %261 = vector.broadcast %260 : vector<8x1xf32> to vector<8x8xf32>
    %262 = arith.divf %258, %261 : vector<8x8xf32>
    %cst_87 = arith.constant dense<0.000000e+00> : vector<8x2xf32>
    %263 = tpu.matmul %262, %250, %cst_87 {dimension_numbers = #tpu.dot_dimension_numbers<[1], [0], [0], [1], [0, 0, 1, 1], [], []>} : vector<8x8xf32>, vector<8x2xf32>, vector<8x2xf32> -> vector<8x2xf32>
    %264 = vector.extract_strided_slice %149 {offsets = [0, 14], sizes = [8, 2], strides = [1, 1]} : vector<8x16xf32> to vector<8x2xf32>
    %265 = vector.extract_strided_slice %150 {offsets = [0, 14], sizes = [8, 2], strides = [1, 1]} : vector<8x16xf32> to vector<8x2xf32>
    %266 = vector.extract_strided_slice %151 {offsets = [0, 14], sizes = [8, 2], strides = [1, 1]} : vector<8x16xf32> to vector<8x2xf32>
    %cst_88 = arith.constant dense<0.000000e+00> : vector<8x8xf32>
    %267 = tpu.matmul %264, %265, %cst_88 {dimension_numbers = #tpu.dot_dimension_numbers<[1], [1], [0], [0], [0, 0, 1, 0], [], []>} : vector<8x2xf32>, vector<8x2xf32>, vector<8x8xf32> -> vector<8x8xf32>
    %cst_89 = arith.constant 0.707106769 : f32
    %268 = vector.broadcast %cst_89 : f32 to vector<8x8xf32>
    %269 = arith.mulf %267, %268 : vector<8x8xf32>
    %cst_90 = arith.constant dense<0xFF800000> : vector<8xf32>
    %270 = vector.multi_reduction <maximumf>, %269, %cst_90 [1] : vector<8x8xf32> to vector<8xf32>
    %271 = vector.shape_cast %270 : vector<8xf32> to vector<8x1xf32>
    %272 = vector.broadcast %271 : vector<8x1xf32> to vector<8x8xf32>
    %273 = arith.subf %269, %272 : vector<8x8xf32>
    %274 = math.exp %273 : vector<8x8xf32>
    %cst_91 = arith.constant dense<0.000000e+00> : vector<8xf32>
    %275 = vector.multi_reduction <add>, %274, %cst_91 [1] : vector<8x8xf32> to vector<8xf32>
    %276 = vector.shape_cast %275 : vector<8xf32> to vector<8x1xf32>
    %277 = vector.broadcast %276 : vector<8x1xf32> to vector<8x8xf32>
    %278 = arith.divf %274, %277 : vector<8x8xf32>
    %cst_92 = arith.constant dense<0.000000e+00> : vector<8x2xf32>
    %279 = tpu.matmul %278, %266, %cst_92 {dimension_numbers = #tpu.dot_dimension_numbers<[1], [0], [0], [1], [0, 0, 1, 1], [], []>} : vector<8x8xf32>, vector<8x2xf32>, vector<8x2xf32> -> vector<8x2xf32>
    %280 = tpu.concatenate %167, %183, %199, %215, %231, %247, %263, %279 in 1 : vector<8x2xf32>, vector<8x2xf32>, vector<8x2xf32>, vector<8x2xf32>, vector<8x2xf32>, vector<8x2xf32>, vector<8x2xf32>, vector<8x2xf32> -> vector<8x16xf32>
    %281 = tpu.concatenate %148, %280 in 0 : vector<8x16xf32>, vector<8x16xf32> -> vector<16x16xf32>
    %c0_93 = arith.constant 0 : index
    %c0_94 = arith.constant 0 : index
    %c0_95 = arith.constant 0 : index
    %282 = vector.load %arg5[%c0_93, %c0_94, %c0_95] : memref<1x16x16xf32, #tpu.memory_space<vmem>>, vector<1x16x16xf32>
    %283 = vector.shape_cast %282 : vector<1x16x16xf32> to vector<16x16xf32>
    %c0_96 = arith.constant 0 : index
    %c0_97 = arith.constant 0 : index
    %c0_98 = arith.constant 0 : index
    %284 = vector.load %arg6[%c0_96, %c0_97, %c0_98] : memref<1x1x16xf32, #tpu.memory_space<vmem>>, vector<1x1x16xf32>
    %285 = vector.shape_cast %284 : vector<1x1x16xf32> to vector<1x16xf32>
    %cst_99 = arith.constant dense<0.000000e+00> : vector<16x16xf32>
    %286 = tpu.matmul %281, %283, %cst_99 {dimension_numbers = #tpu.dot_dimension_numbers<[1], [0], [0], [1], [0, 0, 1, 1], [], []>} : vector<16x16xf32>, vector<16x16xf32>, vector<16x16xf32> -> vector<16x16xf32>
    %287 = vector.broadcast %285 : vector<1x16xf32> to vector<16x16xf32>
    %288 = arith.addf %286, %287 : vector<16x16xf32>
    %289 = arith.addf %3, %288 : vector<16x16xf32>
    %290 = vector.extract_strided_slice %6 {offsets = [0, 0], sizes = [1, 16], strides = [1, 1]} : vector<6x16xf32> to vector<1x16xf32>
    %291 = vector.extract_strided_slice %6 {offsets = [1, 0], sizes = [1, 16], strides = [1, 1]} : vector<6x16xf32> to vector<1x16xf32>
    %cst_100 = arith.constant dense<0.000000e+00> : vector<16xf32>
    %292 = vector.multi_reduction <add>, %289, %cst_100 [1] : vector<16x16xf32> to vector<16xf32>
    %293 = vector.shape_cast %292 : vector<16xf32> to vector<16x1xf32>
    %cst_101 = arith.constant 1.600000e+01 : f32
    %294 = vector.broadcast %cst_101 : f32 to vector<16x1xf32>
    %295 = arith.divf %293, %294 : vector<16x1xf32>
    %296 = vector.broadcast %295 : vector<16x1xf32> to vector<16x16xf32>
    %297 = arith.subf %289, %296 : vector<16x16xf32>
    %298 = arith.mulf %297, %297 : vector<16x16xf32>
    %cst_102 = arith.constant dense<0.000000e+00> : vector<16xf32>
    %299 = vector.multi_reduction <add>, %298, %cst_102 [1] : vector<16x16xf32> to vector<16xf32>
    %300 = vector.shape_cast %299 : vector<16xf32> to vector<16x1xf32>
    %cst_103 = arith.constant 1.600000e+01 : f32
    %301 = vector.broadcast %cst_103 : f32 to vector<16x1xf32>
    %302 = arith.divf %300, %301 : vector<16x1xf32>
    %303 = vector.broadcast %295 : vector<16x1xf32> to vector<16x16xf32>
    %304 = arith.subf %289, %303 : vector<16x16xf32>
    %cst_104 = arith.constant 9.99999974E-6 : f32
    %305 = vector.broadcast %cst_104 : f32 to vector<16x1xf32>
    %306 = arith.addf %302, %305 : vector<16x1xf32>
    %307 = math.rsqrt %306 : vector<16x1xf32>
    %308 = vector.broadcast %307 : vector<16x1xf32> to vector<16x16xf32>
    %309 = arith.mulf %304, %308 : vector<16x16xf32>
    %310 = vector.broadcast %290 : vector<1x16xf32> to vector<16x16xf32>
    %311 = arith.mulf %309, %310 : vector<16x16xf32>
    %312 = vector.broadcast %291 : vector<1x16xf32> to vector<16x16xf32>
    %313 = arith.addf %311, %312 : vector<16x16xf32>
    %c0_105 = arith.constant 0 : index
    %c0_106 = arith.constant 0 : index
    %c0_107 = arith.constant 0 : index
    %314 = vector.load %arg7[%c0_105, %c0_106, %c0_107] : memref<1x16x16xf32, #tpu.memory_space<vmem>>, vector<1x16x16xf32>
    %315 = vector.shape_cast %314 : vector<1x16x16xf32> to vector<16x16xf32>
    %c0_108 = arith.constant 0 : index
    %c0_109 = arith.constant 0 : index
    %c0_110 = arith.constant 0 : index
    %316 = vector.load %arg8[%c0_108, %c0_109, %c0_110] : memref<1x1x16xf32, #tpu.memory_space<vmem>>, vector<1x1x16xf32>
    %317 = vector.shape_cast %316 : vector<1x1x16xf32> to vector<1x16xf32>
    %cst_111 = arith.constant dense<0.000000e+00> : vector<16x16xf32>
    %318 = tpu.matmul %313, %315, %cst_111 {dimension_numbers = #tpu.dot_dimension_numbers<[1], [0], [0], [1], [0, 0, 1, 1], [], []>} : vector<16x16xf32>, vector<16x16xf32>, vector<16x16xf32> -> vector<16x16xf32>
    %319 = vector.broadcast %317 : vector<1x16xf32> to vector<16x16xf32>
    %320 = arith.addf %318, %319 : vector<16x16xf32>
    %c0_112 = arith.constant 0 : index
    %c0_113 = arith.constant 0 : index
    %c0_114 = arith.constant 0 : index
    %321 = vector.load %arg9[%c0_112, %c0_113, %c0_114] : memref<1x16x32xf32, #tpu.memory_space<vmem>>, vector<1x16x32xf32>
    %322 = vector.shape_cast %321 : vector<1x16x32xf32> to vector<16x32xf32>
    %c0_115 = arith.constant 0 : index
    %c0_116 = arith.constant 0 : index
    %c0_117 = arith.constant 0 : index
    %323 = vector.load %arg10[%c0_115, %c0_116, %c0_117] : memref<1x1x32xf32, #tpu.memory_space<vmem>>, vector<1x1x32xf32>
    %324 = vector.shape_cast %323 : vector<1x1x32xf32> to vector<1x32xf32>
    %cst_118 = arith.constant dense<0.000000e+00> : vector<16x32xf32>
    %325 = tpu.matmul %4, %322, %cst_118 {dimension_numbers = #tpu.dot_dimension_numbers<[1], [0], [0], [1], [0, 0, 1, 1], [], []>} : vector<16x16xf32>, vector<16x32xf32>, vector<16x32xf32> -> vector<16x32xf32>
    %326 = vector.broadcast %324 : vector<1x32xf32> to vector<16x32xf32>
    %327 = arith.addf %325, %326 : vector<16x32xf32>
    %328 = vector.extract_strided_slice %327 {offsets = [0, 0], sizes = [16, 16], strides = [1, 1]} : vector<16x32xf32> to vector<16x16xf32>
    %329 = vector.extract_strided_slice %327 {offsets = [0, 16], sizes = [16, 16], strides = [1, 1]} : vector<16x32xf32> to vector<16x16xf32>
    %330 = vector.extract_strided_slice %320 {offsets = [0, 0], sizes = [8, 16], strides = [1, 1]} : vector<16x16xf32> to vector<8x16xf32>
    %331 = vector.extract_strided_slice %328 {offsets = [0, 0], sizes = [8, 16], strides = [1, 1]} : vector<16x16xf32> to vector<8x16xf32>
    %332 = vector.extract_strided_slice %329 {offsets = [0, 0], sizes = [8, 16], strides = [1, 1]} : vector<16x16xf32> to vector<8x16xf32>
    %333 = vector.extract_strided_slice %330 {offsets = [0, 0], sizes = [8, 2], strides = [1, 1]} : vector<8x16xf32> to vector<8x2xf32>
    %334 = vector.extract_strided_slice %331 {offsets = [0, 0], sizes = [8, 2], strides = [1, 1]} : vector<8x16xf32> to vector<8x2xf32>
    %335 = vector.extract_strided_slice %332 {offsets = [0, 0], sizes = [8, 2], strides = [1, 1]} : vector<8x16xf32> to vector<8x2xf32>
    %cst_119 = arith.constant dense<0.000000e+00> : vector<8x8xf32>
    %336 = tpu.matmul %333, %334, %cst_119 {dimension_numbers = #tpu.dot_dimension_numbers<[1], [1], [0], [0], [0, 0, 1, 0], [], []>} : vector<8x2xf32>, vector<8x2xf32>, vector<8x8xf32> -> vector<8x8xf32>
    %cst_120 = arith.constant 0.707106769 : f32
    %337 = vector.broadcast %cst_120 : f32 to vector<8x8xf32>
    %338 = arith.mulf %336, %337 : vector<8x8xf32>
    %cst_121 = arith.constant dense<0xFF800000> : vector<8xf32>
    %339 = vector.multi_reduction <maximumf>, %338, %cst_121 [1] : vector<8x8xf32> to vector<8xf32>
    %340 = vector.shape_cast %339 : vector<8xf32> to vector<8x1xf32>
    %341 = vector.broadcast %340 : vector<8x1xf32> to vector<8x8xf32>
    %342 = arith.subf %338, %341 : vector<8x8xf32>
    %343 = math.exp %342 : vector<8x8xf32>
    %cst_122 = arith.constant dense<0.000000e+00> : vector<8xf32>
    %344 = vector.multi_reduction <add>, %343, %cst_122 [1] : vector<8x8xf32> to vector<8xf32>
    %345 = vector.shape_cast %344 : vector<8xf32> to vector<8x1xf32>
    %346 = vector.broadcast %345 : vector<8x1xf32> to vector<8x8xf32>
    %347 = arith.divf %343, %346 : vector<8x8xf32>
    %cst_123 = arith.constant dense<0.000000e+00> : vector<8x2xf32>
    %348 = tpu.matmul %347, %335, %cst_123 {dimension_numbers = #tpu.dot_dimension_numbers<[1], [0], [0], [1], [0, 0, 1, 1], [], []>} : vector<8x8xf32>, vector<8x2xf32>, vector<8x2xf32> -> vector<8x2xf32>
    %349 = vector.extract_strided_slice %330 {offsets = [0, 2], sizes = [8, 2], strides = [1, 1]} : vector<8x16xf32> to vector<8x2xf32>
    %350 = vector.extract_strided_slice %331 {offsets = [0, 2], sizes = [8, 2], strides = [1, 1]} : vector<8x16xf32> to vector<8x2xf32>
    %351 = vector.extract_strided_slice %332 {offsets = [0, 2], sizes = [8, 2], strides = [1, 1]} : vector<8x16xf32> to vector<8x2xf32>
    %cst_124 = arith.constant dense<0.000000e+00> : vector<8x8xf32>
    %352 = tpu.matmul %349, %350, %cst_124 {dimension_numbers = #tpu.dot_dimension_numbers<[1], [1], [0], [0], [0, 0, 1, 0], [], []>} : vector<8x2xf32>, vector<8x2xf32>, vector<8x8xf32> -> vector<8x8xf32>
    %cst_125 = arith.constant 0.707106769 : f32
    %353 = vector.broadcast %cst_125 : f32 to vector<8x8xf32>
    %354 = arith.mulf %352, %353 : vector<8x8xf32>
    %cst_126 = arith.constant dense<0xFF800000> : vector<8xf32>
    %355 = vector.multi_reduction <maximumf>, %354, %cst_126 [1] : vector<8x8xf32> to vector<8xf32>
    %356 = vector.shape_cast %355 : vector<8xf32> to vector<8x1xf32>
    %357 = vector.broadcast %356 : vector<8x1xf32> to vector<8x8xf32>
    %358 = arith.subf %354, %357 : vector<8x8xf32>
    %359 = math.exp %358 : vector<8x8xf32>
    %cst_127 = arith.constant dense<0.000000e+00> : vector<8xf32>
    %360 = vector.multi_reduction <add>, %359, %cst_127 [1] : vector<8x8xf32> to vector<8xf32>
    %361 = vector.shape_cast %360 : vector<8xf32> to vector<8x1xf32>
    %362 = vector.broadcast %361 : vector<8x1xf32> to vector<8x8xf32>
    %363 = arith.divf %359, %362 : vector<8x8xf32>
    %cst_128 = arith.constant dense<0.000000e+00> : vector<8x2xf32>
    %364 = tpu.matmul %363, %351, %cst_128 {dimension_numbers = #tpu.dot_dimension_numbers<[1], [0], [0], [1], [0, 0, 1, 1], [], []>} : vector<8x8xf32>, vector<8x2xf32>, vector<8x2xf32> -> vector<8x2xf32>
    %365 = vector.extract_strided_slice %330 {offsets = [0, 4], sizes = [8, 2], strides = [1, 1]} : vector<8x16xf32> to vector<8x2xf32>
    %366 = vector.extract_strided_slice %331 {offsets = [0, 4], sizes = [8, 2], strides = [1, 1]} : vector<8x16xf32> to vector<8x2xf32>
    %367 = vector.extract_strided_slice %332 {offsets = [0, 4], sizes = [8, 2], strides = [1, 1]} : vector<8x16xf32> to vector<8x2xf32>
    %cst_129 = arith.constant dense<0.000000e+00> : vector<8x8xf32>
    %368 = tpu.matmul %365, %366, %cst_129 {dimension_numbers = #tpu.dot_dimension_numbers<[1], [1], [0], [0], [0, 0, 1, 0], [], []>} : vector<8x2xf32>, vector<8x2xf32>, vector<8x8xf32> -> vector<8x8xf32>
    %cst_130 = arith.constant 0.707106769 : f32
    %369 = vector.broadcast %cst_130 : f32 to vector<8x8xf32>
    %370 = arith.mulf %368, %369 : vector<8x8xf32>
    %cst_131 = arith.constant dense<0xFF800000> : vector<8xf32>
    %371 = vector.multi_reduction <maximumf>, %370, %cst_131 [1] : vector<8x8xf32> to vector<8xf32>
    %372 = vector.shape_cast %371 : vector<8xf32> to vector<8x1xf32>
    %373 = vector.broadcast %372 : vector<8x1xf32> to vector<8x8xf32>
    %374 = arith.subf %370, %373 : vector<8x8xf32>
    %375 = math.exp %374 : vector<8x8xf32>
    %cst_132 = arith.constant dense<0.000000e+00> : vector<8xf32>
    %376 = vector.multi_reduction <add>, %375, %cst_132 [1] : vector<8x8xf32> to vector<8xf32>
    %377 = vector.shape_cast %376 : vector<8xf32> to vector<8x1xf32>
    %378 = vector.broadcast %377 : vector<8x1xf32> to vector<8x8xf32>
    %379 = arith.divf %375, %378 : vector<8x8xf32>
    %cst_133 = arith.constant dense<0.000000e+00> : vector<8x2xf32>
    %380 = tpu.matmul %379, %367, %cst_133 {dimension_numbers = #tpu.dot_dimension_numbers<[1], [0], [0], [1], [0, 0, 1, 1], [], []>} : vector<8x8xf32>, vector<8x2xf32>, vector<8x2xf32> -> vector<8x2xf32>
    %381 = vector.extract_strided_slice %330 {offsets = [0, 6], sizes = [8, 2], strides = [1, 1]} : vector<8x16xf32> to vector<8x2xf32>
    %382 = vector.extract_strided_slice %331 {offsets = [0, 6], sizes = [8, 2], strides = [1, 1]} : vector<8x16xf32> to vector<8x2xf32>
    %383 = vector.extract_strided_slice %332 {offsets = [0, 6], sizes = [8, 2], strides = [1, 1]} : vector<8x16xf32> to vector<8x2xf32>
    %cst_134 = arith.constant dense<0.000000e+00> : vector<8x8xf32>
    %384 = tpu.matmul %381, %382, %cst_134 {dimension_numbers = #tpu.dot_dimension_numbers<[1], [1], [0], [0], [0, 0, 1, 0], [], []>} : vector<8x2xf32>, vector<8x2xf32>, vector<8x8xf32> -> vector<8x8xf32>
    %cst_135 = arith.constant 0.707106769 : f32
    %385 = vector.broadcast %cst_135 : f32 to vector<8x8xf32>
    %386 = arith.mulf %384, %385 : vector<8x8xf32>
    %cst_136 = arith.constant dense<0xFF800000> : vector<8xf32>
    %387 = vector.multi_reduction <maximumf>, %386, %cst_136 [1] : vector<8x8xf32> to vector<8xf32>
    %388 = vector.shape_cast %387 : vector<8xf32> to vector<8x1xf32>
    %389 = vector.broadcast %388 : vector<8x1xf32> to vector<8x8xf32>
    %390 = arith.subf %386, %389 : vector<8x8xf32>
    %391 = math.exp %390 : vector<8x8xf32>
    %cst_137 = arith.constant dense<0.000000e+00> : vector<8xf32>
    %392 = vector.multi_reduction <add>, %391, %cst_137 [1] : vector<8x8xf32> to vector<8xf32>
    %393 = vector.shape_cast %392 : vector<8xf32> to vector<8x1xf32>
    %394 = vector.broadcast %393 : vector<8x1xf32> to vector<8x8xf32>
    %395 = arith.divf %391, %394 : vector<8x8xf32>
    %cst_138 = arith.constant dense<0.000000e+00> : vector<8x2xf32>
    %396 = tpu.matmul %395, %383, %cst_138 {dimension_numbers = #tpu.dot_dimension_numbers<[1], [0], [0], [1], [0, 0, 1, 1], [], []>} : vector<8x8xf32>, vector<8x2xf32>, vector<8x2xf32> -> vector<8x2xf32>
    %397 = vector.extract_strided_slice %330 {offsets = [0, 8], sizes = [8, 2], strides = [1, 1]} : vector<8x16xf32> to vector<8x2xf32>
    %398 = vector.extract_strided_slice %331 {offsets = [0, 8], sizes = [8, 2], strides = [1, 1]} : vector<8x16xf32> to vector<8x2xf32>
    %399 = vector.extract_strided_slice %332 {offsets = [0, 8], sizes = [8, 2], strides = [1, 1]} : vector<8x16xf32> to vector<8x2xf32>
    %cst_139 = arith.constant dense<0.000000e+00> : vector<8x8xf32>
    %400 = tpu.matmul %397, %398, %cst_139 {dimension_numbers = #tpu.dot_dimension_numbers<[1], [1], [0], [0], [0, 0, 1, 0], [], []>} : vector<8x2xf32>, vector<8x2xf32>, vector<8x8xf32> -> vector<8x8xf32>
    %cst_140 = arith.constant 0.707106769 : f32
    %401 = vector.broadcast %cst_140 : f32 to vector<8x8xf32>
    %402 = arith.mulf %400, %401 : vector<8x8xf32>
    %cst_141 = arith.constant dense<0xFF800000> : vector<8xf32>
    %403 = vector.multi_reduction <maximumf>, %402, %cst_141 [1] : vector<8x8xf32> to vector<8xf32>
    %404 = vector.shape_cast %403 : vector<8xf32> to vector<8x1xf32>
    %405 = vector.broadcast %404 : vector<8x1xf32> to vector<8x8xf32>
    %406 = arith.subf %402, %405 : vector<8x8xf32>
    %407 = math.exp %406 : vector<8x8xf32>
    %cst_142 = arith.constant dense<0.000000e+00> : vector<8xf32>
    %408 = vector.multi_reduction <add>, %407, %cst_142 [1] : vector<8x8xf32> to vector<8xf32>
    %409 = vector.shape_cast %408 : vector<8xf32> to vector<8x1xf32>
    %410 = vector.broadcast %409 : vector<8x1xf32> to vector<8x8xf32>
    %411 = arith.divf %407, %410 : vector<8x8xf32>
    %cst_143 = arith.constant dense<0.000000e+00> : vector<8x2xf32>
    %412 = tpu.matmul %411, %399, %cst_143 {dimension_numbers = #tpu.dot_dimension_numbers<[1], [0], [0], [1], [0, 0, 1, 1], [], []>} : vector<8x8xf32>, vector<8x2xf32>, vector<8x2xf32> -> vector<8x2xf32>
    %413 = vector.extract_strided_slice %330 {offsets = [0, 10], sizes = [8, 2], strides = [1, 1]} : vector<8x16xf32> to vector<8x2xf32>
    %414 = vector.extract_strided_slice %331 {offsets = [0, 10], sizes = [8, 2], strides = [1, 1]} : vector<8x16xf32> to vector<8x2xf32>
    %415 = vector.extract_strided_slice %332 {offsets = [0, 10], sizes = [8, 2], strides = [1, 1]} : vector<8x16xf32> to vector<8x2xf32>
    %cst_144 = arith.constant dense<0.000000e+00> : vector<8x8xf32>
    %416 = tpu.matmul %413, %414, %cst_144 {dimension_numbers = #tpu.dot_dimension_numbers<[1], [1], [0], [0], [0, 0, 1, 0], [], []>} : vector<8x2xf32>, vector<8x2xf32>, vector<8x8xf32> -> vector<8x8xf32>
    %cst_145 = arith.constant 0.707106769 : f32
    %417 = vector.broadcast %cst_145 : f32 to vector<8x8xf32>
    %418 = arith.mulf %416, %417 : vector<8x8xf32>
    %cst_146 = arith.constant dense<0xFF800000> : vector<8xf32>
    %419 = vector.multi_reduction <maximumf>, %418, %cst_146 [1] : vector<8x8xf32> to vector<8xf32>
    %420 = vector.shape_cast %419 : vector<8xf32> to vector<8x1xf32>
    %421 = vector.broadcast %420 : vector<8x1xf32> to vector<8x8xf32>
    %422 = arith.subf %418, %421 : vector<8x8xf32>
    %423 = math.exp %422 : vector<8x8xf32>
    %cst_147 = arith.constant dense<0.000000e+00> : vector<8xf32>
    %424 = vector.multi_reduction <add>, %423, %cst_147 [1] : vector<8x8xf32> to vector<8xf32>
    %425 = vector.shape_cast %424 : vector<8xf32> to vector<8x1xf32>
    %426 = vector.broadcast %425 : vector<8x1xf32> to vector<8x8xf32>
    %427 = arith.divf %423, %426 : vector<8x8xf32>
    %cst_148 = arith.constant dense<0.000000e+00> : vector<8x2xf32>
    %428 = tpu.matmul %427, %415, %cst_148 {dimension_numbers = #tpu.dot_dimension_numbers<[1], [0], [0], [1], [0, 0, 1, 1], [], []>} : vector<8x8xf32>, vector<8x2xf32>, vector<8x2xf32> -> vector<8x2xf32>
    %429 = vector.extract_strided_slice %330 {offsets = [0, 12], sizes = [8, 2], strides = [1, 1]} : vector<8x16xf32> to vector<8x2xf32>
    %430 = vector.extract_strided_slice %331 {offsets = [0, 12], sizes = [8, 2], strides = [1, 1]} : vector<8x16xf32> to vector<8x2xf32>
    %431 = vector.extract_strided_slice %332 {offsets = [0, 12], sizes = [8, 2], strides = [1, 1]} : vector<8x16xf32> to vector<8x2xf32>
    %cst_149 = arith.constant dense<0.000000e+00> : vector<8x8xf32>
    %432 = tpu.matmul %429, %430, %cst_149 {dimension_numbers = #tpu.dot_dimension_numbers<[1], [1], [0], [0], [0, 0, 1, 0], [], []>} : vector<8x2xf32>, vector<8x2xf32>, vector<8x8xf32> -> vector<8x8xf32>
    %cst_150 = arith.constant 0.707106769 : f32
    %433 = vector.broadcast %cst_150 : f32 to vector<8x8xf32>
    %434 = arith.mulf %432, %433 : vector<8x8xf32>
    %cst_151 = arith.constant dense<0xFF800000> : vector<8xf32>
    %435 = vector.multi_reduction <maximumf>, %434, %cst_151 [1] : vector<8x8xf32> to vector<8xf32>
    %436 = vector.shape_cast %435 : vector<8xf32> to vector<8x1xf32>
    %437 = vector.broadcast %436 : vector<8x1xf32> to vector<8x8xf32>
    %438 = arith.subf %434, %437 : vector<8x8xf32>
    %439 = math.exp %438 : vector<8x8xf32>
    %cst_152 = arith.constant dense<0.000000e+00> : vector<8xf32>
    %440 = vector.multi_reduction <add>, %439, %cst_152 [1] : vector<8x8xf32> to vector<8xf32>
    %441 = vector.shape_cast %440 : vector<8xf32> to vector<8x1xf32>
    %442 = vector.broadcast %441 : vector<8x1xf32> to vector<8x8xf32>
    %443 = arith.divf %439, %442 : vector<8x8xf32>
    %cst_153 = arith.constant dense<0.000000e+00> : vector<8x2xf32>
    %444 = tpu.matmul %443, %431, %cst_153 {dimension_numbers = #tpu.dot_dimension_numbers<[1], [0], [0], [1], [0, 0, 1, 1], [], []>} : vector<8x8xf32>, vector<8x2xf32>, vector<8x2xf32> -> vector<8x2xf32>
    %445 = vector.extract_strided_slice %330 {offsets = [0, 14], sizes = [8, 2], strides = [1, 1]} : vector<8x16xf32> to vector<8x2xf32>
    %446 = vector.extract_strided_slice %331 {offsets = [0, 14], sizes = [8, 2], strides = [1, 1]} : vector<8x16xf32> to vector<8x2xf32>
    %447 = vector.extract_strided_slice %332 {offsets = [0, 14], sizes = [8, 2], strides = [1, 1]} : vector<8x16xf32> to vector<8x2xf32>
    %cst_154 = arith.constant dense<0.000000e+00> : vector<8x8xf32>
    %448 = tpu.matmul %445, %446, %cst_154 {dimension_numbers = #tpu.dot_dimension_numbers<[1], [1], [0], [0], [0, 0, 1, 0], [], []>} : vector<8x2xf32>, vector<8x2xf32>, vector<8x8xf32> -> vector<8x8xf32>
    %cst_155 = arith.constant 0.707106769 : f32
    %449 = vector.broadcast %cst_155 : f32 to vector<8x8xf32>
    %450 = arith.mulf %448, %449 : vector<8x8xf32>
    %cst_156 = arith.constant dense<0xFF800000> : vector<8xf32>
    %451 = vector.multi_reduction <maximumf>, %450, %cst_156 [1] : vector<8x8xf32> to vector<8xf32>
    %452 = vector.shape_cast %451 : vector<8xf32> to vector<8x1xf32>
    %453 = vector.broadcast %452 : vector<8x1xf32> to vector<8x8xf32>
    %454 = arith.subf %450, %453 : vector<8x8xf32>
    %455 = math.exp %454 : vector<8x8xf32>
    %cst_157 = arith.constant dense<0.000000e+00> : vector<8xf32>
    %456 = vector.multi_reduction <add>, %455, %cst_157 [1] : vector<8x8xf32> to vector<8xf32>
    %457 = vector.shape_cast %456 : vector<8xf32> to vector<8x1xf32>
    %458 = vector.broadcast %457 : vector<8x1xf32> to vector<8x8xf32>
    %459 = arith.divf %455, %458 : vector<8x8xf32>
    %cst_158 = arith.constant dense<0.000000e+00> : vector<8x2xf32>
    %460 = tpu.matmul %459, %447, %cst_158 {dimension_numbers = #tpu.dot_dimension_numbers<[1], [0], [0], [1], [0, 0, 1, 1], [], []>} : vector<8x8xf32>, vector<8x2xf32>, vector<8x2xf32> -> vector<8x2xf32>
    %461 = tpu.concatenate %348, %364, %380, %396, %412, %428, %444, %460 in 1 : vector<8x2xf32>, vector<8x2xf32>, vector<8x2xf32>, vector<8x2xf32>, vector<8x2xf32>, vector<8x2xf32>, vector<8x2xf32>, vector<8x2xf32> -> vector<8x16xf32>
    %462 = vector.extract_strided_slice %320 {offsets = [8, 0], sizes = [8, 16], strides = [1, 1]} : vector<16x16xf32> to vector<8x16xf32>
    %463 = vector.extract_strided_slice %328 {offsets = [8, 0], sizes = [8, 16], strides = [1, 1]} : vector<16x16xf32> to vector<8x16xf32>
    %464 = vector.extract_strided_slice %329 {offsets = [8, 0], sizes = [8, 16], strides = [1, 1]} : vector<16x16xf32> to vector<8x16xf32>
    %465 = vector.extract_strided_slice %462 {offsets = [0, 0], sizes = [8, 2], strides = [1, 1]} : vector<8x16xf32> to vector<8x2xf32>
    %466 = vector.extract_strided_slice %463 {offsets = [0, 0], sizes = [8, 2], strides = [1, 1]} : vector<8x16xf32> to vector<8x2xf32>
    %467 = vector.extract_strided_slice %464 {offsets = [0, 0], sizes = [8, 2], strides = [1, 1]} : vector<8x16xf32> to vector<8x2xf32>
    %cst_159 = arith.constant dense<0.000000e+00> : vector<8x8xf32>
    %468 = tpu.matmul %465, %466, %cst_159 {dimension_numbers = #tpu.dot_dimension_numbers<[1], [1], [0], [0], [0, 0, 1, 0], [], []>} : vector<8x2xf32>, vector<8x2xf32>, vector<8x8xf32> -> vector<8x8xf32>
    %cst_160 = arith.constant 0.707106769 : f32
    %469 = vector.broadcast %cst_160 : f32 to vector<8x8xf32>
    %470 = arith.mulf %468, %469 : vector<8x8xf32>
    %cst_161 = arith.constant dense<0xFF800000> : vector<8xf32>
    %471 = vector.multi_reduction <maximumf>, %470, %cst_161 [1] : vector<8x8xf32> to vector<8xf32>
    %472 = vector.shape_cast %471 : vector<8xf32> to vector<8x1xf32>
    %473 = vector.broadcast %472 : vector<8x1xf32> to vector<8x8xf32>
    %474 = arith.subf %470, %473 : vector<8x8xf32>
    %475 = math.exp %474 : vector<8x8xf32>
    %cst_162 = arith.constant dense<0.000000e+00> : vector<8xf32>
    %476 = vector.multi_reduction <add>, %475, %cst_162 [1] : vector<8x8xf32> to vector<8xf32>
    %477 = vector.shape_cast %476 : vector<8xf32> to vector<8x1xf32>
    %478 = vector.broadcast %477 : vector<8x1xf32> to vector<8x8xf32>
    %479 = arith.divf %475, %478 : vector<8x8xf32>
    %cst_163 = arith.constant dense<0.000000e+00> : vector<8x2xf32>
    %480 = tpu.matmul %479, %467, %cst_163 {dimension_numbers = #tpu.dot_dimension_numbers<[1], [0], [0], [1], [0, 0, 1, 1], [], []>} : vector<8x8xf32>, vector<8x2xf32>, vector<8x2xf32> -> vector<8x2xf32>
    %481 = vector.extract_strided_slice %462 {offsets = [0, 2], sizes = [8, 2], strides = [1, 1]} : vector<8x16xf32> to vector<8x2xf32>
    %482 = vector.extract_strided_slice %463 {offsets = [0, 2], sizes = [8, 2], strides = [1, 1]} : vector<8x16xf32> to vector<8x2xf32>
    %483 = vector.extract_strided_slice %464 {offsets = [0, 2], sizes = [8, 2], strides = [1, 1]} : vector<8x16xf32> to vector<8x2xf32>
    %cst_164 = arith.constant dense<0.000000e+00> : vector<8x8xf32>
    %484 = tpu.matmul %481, %482, %cst_164 {dimension_numbers = #tpu.dot_dimension_numbers<[1], [1], [0], [0], [0, 0, 1, 0], [], []>} : vector<8x2xf32>, vector<8x2xf32>, vector<8x8xf32> -> vector<8x8xf32>
    %cst_165 = arith.constant 0.707106769 : f32
    %485 = vector.broadcast %cst_165 : f32 to vector<8x8xf32>
    %486 = arith.mulf %484, %485 : vector<8x8xf32>
    %cst_166 = arith.constant dense<0xFF800000> : vector<8xf32>
    %487 = vector.multi_reduction <maximumf>, %486, %cst_166 [1] : vector<8x8xf32> to vector<8xf32>
    %488 = vector.shape_cast %487 : vector<8xf32> to vector<8x1xf32>
    %489 = vector.broadcast %488 : vector<8x1xf32> to vector<8x8xf32>
    %490 = arith.subf %486, %489 : vector<8x8xf32>
    %491 = math.exp %490 : vector<8x8xf32>
    %cst_167 = arith.constant dense<0.000000e+00> : vector<8xf32>
    %492 = vector.multi_reduction <add>, %491, %cst_167 [1] : vector<8x8xf32> to vector<8xf32>
    %493 = vector.shape_cast %492 : vector<8xf32> to vector<8x1xf32>
    %494 = vector.broadcast %493 : vector<8x1xf32> to vector<8x8xf32>
    %495 = arith.divf %491, %494 : vector<8x8xf32>
    %cst_168 = arith.constant dense<0.000000e+00> : vector<8x2xf32>
    %496 = tpu.matmul %495, %483, %cst_168 {dimension_numbers = #tpu.dot_dimension_numbers<[1], [0], [0], [1], [0, 0, 1, 1], [], []>} : vector<8x8xf32>, vector<8x2xf32>, vector<8x2xf32> -> vector<8x2xf32>
    %497 = vector.extract_strided_slice %462 {offsets = [0, 4], sizes = [8, 2], strides = [1, 1]} : vector<8x16xf32> to vector<8x2xf32>
    %498 = vector.extract_strided_slice %463 {offsets = [0, 4], sizes = [8, 2], strides = [1, 1]} : vector<8x16xf32> to vector<8x2xf32>
    %499 = vector.extract_strided_slice %464 {offsets = [0, 4], sizes = [8, 2], strides = [1, 1]} : vector<8x16xf32> to vector<8x2xf32>
    %cst_169 = arith.constant dense<0.000000e+00> : vector<8x8xf32>
    %500 = tpu.matmul %497, %498, %cst_169 {dimension_numbers = #tpu.dot_dimension_numbers<[1], [1], [0], [0], [0, 0, 1, 0], [], []>} : vector<8x2xf32>, vector<8x2xf32>, vector<8x8xf32> -> vector<8x8xf32>
    %cst_170 = arith.constant 0.707106769 : f32
    %501 = vector.broadcast %cst_170 : f32 to vector<8x8xf32>
    %502 = arith.mulf %500, %501 : vector<8x8xf32>
    %cst_171 = arith.constant dense<0xFF800000> : vector<8xf32>
    %503 = vector.multi_reduction <maximumf>, %502, %cst_171 [1] : vector<8x8xf32> to vector<8xf32>
    %504 = vector.shape_cast %503 : vector<8xf32> to vector<8x1xf32>
    %505 = vector.broadcast %504 : vector<8x1xf32> to vector<8x8xf32>
    %506 = arith.subf %502, %505 : vector<8x8xf32>
    %507 = math.exp %506 : vector<8x8xf32>
    %cst_172 = arith.constant dense<0.000000e+00> : vector<8xf32>
    %508 = vector.multi_reduction <add>, %507, %cst_172 [1] : vector<8x8xf32> to vector<8xf32>
    %509 = vector.shape_cast %508 : vector<8xf32> to vector<8x1xf32>
    %510 = vector.broadcast %509 : vector<8x1xf32> to vector<8x8xf32>
    %511 = arith.divf %507, %510 : vector<8x8xf32>
    %cst_173 = arith.constant dense<0.000000e+00> : vector<8x2xf32>
    %512 = tpu.matmul %511, %499, %cst_173 {dimension_numbers = #tpu.dot_dimension_numbers<[1], [0], [0], [1], [0, 0, 1, 1], [], []>} : vector<8x8xf32>, vector<8x2xf32>, vector<8x2xf32> -> vector<8x2xf32>
    %513 = vector.extract_strided_slice %462 {offsets = [0, 6], sizes = [8, 2], strides = [1, 1]} : vector<8x16xf32> to vector<8x2xf32>
    %514 = vector.extract_strided_slice %463 {offsets = [0, 6], sizes = [8, 2], strides = [1, 1]} : vector<8x16xf32> to vector<8x2xf32>
    %515 = vector.extract_strided_slice %464 {offsets = [0, 6], sizes = [8, 2], strides = [1, 1]} : vector<8x16xf32> to vector<8x2xf32>
    %cst_174 = arith.constant dense<0.000000e+00> : vector<8x8xf32>
    %516 = tpu.matmul %513, %514, %cst_174 {dimension_numbers = #tpu.dot_dimension_numbers<[1], [1], [0], [0], [0, 0, 1, 0], [], []>} : vector<8x2xf32>, vector<8x2xf32>, vector<8x8xf32> -> vector<8x8xf32>
    %cst_175 = arith.constant 0.707106769 : f32
    %517 = vector.broadcast %cst_175 : f32 to vector<8x8xf32>
    %518 = arith.mulf %516, %517 : vector<8x8xf32>
    %cst_176 = arith.constant dense<0xFF800000> : vector<8xf32>
    %519 = vector.multi_reduction <maximumf>, %518, %cst_176 [1] : vector<8x8xf32> to vector<8xf32>
    %520 = vector.shape_cast %519 : vector<8xf32> to vector<8x1xf32>
    %521 = vector.broadcast %520 : vector<8x1xf32> to vector<8x8xf32>
    %522 = arith.subf %518, %521 : vector<8x8xf32>
    %523 = math.exp %522 : vector<8x8xf32>
    %cst_177 = arith.constant dense<0.000000e+00> : vector<8xf32>
    %524 = vector.multi_reduction <add>, %523, %cst_177 [1] : vector<8x8xf32> to vector<8xf32>
    %525 = vector.shape_cast %524 : vector<8xf32> to vector<8x1xf32>
    %526 = vector.broadcast %525 : vector<8x1xf32> to vector<8x8xf32>
    %527 = arith.divf %523, %526 : vector<8x8xf32>
    %cst_178 = arith.constant dense<0.000000e+00> : vector<8x2xf32>
    %528 = tpu.matmul %527, %515, %cst_178 {dimension_numbers = #tpu.dot_dimension_numbers<[1], [0], [0], [1], [0, 0, 1, 1], [], []>} : vector<8x8xf32>, vector<8x2xf32>, vector<8x2xf32> -> vector<8x2xf32>
    %529 = vector.extract_strided_slice %462 {offsets = [0, 8], sizes = [8, 2], strides = [1, 1]} : vector<8x16xf32> to vector<8x2xf32>
    %530 = vector.extract_strided_slice %463 {offsets = [0, 8], sizes = [8, 2], strides = [1, 1]} : vector<8x16xf32> to vector<8x2xf32>
    %531 = vector.extract_strided_slice %464 {offsets = [0, 8], sizes = [8, 2], strides = [1, 1]} : vector<8x16xf32> to vector<8x2xf32>
    %cst_179 = arith.constant dense<0.000000e+00> : vector<8x8xf32>
    %532 = tpu.matmul %529, %530, %cst_179 {dimension_numbers = #tpu.dot_dimension_numbers<[1], [1], [0], [0], [0, 0, 1, 0], [], []>} : vector<8x2xf32>, vector<8x2xf32>, vector<8x8xf32> -> vector<8x8xf32>
    %cst_180 = arith.constant 0.707106769 : f32
    %533 = vector.broadcast %cst_180 : f32 to vector<8x8xf32>
    %534 = arith.mulf %532, %533 : vector<8x8xf32>
    %cst_181 = arith.constant dense<0xFF800000> : vector<8xf32>
    %535 = vector.multi_reduction <maximumf>, %534, %cst_181 [1] : vector<8x8xf32> to vector<8xf32>
    %536 = vector.shape_cast %535 : vector<8xf32> to vector<8x1xf32>
    %537 = vector.broadcast %536 : vector<8x1xf32> to vector<8x8xf32>
    %538 = arith.subf %534, %537 : vector<8x8xf32>
    %539 = math.exp %538 : vector<8x8xf32>
    %cst_182 = arith.constant dense<0.000000e+00> : vector<8xf32>
    %540 = vector.multi_reduction <add>, %539, %cst_182 [1] : vector<8x8xf32> to vector<8xf32>
    %541 = vector.shape_cast %540 : vector<8xf32> to vector<8x1xf32>
    %542 = vector.broadcast %541 : vector<8x1xf32> to vector<8x8xf32>
    %543 = arith.divf %539, %542 : vector<8x8xf32>
    %cst_183 = arith.constant dense<0.000000e+00> : vector<8x2xf32>
    %544 = tpu.matmul %543, %531, %cst_183 {dimension_numbers = #tpu.dot_dimension_numbers<[1], [0], [0], [1], [0, 0, 1, 1], [], []>} : vector<8x8xf32>, vector<8x2xf32>, vector<8x2xf32> -> vector<8x2xf32>
    %545 = vector.extract_strided_slice %462 {offsets = [0, 10], sizes = [8, 2], strides = [1, 1]} : vector<8x16xf32> to vector<8x2xf32>
    %546 = vector.extract_strided_slice %463 {offsets = [0, 10], sizes = [8, 2], strides = [1, 1]} : vector<8x16xf32> to vector<8x2xf32>
    %547 = vector.extract_strided_slice %464 {offsets = [0, 10], sizes = [8, 2], strides = [1, 1]} : vector<8x16xf32> to vector<8x2xf32>
    %cst_184 = arith.constant dense<0.000000e+00> : vector<8x8xf32>
    %548 = tpu.matmul %545, %546, %cst_184 {dimension_numbers = #tpu.dot_dimension_numbers<[1], [1], [0], [0], [0, 0, 1, 0], [], []>} : vector<8x2xf32>, vector<8x2xf32>, vector<8x8xf32> -> vector<8x8xf32>
    %cst_185 = arith.constant 0.707106769 : f32
    %549 = vector.broadcast %cst_185 : f32 to vector<8x8xf32>
    %550 = arith.mulf %548, %549 : vector<8x8xf32>
    %cst_186 = arith.constant dense<0xFF800000> : vector<8xf32>
    %551 = vector.multi_reduction <maximumf>, %550, %cst_186 [1] : vector<8x8xf32> to vector<8xf32>
    %552 = vector.shape_cast %551 : vector<8xf32> to vector<8x1xf32>
    %553 = vector.broadcast %552 : vector<8x1xf32> to vector<8x8xf32>
    %554 = arith.subf %550, %553 : vector<8x8xf32>
    %555 = math.exp %554 : vector<8x8xf32>
    %cst_187 = arith.constant dense<0.000000e+00> : vector<8xf32>
    %556 = vector.multi_reduction <add>, %555, %cst_187 [1] : vector<8x8xf32> to vector<8xf32>
    %557 = vector.shape_cast %556 : vector<8xf32> to vector<8x1xf32>
    %558 = vector.broadcast %557 : vector<8x1xf32> to vector<8x8xf32>
    %559 = arith.divf %555, %558 : vector<8x8xf32>
    %cst_188 = arith.constant dense<0.000000e+00> : vector<8x2xf32>
    %560 = tpu.matmul %559, %547, %cst_188 {dimension_numbers = #tpu.dot_dimension_numbers<[1], [0], [0], [1], [0, 0, 1, 1], [], []>} : vector<8x8xf32>, vector<8x2xf32>, vector<8x2xf32> -> vector<8x2xf32>
    %561 = vector.extract_strided_slice %462 {offsets = [0, 12], sizes = [8, 2], strides = [1, 1]} : vector<8x16xf32> to vector<8x2xf32>
    %562 = vector.extract_strided_slice %463 {offsets = [0, 12], sizes = [8, 2], strides = [1, 1]} : vector<8x16xf32> to vector<8x2xf32>
    %563 = vector.extract_strided_slice %464 {offsets = [0, 12], sizes = [8, 2], strides = [1, 1]} : vector<8x16xf32> to vector<8x2xf32>
    %cst_189 = arith.constant dense<0.000000e+00> : vector<8x8xf32>
    %564 = tpu.matmul %561, %562, %cst_189 {dimension_numbers = #tpu.dot_dimension_numbers<[1], [1], [0], [0], [0, 0, 1, 0], [], []>} : vector<8x2xf32>, vector<8x2xf32>, vector<8x8xf32> -> vector<8x8xf32>
    %cst_190 = arith.constant 0.707106769 : f32
    %565 = vector.broadcast %cst_190 : f32 to vector<8x8xf32>
    %566 = arith.mulf %564, %565 : vector<8x8xf32>
    %cst_191 = arith.constant dense<0xFF800000> : vector<8xf32>
    %567 = vector.multi_reduction <maximumf>, %566, %cst_191 [1] : vector<8x8xf32> to vector<8xf32>
    %568 = vector.shape_cast %567 : vector<8xf32> to vector<8x1xf32>
    %569 = vector.broadcast %568 : vector<8x1xf32> to vector<8x8xf32>
    %570 = arith.subf %566, %569 : vector<8x8xf32>
    %571 = math.exp %570 : vector<8x8xf32>
    %cst_192 = arith.constant dense<0.000000e+00> : vector<8xf32>
    %572 = vector.multi_reduction <add>, %571, %cst_192 [1] : vector<8x8xf32> to vector<8xf32>
    %573 = vector.shape_cast %572 : vector<8xf32> to vector<8x1xf32>
    %574 = vector.broadcast %573 : vector<8x1xf32> to vector<8x8xf32>
    %575 = arith.divf %571, %574 : vector<8x8xf32>
    %cst_193 = arith.constant dense<0.000000e+00> : vector<8x2xf32>
    %576 = tpu.matmul %575, %563, %cst_193 {dimension_numbers = #tpu.dot_dimension_numbers<[1], [0], [0], [1], [0, 0, 1, 1], [], []>} : vector<8x8xf32>, vector<8x2xf32>, vector<8x2xf32> -> vector<8x2xf32>
    %577 = vector.extract_strided_slice %462 {offsets = [0, 14], sizes = [8, 2], strides = [1, 1]} : vector<8x16xf32> to vector<8x2xf32>
    %578 = vector.extract_strided_slice %463 {offsets = [0, 14], sizes = [8, 2], strides = [1, 1]} : vector<8x16xf32> to vector<8x2xf32>
    %579 = vector.extract_strided_slice %464 {offsets = [0, 14], sizes = [8, 2], strides = [1, 1]} : vector<8x16xf32> to vector<8x2xf32>
    %cst_194 = arith.constant dense<0.000000e+00> : vector<8x8xf32>
    %580 = tpu.matmul %577, %578, %cst_194 {dimension_numbers = #tpu.dot_dimension_numbers<[1], [1], [0], [0], [0, 0, 1, 0], [], []>} : vector<8x2xf32>, vector<8x2xf32>, vector<8x8xf32> -> vector<8x8xf32>
    %cst_195 = arith.constant 0.707106769 : f32
    %581 = vector.broadcast %cst_195 : f32 to vector<8x8xf32>
    %582 = arith.mulf %580, %581 : vector<8x8xf32>
    %cst_196 = arith.constant dense<0xFF800000> : vector<8xf32>
    %583 = vector.multi_reduction <maximumf>, %582, %cst_196 [1] : vector<8x8xf32> to vector<8xf32>
    %584 = vector.shape_cast %583 : vector<8xf32> to vector<8x1xf32>
    %585 = vector.broadcast %584 : vector<8x1xf32> to vector<8x8xf32>
    %586 = arith.subf %582, %585 : vector<8x8xf32>
    %587 = math.exp %586 : vector<8x8xf32>
    %cst_197 = arith.constant dense<0.000000e+00> : vector<8xf32>
    %588 = vector.multi_reduction <add>, %587, %cst_197 [1] : vector<8x8xf32> to vector<8xf32>
    %589 = vector.shape_cast %588 : vector<8xf32> to vector<8x1xf32>
    %590 = vector.broadcast %589 : vector<8x1xf32> to vector<8x8xf32>
    %591 = arith.divf %587, %590 : vector<8x8xf32>
    %cst_198 = arith.constant dense<0.000000e+00> : vector<8x2xf32>
    %592 = tpu.matmul %591, %579, %cst_198 {dimension_numbers = #tpu.dot_dimension_numbers<[1], [0], [0], [1], [0, 0, 1, 1], [], []>} : vector<8x8xf32>, vector<8x2xf32>, vector<8x2xf32> -> vector<8x2xf32>
    %593 = tpu.concatenate %480, %496, %512, %528, %544, %560, %576, %592 in 1 : vector<8x2xf32>, vector<8x2xf32>, vector<8x2xf32>, vector<8x2xf32>, vector<8x2xf32>, vector<8x2xf32>, vector<8x2xf32>, vector<8x2xf32> -> vector<8x16xf32>
    %594 = tpu.concatenate %461, %593 in 0 : vector<8x16xf32>, vector<8x16xf32> -> vector<16x16xf32>
    %c0_199 = arith.constant 0 : index
    %c0_200 = arith.constant 0 : index
    %c0_201 = arith.constant 0 : index
    %595 = vector.load %arg11[%c0_199, %c0_200, %c0_201] : memref<1x16x16xf32, #tpu.memory_space<vmem>>, vector<1x16x16xf32>
    %596 = vector.shape_cast %595 : vector<1x16x16xf32> to vector<16x16xf32>
    %c0_202 = arith.constant 0 : index
    %c0_203 = arith.constant 0 : index
    %c0_204 = arith.constant 0 : index
    %597 = vector.load %arg12[%c0_202, %c0_203, %c0_204] : memref<1x1x16xf32, #tpu.memory_space<vmem>>, vector<1x1x16xf32>
    %598 = vector.shape_cast %597 : vector<1x1x16xf32> to vector<1x16xf32>
    %cst_205 = arith.constant dense<0.000000e+00> : vector<16x16xf32>
    %599 = tpu.matmul %594, %596, %cst_205 {dimension_numbers = #tpu.dot_dimension_numbers<[1], [0], [0], [1], [0, 0, 1, 1], [], []>} : vector<16x16xf32>, vector<16x16xf32>, vector<16x16xf32> -> vector<16x16xf32>
    %600 = vector.broadcast %598 : vector<1x16xf32> to vector<16x16xf32>
    %601 = arith.addf %599, %600 : vector<16x16xf32>
    %602 = arith.addf %313, %601 : vector<16x16xf32>
    %603 = vector.extract_strided_slice %6 {offsets = [2, 0], sizes = [1, 16], strides = [1, 1]} : vector<6x16xf32> to vector<1x16xf32>
    %604 = vector.extract_strided_slice %6 {offsets = [3, 0], sizes = [1, 16], strides = [1, 1]} : vector<6x16xf32> to vector<1x16xf32>
    %cst_206 = arith.constant dense<0.000000e+00> : vector<16xf32>
    %605 = vector.multi_reduction <add>, %602, %cst_206 [1] : vector<16x16xf32> to vector<16xf32>
    %606 = vector.shape_cast %605 : vector<16xf32> to vector<16x1xf32>
    %cst_207 = arith.constant 1.600000e+01 : f32
    %607 = vector.broadcast %cst_207 : f32 to vector<16x1xf32>
    %608 = arith.divf %606, %607 : vector<16x1xf32>
    %609 = vector.broadcast %608 : vector<16x1xf32> to vector<16x16xf32>
    %610 = arith.subf %602, %609 : vector<16x16xf32>
    %611 = arith.mulf %610, %610 : vector<16x16xf32>
    %cst_208 = arith.constant dense<0.000000e+00> : vector<16xf32>
    %612 = vector.multi_reduction <add>, %611, %cst_208 [1] : vector<16x16xf32> to vector<16xf32>
    %613 = vector.shape_cast %612 : vector<16xf32> to vector<16x1xf32>
    %cst_209 = arith.constant 1.600000e+01 : f32
    %614 = vector.broadcast %cst_209 : f32 to vector<16x1xf32>
    %615 = arith.divf %613, %614 : vector<16x1xf32>
    %616 = vector.broadcast %608 : vector<16x1xf32> to vector<16x16xf32>
    %617 = arith.subf %602, %616 : vector<16x16xf32>
    %cst_210 = arith.constant 9.99999974E-6 : f32
    %618 = vector.broadcast %cst_210 : f32 to vector<16x1xf32>
    %619 = arith.addf %615, %618 : vector<16x1xf32>
    %620 = math.rsqrt %619 : vector<16x1xf32>
    %621 = vector.broadcast %620 : vector<16x1xf32> to vector<16x16xf32>
    %622 = arith.mulf %617, %621 : vector<16x16xf32>
    %623 = vector.broadcast %603 : vector<1x16xf32> to vector<16x16xf32>
    %624 = arith.mulf %622, %623 : vector<16x16xf32>
    %625 = vector.broadcast %604 : vector<1x16xf32> to vector<16x16xf32>
    %626 = arith.addf %624, %625 : vector<16x16xf32>
    %c0_211 = arith.constant 0 : index
    %c0_212 = arith.constant 0 : index
    %c0_213 = arith.constant 0 : index
    %627 = vector.load %arg13[%c0_211, %c0_212, %c0_213] : memref<1x16x64xf32, #tpu.memory_space<vmem>>, vector<1x16x64xf32>
    %628 = vector.shape_cast %627 : vector<1x16x64xf32> to vector<16x64xf32>
    %c0_214 = arith.constant 0 : index
    %c0_215 = arith.constant 0 : index
    %c0_216 = arith.constant 0 : index
    %629 = vector.load %arg14[%c0_214, %c0_215, %c0_216] : memref<1x1x64xf32, #tpu.memory_space<vmem>>, vector<1x1x64xf32>
    %630 = vector.shape_cast %629 : vector<1x1x64xf32> to vector<1x64xf32>
    %cst_217 = arith.constant dense<0.000000e+00> : vector<16x64xf32>
    %631 = tpu.matmul %626, %628, %cst_217 {dimension_numbers = #tpu.dot_dimension_numbers<[1], [0], [0], [1], [0, 0, 1, 1], [], []>} : vector<16x16xf32>, vector<16x64xf32>, vector<16x64xf32> -> vector<16x64xf32>
    %632 = vector.broadcast %630 : vector<1x64xf32> to vector<16x64xf32>
    %633 = arith.addf %631, %632 : vector<16x64xf32>
    %cst_218 = arith.constant 0.000000e+00 : f32
    %634 = vector.broadcast %cst_218 : f32 to vector<16x64xf32>
    %635 = arith.maximumf %633, %634 : vector<16x64xf32>
    %c0_219 = arith.constant 0 : index
    %c0_220 = arith.constant 0 : index
    %c0_221 = arith.constant 0 : index
    %636 = vector.load %arg15[%c0_219, %c0_220, %c0_221] : memref<1x64x16xf32, #tpu.memory_space<vmem>>, vector<1x64x16xf32>
    %637 = vector.shape_cast %636 : vector<1x64x16xf32> to vector<64x16xf32>
    %c0_222 = arith.constant 0 : index
    %c0_223 = arith.constant 0 : index
    %c0_224 = arith.constant 0 : index
    %638 = vector.load %arg16[%c0_222, %c0_223, %c0_224] : memref<1x1x16xf32, #tpu.memory_space<vmem>>, vector<1x1x16xf32>
    %639 = vector.shape_cast %638 : vector<1x1x16xf32> to vector<1x16xf32>
    %cst_225 = arith.constant dense<0.000000e+00> : vector<16x16xf32>
    %640 = tpu.matmul %635, %637, %cst_225 {dimension_numbers = #tpu.dot_dimension_numbers<[1], [0], [0], [1], [0, 0, 1, 1], [], []>} : vector<16x64xf32>, vector<64x16xf32>, vector<16x16xf32> -> vector<16x16xf32>
    %641 = vector.broadcast %639 : vector<1x16xf32> to vector<16x16xf32>
    %642 = arith.addf %640, %641 : vector<16x16xf32>
    %643 = arith.addf %626, %642 : vector<16x16xf32>
    %644 = vector.extract_strided_slice %6 {offsets = [4, 0], sizes = [1, 16], strides = [1, 1]} : vector<6x16xf32> to vector<1x16xf32>
    %645 = vector.extract_strided_slice %6 {offsets = [5, 0], sizes = [1, 16], strides = [1, 1]} : vector<6x16xf32> to vector<1x16xf32>
    %cst_226 = arith.constant dense<0.000000e+00> : vector<16xf32>
    %646 = vector.multi_reduction <add>, %643, %cst_226 [1] : vector<16x16xf32> to vector<16xf32>
    %647 = vector.shape_cast %646 : vector<16xf32> to vector<16x1xf32>
    %cst_227 = arith.constant 1.600000e+01 : f32
    %648 = vector.broadcast %cst_227 : f32 to vector<16x1xf32>
    %649 = arith.divf %647, %648 : vector<16x1xf32>
    %650 = vector.broadcast %649 : vector<16x1xf32> to vector<16x16xf32>
    %651 = arith.subf %643, %650 : vector<16x16xf32>
    %652 = arith.mulf %651, %651 : vector<16x16xf32>
    %cst_228 = arith.constant dense<0.000000e+00> : vector<16xf32>
    %653 = vector.multi_reduction <add>, %652, %cst_228 [1] : vector<16x16xf32> to vector<16xf32>
    %654 = vector.shape_cast %653 : vector<16xf32> to vector<16x1xf32>
    %cst_229 = arith.constant 1.600000e+01 : f32
    %655 = vector.broadcast %cst_229 : f32 to vector<16x1xf32>
    %656 = arith.divf %654, %655 : vector<16x1xf32>
    %657 = vector.broadcast %649 : vector<16x1xf32> to vector<16x16xf32>
    %658 = arith.subf %643, %657 : vector<16x16xf32>
    %cst_230 = arith.constant 9.99999974E-6 : f32
    %659 = vector.broadcast %cst_230 : f32 to vector<16x1xf32>
    %660 = arith.addf %656, %659 : vector<16x1xf32>
    %661 = math.rsqrt %660 : vector<16x1xf32>
    %662 = vector.broadcast %661 : vector<16x1xf32> to vector<16x16xf32>
    %663 = arith.mulf %658, %662 : vector<16x16xf32>
    %664 = vector.broadcast %644 : vector<1x16xf32> to vector<16x16xf32>
    %665 = arith.mulf %663, %664 : vector<16x16xf32>
    %666 = vector.broadcast %645 : vector<1x16xf32> to vector<16x16xf32>
    %667 = arith.addf %665, %666 : vector<16x16xf32>
    %c0_231 = arith.constant 0 : index
    %c0_232 = arith.constant 0 : index
    %668 = vector.load %arg22[%c0_231, %c0_232] : memref<16x16xf32, #tpu.memory_space<vmem>>, vector<16x16xf32>
    tpu.vector_store %arg22[%c0_231, %c0_232], %667 {strides = array<i32>} : memref<16x16xf32, #tpu.memory_space<vmem>>, vector<16x16xf32>,
    %c5_i32 = arith.constant 5 : i32
    %669 = arith.cmpi eq, %arg0, %c5_i32 : i32
    %670 = arith.extui %669 : i1 to i32
    %c0_i32_233 = arith.constant 0 : i32
    %671 = arith.cmpi ne, %670, %c0_i32_233 : i32
    scf.if %671 {
      %c0_234 = arith.constant 0 : index
      %c0_235 = arith.constant 0 : index
      %672 = vector.load %arg18[%c0_234, %c0_235] : memref<2x16xf32, #tpu.memory_space<vmem>>, vector<1x16xf32>
      %c1 = arith.constant 1 : index
      %c0_236 = arith.constant 0 : index
      %673 = vector.load %arg18[%c1, %c0_236] : memref<2x16xf32, #tpu.memory_space<vmem>>, vector<1x16xf32>
      %cst_237 = arith.constant dense<0.000000e+00> : vector<16xf32>
      %674 = vector.multi_reduction <add>, %667, %cst_237 [1] : vector<16x16xf32> to vector<16xf32>
      %675 = vector.shape_cast %674 : vector<16xf32> to vector<16x1xf32>
      %cst_238 = arith.constant 1.600000e+01 : f32
      %676 = vector.broadcast %cst_238 : f32 to vector<16x1xf32>
      %677 = arith.divf %675, %676 : vector<16x1xf32>
      %678 = vector.broadcast %677 : vector<16x1xf32> to vector<16x16xf32>
      %679 = arith.subf %667, %678 : vector<16x16xf32>
      %680 = arith.mulf %679, %679 : vector<16x16xf32>
      %cst_239 = arith.constant dense<0.000000e+00> : vector<16xf32>
      %681 = vector.multi_reduction <add>, %680, %cst_239 [1] : vector<16x16xf32> to vector<16xf32>
      %682 = vector.shape_cast %681 : vector<16xf32> to vector<16x1xf32>
      %cst_240 = arith.constant 1.600000e+01 : f32
      %683 = vector.broadcast %cst_240 : f32 to vector<16x1xf32>
      %684 = arith.divf %682, %683 : vector<16x1xf32>
      %685 = vector.broadcast %677 : vector<16x1xf32> to vector<16x16xf32>
      %686 = arith.subf %667, %685 : vector<16x16xf32>
      %cst_241 = arith.constant 9.99999974E-6 : f32
      %687 = vector.broadcast %cst_241 : f32 to vector<16x1xf32>
      %688 = arith.addf %684, %687 : vector<16x1xf32>
      %689 = math.rsqrt %688 : vector<16x1xf32>
      %690 = vector.broadcast %689 : vector<16x1xf32> to vector<16x16xf32>
      %691 = arith.mulf %686, %690 : vector<16x16xf32>
      %692 = vector.broadcast %672 : vector<1x16xf32> to vector<16x16xf32>
      %693 = arith.mulf %691, %692 : vector<16x16xf32>
      %694 = vector.broadcast %673 : vector<1x16xf32> to vector<16x16xf32>
      %695 = arith.addf %693, %694 : vector<16x16xf32>
      %c0_242 = arith.constant 0 : index
      %c0_243 = arith.constant 0 : index
      %696 = vector.load %arg19[%c0_242, %c0_243] : memref<16x128xf32, #tpu.memory_space<vmem>>, vector<16x128xf32>
      %c0_244 = arith.constant 0 : index
      %c0_245 = arith.constant 0 : index
      %697 = vector.load %arg20[%c0_244, %c0_245] : memref<1x128xf32, #tpu.memory_space<vmem>>, vector<1x128xf32>
      %cst_246 = arith.constant dense<0.000000e+00> : vector<16x128xf32>
      %698 = tpu.matmul %695, %696, %cst_246 {dimension_numbers = #tpu.dot_dimension_numbers<[1], [0], [0], [1], [0, 0, 1, 1], [], []>} : vector<16x16xf32>, vector<16x128xf32>, vector<16x128xf32> -> vector<16x128xf32>
      %699 = vector.broadcast %697 : vector<1x128xf32> to vector<16x128xf32>
      %700 = arith.addf %698, %699 : vector<16x128xf32>
      %c0_247 = arith.constant 0 : index
      %c0_248 = arith.constant 0 : index
      %701 = vector.load %arg21[%c0_247, %c0_248] : memref<16x128xf32, #tpu.memory_space<vmem>>, vector<16x128xf32>
      tpu.vector_store %arg21[%c0_247, %c0_248], %700 {strides = array<i32>} : memref<16x128xf32, #tpu.memory_space<vmem>>, vector<16x128xf32>,
    } else {
    }
    return
  }
  func.func @transform_0(%arg0: i32) -> (i32, i32) {
    %c0_i32 = arith.constant 0 : i32
    %c0_i32_0 = arith.constant 0 : i32
    %c0_i32_1 = arith.constant 0 : i32
    return %c0_i32, %c0_i32_0 : i32, i32
  }
  func.func @transform_1(%arg0: i32) -> (i32, i32) {
    %c0_i32 = arith.constant 0 : i32
    %c0_i32_0 = arith.constant 0 : i32
    %c0_i32_1 = arith.constant 0 : i32
    return %c0_i32, %c0_i32_0 : i32, i32
  }
  func.func @transform_2(%arg0: i32) -> (i32, i32, i32) {
    %c0_i32 = arith.constant 0 : i32
    %c0_i32_0 = arith.constant 0 : i32
    %c0_i32_1 = arith.constant 0 : i32
    return %arg0, %c0_i32, %c0_i32_0 : i32, i32, i32
  }
  func.func @transform_3(%arg0: i32) -> (i32, i32, i32) {
    %c0_i32 = arith.constant 0 : i32
    %c0_i32_0 = arith.constant 0 : i32
    %c0_i32_1 = arith.constant 0 : i32
    return %arg0, %c0_i32, %c0_i32_0 : i32, i32, i32
  }
  func.func @transform_4(%arg0: i32) -> (i32, i32, i32) {
    %c0_i32 = arith.constant 0 : i32
    %c0_i32_0 = arith.constant 0 : i32
    %c0_i32_1 = arith.constant 0 : i32
    return %arg0, %c0_i32, %c0_i32_0 : i32, i32, i32
  }
  func.func @transform_5(%arg0: i32) -> (i32, i32, i32) {
    %c0_i32 = arith.constant 0 : i32
    %c0_i32_0 = arith.constant 0 : i32
    %c0_i32_1 = arith.constant 0 : i32
    return %arg0, %c0_i32, %c0_i32_0 : i32, i32, i32
  }
  func.func @transform_6(%arg0: i32) -> (i32, i32, i32) {
    %c0_i32 = arith.constant 0 : i32
    %c0_i32_0 = arith.constant 0 : i32
    %c0_i32_1 = arith.constant 0 : i32
    return %arg0, %c0_i32, %c0_i32_0 : i32, i32, i32
  }
  func.func @transform_7(%arg0: i32) -> (i32, i32, i32) {
    %c0_i32 = arith.constant 0 : i32
    %c0_i32_0 = arith.constant 0 : i32
    %c0_i32_1 = arith.constant 0 : i32
    return %arg0, %c0_i32, %c0_i32_0 : i32, i32, i32
  }
  func.func @transform_8(%arg0: i32) -> (i32, i32, i32) {
    %c0_i32 = arith.constant 0 : i32
    %c0_i32_0 = arith.constant 0 : i32
    %c0_i32_1 = arith.constant 0 : i32
    return %arg0, %c0_i32, %c0_i32_0 : i32, i32, i32
  }
  func.func @transform_9(%arg0: i32) -> (i32, i32, i32) {
    %c0_i32 = arith.constant 0 : i32
    %c0_i32_0 = arith.constant 0 : i32
    %c0_i32_1 = arith.constant 0 : i32
    return %arg0, %c0_i32, %c0_i32_0 : i32, i32, i32
  }
  func.func @transform_10(%arg0: i32) -> (i32, i32, i32) {
    %c0_i32 = arith.constant 0 : i32
    %c0_i32_0 = arith.constant 0 : i32
    %c0_i32_1 = arith.constant 0 : i32
    return %arg0, %c0_i32, %c0_i32_0 : i32, i32, i32
  }
  func.func @transform_11(%arg0: i32) -> (i32, i32, i32) {
    %c0_i32 = arith.constant 0 : i32
    %c0_i32_0 = arith.constant 0 : i32
    %c0_i32_1 = arith.constant 0 : i32
    return %arg0, %c0_i32, %c0_i32_0 : i32, i32, i32
  }
  func.func @transform_12(%arg0: i32) -> (i32, i32, i32) {
    %c0_i32 = arith.constant 0 : i32
    %c0_i32_0 = arith.constant 0 : i32
    %c0_i32_1 = arith.constant 0 : i32
    return %arg0, %c0_i32, %c0_i32_0 : i32, i32, i32
  }
  func.func @transform_13(%arg0: i32) -> (i32, i32, i32) {
    %c0_i32 = arith.constant 0 : i32
    %c0_i32_0 = arith.constant 0 : i32
    %c0_i32_1 = arith.constant 0 : i32
    return %arg0, %c0_i32, %c0_i32_0 : i32, i32, i32
  }
  func.func @transform_14(%arg0: i32) -> (i32, i32, i32) {
    %c0_i32 = arith.constant 0 : i32
    %c0_i32_0 = arith.constant 0 : i32
    %c0_i32_1 = arith.constant 0 : i32
    return %arg0, %c0_i32, %c0_i32_0 : i32, i32, i32
  }
  func.func @transform_15(%arg0: i32) -> (i32, i32, i32) {
    %c0_i32 = arith.constant 0 : i32
    %c0_i32_0 = arith.constant 0 : i32
    %c0_i32_1 = arith.constant 0 : i32
    return %arg0, %c0_i32, %c0_i32_0 : i32, i32, i32
  }
  func.func @transform_16(%arg0: i32) -> (i32, i32, i32) {
    %c0_i32 = arith.constant 0 : i32
    %c0_i32_0 = arith.constant 0 : i32
    %c0_i32_1 = arith.constant 0 : i32
    return %arg0, %c0_i32, %c0_i32_0 : i32, i32, i32
  }
  func.func @transform_17(%arg0: i32) -> (i32, i32) {
    %c0_i32 = arith.constant 0 : i32
    %c0_i32_0 = arith.constant 0 : i32
    %c0_i32_1 = arith.constant 0 : i32
    return %c0_i32, %c0_i32_0 : i32, i32
  }
  func.func @transform_18(%arg0: i32) -> (i32, i32) {
    %c0_i32 = arith.constant 0 : i32
    %c0_i32_0 = arith.constant 0 : i32
    %c0_i32_1 = arith.constant 0 : i32
    return %c0_i32, %c0_i32_0 : i32, i32
  }
  func.func @transform_19(%arg0: i32) -> (i32, i32) {
    %c0_i32 = arith.constant 0 : i32
    %c0_i32_0 = arith.constant 0 : i32
    %c0_i32_1 = arith.constant 0 : i32
    return %c0_i32, %c0_i32_0 : i32, i32
  }
  func.func @transform_20(%arg0: i32) -> (i32, i32) {
    %c0_i32 = arith.constant 0 : i32
    %c0_i32_0 = arith.constant 0 : i32
    %c0_i32_1 = arith.constant 0 : i32
    return %c0_i32, %c0_i32_0 : i32, i32
  }
}

</mosaic_0001>

<bundles_post_ra>
// kernel: transformer_forward.2
= control target key start
LH: loop header
LB: loop body
LE: loop exit
PB: predicated region body
PF: predicated region fallthrough
CT: control target
= control target key end

     0   :  { %s4476_s17 = smov 0   ;;  %s5072_s0 = inlined_call_operand.vmem [shape: f32[16,16], index: 0, kind: input, shape index: {}]   ;;  %s5073_s1 = inlined_call_operand.vmem [shape: f32[6,16,48], index: 1, kind: input, shape index: {}]   ;;  %s5074_s2 = inlined_call_operand.vmem [shape: f32[6,1,48], index: 2, kind: input, shape index: {}]   ;;  %s5075_s3 = inlined_call_operand.vmem [shape: f32[6,16,16], index: 3, kind: input, shape index: {}]   ;;  %s5076_s4 = inlined_call_operand.vmem [shape: f32[6,1,16], index: 4, kind: input, shape index: {}]   ;;  %s5077_s5 = inlined_call_operand.vmem [shape: f32[6,16,64], index: 5, kind: input, shape index: {}]   ;;  %s5078_s6 = inlined_call_operand.vmem [shape: f32[6,1,64], index: 6, kind: input, shape index: {}]   ;;  %s5079_s7 = inlined_call_operand.vmem [shape: f32[6,64,16], index: 7, kind: input, shape index: {}]   ;;  %s5080_s8 = inlined_call_operand.vmem [shape: f32[6,1,16], index: 8, kind: input, shape index: {}]   ;;  %s5081_s9 = inlined_call_operand.vmem [shape: f32[6,4,16], index: 9, kind: input, shape index: {}]   ;;  %s5082_s10 = inlined_call_operand.vmem [shape: f32[2,16], index: 10, kind: input, shape index: {}]   ;;  %s5083_s11 = inlined_call_operand.vmem [shape: f32[16,16], index: 11, kind: output, shape index: {}]  }
   0x1   :  { %5085 = sst [smem:[#allocation3_spill]] %s5073_s1 }
   0x2   :  { %5086 = sst [smem:[#allocation4_spill]] %s5075_s3 }
   0x3 LB: > { %5087 = sst [smem:[#allocation2_spill]] %s4382_s17  ;;  %s4482_s18 = sadd.s32 4294967295, %s4382_s17   ;;  %s4382_s17 = sphi %s4476_s17, %s21_s17  }
   0x4   : > { %p3864_p0 = scmp.ge.s32.totalorder %s4382_s17, 1  ;;  %p403_p1 = scmp.lt.s32.totalorder %s4382_s17, 7 }
   0x6   : > { %p404_p2 = pnand %p3864_p0, %p403_p1 }
   0x7   : > { %p469_p3 = scmp.lt.s32.totalorder (!%p404_p2), %s4482_s18, 5  ;;  %s5088_s1 = sld [smem:[#allocation3_spill]] (!%p404_p2) }
   0x8   : > { %407 = sbr.rel (%p404_p2) target bundleno = 2953 (0xb89), region = 64  ;;  %s5089_s3 = sld [smem:[#allocation4_spill]] (!%p404_p2) }
   0x9   : > { %p3874_p4 = scmp.ne.s32.totalorder (!%p404_p2), %s4482_s18, 0 }
   0xf   : > { %s4488_s19 = scalar_select %p469_p3, %s4482_s18, 5 }
  0x10   : > { %508 = sbr.rel (%p3874_p4) target bundleno = 23 (0x17), region = 68  ;;  %v509_v0 = vld [vmem:[%s5072_s0] sm:$0xff] (!%p3874_p4)  ;;  %vm513_vm0 = vcmask (!%p3874_p4), 130048   ;;  %v510_v1 = vld [vmem:[%s5072_s0 + $0x8] sm:$0xff] (!%p3874_p4) }
  0x11   : > { %s3940_s20 = sshll.u32 %s4488_s19, 4  ;;  %s3943_s24 = sshll.u32 %s4488_s19, 6  ;;  %v511_v2 = vmul.f32 (!%p3874_p4), 4.0, %v509_v0  ;;  %v512_v3 = vmul.f32 (!%p3874_p4), 4.0, %v510_v1 }
  0x12   : > { %s473_s26 = scalar_lea.vmem %s5088_s1, %s3940_s20  ;;  %s4501_s29 = scalar_lea.vmem %s5089_s3, %s3940_s20 }
  0x13   : > { %s4510_s16 = scalar_lea.vmem %s5077_s5, %s3940_s20  ;;  %s4520_s27 = scalar_lea.vmem %s5079_s7, %s3943_s24  ;;  %514 = vst.msk [vmem:[%s5083_s11] sm:$0xff] (!%p3874_p4), %vm513_vm0, %v511_v2  ;;  %515 = vst.msk [vmem:[%s5083_s11 + $0x8] sm:$0xff] (!%p3874_p4), %vm513_vm0, %v512_v3 }
  0x14   : > { %s3873_s12 = sshll.u32 %s4488_s19, 2 }
  0x15   : > { %s4530_s20 = scalar_lea.vmem %s5081_s9, %s3873_s12 }
  0x17 PF: > { %v519_v4 = vld [vmem:[%s473_s26] sm:$0xff]  ;;  %v520_v5 = vld [vmem:[%s473_s26 + $0x8] sm:$0xff]  ;;  %vm528_vm1 = vcmask 130048   ;;  %v4384_v9 = vmov 0.0   ;;  %vm4385_vm2 = vmmov 0   ;;  %s5090_s15 = scalar_lea.vmem %s5074_s2, %s4488_s19  ;;  %s4386_s1 = smov 126  }
  0x18   : > { %v4230_v7 = vpack.c.bf16 %v520_v5, %v519_v4  ;;  %4047 = vmatprep.subr.mxu1 %v4384_v9  ;;  %4049 = vmatprep.mubr.msk.f32.mxu1 %vm4385_vm2, %v4384_v9  ;;  %v3875_v10 = vld [vmem:[%s5090_s15] ss:$0 sm:$0xff]  ;;  %s4387_s21 = smov 112   ;;  %s4388_s3 = smov 108   ;;  %vm613_vm3 = vcmask 15360   ;;  %vm689_vm4 = vcmask 64512  }
  0x19   : > { %s4389_s22 = smov 110   ;;  %s4390_s17 = smov 106   ;;  %vm1968_vm5 = vcmask 31744   ;;  %vm1970_vm6 = vcmask 48128   ;;  %vm1973_vm7 = vcmask 80896   ;;  %vm1975_vm8 = vcmask 97280  }
  0x1a   : > { %v516_v6 = vld [vmem:[%s5083_s11] sm:$0xff]  ;;  %4231 = vmatprep.subr.bf16.mxu0 %v4230_v7  ;;  %v517_v8 = vld [vmem:[%s5083_s11 + $0x8] sm:$0xff]  ;;  %s4391_s13 = smov 124   ;;  %s4392_s24 = smov 104   ;;  %vm1977_vm9 = vcmask 113664   ;;  %vm3579_vm10 = vcmask 523264  }
  0x1b   : > { %4034 = vmatprep.mubr.msk.f32.mxu0 %vm528_vm1, %v516_v6  ;;  %4233 = vmatpush3.bf16.msra.mxu0 %v4230_v7  ;;  %s4393_s25 = smov 122   ;;  %s4394_s28 = smov 102  }
  0x1c   : > { %4037 = vmatprep.subr.mxu0 %v4384_v9  ;;  %s4395_s12 = smov 120   ;;  %s4396_s26 = smov 100  }
  0x1d   : > { %s4397_s14 = smov 118   ;;  %s4398_s15 = smov 98  }
  0x1e   : > { %4035 = vmatmul.mubr.msk.f32.vlgmr.msra.gmra.mrb[0].mxu0 %vm528_vm1, %v517_v8  ;;  %s4399_s30 = smov 116   ;;  %s4400_s23 = smov 114  }
  0x1f   : > { %4039 = vmatprep.mubr.msk.f32.mxu0 %vm4385_vm2, %v4384_v9  ;;  %p3935_p5 = scmp.ne.s32.totalorder %s4482_s18, 5 }
  0xf1   : > { %v4036_v11 = vpop.f32.mrb[0].mxu0 }
  0xf2   : > { %v601_v12 = vpop.f32.mrb[1].mxu0  ;;  %v4582_v14 = vadd.f32 %v4036_v11, %v3875_v10 }
  0xf3   : > { %v4564_v13 = vadd.f32 %v3875_v10, %v601_v12 }
  0xf5   : > { %777 = vrot.lane.b32.xlu1 %v4564_v13, %s4386_s1  ;;  %611 = vrot.lane.b32.xlu0 %v4564_v13, %s4387_s21 }
  0xf9   : > { %945 = vrot.lane.b32.xlu1 %v4564_v13, %s4388_s3  ;;  %779 = vrot.lane.b32.xlu0 %v4564_v13, %s4389_s22 }
  0xfd   : > { %1111 = vrot.lane.b32.xlu1 %v4564_v13, %s4390_s17  ;;  %943 = vrot.lane.b32.xlu0 %v4564_v13, %s4391_s13 }
 0x101   : > { %1277 = vrot.lane.b32.xlu1 %v4564_v13, %s4392_s24  ;;  %1109 = vrot.lane.b32.xlu0 %v4564_v13, %s4393_s25 }
 0x105   : > { %1443 = vrot.lane.b32.xlu1 %v4564_v13, %s4394_s28  ;;  %1275 = vrot.lane.b32.xlu0 %v4564_v13, %s4395_s12 }
 0x109   : > { %1609 = vrot.lane.b32.xlu1 %v4564_v13, %s4396_s26  ;;  %1441 = vrot.lane.b32.xlu0 %v4564_v13, %s4397_s14 }
 0x10d   : > { %1775 = vrot.lane.b32.xlu1 %v4564_v13, %s4398_s15  ;;  %1607 = vrot.lane.b32.xlu0 %v4564_v13, %s4399_s30 }
 0x111   : > { %1980 = vrot.lane.b32.xlu1 %v4582_v14, %s4387_s21  ;;  %1773 = vrot.lane.b32.xlu0 %v4564_v13, %s4400_s23  ;;  %s4402_s21 = smov 96  }
 0x115   : > { %2144 = vrot.lane.b32.xlu1 %v4582_v14, %s4386_s1  ;;  %2146 = vrot.lane.b32.xlu0 %v4582_v14, %s4389_s22  ;;  %s4401_s1 = smov 94   ;;  %s4404_s22 = smov 90  }
 0x119   : > { %2310 = vrot.lane.b32.xlu1 %v4582_v14, %s4391_s13  ;;  %2312 = vrot.lane.b32.xlu0 %v4582_v14, %s4388_s3  ;;  %s4403_s3 = smov 92   ;;  %s4408_s13 = smov 82  }
 0x11d   : > { %2476 = vrot.lane.b32.xlu1 %v4582_v14, %s4393_s25  ;;  %2478 = vrot.lane.b32.xlu0 %v4582_v14, %s4390_s17  ;;  %s4407_s17 = smov 86   ;;  %s4410_s25 = smov 4  }
 0x121   : > { %2642 = vrot.lane.b32.xlu1 %v4582_v14, %s4395_s12  ;;  %2644 = vrot.lane.b32.xlu0 %v4582_v14, %s4392_s24  ;;  %s4409_s24 = smov 2   ;;  %s4412_s12 = smov 8  }
 0x125   : > { %2808 = vrot.lane.b32.xlu1 %v4582_v14, %s4397_s14  ;;  %2810 = vrot.lane.b32.xlu0 %v4582_v14, %s4394_s28  ;;  %s4411_s28 = smov 6   ;;  %s4414_s14 = smov 12  }
 0x129   : > { %2974 = vrot.lane.b32.xlu1 %v4582_v14, %s4399_s30  ;;  %2976 = vrot.lane.b32.xlu0 %v4582_v14, %s4396_s26  ;;  %s4405_s30 = smov 88   ;;  %s4413_s26 = smov 10  }
 0x12d   : > { %3140 = vrot.lane.b32.xlu1 %v4582_v14, %s4400_s23  ;;  %3142 = vrot.lane.b32.xlu0 %v4582_v14, %s4398_s15  ;;  %s4406_s23 = smov 84   ;;  %s4415_s15 = smov 14  }
 0x131   : > { %867 = vrot.lane.b32.xlu1 %v4564_v13, %s4401_s1  ;;  %701 = vrot.lane.b32.xlu0 %v4564_v13, %s4402_s21 }
 0x135   : > { %1033 = vrot.lane.b32.xlu1 %v4564_v13, %s4403_s3  ;;  %1199 = vrot.lane.b32.xlu0 %v4564_v13, %s4404_s22 }
 0x139   : > { %1365 = vrot.lane.b32.xlu1 %v4564_v13, %s4405_s30  ;;  %1697 = vrot.lane.b32.xlu0 %v4564_v13, %s4406_s23 }
 0x13d   : > { %1531 = vrot.lane.b32.xlu1 %v4564_v13, %s4407_s17 }
 0x167   : > { %v778_v15 = vpop.permute.xlu1 %777  ;;  %v612_v16 = vpop.permute.xlu0 %611 }
 0x168   : > { %4038 = vmatpush3.xpose.msk.msra.mxu0 %vm613_vm3, %v612_v16 }
 0x169   : > { %4042 = vmatprep.subr.mxu0 %v4384_v9 }
 0x16b   : > { %v946_v17 = vpop.permute.xlu1 %945  ;;  %4040 = vmatmul.mubr.msk.f32.vlgmr.msra.gmra.mrb[2].mxu0 %vm613_vm3, %v4564_v13  ;;  %v780_v18 = vpop.permute.xlu0 %779 }
 0x16c   : > { %4048 = vmatpush3.xpose.msk.msra.mxu1 %vm613_vm3, %v780_v18  ;;  %4044 = vmatprep.mubr.msk.f32.mxu0 %vm4385_vm2, %v4384_v9 }
 0x16d   : > { %4057 = vmatprep.subr.mxu1 %v4384_v9 }
 0x16f   : > { %v1112_v19 = vpop.permute.xlu1 %1111  ;;  %4050 = vmatmul.mubr.msk.f32.vlgmr.msra.gmra.mrb[0].mxu1 %vm613_vm3, %v778_v15  ;;  %v944_v20 = vpop.permute.xlu0 %943 }
 0x170   : > { %4058 = vmatpush3.xpose.msk.msra.mxu1 %vm613_vm3, %v946_v17  ;;  %4059 = vmatprep.mubr.msk.f32.mxu1 %vm4385_vm2, %v4384_v9 }
 0x171   : > { %4067 = vmatprep.subr.mxu1 %v4384_v9 }
 0x173   : > { %v1278_v21 = vpop.permute.xlu1 %1277  ;;  %4060 = vmatmul.mubr.msk.f32.vlgmr.msra.gmra.mrb[2].mxu1 %vm613_vm3, %v944_v20  ;;  %v1110_v22 = vpop.permute.xlu0 %1109 }
 0x174   : > { %4068 = vmatpush3.xpose.msk.msra.mxu1 %vm613_vm3, %v1112_v19  ;;  %4069 = vmatprep.mubr.msk.f32.mxu1 %vm4385_vm2, %v4384_v9 }
 0x175   : > { %4077 = vmatprep.subr.mxu1 %v4384_v9 }
 0x177   : > { %v1444_v23 = vpop.permute.xlu1 %1443  ;;  %4070 = vmatmul.mubr.msk.f32.vlgmr.msra.gmra.mrb[4].mxu1 %vm613_vm3, %v1110_v22  ;;  %v1276_v24 = vpop.permute.xlu0 %1275 }
 0x178   : > { %4078 = vmatpush3.xpose.msk.msra.mxu1 %vm613_vm3, %v1278_v21  ;;  %4079 = vmatprep.mubr.msk.f32.mxu1 %vm4385_vm2, %v4384_v9 }
 0x179   : > { %4087 = vmatprep.subr.mxu1 %v4384_v9 }
 0x17b   : > { %v1610_v25 = vpop.permute.xlu1 %1609  ;;  %4080 = vmatmul.mubr.msk.f32.vlgmr.msra.gmra.mrb[6].mxu1 %vm613_vm3, %v1276_v24  ;;  %v1442_v26 = vpop.permute.xlu0 %1441 }
 0x17c   : > { %4088 = vmatpush3.xpose.msk.msra.mxu1 %vm613_vm3, %v1444_v23  ;;  %4089 = vmatprep.mubr.msk.f32.mxu1 %vm4385_vm2, %v4384_v9 }
 0x17d   : > { %4097 = vmatprep.subr.mxu1 %v4384_v9 }
 0x17f   : > { %v1776_v27 = vpop.permute.xlu1 %1775  ;;  %4090 = vmatmul.mubr.msk.f32.vlgmr.msra.gmra.mrb[8].mxu1 %vm613_vm3, %v1442_v26  ;;  %v1608_v28 = vpop.permute.xlu0 %1607 }
 0x180   : > { %4098 = vmatpush3.xpose.msk.msra.mxu1 %vm613_vm3, %v1610_v25  ;;  %4099 = vmatprep.mubr.msk.f32.mxu1 %vm4385_vm2, %v4384_v9 }
 0x181   : > { %4107 = vmatprep.subr.mxu1 %v4384_v9 }
 0x183   : > { %v1981_v29 = vpop.permute.xlu1 %1980  ;;  %4100 = vmatmul.mubr.msk.f32.vlgmr.msra.gmra.mrb[10].mxu1 %vm613_vm3, %v1608_v28  ;;  %v1774_v30 = vpop.permute.xlu0 %1773 }
 0x184   : > { %4108 = vmatpush3.xpose.msk.msra.mxu1 %vm613_vm3, %v1776_v27  ;;  %4109 = vmatprep.mubr.msk.f32.mxu1 %vm4385_vm2, %v4384_v9 }
 0x185   : > { %4117 = vmatprep.subr.mxu1 %v4384_v9 }
 0x187   : > { %v2145_v31 = vpop.permute.xlu1 %2144  ;;  %4110 = vmatmul.mubr.msk.f32.vlgmr.msra.gmra.mrb[12].mxu1 %vm613_vm3, %v1774_v30  ;;  %v2147_v32 = vpop.permute.xlu0 %2146 }
 0x188   : > { %4118 = vmatpush3.xpose.msk.msra.mxu1 %vm613_vm3, %v1981_v29  ;;  %4119 = vmatprep.mubr.msk.f32.mxu1 %vm4385_vm2, %v4384_v9 }
 0x189   : > { %4127 = vmatprep.subr.mxu1 %v4384_v9 }
 0x18b   : > { %v2311_v33 = vpop.permute.xlu1 %2310  ;;  %4120 = vmatmul.mubr.msk.f32.vlgmr.msra.gmra.mrb[14].mxu1 %vm613_vm3, %v4582_v14  ;;  %v2313_v34 = vpop.permute.xlu0 %2312 }
 0x18c   : > { %4128 = vmatpush3.xpose.msk.msra.mxu1 %vm613_vm3, %v2147_v32  ;;  %4129 = vmatprep.mubr.msk.f32.mxu1 %vm4385_vm2, %v4384_v9 }
 0x18d   : > { %4137 = vmatprep.subr.mxu1 %v4384_v9 }
 0x18f   : > { %v2477_v35 = vpop.permute.xlu1 %2476  ;;  %4130 = vmatmul.mubr.msk.f32.vlgmr.msra.gmra.mrb[16].mxu1 %vm613_vm3, %v2145_v31  ;;  %v2479_v36 = vpop.permute.xlu0 %2478 }
 0x190   : > { %4138 = vmatpush3.xpose.msk.msra.mxu1 %vm613_vm3, %v2313_v34  ;;  %4139 = vmatprep.mubr.msk.f32.mxu1 %vm4385_vm2, %v4384_v9 }
 0x191   : > { %4147 = vmatprep.subr.mxu1 %v4384_v9 }
 0x193   : > { %4140 = vmatmul.mubr.msk.f32.vlgmr.msra.gmra.mrb[18].mxu1 %vm613_vm3, %v2311_v33  ;;  %v2645_v37 = vpop.permute.xlu0 %2644  ;;  %v2643_v38 = vpop.permute.xlu1 %2642 }
 0x194   : > { %4148 = vmatpush3.xpose.msk.msra.mxu1 %vm613_vm3, %v2479_v36  ;;  %4149 = vmatprep.mubr.msk.f32.mxu1 %vm4385_vm2, %v4384_v9 }
 0x195   : > { %4157 = vmatprep.subr.mxu1 %v4384_v9 }
 0x197   : > { %4150 = vmatmul.mubr.msk.f32.vlgmr.msra.gmra.mrb[20].mxu1 %vm613_vm3, %v2477_v35  ;;  %v2811_v39 = vpop.permute.xlu0 %2810  ;;  %v2809_v40 = vpop.permute.xlu1 %2808 }
 0x198   : > { %4158 = vmatpush3.xpose.msk.msra.mxu1 %vm613_vm3, %v2645_v37  ;;  %4159 = vmatprep.mubr.msk.f32.mxu1 %vm4385_vm2, %v4384_v9 }
 0x199   : > { %4167 = vmatprep.subr.mxu1 %v4384_v9 }
 0x19b   : > { %4160 = vmatmul.mubr.msk.f32.vlgmr.msra.gmra.mrb[22].mxu1 %vm613_vm3, %v2643_v38  ;;  %v2977_v41 = vpop.permute.xlu0 %2976  ;;  %v2975_v43 = vpop.permute.xlu1 %2974 }
 0x19c   : > { %4168 = vmatpush3.xpose.msk.msra.mxu1 %vm613_vm3, %v2811_v39  ;;  %4169 = vmatprep.mubr.msk.f32.mxu1 %vm4385_vm2, %v4384_v9 }
 0x19d   : > { %4177 = vmatprep.subr.mxu1 %v4384_v9 }
 0x19f   : > { %4170 = vmatmul.mubr.msk.f32.vlgmr.msra.gmra.mrb[24].mxu1 %vm613_vm3, %v2809_v40  ;;  %v3143_v42 = vpop.permute.xlu0 %3142  ;;  %v3141_v45 = vpop.permute.xlu1 %3140 }
 0x1a0   : > { %4178 = vmatpush3.xpose.msk.msra.mxu1 %vm613_vm3, %v2977_v41  ;;  %4179 = vmatprep.mubr.msk.f32.mxu1 %vm4385_vm2, %v4384_v9 }
 0x1a1   : > { %4187 = vmatprep.subr.mxu1 %v4384_v9 }
 0x1a3   : > { %4180 = vmatmul.mubr.msk.f32.vlgmr.msra.gmra.mrb[26].mxu1 %vm613_vm3, %v2975_v43  ;;  %v702_v44 = vpop.permute.xlu0 %701 }
 0x1a4   : > { %4043 = vmatpush3.msra.mxu0 %v702_v44  ;;  %4188 = vmatpush3.xpose.msk.msra.mxu1 %vm613_vm3, %v3143_v42 }
 0x1a5   : > { %4189 = vmatprep.mubr.msk.f32.mxu1 %vm4385_vm2, %v4384_v9  ;;  %4052 = vmatprep.subr.mxu0 %v4384_v9 }
 0x1a7   : > { %4190 = vmatmul.mubr.msk.f32.vlgmr.msra.gmra.mrb[28].mxu1 %vm613_vm3, %v3141_v45 }
 0x23e   : > { %v684_v46 = vpop.f32.mrb[2].mxu0 }
 0x23f   : > { %v4696_v47 = vmul.f32 0.70710677, %v684_v46  ;;  %v4041_v48 = vpop.f32.mrb[3].mxu0 }
 0x241   : > { %v690_v49 = vsel %vm689_vm4, %v4696_v47, -inf }
 0x242   : > { %691 = vmax.xlane.f32.xlu0 %v690_v49  ;;  %v851_v50 = vpop.f32.mrb[0].mxu1  ;;  %v4766_v49 = vpop.permute.xlu1 %867 }
 0x243   : > { %v4700_v51 = vmul.f32 0.70710677, %v851_v50  ;;  %v4051_v52 = vpop.f32.mrb[1].mxu1 }
 0x244   : > { %v4770_v52 = vpop.permute.xlu0 %1199 }
 0x245   : > { %v856_v53 = vsel %vm689_vm4, %v4700_v51, -inf }
 0x246   : > { %857 = vmax.xlane.f32.xlu1 %v856_v53  ;;  %v1017_v54 = vpop.f32.mrb[2].mxu1  ;;  %v4768_v50 = vpop.permute.xlu1 %1033 }
 0x247   : > { %v4704_v55 = vmul.f32 0.70710677, %v1017_v54  ;;  %v4061_v56 = vpop.f32.mrb[3].mxu1 }
 0x248   : > { %v4774_v54 = vpop.permute.xlu0 %1697 }
 0x249   : > { %v1022_v57 = vsel %vm689_vm4, %v4704_v55, -inf }
 0x24a   : > { %1023 = vmax.xlane.f32.xlu0 %v1022_v57  ;;  %v1183_v58 = vpop.f32.mrb[4].mxu1  ;;  %v4772_v53 = vpop.permute.xlu1 %1365 }
 0x24b   : > { %v4708_v59 = vmul.f32 0.70710677, %v1183_v58  ;;  %v4071_v60 = vpop.f32.mrb[5].mxu1 }
 0x24d   : > { %v1188_v61 = vsel %vm689_vm4, %v4708_v59, -inf }
 0x24e   : > { %1189 = vmax.xlane.f32.xlu0 %v1188_v61  ;;  %v1349_v62 = vpop.f32.mrb[6].mxu1  ;;  %v4776_v56 = vpop.permute.xlu1 %1531 }
 0x24f   : > { %v4081_v63 = vpop.f32.mrb[7].mxu1  ;;  %v4734_v30 = vmul.f32 0.70710677, %v1349_v62 }
 0x251   : > { %v1354_v35 = vsel %vm689_vm4, %v4734_v30, -inf }
 0x252   : > { %v1515_v0 = vpop.f32.mrb[8].mxu1 }
 0x253   : > { %v4712_v1 = vmul.f32 0.70710677, %v1515_v0  ;;  %v4091_v2 = vpop.f32.mrb[9].mxu1 }
 0x255   : > { %v1520_v3 = vsel %vm689_vm4, %v4712_v1, -inf }
 0x256   : > { %1521 = vmax.xlane.f32.xlu0 %v1520_v3  ;;  %v1681_v4 = vpop.f32.mrb[10].mxu1 }
 0x257   : > { %1863 = vrot.lane.b32.xlu1 %v4564_v13, %s4408_s13  ;;  %v4101_v5 = vpop.f32.mrb[11].mxu1  ;;  %v4736_v33 = vmul.f32 0.70710677, %v1681_v4 }
 0x259   : > { %v1686_v38 = vsel %vm689_vm4, %v4736_v33, -inf }
 0x25a   : > { %v1847_v6 = vpop.f32.mrb[12].mxu1 }
 0x25b   : > { %v4718_v7 = vmul.f32 0.70710677, %v1847_v6  ;;  %v4111_v8 = vpop.f32.mrb[13].mxu1 }
 0x25d   : > { %v1852_v10 = vsel %vm689_vm4, %v4718_v7, -inf }
 0x25e   : > { %1853 = vmax.xlane.f32.xlu0 %v1852_v10  ;;  %v2052_v11 = vpop.f32.mrb[14].mxu1 }
 0x25f   : > { %v4121_v12 = vpop.f32.mrb[15].mxu1  ;;  %v4740_v37 = vmul.f32 0.70710677, %v2052_v11 }
 0x261   : > { %v2057_v40 = vsel %vm689_vm4, %v4740_v37, -inf }
 0x262   : > { %v2218_v15 = vpop.f32.mrb[16].mxu1 }
 0x263   : > { %v4722_v16 = vmul.f32 0.70710677, %v2218_v15  ;;  %v4131_v17 = vpop.f32.mrb[17].mxu1 }
 0x265   : > { %v2223_v18 = vsel %vm689_vm4, %v4722_v16, -inf }
 0x266   : > { %2224 = vmax.xlane.f32.xlu0 %v2223_v18  ;;  %v2384_v13 = vpop.f32.mrb[18].mxu1 }
 0x267   : > { %v4141_v19 = vpop.f32.mrb[19].mxu1  ;;  %v4744_v39 = vmul.f32 0.70710677, %v2384_v13 }
 0x269   : > { %v2389_v42 = vsel %vm689_vm4, %v4744_v39, -inf }
 0x26a   : > { %v2550_v20 = vpop.f32.mrb[20].mxu1 }
 0x26b   : > { %v4726_v21 = vmul.f32 0.70710677, %v2550_v20  ;;  %v4151_v22 = vpop.f32.mrb[21].mxu1 }
 0x26d   : > { %v2555_v23 = vsel %vm689_vm4, %v4726_v21, -inf }
 0x26e   : > { %2556 = vmax.xlane.f32.xlu0 %v2555_v23  ;;  %v2716_v24 = vpop.f32.mrb[22].mxu1 }
 0x26f   : > { %v4161_v25 = vpop.f32.mrb[23].mxu1  ;;  %v4748_v41 = vmul.f32 0.70710677, %v2716_v24 }
 0x271   : > { %v2721_v44 = vsel %vm689_vm4, %v4748_v41, -inf }
 0x272   : > { %v2882_v26 = vpop.f32.mrb[24].mxu1 }
 0x273   : > { %v4730_v27 = vmul.f32 0.70710677, %v2882_v26  ;;  %v4171_v28 = vpop.f32.mrb[25].mxu1 }
 0x275   : > { %v2887_v29 = vsel %vm689_vm4, %v4730_v27, -inf }
 0x276   : > { %2888 = vmax.xlane.f32.xlu0 %v2887_v29  ;;  %v3048_v31 = vpop.f32.mrb[26].mxu1 }
 0x277   : > { %v4181_v32 = vpop.f32.mrb[27].mxu1  ;;  %v4752_v43 = vmul.f32 0.70710677, %v3048_v31 }
 0x279   : > { %v3053_v45 = vsel %vm689_vm4, %v4752_v43, -inf }
 0x27a   : > { %v3214_v34 = vpop.f32.mrb[28].mxu1 }
 0x27b   : > { %1355 = vmax.xlane.f32.xlu1 %v1354_v35  ;;  %v4191_v36 = vpop.f32.mrb[29].mxu1  ;;  %v4762_v46 = vmul.f32 0.70710677, %v3214_v34 }
 0x27d   : > { %v3219_v48 = vsel %vm689_vm4, %v4762_v46, -inf }
 0x27f   : > { %1687 = vmax.xlane.f32.xlu1 %v1686_v38 }
 0x283   : > { %2058 = vmax.xlane.f32.xlu1 %v2057_v40 }
 0x287   : > { %2390 = vmax.xlane.f32.xlu1 %v2389_v42 }
 0x28b   : > { %2722 = vmax.xlane.f32.xlu1 %v2721_v44 }
 0x28c   : > { %2234 = vrot.lane.b32.xlu0 %v4582_v14, %s4401_s1 }
 0x28f   : > { %3054 = vmax.xlane.f32.xlu1 %v3053_v45 }
 0x2a0   : > { %2068 = vrot.lane.b32.xlu1 %v4582_v14, %s4402_s21  ;;  %s5091_s21 = scalar_lea.vmem %s5076_s4, %s4488_s19 }
 0x2ab   : > { %3220 = vmax.xlane.f32.xlu0 %v3219_v48 }
 0x2cf   : > { %v692_v57 = vpop.xlane.xlu0 %691 }
 0x2d0   : > { %v693_v58 = vsub.f32 %v4696_v47, %v692_v57 }
 0x2d2   : > { %v694_v60 = vmul.f32 1.442695, %v693_v58 }
 0x2d3   : > { %v858_v61 = vpop.xlane.xlu1 %857 }
 0x2d4   : > { %4298 = vpow2.f32 %v694_v60  ;;  %v859_v62 = vsub.f32 %v4700_v51, %v858_v61 }
 0x2d6   : > { %v860_v63 = vmul.f32 1.442695, %v859_v62 }
 0x2d7   : > { %v1024_v0 = vpop.xlane.xlu0 %1023  ;;  %v4803_v19 = vpop.permute.xlu1 %1863 }
 0x2d8   : > { %4300 = vpow2.f32 %v860_v63  ;;  %v1025_v2 = vsub.f32 %v4704_v55, %v1024_v0 }
 0x2da   : > { %v1026_v3 = vmul.f32 1.442695, %v1025_v2 }
 0x2db   : > { %v1190_v4 = vpop.xlane.xlu0 %1189 }
 0x2dc   : > { %4302 = vpow2.f32 %v1026_v3  ;;  %v1191_v5 = vsub.f32 %v4708_v59, %v1190_v4 }
 0x2de   : > { %v4782_v6 = vpop.eup %4298  ;;  %v1192_v8 = vmul.f32 1.442695, %v1191_v5 }
 0x2df   : > { %v696_v47 = vsel %vm689_vm4, %v4782_v6, 0.0 }
 0x2e0   : > { %4304 = vpow2.f32 %v1192_v8  ;;  %697 = vadd.xlane.f32.xlu1 %v696_v47 }
 0x2e2   : > { %v4786_v10 = vpop.eup %4300 }
 0x2e3   : > { %v1522_v51 = vpop.xlane.xlu0 %1521  ;;  %v862_v11 = vsel %vm689_vm4, %v4786_v10, 0.0 }
 0x2e4   : > { %v1523_v55 = vsub.f32 %v4712_v1, %v1522_v51  ;;  %863 = vadd.xlane.f32.xlu0 %v862_v11 }
 0x2e6   : > { %v4791_v12 = vpop.eup %4302  ;;  %v1524_v59 = vmul.f32 1.442695, %v1523_v55 }
 0x2e7   : > { %v1028_v15 = vsel %vm689_vm4, %v4791_v12, 0.0 }
 0x2e8   : > { %4306 = vpow2.f32 %v1524_v59  ;;  %1029 = vadd.xlane.f32.xlu1 %v1028_v15 }
 0x2ea   : > { %v4795_v17 = vpop.eup %4304 }
 0x2eb   : > { %v1194_v18 = vsel %vm689_vm4, %v4795_v17, 0.0  ;;  %v1854_v20 = vpop.xlane.xlu0 %1853 }
 0x2ec   : > { %1195 = vadd.xlane.f32.xlu0 %v1194_v18  ;;  %v1855_v24 = vsub.f32 %v4718_v7, %v1854_v20 }
 0x2ee   : > { %v1856_v31 = vmul.f32 1.442695, %v1855_v24 }
 0x2f2   : > { %v4799_v13 = vpop.eup %4306 }
 0x2f3   : > { %v1526_v1 = vsel %vm689_vm4, %v4799_v13, 0.0  ;;  %v2225_v26 = vpop.xlane.xlu0 %2224 }
 0x2f4   : > { %1527 = vadd.xlane.f32.xlu0 %v1526_v1  ;;  %v2226_v32 = vsub.f32 %v4722_v16, %v2225_v26 }
 0x2f6   : > { %v2227_v38 = vmul.f32 1.442695, %v2226_v32 }
 0x308   : > { %v1356_v22 = vpop.xlane.xlu1 %1355 }
 0x309   : > { %v1357_v23 = vsub.f32 %v4734_v30, %v1356_v22  ;;  %v2557_v30 = vpop.xlane.xlu0 %2556 }
 0x30a   : > { %v2558_v18 = vsub.f32 %v4726_v21, %v2557_v30 }
 0x30b   : > { %v1358_v25 = vmul.f32 1.442695, %v1357_v23 }
 0x30c   : > { %v1688_v28 = vpop.xlane.xlu1 %1687  ;;  %v2559_v20 = vmul.f32 1.442695, %v2558_v18 }
 0x30d   : > { %4308 = vpow2.f32 %v1358_v25  ;;  %v1689_v29 = vsub.f32 %v4736_v33, %v1688_v28  ;;  %v2889_v45 = vpop.xlane.xlu0 %2888 }
 0x30e   : > { %v2890_v58 = vsub.f32 %v4730_v27, %v2889_v45 }
 0x30f   : > { %v1690_v34 = vmul.f32 1.442695, %v1689_v29 }
 0x310   : > { %v2059_v35 = vpop.xlane.xlu1 %2058  ;;  %v2891_v63 = vmul.f32 1.442695, %v2890_v58 }
 0x311   : > { %4310 = vpow2.f32 %v1690_v34  ;;  %v2060_v36 = vsub.f32 %v4740_v37, %v2059_v35  ;;  %v4845_v11 = vpop.permute.xlu0 %2234 }
 0x312   : > { %4312 = vpow2.f32 %v1856_v31 }
 0x313   : > { %v2061_v40 = vmul.f32 1.442695, %v2060_v36 }
 0x314   : > { %v2391_v42 = vpop.xlane.xlu1 %2390 }
 0x315   : > { %4314 = vpow2.f32 %v2061_v40  ;;  %v2392_v7 = vsub.f32 %v4744_v39, %v2391_v42 }
 0x316   : > { %4316 = vpow2.f32 %v2227_v38 }
 0x317   : > { %v4811_v44 = vpop.eup %4308  ;;  %v2393_v33 = vmul.f32 1.442695, %v2392_v7 }
 0x318   : > { %v2723_v48 = vpop.xlane.xlu1 %2722  ;;  %v1360_v16 = vsel %vm689_vm4, %v4811_v44, 0.0 }
 0x319   : > { %v2724_v57 = vsub.f32 %v4748_v41, %v2723_v48  ;;  %1361 = vadd.xlane.f32.xlu1 %v1360_v16  ;;  %4318 = vpow2.f32 %v2393_v33 }
 0x31b   : > { %v4816_v37 = vpop.eup %4310  ;;  %v2725_v60 = vmul.f32 1.442695, %v2724_v57 }
 0x31c   : > { %v1692_v39 = vsel %vm689_vm4, %v4816_v37, 0.0  ;;  %v4821_v61 = vpop.eup %4312  ;;  %v3055_v1 = vpop.xlane.xlu1 %3054 }
 0x31d   : > { %1693 = vadd.xlane.f32.xlu1 %v1692_v39  ;;  %4320 = vpow2.f32 %v2725_v60  ;;  %v1858_v0 = vsel %vm689_vm4, %v4821_v61, 0.0  ;;  %v3056_v22 = vsub.f32 %v4752_v43, %v3055_v1 }
 0x31e   : > { %4322 = vpow2.f32 %v2891_v63 }
 0x31f   : > { %v4823_v62 = vpop.eup %4314  ;;  %v3057_v24 = vmul.f32 1.442695, %v3056_v22 }
 0x320   : > { %v2063_v41 = vsel %vm689_vm4, %v4823_v62, 0.0  ;;  %v4829_v2 = vpop.eup %4316  ;;  %v4866_v43 = vpop.permute.xlu1 %2068 }
 0x321   : > { %2064 = vadd.xlane.f32.xlu0 %v2063_v41  ;;  %1859 = vadd.xlane.f32.xlu1 %v1858_v0  ;;  %v2229_v27 = vsel %vm689_vm4, %v4829_v2, 0.0 }
 0x323   : > { %v4833_v3 = vpop.eup %4318 }
 0x324   : > { %v2395_v4 = vsel %vm689_vm4, %v4833_v3, 0.0 }
 0x325   : > { %2230 = vadd.xlane.f32.xlu1 %v2229_v27 }
 0x327   : > { %v4837_v5 = vpop.eup %4320 }
 0x328   : > { %v2727_v8 = vsel %vm689_vm4, %v4837_v5, 0.0  ;;  %v4841_v47 = vpop.eup %4322 }
 0x329   : > { %2396 = vadd.xlane.f32.xlu1 %v2395_v4  ;;  %v2893_v51 = vsel %vm689_vm4, %v4841_v47, 0.0 }
 0x32d   : > { %2728 = vadd.xlane.f32.xlu1 %v2727_v8 }
 0x331   : > { %2894 = vadd.xlane.f32.xlu1 %v2893_v51 }
 0x337   : > { %2400 = vrot.lane.b32.xlu0 %v4582_v14, %s4403_s3 }
 0x338   : > { %v3221_v55 = vpop.xlane.xlu0 %3220 }
 0x339   : > { %v3222_v59 = vsub.f32 %v4762_v46, %v3221_v55 }
 0x33b   : > { %v3223_v15 = vmul.f32 1.442695, %v3222_v59 }
 0x33d   : > { %4324 = vpow2.f32 %v3223_v15 }
 0x33e   : > { %4326 = vpow2.f32 %v2559_v20 }
 0x33f   : > { %4328 = vpow2.f32 %v3057_v24 }
 0x347   : > { %v4852_v23 = vpop.eup %4324 }
 0x348   : > { %v3225_v25 = vsel %vm689_vm4, %v4852_v23, 0.0  ;;  %v4856_v26 = vpop.eup %4326 }
 0x349   : > { %3226 = vadd.xlane.f32.xlu1 %v3225_v25  ;;  %v2561_v46 = vsel %vm689_vm4, %v4856_v26, 0.0  ;;  %v4860_v28 = vpop.eup %4328 }
 0x34a   : > { %v3059_v21 = vsel %vm689_vm4, %v4860_v28, 0.0 }
 0x356   : > { %2562 = vadd.xlane.f32.xlu0 %v2561_v46 }
 0x35a   : > { %3060 = vadd.xlane.f32.xlu0 %v3059_v21  ;;  %2566 = vrot.lane.b32.xlu1 %v4582_v14, %s4404_s22 }
 0x36d   : > { %v698_v29 = vpop.xlane.xlu1 %697 }
 0x36e   : > { %4330 = vrcp.f32 %v698_v29 }
 0x370   : > { %2732 = vrot.lane.b32.xlu0 %v4582_v14, %s4405_s30 }
 0x371   : > { %v864_v31 = vpop.xlane.xlu0 %863 }
 0x372   : > { %4332 = vrcp.f32 %v864_v31 }
 0x374   : > { %2898 = vrot.lane.b32.xlu0 %v4582_v14, %s4407_s17  ;;  %s5092_s17 = scalar_lea.vmem %s5078_s6, %s4488_s19 }
 0x375   : > { %v1030_v32 = vpop.xlane.xlu1 %1029 }
 0x376   : > { %4334 = vrcp.f32 %v1030_v32 }
 0x378   : > { %v4331_v34 = vpop.eup %4330  ;;  %3064 = vrot.lane.b32.xlu0 %v4582_v14, %s4406_s23 }
 0x379   : > { %v700_v35 = vmul.f32 %v4331_v34, %v4782_v6  ;;  %v1196_v36 = vpop.xlane.xlu0 %1195 }
 0x37a   : > { %4336 = vrcp.f32 %v1196_v36 }
 0x37b   : > { %4045 = vmatmul.mubr.msk.f32.vlgmr.msra.gmra.mrb[4].mxu0 %vm689_vm4, %v700_v35 }
 0x37c   : > { %v4333_v38 = vpop.eup %4332  ;;  %4053 = vmatpush3.msra.mxu0 %v4766_v49  ;;  %3230 = vrot.lane.b32.xlu0 %v4582_v14, %s4408_s13 }
 0x37d   : > { %v866_v40 = vmul.f32 %v4333_v38, %v4786_v10  ;;  %4054 = vmatprep.mubr.msk.f32.mxu0 %vm4385_vm2, %v4384_v9  ;;  %4062 = vmatprep.subr.mxu0 %v4384_v9 }
 0x37f   : > { %4055 = vmatmul.mubr.msk.f32.vlgmr.msra.gmra.mrb[6].mxu0 %vm689_vm4, %v866_v40 }
 0x380   : > { %v4335_v6 = vpop.eup %4334  ;;  %4063 = vmatpush3.msra.mxu0 %v4768_v50  ;;  %4064 = vmatprep.mubr.msk.f32.mxu0 %vm4385_vm2, %v4384_v9 }
 0x381   : > { %v1032_v49 = vmul.f32 %v4335_v6, %v4791_v12  ;;  %4072 = vmatprep.subr.mxu0 %v4384_v9  ;;  %v1528_v50 = vpop.xlane.xlu0 %1527 }
 0x383   : > { %4065 = vmatmul.mubr.msk.f32.vlgmr.msra.gmra.mrb[8].mxu0 %vm689_vm4, %v1032_v49 }
 0x384   : > { %v4337_v14 = vpop.eup %4336  ;;  %4073 = vmatpush3.msra.mxu0 %v4770_v52  ;;  %4074 = vmatprep.mubr.msk.f32.mxu0 %vm4385_vm2, %v4384_v9 }
 0x385   : > { %v1198_v10 = vmul.f32 %v4337_v14, %v4795_v17  ;;  %4082 = vmatprep.subr.mxu0 %v4384_v9 }
 0x387   : > { %4075 = vmatmul.mubr.msk.f32.vlgmr.msra.gmra.mrb[10].mxu0 %vm689_vm4, %v1198_v10 }
 0x388   : > { %4083 = vmatpush3.msra.mxu0 %v4772_v53  ;;  %4084 = vmatprep.mubr.msk.f32.mxu0 %vm4385_vm2, %v4384_v9 }
 0x389   : > { %4092 = vmatprep.subr.mxu0 %v4384_v9 }
 0x3a6   : > { %v1362_v12 = vpop.xlane.xlu1 %1361 }
 0x3a7   : > { %4338 = vrcp.f32 %v1362_v12  ;;  %v3342_v12 = vld [vmem:[%s4501_s29 + $0x8] sm:$0xff] }
 0x3a8   : > { %4340 = vrcp.f32 %v1528_v50  ;;  %v3341_v50 = vld [vmem:[%s4501_s29] sm:$0xff] }
 0x3aa   : > { %v1694_v52 = vpop.xlane.xlu1 %1693 }
 0x3ab   : > { %4342 = vrcp.f32 %v1694_v52 }
 0x3ae   : > { %v1860_v30 = vpop.xlane.xlu1 %1859  ;;  %v2065_v7 = vpop.xlane.xlu0 %2064 }
 0x3af   : > { %4344 = vrcp.f32 %v1860_v30  ;;  %v4234_v30 = vpack.c.bf16 %v3342_v12, %v3341_v50  ;;  %v3564_v12 = vld [vmem:[%s4520_s27] sm:$0xff] }
 0x3b0   : > { %4346 = vrcp.f32 %v2065_v7 }
 0x3b1   : > { %v4339_v42 = vpop.eup %4338  ;;  %4235 = vmatprep.subr.bf16.mxu1 %v4234_v30 }
 0x3b2   : > { %v1364_v17 = vmul.f32 %v4339_v42, %v4811_v44  ;;  %v4341_v33 = vpop.eup %4340  ;;  %v2231_v45 = vpop.xlane.xlu1 %2230  ;;  %4237 = vmatpush3.bf16.msra.mxu1 %v4234_v30  ;;  %v3566_v30 = vld [vmem:[%s4520_s27 + $0x10] sm:$0xff] }
 0x3b3   : > { %v1530_v53 = vmul.f32 %v4341_v33, %v4799_v13  ;;  %4348 = vrcp.f32 %v2231_v45  ;;  %v2401_v60 = vpop.permute.xlu0 %2400 }
 0x3b4   : > { %4085 = vmatmul.mubr.msk.f32.vlgmr.msra.gmra.mrb[12].mxu0 %vm689_vm4, %v1364_v17 }
 0x3b5   : > { %4093 = vmatpush3.msra.mxu0 %v4776_v56  ;;  %4094 = vmatprep.mubr.msk.f32.mxu0 %vm4385_vm2, %v4384_v9  ;;  %v4343_v48 = vpop.eup %4342 }
 0x3b6   : > { %4102 = vmatprep.subr.mxu0 %v4384_v9  ;;  %v1696_v44 = vmul.f32 %v4343_v48, %v4816_v37  ;;  %v2397_v16 = vpop.xlane.xlu1 %2396 }
 0x3b7   : > { %4350 = vrcp.f32 %v2397_v16 }
 0x3b8   : > { %4095 = vmatmul.mubr.msk.f32.vlgmr.msra.gmra.mrb[14].mxu0 %vm689_vm4, %v1530_v53 }
 0x3b9   : > { %4103 = vmatpush3.msra.mxu0 %v4774_v54  ;;  %4104 = vmatprep.mubr.msk.f32.mxu0 %vm4385_vm2, %v4384_v9  ;;  %v4345_v56 = vpop.eup %4344 }
 0x3ba   : > { %4112 = vmatprep.subr.mxu0 %v4384_v9  ;;  %v1862_v13 = vmul.f32 %v4345_v56, %v4821_v61  ;;  %v4347_v54 = vpop.eup %4346  ;;  %v2729_v61 = vpop.xlane.xlu1 %2728 }
 0x3bb   : > { %v2067_v57 = vmul.f32 %v4347_v54, %v4823_v62 }
 0x3bc   : > { %4105 = vmatmul.mubr.msk.f32.vlgmr.msra.gmra.mrb[16].mxu0 %vm689_vm4, %v1696_v44 }
 0x3bd   : > { %4113 = vmatpush3.msra.mxu0 %v4803_v19  ;;  %4114 = vmatprep.mubr.msk.f32.mxu0 %vm4385_vm2, %v4384_v9  ;;  %v4349_v19 = vpop.eup %4348 }
 0x3be   : > { %4122 = vmatprep.subr.mxu0 %v4384_v9  ;;  %v2233_v37 = vmul.f32 %v4349_v19, %v4829_v2  ;;  %v2895_v62 = vpop.xlane.xlu1 %2894 }
 0x3c0   : > { %4115 = vmatmul.mubr.msk.f32.vlgmr.msra.gmra.mrb[18].mxu0 %vm689_vm4, %v1862_v13 }
 0x3c1   : > { %4123 = vmatpush3.msra.mxu0 %v4866_v43  ;;  %4124 = vmatprep.mubr.msk.f32.mxu0 %vm4385_vm2, %v4384_v9  ;;  %v4351_v58 = vpop.eup %4350 }
 0x3c2   : > { %4132 = vmatprep.subr.mxu0 %v4384_v9  ;;  %v2399_v39 = vmul.f32 %v4351_v58, %v4833_v3 }
 0x3c4   : > { %4125 = vmatmul.mubr.msk.f32.vlgmr.msra.gmra.mrb[20].mxu0 %vm689_vm4, %v2067_v57 }
 0x3c5   : > { %4133 = vmatpush3.msra.mxu0 %v4845_v11  ;;  %4134 = vmatprep.mubr.msk.f32.mxu0 %vm4385_vm2, %v4384_v9 }
 0x3c6   : > { %4142 = vmatprep.subr.mxu0 %v4384_v9 }
 0x3c8   : > { %4135 = vmatmul.mubr.msk.f32.vlgmr.msra.gmra.mrb[22].mxu0 %vm689_vm4, %v2233_v37 }
 0x3c9   : > { %4143 = vmatpush3.msra.mxu0 %v2401_v60  ;;  %4144 = vmatprep.mubr.msk.f32.mxu0 %vm4385_vm2, %v4384_v9 }
 0x3ca   : > { %4152 = vmatprep.subr.mxu0 %v4384_v9 }
 0x3cc   : > { %4145 = vmatmul.mubr.msk.f32.vlgmr.msra.gmra.mrb[24].mxu0 %vm689_vm4, %v2399_v39 }
 0x3cd   : > { %4154 = vmatprep.mubr.msk.f32.mxu0 %vm4385_vm2, %v4384_v9 }
 0x3d6   : > { %v3227_v63 = vpop.xlane.xlu1 %3226 }
 0x3da   : > { %v2567_v41 = vpop.permute.xlu1 %2566 }
 0x3db   : > { %4153 = vmatpush3.msra.mxu0 %v2567_v41 }
 0x3dc   : > { %4162 = vmatprep.subr.mxu0 %v4384_v9 }
 0x3e3   : > { %v2563_v0 = vpop.xlane.xlu0 %2562 }
 0x3e4   : > { %4352 = vrcp.f32 %v2563_v0 }
 0x3e5   : > { %4354 = vrcp.f32 %v2729_v61 }
 0x3e6   : > { %4356 = vrcp.f32 %v2895_v62 }
 0x3e7   : > { %v3061_v2 = vpop.xlane.xlu0 %3060 }
 0x3e8   : > { %4358 = vrcp.f32 %v3061_v2 }
 0x3e9   : > { %4360 = vrcp.f32 %v3227_v63 }
 0x3eb   : > { %v2733_v27 = vpop.permute.xlu0 %2732 }
 0x3ee   : > { %v4353_v3 = vpop.eup %4352 }
 0x3ef   : > { %v2565_v4 = vmul.f32 %v4353_v3, %v4856_v26  ;;  %v4355_v8 = vpop.eup %4354  ;;  %v2899_v51 = vpop.permute.xlu0 %2898 }
 0x3f0   : > { %v2731_v11 = vmul.f32 %v4355_v8, %v4837_v5  ;;  %v4357_v55 = vpop.eup %4356 }
 0x3f1   : > { %4155 = vmatmul.mubr.msk.f32.vlgmr.msra.gmra.mrb[26].mxu0 %vm689_vm4, %v2565_v4  ;;  %v2897_v59 = vmul.f32 %v4357_v55, %v4841_v47 }
 0x3f2   : > { %4163 = vmatpush3.msra.mxu0 %v2733_v27  ;;  %4164 = vmatprep.mubr.msk.f32.mxu0 %vm4385_vm2, %v4384_v9  ;;  %v4359_v18 = vpop.eup %4358 }
 0x3f3   : > { %4172 = vmatprep.subr.mxu0 %v4384_v9  ;;  %v3065_v15 = vpop.permute.xlu0 %3064  ;;  %v3063_v5 = vmul.f32 %v4359_v18, %v4860_v28  ;;  %v4361_v1 = vpop.eup %4360 }
 0x3f4   : > { %v3229_v47 = vmul.f32 %v4361_v1, %v4852_v23 }
 0x3f5   : > { %4165 = vmatmul.mubr.msk.f32.vlgmr.msra.gmra.mrb[28].mxu0 %vm689_vm4, %v2731_v11 }
 0x3f6   : > { %4173 = vmatpush3.msra.mxu0 %v2899_v51  ;;  %4174 = vmatprep.mubr.msk.f32.mxu0 %vm4385_vm2, %v4384_v9 }
 0x3f7   : > { %4182 = vmatprep.subr.mxu0 %v4384_v9  ;;  %v3231_v20 = vpop.permute.xlu0 %3230 }
 0x3f9   : > { %4175 = vmatmul.mubr.msk.f32.vlgmr.msra.gmra.mrb[30].mxu0 %vm689_vm4, %v2897_v59 }
 0x3fa   : > { %4183 = vmatpush3.msra.mxu0 %v3065_v15  ;;  %4184 = vmatprep.mubr.msk.f32.mxu0 %vm4385_vm2, %v4384_v9 }
 0x3fb   : > { %4192 = vmatprep.subr.mxu0 %v4384_v9 }
 0x3fd   : > { %4185 = vmatmul.mubr.msk.f32.vlgmr.msra.gmra.mrb[32].mxu0 %vm689_vm4, %v3063_v5 }
 0x3fe   : > { %4193 = vmatpush3.msra.mxu0 %v3231_v20  ;;  %4194 = vmatprep.mubr.msk.f32.mxu0 %vm4385_vm2, %v4384_v9 }
 0x401   : > { %4195 = vmatmul.mubr.msk.f32.vlgmr.msra.gmra.mrb[34].mxu0 %vm689_vm4, %v3229_v47  ;;  %v3926_v47 = vld [vmem:[%s5091_s21] ss:$0 sm:$0xff] }
 0x44e   : > { %v4961_v22 = vpop.f32.mrb[4].mxu0 }
 0x44f   : > { %v4046_v24 = vpop.f32.mrb[5].mxu0 }
 0x452   : > { %v939_v25 = vpop.f32.mrb[6].mxu0 }
 0x453   : > { %1940 = vrot.lane.b32.xlu0 %v939_v25, %s4409_s24  ;;  %v4056_v26 = vpop.f32.mrb[7].mxu0 }
 0x456   : > { %v1105_v46 = vpop.f32.mrb[8].mxu0 }
 0x457   : > { %1944 = vrot.lane.b32.xlu1 %v1105_v46, %s4410_s25  ;;  %v4066_v28 = vpop.f32.mrb[9].mxu0  ;;  %v4370_v46 = vld [vmem:[%s5083_s11 + $0x8] sm:$0xff] }
 0x45a   : > { %v1271_v21 = vpop.f32.mrb[10].mxu0 }
 0x45b   : > { %1948 = vrot.lane.b32.xlu1 %v1271_v21, %s4411_s28  ;;  %v4076_v9 = vpop.f32.mrb[11].mxu0  ;;  %v4371_v21 = vld [vmem:[%s5083_s11] sm:$0xff] }
 0x487   : > { %v1437_v43 = vpop.f32.mrb[12].mxu0 }
 0x488   : > { %1952 = vrot.lane.b32.xlu1 %v1437_v43, %s4412_s12  ;;  %v4086_v23 = vpop.f32.mrb[13].mxu0 }
 0x48b   : > { %v1603_v29 = vpop.f32.mrb[14].mxu0 }
 0x48c   : > { %1956 = vrot.lane.b32.xlu1 %v1603_v29, %s4413_s26  ;;  %v4096_v31 = vpop.f32.mrb[15].mxu0 }
 0x48f   : > { %v1769_v32 = vpop.f32.mrb[16].mxu0 }
 0x490   : > { %1960 = vrot.lane.b32.xlu1 %v1769_v32, %s4414_s14  ;;  %v4106_v34 = vpop.f32.mrb[17].mxu0 }
 0x493   : > { %v1935_v35 = vpop.f32.mrb[18].mxu0 }
 0x494   : > { %1964 = vrot.lane.b32.xlu1 %v1935_v35, %s4415_s15  ;;  %v4116_v36 = vpop.f32.mrb[19].mxu0 }
 0x497   : > { %v2140_v38 = vpop.f32.mrb[20].mxu0 }
 0x498   : > { %v4126_v40 = vpop.f32.mrb[21].mxu0 }
 0x49b   : > { %v2306_v6 = vpop.f32.mrb[22].mxu0 }
 0x49c   : > { %3307 = vrot.lane.b32.xlu0 %v2306_v6, %s4409_s24  ;;  %v4136_v49 = vpop.f32.mrb[23].mxu0 }
 0x49f   : > { %v2472_v14 = vpop.f32.mrb[24].mxu0 }
 0x4a0   : > { %3311 = vrot.lane.b32.xlu0 %v2472_v14, %s4410_s25  ;;  %v4146_v10 = vpop.f32.mrb[25].mxu0  ;;  %v3472_v14 = vld [vmem:[%s4510_s16] sm:$0xff] }
 0x4a1   : > { %v3473_v10 = vld [vmem:[%s4510_s16 + $0x8] sm:$0xff] }
 0x4a2   : > { %v4238_v50 = vpack.c.bf16 %v3473_v10, %v3472_v14 }
 0x4a4   : > { %4239 = vmatprep.subr.bf16.mxu0 %v4238_v50 }
 0x4a5   : > { %4241 = vmatpush3.bf16.msra.mxu0 %v4238_v50 }
 0x4c4   : > { %v2638_v52 = vpop.f32.mrb[26].mxu0 }
 0x4c5   : > { %3315 = vrot.lane.b32.xlu0 %v2638_v52, %s4411_s28  ;;  %v4156_v42 = vpop.f32.mrb[27].mxu0  ;;  %v1941_v57 = vpop.permute.xlu0 %1940  ;;  %v3565_v52 = vld [vmem:[%s4520_s27 + $0x8] sm:$0xff] }
 0x4c6   : > { %v1967_v37 = vsel %vm613_vm3, %v4961_v22, %v1941_v57  ;;  %v4242_v42 = vpack.c.bf16 %v3565_v52, %v3564_v12 }
 0x4c8   : > { %v2804_v17 = vpop.f32.mrb[28].mxu0  ;;  %4243 = vmatprep.subr.bf16.mxu1 %v4242_v42 }
 0x4c9   : > { %3319 = vrot.lane.b32.xlu0 %v2804_v17, %s4412_s12  ;;  %v4166_v7 = vpop.f32.mrb[29].mxu0  ;;  %v1945_v56 = vpop.permute.xlu1 %1944  ;;  %v3567_v17 = vld [vmem:[%s4520_s27 + $0x18] sm:$0xff] }
 0x4ca   : > { %v1969_v58 = vsel %vm1968_vm5, %v1967_v37, %v1945_v56  ;;  %v4246_v7 = vpack.c.bf16 %v3567_v17, %v3566_v30 }
 0x4cc   : > { %v2970_v33 = vpop.f32.mrb[30].mxu0 }
 0x4cd   : > { %3323 = vrot.lane.b32.xlu0 %v2970_v33, %s4413_s26  ;;  %v4176_v45 = vpop.f32.mrb[31].mxu0  ;;  %v1949_v13 = vpop.permute.xlu1 %1948  ;;  %v3568_v33 = vld [vmem:[%s4520_s27 + $0x20] sm:$0xff] }
 0x4ce   : > { %v1971_v39 = vsel %vm1970_vm6, %v1969_v58, %v1949_v13  ;;  %v3569_v45 = vld [vmem:[%s4520_s27 + $0x28] sm:$0xff]  ;;  %v5015_v58 = vld [vmem:[%s4530_s20] sm:$0xf] }
 0x4d0   : > { %v3136_v53 = vpop.f32.mrb[32].mxu0 }
 0x4d1   : > { %3327 = vrot.lane.b32.xlu0 %v3136_v53, %s4414_s14  ;;  %v4186_v48 = vpop.f32.mrb[33].mxu0  ;;  %v4250_v53 = vpack.c.bf16 %v3569_v45, %v3568_v33 }
 0x4d4   : > { %v3302_v44 = vpop.f32.mrb[34].mxu0 }
 0x4d5   : > { %3331 = vrot.lane.b32.xlu1 %v3302_v44, %s4415_s15  ;;  %v4196_v16 = vpop.f32.mrb[35].mxu0 }
 0x4d6   : > { %v3460_v16 = vlaneseq }
 0x4d8   : > { %v5011_v57 = vshrl.u32 %v3460_v16, 7 }
 0x4da   : > { %v3462_v37 = vsub.s32 0, %v5011_v57  ;;  %v3691_v52 = vsub.s32 2, %v5011_v57  ;;  %v3697_v30 = vsub.s32 3, %v5011_v57 }
 0x4dc   : > { %v3698_v33 = vrot.slane %v5015_v58, %v3697_v30 }
 0x4fa   : > { %v1953_v54 = vpop.permute.xlu1 %1952 }
 0x4fb   : > { %v1972_v61 = vsel %vm689_vm4, %v1971_v39, %v1953_v54  ;;  %v3463_v39 = vrot.slane %v5015_v58, %v3462_v37 }
 0x4fe   : > { %v1957_v19 = vpop.permute.xlu1 %1956 }
 0x4ff   : > { %v1974_v62 = vsel %vm1973_vm7, %v1972_v61, %v1957_v19 }
 0x502   : > { %v1961_v60 = vpop.permute.xlu1 %1960 }
 0x503   : > { %v1976_v63 = vsel %vm1975_vm8, %v1974_v62, %v1961_v60  ;;  %v3468_v60 = vsub.s32 1, %v5011_v57 }
 0x506   : > { %v1965_v41 = vpop.permute.xlu1 %1964 }
 0x507   : > { %v1978_v0 = vsel %vm1977_vm9, %v1976_v63, %v1965_v41  ;;  %v3469_v63 = vrot.slane %v5015_v58, %v3468_v60 }
 0x508   : > { %4201 = vmatprep.mubr.msk.f32.mxu1 %vm528_vm1, %v1978_v0 }
 0x50e   : > { %v3308_v2 = vpop.permute.xlu0 %3307 }
 0x50f   : > { %v3334_v51 = vsel %vm613_vm3, %v2140_v38, %v3308_v2 }
 0x512   : > { %v3312_v27 = vpop.permute.xlu0 %3311 }
 0x513   : > { %v3335_v11 = vsel %vm1968_vm5, %v3334_v51, %v3312_v27  ;;  %v3571_v51 = vld [vmem:[%s4520_s27 + $0x38] sm:$0xff] }
 0x537   : > { %v3316_v3 = vpop.permute.xlu0 %3315 }
 0x538   : > { %v3336_v55 = vsel %vm1970_vm6, %v3335_v11, %v3316_v3 }
 0x53b   : > { %v3320_v4 = vpop.permute.xlu0 %3319 }
 0x53c   : > { %v3337_v15 = vsel %vm689_vm4, %v3336_v55, %v3320_v4  ;;  %v3929_v55 = vld [vmem:[%s5092_s17] ss:$0 sm:$0xff] }
 0x53f   : > { %v3324_v8 = vpop.permute.xlu0 %3323 }
 0x540   : > { %v3338_v18 = vsel %vm1973_vm7, %v3337_v15, %v3324_v8  ;;  %v3570_v8 = vld [vmem:[%s4520_s27 + $0x30] sm:$0xff]  ;;  %s5093_s27 = scalar_lea.vmem %s5080_s8, %s4488_s19 }
 0x541   : > { %v4254_v11 = vpack.c.bf16 %v3571_v51, %v3570_v8 }
 0x543   : > { %v3328_v59 = vpop.permute.xlu0 %3327 }
 0x544   : > { %v3339_v5 = vsel %vm1975_vm8, %v3338_v18, %v3328_v59 }
 0x547   : > { %v3332_v1 = vpop.permute.xlu1 %3331 }
 0x548   : > { %v3340_v20 = vsel %vm1977_vm9, %v3339_v5, %v3332_v1 }
 0x549   : > { %4202 = vmatmul.mubr.msk.f32.vlgmr.msra.gmra.mrb[30].mxu1 %vm528_vm1, %v3340_v20 }
 0x54a   : > { %4245 = vmatpush3.bf16.msra.mxu1 %v4242_v42  ;;  %v3692_v42 = vrot.slane %v5015_v58, %v3691_v52 }
 0x54b   : > { %4247 = vmatprep.subr.bf16.mxu1 %v4246_v7 }
 0x54e   : > { %4249 = vmatpush3.bf16.msra.mxu1 %v4246_v7 }
 0x54f   : > { %4251 = vmatprep.subr.bf16.mxu1 %v4250_v53 }
 0x552   : > { %4253 = vmatpush3.bf16.msra.mxu1 %v4250_v53 }
 0x553   : > { %4255 = vmatprep.subr.bf16.mxu1 %v4254_v11 }
 0x556   : > { %4257 = vmatpush3.bf16.msra.mxu1 %v4254_v11  ;;  %v3936_v11 = vld [vmem:[%s5082_s10] ss:$0 sm:$0xff] (!%p3935_p5) }
 0x61c   : > { %v4203_v22 = vpop.f32.mrb[30].mxu1 }
 0x61d   : > { %v3428_v24 = vadd.f32 %v4203_v22, %v3926_v47  ;;  %v3422_v25 = vpop.f32.mrb[31].mxu1 }
 0x61e   : > { %v3423_v26 = vadd.f32 %v3926_v47, %v3422_v25  ;;  %v3932_v47 = vld [vmem:[%s5093_s27] ss:$0 sm:$0xff] }
 0x61f   : > { %v3432_v28 = vadd.f32 %v4370_v46, %v3428_v24 }
 0x620   : > { %v3431_v9 = vadd.f32 %v4371_v21, %v3423_v26 }
 0x621   : > { %v3436_v43 = vsel %vm528_vm1, %v3432_v28, 0.0 }
 0x622   : > { %3437 = vadd.xlane.f32.xlu1 %v3436_v43  ;;  %v3433_v23 = vsel %vm528_vm1, %v3431_v9, 0.0 }
 0x623   : > { %3434 = vadd.xlane.f32.xlu0 %v3433_v23 }
 0x6af   : > { %v3438_v29 = vpop.xlane.xlu1 %3437 }
 0x6b0   : > { %v3441_v31 = vmul.f32 0.0625, %v3438_v29  ;;  %v3435_v32 = vpop.xlane.xlu0 %3434 }
 0x6b1   : > { %v3440_v34 = vmul.f32 0.0625, %v3435_v32 }
 0x6b2   : > { %v3443_v35 = vsub.f32 %v3432_v28, %v3441_v31 }
 0x6b3   : > { %v3442_v36 = vsub.f32 %v3431_v9, %v3440_v34 }
 0x6b4   : > { %v3445_v6 = vmul.f32 %v3443_v35, %v3443_v35 }
 0x6b5   : > { %v3444_v38 = vmul.f32 %v3442_v36, %v3442_v36 }
 0x6b6   : > { %v3449_v49 = vsel %vm528_vm1, %v3445_v6, 0.0 }
 0x6b7   : > { %v3446_v40 = vsel %vm528_vm1, %v3444_v38, 0.0 }
 0x6b8   : > { %3447 = vadd.xlane.f32.xlu0 %v3446_v40 }
 0x6bc   : > { %3450 = vadd.xlane.f32.xlu0 %v3449_v49 }
 0x745   : > { %v3448_v48 = vpop.xlane.xlu0 %3447 }
 0x746   : > { %v3452_v44 = vmul.f32 0.0625, %v3448_v48 }
 0x748   : > { %v3454_v56 = vadd.f32 1e-05, %v3452_v44 }
 0x749   : > { %v3451_v13 = vpop.xlane.xlu0 %3450 }
 0x74a   : > { %4362 = vrsqrt.f32 %v3454_v56  ;;  %v3453_v54 = vmul.f32 0.0625, %v3451_v13 }
 0x74c   : > { %v3455_v19 = vadd.f32 1e-05, %v3453_v54 }
 0x74e   : > { %4364 = vrsqrt.f32 %v3455_v19 }
 0x754   : > { %v4363_v61 = vpop.eup %4362 }
 0x755   : > { %v3458_v62 = vmul.f32 %v4363_v61, %v3442_v36 }
 0x757   : > { %v3464_v41 = vmul.f32 %v3463_v39, %v3458_v62 }
 0x758   : > { %v4365_v0 = vpop.eup %4364 }
 0x759   : > { %v3459_v2 = vmul.f32 %v4365_v0, %v3443_v35  ;;  %v3470_v27 = vadd.f32 %v3469_v63, %v3464_v41 }
 0x75b   : > { %v3465_v3 = vmul.f32 %v3463_v39, %v3459_v2  ;;  %4208 = vmatprep.mubr.msk.f32.mxu0 %vm528_vm1, %v3470_v27 }
 0x75d   : > { %v3471_v4 = vadd.f32 %v3469_v63, %v3465_v3 }
 0x75f   : > { %4209 = vmatmul.mubr.msk.f32.vlgmr.msra.gmra.mrb[36].mxu0 %vm528_vm1, %v3471_v4 }
 0x832   : > { %v4210_v59 = vpop.f32.mrb[36].mxu0 }
 0x833   : > { %v3559_v15 = vadd.f32 %v4210_v59, %v3929_v55  ;;  %v3553_v18 = vpop.f32.mrb[37].mxu0  ;;  %v3937_v59 = vld [vmem:[%s5082_s10 + $0x1] ss:$0 sm:$0xff] (!%p3935_p5) }
 0x834   : > { %v3554_v5 = vadd.f32 %v3929_v55, %v3553_v18 }
 0x835   : > { %v3563_v20 = vmax.f32 %v3559_v15, 0.0 }
 0x836   : > { %v3562_v1 = vmax.f32 %v3554_v5, 0.0 }
 0x838   : > { %4227 = vmatprep.mubr.msk.f32.mxu1 %vm3579_vm10, %v3562_v1 }
 0x839   : > { %4228 = vmatmul.mubr.msk.f32.vlgmr.msra.gmra.mrb[32].mxu1 %vm3579_vm10, %v3563_v20 }
 0x90c   : > { %v4229_v22 = vpop.f32.mrb[32].mxu1 }
 0x90d   : > { %v3658_v24 = vadd.f32 %v4229_v22, %v3932_v47  ;;  %v3652_v25 = vpop.f32.mrb[33].mxu1 }
 0x90e   : > { %v3653_v26 = vadd.f32 %v3932_v47, %v3652_v25 }
 0x90f   : > { %v3662_v46 = vadd.f32 %v3658_v24, %v3471_v4 }
 0x910   : > { %v3661_v28 = vadd.f32 %v3653_v26, %v3470_v27 }
 0x911   : > { %v3666_v21 = vsel %vm528_vm1, %v3662_v46, 0.0 }
 0x912   : > { %3667 = vadd.xlane.f32.xlu0 %v3666_v21  ;;  %v3663_v9 = vsel %vm528_vm1, %v3661_v28, 0.0 }
 0x913   : > { %3664 = vadd.xlane.f32.xlu1 %v3663_v9 }
 0x99f   : > { %v3668_v43 = vpop.xlane.xlu0 %3667 }
 0x9a0   : > { %v3670_v23 = vmul.f32 0.0625, %v3668_v43  ;;  %v3665_v29 = vpop.xlane.xlu1 %3664 }
 0x9a1   : > { %v3669_v31 = vmul.f32 0.0625, %v3665_v29 }
 0x9a2   : > { %v3672_v32 = vsub.f32 %v3662_v46, %v3670_v23 }
 0x9a3   : > { %v3671_v34 = vsub.f32 %v3661_v28, %v3669_v31 }
 0x9a4   : > { %v3674_v35 = vmul.f32 %v3672_v32, %v3672_v32 }
 0x9a5   : > { %v3673_v36 = vmul.f32 %v3671_v34, %v3671_v34 }
 0x9a6   : > { %v3678_v38 = vsel %vm528_vm1, %v3674_v35, 0.0 }
 0x9a7   : > { %3679 = vadd.xlane.f32.xlu0 %v3678_v38  ;;  %v3675_v40 = vsel %vm528_vm1, %v3673_v36, 0.0 }
 0x9a8   : > { %3676 = vadd.xlane.f32.xlu1 %v3675_v40 }
 0xa34   : > { %v3680_v6 = vpop.xlane.xlu0 %3679 }
 0xa35   : > { %v3682_v49 = vmul.f32 0.0625, %v3680_v6  ;;  %v3677_v14 = vpop.xlane.xlu1 %3676 }
 0xa36   : > { %v3681_v10 = vmul.f32 0.0625, %v3677_v14 }
 0xa37   : > { %v3684_v50 = vadd.f32 1e-05, %v3682_v49 }
 0xa38   : > { %v3683_v12 = vadd.f32 1e-05, %v3681_v10 }
 0xa39   : > { %4366 = vrsqrt.f32 %v3684_v50 }
 0xa3a   : > { %4368 = vrsqrt.f32 %v3683_v12 }
 0xa43   : > { %v4367_v17 = vpop.eup %4366 }
 0xa44   : > { %v4369_v7 = vpop.eup %4368  ;;  %v3688_v45 = vmul.f32 %v4367_v17, %v3672_v32 }
 0xa45   : > { %v3687_v53 = vmul.f32 %v4369_v7, %v3671_v34  ;;  %3706 = sbr.rel (%p3935_p5) target bundleno = 2953 (0xb89), region = 72 }
 0xa46   : > { %v3694_v48 = vmul.f32 %v3692_v42, %v3688_v45 }
 0xa47   : > { %v3693_v44 = vmul.f32 %v3692_v42, %v3687_v53 }
 0xa48   : > { %v3700_v16 = vadd.f32 %v3698_v33, %v3694_v48 }
 0xa49   : > { %v3699_v56 = vadd.f32 %v3698_v33, %v3693_v44 }
 0xa4a   : > { %3702 = vst.msk [vmem:[%s5083_s11 + $0x8] sm:$0xff] %vm528_vm1, %v3700_v16  ;;  %v3712_v54 = vsel (!%p3935_p5), %vm528_vm1, %v3700_v16, 0.0 }
 0xa4b   : > { %3701 = vst.msk [vmem:[%s5083_s11] sm:$0xff] %vm528_vm1, %v3699_v56  ;;  %v3709_v13 = vsel (!%p3935_p5), %vm528_vm1, %v3699_v56, 0.0 }
 0xa4c   : > { %3710 = vadd.xlane.f32.xlu0 %v3709_v13 }
 0xa50   : > { %3713 = vadd.xlane.f32.xlu0 %v3712_v54 }
 0xad9   : > { %v3711_v57 = vpop.xlane.xlu0 %3710 }
 0xada   : > { %v3715_v19 = vmul.f32 0.0625, %v3711_v57 }
 0xadc   : > { %v3717_v37 = vsub.f32 %v3699_v56, %v3715_v19 }
 0xadd   : > { %v3714_v58 = vpop.xlane.xlu0 %3713 }
 0xade   : > { %v3716_v60 = vmul.f32 0.0625, %v3714_v58  ;;  %v3719_v39 = vmul.f32 %v3717_v37, %v3717_v37 }
 0xae0   : > { %v3718_v61 = vsub.f32 %v3700_v16, %v3716_v60  ;;  %v3721_v62 = vsel %vm528_vm1, %v3719_v39, 0.0 }
 0xae1   : > { %3722 = vadd.xlane.f32.xlu1 %v3721_v62 }
 0xae2   : > { %v3720_v63 = vmul.f32 %v3718_v61, %v3718_v61 }
 0xae4   : > { %v3724_v41 = vsel %vm528_vm1, %v3720_v63, 0.0 }
 0xae5   : > { %3725 = vadd.xlane.f32.xlu1 %v3724_v41 }
 0xb6e   : > { %v3723_v0 = vpop.xlane.xlu1 %3722 }
 0xb6f   : > { %v3727_v2 = vmul.f32 0.0625, %v3723_v0 }
 0xb71   : > { %v3729_v27 = vadd.f32 1e-05, %v3727_v2 }
 0xb72   : > { %v3726_v3 = vpop.xlane.xlu1 %3725 }
 0xb73   : > { %4372 = vrsqrt.f32 %v3729_v27  ;;  %v3728_v4 = vmul.f32 0.0625, %v3726_v3 }
 0xb75   : > { %v3730_v8 = vadd.f32 1e-05, %v3728_v4 }
 0xb77   : > { %4374 = vrsqrt.f32 %v3730_v8 }
 0xb7d   : > { %v4373_v51 = vpop.eup %4372 }
 0xb7e   : > { %v3733_v55 = vmul.f32 %v4373_v51, %v3717_v37 }
 0xb80   : > { %v3739_v15 = vmul.f32 %v3936_v11, %v3733_v55 }
 0xb81   : > { %v4375_v18 = vpop.eup %4374 }
 0xb82   : > { %v3745_v5 = vadd.f32 %v3937_v59, %v3739_v15  ;;  %v3734_v1 = vmul.f32 %v4375_v18, %v3718_v61 }
 0xb84   : > { %3747 = vst.msk [vmem:[%s5083_s11] sm:$0xff] %vm528_vm1, %v3745_v5  ;;  %v3740_v20 = vmul.f32 %v3936_v11, %v3734_v1 }
 0xb86   : > { %v3746_v47 = vadd.f32 %v3937_v59, %v3740_v20 }
 0xb88   : > { %3748 = vst.msk [vmem:[%s5083_s11 + $0x8] sm:$0xff] %vm528_vm1, %v3746_v47 }
 0xb89 PF: > { %s5094_s22 = sld [smem:[#allocation2_spill]] }
 0xb8f   : > { %s21_s17 = sadd.s32 1, %s5094_s22  }
 0xb90   : > { %p18_p6 = scmp.ge.s32.totalorder %s21_s17, 8  }
 0xb92   :  { %20 = sbr.rel (!%p18_p6) target bundleno = 3 (0x3), region = 122 }

// kernel: transformer_forward.3
= control target key start
LH: loop header
LB: loop body
LE: loop exit
PB: predicated region body
PF: predicated region fallthrough
CT: control target
= control target key end

     0   :  { %s9602_s0 = inlined_call_operand.vmem [shape: f32[16,16], index: 0, kind: input, shape index: {}]   ;;  %s9603_s1 = inlined_call_operand.vmem [shape: f32[16,16], index: 1, kind: input, shape index: {}]   ;;  %s9604_s2 = inlined_call_operand.vmem [shape: f32[6,16,48], index: 2, kind: input, shape index: {}]   ;;  %s9605_s3 = inlined_call_operand.vmem [shape: f32[6,1,48], index: 3, kind: input, shape index: {}]   ;;  %s9606_s4 = inlined_call_operand.vmem [shape: f32[6,16,16], index: 4, kind: input, shape index: {}]   ;;  %s9607_s5 = inlined_call_operand.vmem [shape: f32[6,1,16], index: 5, kind: input, shape index: {}]   ;;  %s9608_s6 = inlined_call_operand.vmem [shape: f32[6,16,16], index: 6, kind: input, shape index: {}]   ;;  %s9609_s7 = inlined_call_operand.vmem [shape: f32[6,1,16], index: 7, kind: input, shape index: {}]   ;;  %s9610_s8 = inlined_call_operand.vmem [shape: f32[6,16,32], index: 8, kind: input, shape index: {}]   ;;  %s9611_s9 = inlined_call_operand.vmem [shape: f32[6,1,32], index: 9, kind: input, shape index: {}]   ;;  %s9612_s10 = inlined_call_operand.vmem [shape: f32[6,16,16], index: 10, kind: input, shape index: {}]   ;;  %s9613_s11 = inlined_call_operand.vmem [shape: f32[6,1,16], index: 11, kind: input, shape index: {}]   ;;  %s9614_s12 = inlined_call_operand.vmem [shape: f32[6,16,64], index: 12, kind: input, shape index: {}]   ;;  %s9615_s13 = inlined_call_operand.vmem [shape: f32[6,1,64], index: 13, kind: input, shape index: {}]   ;;  %s9616_s14 = inlined_call_operand.vmem [shape: f32[6,64,16], index: 14, kind: input, shape index: {}]   ;;  %s9617_s15 = inlined_call_operand.vmem [shape: f32[6,1,16], index: 15, kind: input, shape index: {}]   ;;  %s9618_s16 = inlined_call_operand.vmem [shape: f32[6,6,16], index: 16, kind: input, shape index: {}]   ;;  %s9619_s17 = inlined_call_operand.vmem [shape: f32[2,16], index: 17, kind: input, shape index: {}]   ;;  %s9620_s18 = inlined_call_operand.vmem [shape: f32[16,128], index: 18, kind: input, shape index: {}]   ;;  %s9621_s19 = inlined_call_operand.vmem [shape: f32[1,128], index: 19, kind: input, shape index: {}]   ;;  %s9622_s20 = inlined_call_operand.vmem [shape: f32[16,128], index: 20, kind: output, shape index: {}]  }
   0x1   :  { %9658 = sst [smem:[#allocation5_spill]] %s9602_s0 }
   0x2   :  { %9659 = sst [smem:[#allocation6_spill]] %s9603_s1  ;;  %s8475_s1 = smov 0  }
   0x3   :  { %9660 = sst [smem:[#allocation7_spill]] %s9604_s2 }
   0x4   :  { %9661 = sst [smem:[#allocation8_spill]] %s9605_s3 }
   0x5   :  { %9662 = sst [smem:[#allocation9_spill]] %s9606_s4 }
   0x6   :  { %9663 = sst [smem:[#allocation10_spill]] %s9608_s6 }
   0x7   :  { %9664 = sst [smem:[#allocation11_spill]] %s9610_s8 }
   0x8   :  { %9665 = sst [smem:[#allocation12_spill]] %s9612_s10 }
   0x9   :  { %9666 = sst [smem:[#allocation13_spill]] %s9618_s16 }
   0xa   :  { %9667 = sst [smem:[#allocation14_spill]] %s9619_s17 }
   0xb   :  { %9668 = sst [smem:[#allocation15_spill]] %s9620_s18 }
   0xc   :  { %9669 = sst [smem:[#allocation16_spill]] %s9621_s19 }
   0xd   :  { %9670 = sst [smem:[#allocation17_spill]] %s9622_s20 }
   0xe LB: > { %9671 = sst [smem:[#allocation3_spill]] %s8336_s1  ;;  %s8481_s22 = sadd.s32 4294967295, %s8336_s1   ;;  %s8336_s1 = sphi %s8475_s1, %s30_s1  }
   0xf   : > { %9672 = sst [smem:[#allocation4_spill]] %s8481_s22  ;;  %p7396_p0 = scmp.ge.s32.totalorder %s8336_s1, 1 }
  0x10   : > { %p682_p1 = scmp.lt.s32.totalorder %s8336_s1, 7 }
  0x12   : > { %p683_p2 = pnand %p7396_p0, %p682_p1 }
  0x13   : > { %p790_p3 = scmp.lt.s32.totalorder (!%p683_p2), %s8481_s22, 5  ;;  %s9674_s4 = sld [smem:[#allocation7_spill]] (!%p683_p2) }
  0x14   : > { %686 = sbr.rel (%p683_p2) target bundleno = 5576 (0x15c8), region = 100  ;;  %s9675_s21 = sld [smem:[#allocation9_spill]] (!%p683_p2) }
  0x15   : > { %s9676_s6 = sld [smem:[#allocation10_spill]] (!%p683_p2)  ;;  %s9677_s8 = sld [smem:[#allocation11_spill]] (!%p683_p2) }
  0x16   : > { %s9678_s10 = sld [smem:[#allocation12_spill]] (!%p683_p2)  ;;  %s9679_s2 = sld [smem:[#allocation13_spill]] (!%p683_p2) }
  0x17   : > { %s9680_s25 = sld [smem:[#allocation4_spill]] (!%p683_p2) }
  0x1b   : > { %s8487_s23 = scalar_select %p790_p3, %s8481_s22, 5 }
  0x1d   : > { %s7538_s24 = sshll.u32 %s8487_s23, 4  ;;  %s7544_s30 = sshll.u32 %s8487_s23, 6 }
  0x1e   : > { %s794_s29 = scalar_lea.vmem %s9674_s4, %s7538_s24  ;;  %s8500_s1 = scalar_lea.vmem %s9675_s21, %s7538_s24 }
  0x1f   : > { %s8509_s16 = scalar_lea.vmem %s9676_s6, %s7538_s24  ;;  %s8518_s4 = scalar_lea.vmem %s9677_s8, %s7538_s24 }
  0x20   : > { %s8527_s17 = scalar_lea.vmem %s9678_s10, %s7538_s24  ;;  %s8536_s3 = scalar_lea.vmem %s9614_s12, %s7538_s24 }
  0x21   : > { %s8546_s19 = scalar_lea.vmem %s9616_s14, %s7544_s30  ;;  %s7411_s22 = sshll.u32 %s8487_s23, 3 }
  0x22   : > { %s8556_s24 = scalar_lea.vmem %s9679_s2, %s7411_s22  ;;  %p7412_p4 = scmp.ne.s32.totalorder %s9680_s25, 0 }
  0x23   : > { %s9681_s6 = sld [smem:[#allocation5_spill]] (!%p7412_p4)  ;;  %vm858_vm0 = vcmask (!%p7412_p4), 130048  }
  0x24   : > { %853 = sbr.rel (%p7412_p4) target bundleno = 45 (0x2d), region = 104 }
  0x29   : > { %v854_v0 = vld [vmem:[%s9681_s6] sm:$0xff] (!%p7412_p4)  ;;  %v855_v1 = vld [vmem:[%s9681_s6 + $0x8] sm:$0xff] (!%p7412_p4) }
  0x2a   : > { %v856_v2 = vmul.f32 (!%p7412_p4), 4.0, %v854_v0  ;;  %v857_v3 = vmul.f32 (!%p7412_p4), 4.0, %v855_v1 }
  0x2c   : > { %859 = vst.msk [vmem:[#allocation2] sm:$0xff] %vm858_vm0, %v856_v2  ;;  %860 = vst.msk [vmem:[#allocation2 + $0x8] sm:$0xff] %vm858_vm0, %v857_v3 }
  0x2d PF: > { %v866_v4 = vld [vmem:[%s794_s29] sm:$0xff]  ;;  %v867_v5 = vld [vmem:[%s794_s29 + $0x8] sm:$0xff]  ;;  %vm875_vm1 = vcmask 130048   ;;  %v8338_v9 = vmov 0.0   ;;  %vm8339_vm2 = vmmov 0   ;;  %s9682_s26 = sld [smem:[#allocation8_spill]] }
  0x2e   : > { %v8099_v7 = vpack.c.bf16 %v867_v5, %v866_v4  ;;  %7733 = vmatprep.subr.mxu0 %v8338_v9  ;;  %7735 = vmatprep.mubr.msk.f32.mxu0 %vm8339_vm2, %v8338_v9  ;;  %s8340_s0 = smov 96   ;;  %s9630_s20 = smov 112   ;;  %vm960_vm3 = vcmask 15360   ;;  %vm1036_vm4 = vcmask 64512   ;;  %vm2315_vm5 = vcmask 31744  }
  0x2f   : > { %s8342_s22 = smov 110   ;;  %s8343_s2 = smov 126   ;;  %vm2317_vm6 = vcmask 48128   ;;  %vm2320_vm7 = vcmask 80896   ;;  %vm2322_vm8 = vcmask 97280   ;;  %vm2324_vm9 = vcmask 113664  }
  0x30   : > { %8100 = vmatprep.subr.bf16.mxu1 %v8099_v7  ;;  %s9638_s25 = smov 108   ;;  %s9634_s27 = smov 124   ;;  %vm6958_vm10 = vcmask 523264  }
  0x31   : > { %8102 = vmatpush3.bf16.msra.mxu1 %v8099_v7  ;;  %s9632_s28 = smov 122   ;;  %s9644_s21 = smov 106  }
  0x32   : > { %7718 = vmatprep.subr.mxu1 %v8338_v9  ;;  %s9642_s30 = smov 100   ;;  %s9640_s8 = smov 98  }
  0x33   : > { %v861_v6 = vld [vmem:[#allocation2] sm:$0xff]  ;;  %v862_v8 = vld [vmem:[#allocation2 + $0x8] sm:$0xff]  ;;  %s9683_s29 = scalar_lea.vmem %s9682_s26, %s8487_s23  ;;  %s8350_s10 = smov 120  }
  0x34   : > { %7715 = vmatprep.mubr.msk.f32.mxu1 %vm875_vm1, %v861_v6  ;;  %v7413_v10 = vld [vmem:[%s9683_s29] ss:$0 sm:$0xff]  ;;  %s8351_s26 = smov 118   ;;  %s8352_s29 = smov 116  }
  0x35   : > { %7716 = vmatmul.mubr.msk.f32.vlgmr.msra.gmra.mrb[0].mxu1 %vm875_vm1, %v862_v8  ;;  %s9636_s18 = smov 114  }
  0x36   : > { %7720 = vmatprep.mubr.msk.f32.mxu1 %vm8339_vm2, %v8338_v9 }
 0x108   : > { %v7717_v11 = vpop.f32.mrb[0].mxu1 }
 0x109   : > { %v8578_v12 = vadd.f32 %v7717_v11, %v7413_v10  ;;  %v948_v13 = vpop.f32.mrb[1].mxu1 }
 0x10a   : > { %v8580_v14 = vadd.f32 %v7413_v10, %v948_v13 }
 0x10c   : > { %1048 = vrot.lane.b32.xlu1 %v8580_v14, %s8340_s0  ;;  %958 = vrot.lane.b32.xlu0 %v8580_v14, %s9630_s20 }
 0x110   : > { %1126 = vrot.lane.b32.xlu1 %v8580_v14, %s8342_s22 }
 0x114   : > { %1124 = vrot.lane.b32.xlu1 %v8580_v14, %s8343_s2 }
 0x118   : > { %1292 = vrot.lane.b32.xlu1 %v8580_v14, %s9638_s25 }
 0x11c   : > { %1290 = vrot.lane.b32.xlu1 %v8580_v14, %s9634_s27 }
 0x120   : > { %1456 = vrot.lane.b32.xlu1 %v8580_v14, %s9632_s28 }
 0x17e   : > { %v959_v15 = vpop.permute.xlu0 %958  ;;  %v1049_v16 = vpop.permute.xlu1 %1048 }
 0x17f   : > { %7719 = vmatpush3.xpose.msk.msra.mxu1 %vm960_vm3, %v959_v15 }
 0x180   : > { %7723 = vmatprep.subr.mxu1 %v8338_v9 }
 0x182   : > { %7721 = vmatmul.mubr.msk.f32.vlgmr.msra.gmra.mrb[2].mxu1 %vm960_vm3, %v8580_v14  ;;  %v1127_v38 = vpop.permute.xlu1 %1126 }
 0x183   : > { %7724 = vmatpush3.msra.mxu1 %v1049_v16  ;;  %7725 = vmatprep.mubr.msk.f32.mxu1 %vm8339_vm2, %v8338_v9 }
 0x184   : > { %7728 = vmatprep.subr.mxu1 %v8338_v9 }
 0x186   : > { %v1125_v39 = vpop.permute.xlu1 %1124 }
 0x18a   : > { %v1293_v40 = vpop.permute.xlu1 %1292 }
 0x18e   : > { %v1291_v41 = vpop.permute.xlu1 %1290 }
 0x192   : > { %v1457_v42 = vpop.permute.xlu1 %1456 }
 0x255   : > { %v1031_v17 = vpop.f32.mrb[2].mxu1 }
 0x256   : > { %v1035_v18 = vmul.f32 0.70710677, %v1031_v17  ;;  %v7722_v19 = vpop.f32.mrb[3].mxu1 }
 0x258   : > { %v1037_v20 = vsel %vm1036_vm4, %v1035_v18, -inf }
 0x259   : > { %1038 = vmax.xlane.f32.xlu0 %v1037_v20 }
 0x26f   : > { %1458 = vrot.lane.b32.xlu0 %v8580_v14, %s9644_s21 }
 0x273   : > { %1956 = vrot.lane.b32.xlu0 %v8580_v14, %s9642_s30 }
 0x277   : > { %2122 = vrot.lane.b32.xlu0 %v8580_v14, %s9640_s8 }
 0x27b   : > { %2327 = vrot.lane.b32.xlu0 %v8578_v12, %s9630_s20  ;;  %s8354_s20 = smov 94  }
 0x27f   : > { %2491 = vrot.lane.b32.xlu0 %v8578_v12, %s8343_s2 }
 0x283   : > { %2657 = vrot.lane.b32.xlu0 %v8578_v12, %s9634_s27  ;;  %s9646_s27 = smov 102  }
 0x287   : > { %2823 = vrot.lane.b32.xlu0 %v8578_v12, %s9632_s28  ;;  %s8355_s28 = smov 104  }
 0x28b   : > { %2989 = vrot.lane.b32.xlu0 %v8578_v12, %s8350_s10 }
 0x28f   : > { %3155 = vrot.lane.b32.xlu0 %v8578_v12, %s8351_s26 }
 0x293   : > { %3321 = vrot.lane.b32.xlu0 %v8578_v12, %s8352_s29 }
 0x297   : > { %3487 = vrot.lane.b32.xlu0 %v8578_v12, %s9636_s18 }
 0x29b   : > { %1214 = vrot.lane.b32.xlu0 %v8580_v14, %s8354_s20 }
 0x2e6   : > { %v1039_v21 = vpop.xlane.xlu0 %1038 }
 0x2e7   : > { %v1040_v22 = vsub.f32 %v1035_v18, %v1039_v21 }
 0x2e9   : > { %v1041_v23 = vmul.f32 1.442695, %v1040_v22 }
 0x2ea   : > { %v1459_v24 = vpop.permute.xlu0 %1458 }
 0x2eb   : > { %8183 = vpow2.f32 %v1041_v23 }
 0x2ee   : > { %v8628_v25 = vpop.permute.xlu0 %1956 }
 0x2f2   : > { %v8630_v26 = vpop.permute.xlu0 %2122 }
 0x2f5   : > { %v8184_v27 = vpop.eup %8183 }
 0x2f6   : > { %v8632_v28 = vpop.permute.xlu0 %2327  ;;  %v1043_v29 = vsel %vm1036_vm4, %v8184_v27, 0.0 }
 0x2f7   : > { %1044 = vadd.xlane.f32.xlu1 %v1043_v29 }
 0x2fa   : > { %v8635_v30 = vpop.permute.xlu0 %2491 }
 0x2fe   : > { %v8637_v31 = vpop.permute.xlu0 %2657 }
 0x302   : > { %v8639_v32 = vpop.permute.xlu0 %2823 }
 0x306   : > { %v8641_v33 = vpop.permute.xlu0 %2989 }
 0x308   : > { %1624 = vrot.lane.b32.xlu1 %v8580_v14, %s8355_s28 }
 0x30a   : > { %v8645_v34 = vpop.permute.xlu0 %3155 }
 0x30c   : > { %1622 = vrot.lane.b32.xlu1 %v8580_v14, %s8350_s10 }
 0x30e   : > { %v8649_v35 = vpop.permute.xlu0 %3321 }
 0x310   : > { %1790 = vrot.lane.b32.xlu1 %v8580_v14, %s9646_s27 }
 0x312   : > { %v8653_v36 = vpop.permute.xlu0 %3487 }
 0x314   : > { %1788 = vrot.lane.b32.xlu1 %v8580_v14, %s8351_s26 }
 0x316   : > { %v1215_v37 = vpop.permute.xlu0 %1214 }
 0x317   : > { %7734 = vmatpush3.msra.mxu0 %v1215_v37 }
 0x318   : > { %1954 = vrot.lane.b32.xlu1 %v8580_v14, %s8352_s29  ;;  %7743 = vmatprep.subr.mxu0 %v8338_v9 }
 0x31c   : > { %2120 = vrot.lane.b32.xlu1 %v8580_v14, %s9636_s18  ;;  %s8357_s18 = smov 92  }
 0x320   : > { %2493 = vrot.lane.b32.xlu1 %v8578_v12, %s8342_s22 }
 0x324   : > { %2659 = vrot.lane.b32.xlu1 %v8578_v12, %s9638_s25  ;;  %s8358_s25 = smov 90  }
 0x328   : > { %2825 = vrot.lane.b32.xlu1 %v8578_v12, %s9644_s21  ;;  %s8361_s21 = smov 88  }
 0x32c   : > { %2991 = vrot.lane.b32.xlu1 %v8578_v12, %s8355_s28 }
 0x330   : > { %3157 = vrot.lane.b32.xlu1 %v8578_v12, %s9646_s27  ;;  %s8362_s27 = smov 82  }
 0x334   : > { %3323 = vrot.lane.b32.xlu1 %v8578_v12, %s9642_s30  ;;  %s8360_s30 = smov 84  }
 0x338   : > { %3489 = vrot.lane.b32.xlu1 %v8578_v12, %s9640_s8  ;;  %s8359_s8 = smov 86  }
 0x33c   : > { %1380 = vrot.lane.b32.xlu1 %v8580_v14, %s8357_s18 }
 0x340   : > { %1546 = vrot.lane.b32.xlu1 %v8580_v14, %s8358_s25 }
 0x384   : > { %v1045_v43 = vpop.xlane.xlu1 %1044 }
 0x385   : > { %8185 = vrcp.f32 %v1045_v43 }
 0x388   : > { %v1625_v44 = vpop.permute.xlu1 %1624 }
 0x38c   : > { %v1623_v45 = vpop.permute.xlu1 %1622 }
 0x38f   : > { %v8186_v46 = vpop.eup %8185 }
 0x390   : > { %v1791_v47 = vpop.permute.xlu1 %1790  ;;  %v1047_v48 = vmul.f32 %v8186_v46, %v8184_v27 }
 0x392   : > { %7726 = vmatmul.mubr.msk.f32.vlgmr.msra.gmra.mrb[4].mxu1 %vm1036_vm4, %v1047_v48 }
 0x393   : > { %7729 = vmatpush3.xpose.msk.msra.mxu1 %vm960_vm3, %v1127_v38  ;;  %7730 = vmatprep.mubr.msk.f32.mxu1 %vm8339_vm2, %v8338_v9 }
 0x394   : > { %v1789_v49 = vpop.permute.xlu1 %1788  ;;  %7738 = vmatprep.subr.mxu1 %v8338_v9 }
 0x396   : > { %7731 = vmatmul.mubr.msk.f32.vlgmr.msra.gmra.mrb[6].mxu1 %vm960_vm3, %v1125_v39 }
 0x397   : > { %7739 = vmatpush3.xpose.msk.msra.mxu1 %vm960_vm3, %v1293_v40  ;;  %7740 = vmatprep.mubr.msk.f32.mxu1 %vm8339_vm2, %v8338_v9 }
 0x398   : > { %7748 = vmatprep.subr.mxu1 %v8338_v9  ;;  %v1955_v50 = vpop.permute.xlu1 %1954 }
 0x39a   : > { %7741 = vmatmul.mubr.msk.f32.vlgmr.msra.gmra.mrb[8].mxu1 %vm960_vm3, %v1291_v41 }
 0x39b   : > { %7749 = vmatpush3.xpose.msk.msra.mxu1 %vm960_vm3, %v1459_v24  ;;  %7750 = vmatprep.mubr.msk.f32.mxu1 %vm8339_vm2, %v8338_v9 }
 0x39c   : > { %7758 = vmatprep.subr.mxu1 %v8338_v9  ;;  %v2121_v51 = vpop.permute.xlu1 %2120 }
 0x39e   : > { %7751 = vmatmul.mubr.msk.f32.vlgmr.msra.gmra.mrb[10].mxu1 %vm960_vm3, %v1457_v42 }
 0x39f   : > { %7759 = vmatpush3.xpose.msk.msra.mxu1 %vm960_vm3, %v1625_v44  ;;  %7760 = vmatprep.mubr.msk.f32.mxu1 %vm8339_vm2, %v8338_v9 }
 0x3a0   : > { %7768 = vmatprep.subr.mxu1 %v8338_v9  ;;  %v2494_v52 = vpop.permute.xlu1 %2493 }
 0x3a2   : > { %7761 = vmatmul.mubr.msk.f32.vlgmr.msra.gmra.mrb[12].mxu1 %vm960_vm3, %v1623_v45 }
 0x3a3   : > { %7769 = vmatpush3.xpose.msk.msra.mxu1 %vm960_vm3, %v1791_v47  ;;  %7770 = vmatprep.mubr.msk.f32.mxu1 %vm8339_vm2, %v8338_v9 }
 0x3a4   : > { %7778 = vmatprep.subr.mxu1 %v8338_v9  ;;  %v2660_v53 = vpop.permute.xlu1 %2659 }
 0x3a6   : > { %7771 = vmatmul.mubr.msk.f32.vlgmr.msra.gmra.mrb[14].mxu1 %vm960_vm3, %v1789_v49 }
 0x3a7   : > { %7779 = vmatpush3.xpose.msk.msra.mxu1 %vm960_vm3, %v8628_v25  ;;  %7780 = vmatprep.mubr.msk.f32.mxu1 %vm8339_vm2, %v8338_v9 }
 0x3a8   : > { %7788 = vmatprep.subr.mxu1 %v8338_v9  ;;  %v2826_v54 = vpop.permute.xlu1 %2825 }
 0x3aa   : > { %7781 = vmatmul.mubr.msk.f32.vlgmr.msra.gmra.mrb[16].mxu1 %vm960_vm3, %v1955_v50 }
 0x3ab   : > { %7789 = vmatpush3.xpose.msk.msra.mxu1 %vm960_vm3, %v8630_v26  ;;  %7790 = vmatprep.mubr.msk.f32.mxu1 %vm8339_vm2, %v8338_v9 }
 0x3ac   : > { %7798 = vmatprep.subr.mxu1 %v8338_v9  ;;  %v2992_v55 = vpop.permute.xlu1 %2991 }
 0x3ae   : > { %7791 = vmatmul.mubr.msk.f32.vlgmr.msra.gmra.mrb[18].mxu1 %vm960_vm3, %v2121_v51 }
 0x3af   : > { %7799 = vmatpush3.xpose.msk.msra.mxu1 %vm960_vm3, %v8632_v28  ;;  %7800 = vmatprep.mubr.msk.f32.mxu1 %vm8339_vm2, %v8338_v9 }
 0x3b0   : > { %7808 = vmatprep.subr.mxu1 %v8338_v9  ;;  %v3158_v56 = vpop.permute.xlu1 %3157 }
 0x3b2   : > { %7801 = vmatmul.mubr.msk.f32.vlgmr.msra.gmra.mrb[20].mxu1 %vm960_vm3, %v8578_v12 }
 0x3b3   : > { %7809 = vmatpush3.xpose.msk.msra.mxu1 %vm960_vm3, %v2494_v52  ;;  %7810 = vmatprep.mubr.msk.f32.mxu1 %vm8339_vm2, %v8338_v9 }
 0x3b4   : > { %7818 = vmatprep.subr.mxu1 %v8338_v9  ;;  %v3324_v57 = vpop.permute.xlu1 %3323 }
 0x3b6   : > { %7811 = vmatmul.mubr.msk.f32.vlgmr.msra.gmra.mrb[22].mxu1 %vm960_vm3, %v8635_v30 }
 0x3b7   : > { %7819 = vmatpush3.xpose.msk.msra.mxu1 %vm960_vm3, %v2660_v53  ;;  %7820 = vmatprep.mubr.msk.f32.mxu1 %vm8339_vm2, %v8338_v9 }
 0x3b8   : > { %7828 = vmatprep.subr.mxu1 %v8338_v9  ;;  %v3490_v58 = vpop.permute.xlu1 %3489 }
 0x3ba   : > { %7821 = vmatmul.mubr.msk.f32.vlgmr.msra.gmra.mrb[24].mxu1 %vm960_vm3, %v8637_v31 }
 0x3bb   : > { %7829 = vmatpush3.xpose.msk.msra.mxu1 %vm960_vm3, %v2826_v54  ;;  %7830 = vmatprep.mubr.msk.f32.mxu1 %vm8339_vm2, %v8338_v9 }
 0x3bc   : > { %7838 = vmatprep.subr.mxu1 %v8338_v9 }
 0x3be   : > { %7831 = vmatmul.mubr.msk.f32.vlgmr.msra.gmra.mrb[26].mxu1 %vm960_vm3, %v8639_v32 }
 0x3bf   : > { %7839 = vmatpush3.xpose.msk.msra.mxu1 %vm960_vm3, %v2992_v55  ;;  %7840 = vmatprep.mubr.msk.f32.mxu1 %vm8339_vm2, %v8338_v9 }
 0x3c0   : > { %7848 = vmatprep.subr.mxu1 %v8338_v9 }
 0x3c2   : > { %7841 = vmatmul.mubr.msk.f32.vlgmr.msra.gmra.mrb[28].mxu1 %vm960_vm3, %v8641_v33 }
 0x3c3   : > { %7849 = vmatpush3.xpose.msk.msra.mxu1 %vm960_vm3, %v3158_v56  ;;  %7850 = vmatprep.mubr.msk.f32.mxu1 %vm8339_vm2, %v8338_v9 }
 0x3c4   : > { %7858 = vmatprep.subr.mxu1 %v8338_v9 }
 0x3c6   : > { %7851 = vmatmul.mubr.msk.f32.vlgmr.msra.gmra.mrb[30].mxu1 %vm960_vm3, %v8645_v34 }
 0x3c7   : > { %7859 = vmatpush3.xpose.msk.msra.mxu1 %vm960_vm3, %v3324_v57  ;;  %7860 = vmatprep.mubr.msk.f32.mxu1 %vm8339_vm2, %v8338_v9 }
 0x3c8   : > { %7868 = vmatprep.subr.mxu1 %v8338_v9 }
 0x3ca   : > { %7861 = vmatmul.mubr.msk.f32.vlgmr.msra.gmra.mrb[32].mxu1 %vm960_vm3, %v8649_v35 }
 0x3cb   : > { %7869 = vmatpush3.xpose.msk.msra.mxu1 %vm960_vm3, %v3490_v58  ;;  %7870 = vmatprep.mubr.msk.f32.mxu1 %vm8339_vm2, %v8338_v9 }
 0x3ce   : > { %7871 = vmatmul.mubr.msk.f32.vlgmr.msra.gmra.mrb[34].mxu1 %vm960_vm3, %v8653_v36 }
 0x465   : > { %v8766_v59 = vpop.f32.mrb[4].mxu1 }
 0x466   : > { %v7727_v60 = vpop.f32.mrb[5].mxu1 }
 0x469   : > { %v1198_v61 = vpop.f32.mrb[6].mxu1 }
 0x46a   : > { %v8768_v62 = vmul.f32 0.70710677, %v1198_v61  ;;  %v7732_v63 = vpop.f32.mrb[7].mxu1  ;;  %v8834_v61 = vpop.permute.xlu1 %1380 }
 0x46c   : > { %v1203_v0 = vsel %vm1036_vm4, %v8768_v62, -inf }
 0x46d   : > { %1204 = vmax.xlane.f32.xlu1 %v1203_v0  ;;  %v1364_v1 = vpop.f32.mrb[8].mxu1 }
 0x46e   : > { %v8772_v2 = vmul.f32 0.70710677, %v1364_v1  ;;  %v7742_v3 = vpop.f32.mrb[9].mxu1  ;;  %v8836_v63 = vpop.permute.xlu1 %1546 }
 0x470   : > { %v1369_v4 = vsel %vm1036_vm4, %v8772_v2, -inf }
 0x471   : > { %1370 = vmax.xlane.f32.xlu0 %v1369_v4  ;;  %v1530_v5 = vpop.f32.mrb[10].mxu1 }
 0x472   : > { %v8776_v6 = vmul.f32 0.70710677, %v1530_v5  ;;  %v7752_v7 = vpop.f32.mrb[11].mxu1 }
 0x474   : > { %v1535_v8 = vsel %vm1036_vm4, %v8776_v6, -inf }
 0x475   : > { %1536 = vmax.xlane.f32.xlu0 %v1535_v8  ;;  %v1696_v10 = vpop.f32.mrb[12].mxu1 }
 0x476   : > { %v8780_v11 = vmul.f32 0.70710677, %v1696_v10  ;;  %v7762_v13 = vpop.f32.mrb[13].mxu1 }
 0x478   : > { %v1701_v15 = vsel %vm1036_vm4, %v8780_v11, -inf }
 0x479   : > { %1702 = vmax.xlane.f32.xlu1 %v1701_v15  ;;  %v1862_v16 = vpop.f32.mrb[14].mxu1 }
 0x47a   : > { %v8784_v17 = vmul.f32 0.70710677, %v1862_v16  ;;  %v7772_v18 = vpop.f32.mrb[15].mxu1 }
 0x47c   : > { %v1867_v19 = vsel %vm1036_vm4, %v8784_v17, -inf }
 0x47d   : > { %1868 = vmax.xlane.f32.xlu0 %v1867_v19  ;;  %v2028_v20 = vpop.f32.mrb[16].mxu1 }
 0x47e   : > { %v8788_v21 = vmul.f32 0.70710677, %v2028_v20  ;;  %v7782_v22 = vpop.f32.mrb[17].mxu1 }
 0x480   : > { %v2033_v23 = vsel %vm1036_vm4, %v8788_v21, -inf }
 0x481   : > { %2034 = vmax.xlane.f32.xlu1 %v2033_v23  ;;  %v2194_v24 = vpop.f32.mrb[18].mxu1 }
 0x482   : > { %v8792_v25 = vmul.f32 0.70710677, %v2194_v24  ;;  %v7792_v26 = vpop.f32.mrb[19].mxu1 }
 0x484   : > { %v2199_v27 = vsel %vm1036_vm4, %v8792_v25, -inf }
 0x485   : > { %2200 = vmax.xlane.f32.xlu0 %v2199_v27  ;;  %v2399_v28 = vpop.f32.mrb[20].mxu1 }
 0x486   : > { %v8796_v29 = vmul.f32 0.70710677, %v2399_v28  ;;  %v7802_v30 = vpop.f32.mrb[21].mxu1 }
 0x488   : > { %v2404_v31 = vsel %vm1036_vm4, %v8796_v29, -inf }
 0x489   : > { %2405 = vmax.xlane.f32.xlu1 %v2404_v31  ;;  %v2565_v32 = vpop.f32.mrb[22].mxu1 }
 0x48a   : > { %v8800_v33 = vmul.f32 0.70710677, %v2565_v32  ;;  %v7812_v34 = vpop.f32.mrb[23].mxu1 }
 0x48c   : > { %v2570_v35 = vsel %vm1036_vm4, %v8800_v33, -inf }
 0x48d   : > { %2571 = vmax.xlane.f32.xlu0 %v2570_v35  ;;  %v2731_v36 = vpop.f32.mrb[24].mxu1 }
 0x48e   : > { %v8804_v37 = vmul.f32 0.70710677, %v2731_v36  ;;  %v7822_v38 = vpop.f32.mrb[25].mxu1 }
 0x490   : > { %v2736_v39 = vsel %vm1036_vm4, %v8804_v37, -inf }
 0x491   : > { %2737 = vmax.xlane.f32.xlu1 %v2736_v39  ;;  %v2897_v40 = vpop.f32.mrb[26].mxu1 }
 0x492   : > { %v8808_v41 = vmul.f32 0.70710677, %v2897_v40  ;;  %v7832_v42 = vpop.f32.mrb[27].mxu1 }
 0x494   : > { %v2902_v43 = vsel %vm1036_vm4, %v8808_v41, -inf }
 0x495   : > { %2903 = vmax.xlane.f32.xlu0 %v2902_v43  ;;  %v3063_v44 = vpop.f32.mrb[28].mxu1 }
 0x496   : > { %v8812_v45 = vmul.f32 0.70710677, %v3063_v44  ;;  %v7842_v46 = vpop.f32.mrb[29].mxu1 }
 0x498   : > { %v3068_v47 = vsel %vm1036_vm4, %v8812_v45, -inf }
 0x499   : > { %3069 = vmax.xlane.f32.xlu1 %v3068_v47  ;;  %v3229_v48 = vpop.f32.mrb[30].mxu1 }
 0x49a   : > { %v8816_v49 = vmul.f32 0.70710677, %v3229_v48  ;;  %v7852_v50 = vpop.f32.mrb[31].mxu1 }
 0x49c   : > { %v3234_v51 = vsel %vm1036_vm4, %v8816_v49, -inf }
 0x49d   : > { %3235 = vmax.xlane.f32.xlu0 %v3234_v51  ;;  %v3395_v52 = vpop.f32.mrb[32].mxu1 }
 0x49e   : > { %v8820_v53 = vmul.f32 0.70710677, %v3395_v52  ;;  %v7862_v54 = vpop.f32.mrb[33].mxu1 }
 0x4a0   : > { %v3400_v55 = vsel %vm1036_vm4, %v8820_v53, -inf }
 0x4a1   : > { %3401 = vmax.xlane.f32.xlu1 %v3400_v55  ;;  %v3561_v56 = vpop.f32.mrb[34].mxu1 }
 0x4a2   : > { %v8824_v57 = vmul.f32 0.70710677, %v3561_v56  ;;  %v7872_v58 = vpop.f32.mrb[35].mxu1 }
 0x4a4   : > { %v3566_v60 = vsel %vm1036_vm4, %v8824_v57, -inf }
 0x4a5   : > { %3567 = vmax.xlane.f32.xlu0 %v3566_v60 }
 0x4b2   : > { %1878 = vrot.lane.b32.xlu1 %v8580_v14, %s8359_s8 }
 0x4b6   : > { %2044 = vrot.lane.b32.xlu1 %v8580_v14, %s8360_s30 }
 0x4bb   : > { %1712 = vrot.lane.b32.xlu0 %v8580_v14, %s8361_s21 }
 0x4fa   : > { %v1205_v0 = vpop.xlane.xlu1 %1204 }
 0x4fb   : > { %v1206_v1 = vsub.f32 %v8768_v62, %v1205_v0 }
 0x4fd   : > { %v1207_v3 = vmul.f32 1.442695, %v1206_v1 }
 0x4fe   : > { %v1371_v4 = vpop.xlane.xlu0 %1370 }
 0x4ff   : > { %8187 = vpow2.f32 %v1207_v3  ;;  %v1372_v5 = vsub.f32 %v8772_v2, %v1371_v4 }
 0x501   : > { %v1373_v7 = vmul.f32 1.442695, %v1372_v5 }
 0x502   : > { %v1537_v8 = vpop.xlane.xlu0 %1536 }
 0x503   : > { %8189 = vpow2.f32 %v1373_v7  ;;  %v1538_v10 = vsub.f32 %v8776_v6, %v1537_v8 }
 0x505   : > { %v1539_v13 = vmul.f32 1.442695, %v1538_v10 }
 0x506   : > { %v1703_v15 = vpop.xlane.xlu1 %1702 }
 0x507   : > { %8191 = vpow2.f32 %v1539_v13  ;;  %v1704_v16 = vsub.f32 %v8780_v11, %v1703_v15 }
 0x509   : > { %v8842_v18 = vpop.eup %8187  ;;  %v1705_v19 = vmul.f32 1.442695, %v1704_v16 }
 0x50a   : > { %v1869_v20 = vpop.xlane.xlu0 %1868  ;;  %v1209_v62 = vsel %vm1036_vm4, %v8842_v18, 0.0 }
 0x50b   : > { %8193 = vpow2.f32 %v1705_v19  ;;  %v1870_v2 = vsub.f32 %v8784_v17, %v1869_v20  ;;  %1210 = vadd.xlane.f32.xlu1 %v1209_v62 }
 0x50d   : > { %v8847_v22 = vpop.eup %8189  ;;  %v1871_v23 = vmul.f32 1.442695, %v1870_v2 }
 0x50e   : > { %v2035_v6 = vpop.xlane.xlu1 %2034  ;;  %v1375_v24 = vsel %vm1036_vm4, %v8847_v22, 0.0 }
 0x50f   : > { %8195 = vpow2.f32 %v1871_v23  ;;  %v2036_v11 = vsub.f32 %v8788_v21, %v2035_v6  ;;  %1376 = vadd.xlane.f32.xlu0 %v1375_v24 }
 0x511   : > { %v8852_v26 = vpop.eup %8191  ;;  %v2037_v27 = vmul.f32 1.442695, %v2036_v11 }
 0x512   : > { %v2201_v28 = vpop.xlane.xlu0 %2200  ;;  %v1541_v30 = vsel %vm1036_vm4, %v8852_v26, 0.0 }
 0x513   : > { %8197 = vpow2.f32 %v2037_v27  ;;  %v2202_v17 = vsub.f32 %v8792_v25, %v2201_v28  ;;  %1542 = vadd.xlane.f32.xlu1 %v1541_v30 }
 0x515   : > { %v8857_v31 = vpop.eup %8193  ;;  %v2203_v32 = vmul.f32 1.442695, %v2202_v17 }
 0x516   : > { %v2406_v34 = vpop.xlane.xlu1 %2405  ;;  %v1707_v35 = vsel %vm1036_vm4, %v8857_v31, 0.0 }
 0x517   : > { %8199 = vpow2.f32 %v2203_v32  ;;  %v2407_v21 = vsub.f32 %v8796_v29, %v2406_v34  ;;  %1708 = vadd.xlane.f32.xlu0 %v1707_v35 }
 0x519   : > { %v8862_v36 = vpop.eup %8195  ;;  %v2408_v38 = vmul.f32 1.442695, %v2407_v21 }
 0x51a   : > { %v2572_v39 = vpop.xlane.xlu0 %2571  ;;  %v1873_v40 = vsel %vm1036_vm4, %v8862_v36, 0.0 }
 0x51b   : > { %8201 = vpow2.f32 %v2408_v38  ;;  %v2573_v25 = vsub.f32 %v8800_v33, %v2572_v39  ;;  %1874 = vadd.xlane.f32.xlu1 %v1873_v40 }
 0x51d   : > { %v8867_v42 = vpop.eup %8197  ;;  %v2574_v43 = vmul.f32 1.442695, %v2573_v25 }
 0x51e   : > { %v2039_v44 = vsel %vm1036_vm4, %v8867_v42, 0.0  ;;  %v2738_v51 = vpop.xlane.xlu1 %2737 }
 0x51f   : > { %8203 = vpow2.f32 %v2574_v43  ;;  %2040 = vadd.xlane.f32.xlu0 %v2039_v44 }
 0x521   : > { %v8871_v29 = vpop.eup %8199 }
 0x522   : > { %v2205_v46 = vsel %vm1036_vm4, %v8871_v29, 0.0  ;;  %v2904_v52 = vpop.xlane.xlu0 %2903 }
 0x523   : > { %2206 = vadd.xlane.f32.xlu1 %v2205_v46  ;;  %v2905_v4 = vsub.f32 %v8808_v41, %v2904_v52 }
 0x525   : > { %v8875_v47 = vpop.eup %8201  ;;  %v2906_v7 = vmul.f32 1.442695, %v2905_v4 }
 0x526   : > { %v2410_v33 = vsel %vm1036_vm4, %v8875_v47, 0.0  ;;  %v3070_v54 = vpop.xlane.xlu1 %3069 }
 0x527   : > { %2411 = vadd.xlane.f32.xlu1 %v2410_v33  ;;  %v3071_v56 = vsub.f32 %v8812_v45, %v3070_v54 }
 0x529   : > { %v8879_v48 = vpop.eup %8203  ;;  %v3072_v60 = vmul.f32 1.442695, %v3071_v56 }
 0x52a   : > { %v2576_v50 = vsel %vm1036_vm4, %v8879_v48, 0.0  ;;  %v3236_v55 = vpop.xlane.xlu0 %3235 }
 0x52b   : > { %2577 = vadd.xlane.f32.xlu0 %v2576_v50  ;;  %8205 = vpow2.f32 %v3072_v60  ;;  %v3237_v8 = vsub.f32 %v8816_v49, %v3236_v55 }
 0x52e   : > { %v3402_v10 = vpop.xlane.xlu1 %3401 }
 0x532   : > { %v3568_v58 = vpop.xlane.xlu0 %3567  ;;  %v1879_v6 = vpop.permute.xlu1 %1878 }
 0x533   : > { %v3569_v0 = vsub.f32 %v8824_v57, %v3568_v58  ;;  %v3238_v57 = vmul.f32 1.442695, %v3237_v8 }
 0x535   : > { %v3570_v1 = vmul.f32 1.442695, %v3569_v0  ;;  %v8899_v5 = vpop.eup %8205 }
 0x536   : > { %v3074_v45 = vsel %vm1036_vm4, %v8899_v5, 0.0  ;;  %v2045_v24 = vpop.permute.xlu1 %2044  ;;  %v1713_v11 = vpop.permute.xlu0 %1712 }
 0x537   : > { %8207 = vpow2.f32 %v3570_v1 }
 0x538   : > { %2415 = vrot.lane.b32.xlu1 %v8578_v12, %s8340_s0  ;;  %s8364_s0 = smov 4  }
 0x53c   : > { %2581 = vrot.lane.b32.xlu1 %v8578_v12, %s8354_s20  ;;  %s9656_s20 = smov 6  }
 0x540   : > { %2747 = vrot.lane.b32.xlu1 %v8578_v12, %s8357_s18  ;;  %s8363_s18 = smov 2  }
 0x541   : > { %2210 = vrot.lane.b32.xlu0 %v8580_v14, %s8362_s27  ;;  %v2739_v14 = vsub.f32 %v8804_v37, %v2738_v51  ;;  %v8904_v13 = vpop.eup %8207  ;;  %v3403_v37 = vsub.f32 %v8820_v53, %v3402_v10 }
 0x542   : > { %v3572_v41 = vsel %vm1036_vm4, %v8904_v13, 0.0 }
 0x543   : > { %v2740_v3 = vmul.f32 1.442695, %v2739_v14  ;;  %v3404_v15 = vmul.f32 1.442695, %v3403_v37 }
 0x544   : > { %2913 = vrot.lane.b32.xlu1 %v8578_v12, %s8358_s25  ;;  %s9654_s25 = smov 8  }
 0x545   : > { %8209 = vpow2.f32 %v2740_v3 }
 0x546   : > { %8211 = vpow2.f32 %v2906_v7 }
 0x547   : > { %8213 = vpow2.f32 %v3238_v57 }
 0x548   : > { %3079 = vrot.lane.b32.xlu1 %v8578_v12, %s8361_s21  ;;  %8215 = vpow2.f32 %v3404_v15  ;;  %s9650_s21 = smov 12  }
 0x54f   : > { %v8909_v16 = vpop.eup %8209 }
 0x550   : > { %v2742_v49 = vsel %vm1036_vm4, %v8909_v16, 0.0  ;;  %v8913_v19 = vpop.eup %8211 }
 0x551   : > { %v2908_v20 = vsel %vm1036_vm4, %v8913_v19, 0.0  ;;  %v8917_v62 = vpop.eup %8213 }
 0x552   : > { %v3240_v53 = vsel %vm1036_vm4, %v8917_v62, 0.0  ;;  %v8921_v2 = vpop.eup %8215 }
 0x553   : > { %v3406_v23 = vsel %vm1036_vm4, %v8921_v2, 0.0 }
 0x560   : > { %3075 = vadd.xlane.f32.xlu0 %v3074_v45 }
 0x564   : > { %3573 = vadd.xlane.f32.xlu0 %v3572_v41 }
 0x56c   : > { %2743 = vadd.xlane.f32.xlu1 %v2742_v49 }
 0x570   : > { %2909 = vadd.xlane.f32.xlu1 %v2908_v20 }
 0x574   : > { %3241 = vadd.xlane.f32.xlu1 %v3240_v53 }
 0x578   : > { %3407 = vadd.xlane.f32.xlu1 %v3406_v23 }
 0x57a   : > { %3245 = vrot.lane.b32.xlu0 %v8578_v12, %s8359_s8  ;;  %s9685_s8 = sld [smem:[#allocation6_spill]] }
 0x589   : > { %3411 = vrot.lane.b32.xlu1 %v8578_v12, %s8360_s30  ;;  %s9648_s30 = smov 14  }
 0x58d   : > { %3577 = vrot.lane.b32.xlu1 %v8578_v12, %s8362_s27  ;;  %s9652_s27 = smov 10  }
 0x598   : > { %v1211_v27 = vpop.xlane.xlu1 %1210 }
 0x599   : > { %8217 = vrcp.f32 %v1211_v27 }
 0x59c   : > { %v1377_v28 = vpop.xlane.xlu0 %1376 }
 0x59d   : > { %8219 = vrcp.f32 %v1377_v28 }
 0x5a0   : > { %v1543_v30 = vpop.xlane.xlu1 %1542 }
 0x5a1   : > { %8221 = vrcp.f32 %v1543_v30 }
 0x5a3   : > { %v8218_v17 = vpop.eup %8217 }
 0x5a4   : > { %v1709_v32 = vpop.xlane.xlu0 %1708  ;;  %v1213_v34 = vmul.f32 %v8218_v17, %v8842_v18 }
 0x5a5   : > { %8223 = vrcp.f32 %v1709_v32 }
 0x5a6   : > { %7736 = vmatmul.mubr.msk.f32.vlgmr.msra.gmra.mrb[0].mxu0 %vm1036_vm4, %v1213_v34 }
 0x5a7   : > { %v8220_v35 = vpop.eup %8219  ;;  %7744 = vmatpush3.msra.mxu0 %v8834_v61  ;;  %7745 = vmatprep.mubr.msk.f32.mxu0 %vm8339_vm2, %v8338_v9 }
 0x5a8   : > { %v1875_v12 = vpop.xlane.xlu1 %1874  ;;  %7753 = vmatprep.subr.mxu0 %v8338_v9  ;;  %v1379_v21 = vmul.f32 %v8220_v35, %v8847_v22 }
 0x5a9   : > { %8225 = vrcp.f32 %v1875_v12 }
 0x5aa   : > { %7746 = vmatmul.mubr.msk.f32.vlgmr.msra.gmra.mrb[2].mxu0 %vm1036_vm4, %v1379_v21 }
 0x5ab   : > { %v8222_v38 = vpop.eup %8221  ;;  %7754 = vmatpush3.msra.mxu0 %v8836_v63  ;;  %7755 = vmatprep.mubr.msk.f32.mxu0 %vm8339_vm2, %v8338_v9 }
 0x5ac   : > { %v2041_v18 = vpop.xlane.xlu0 %2040  ;;  %7763 = vmatprep.subr.mxu0 %v8338_v9  ;;  %v1545_v61 = vmul.f32 %v8222_v38, %v8852_v26 }
 0x5ad   : > { %8227 = vrcp.f32 %v2041_v18 }
 0x5ae   : > { %7756 = vmatmul.mubr.msk.f32.vlgmr.msra.gmra.mrb[4].mxu0 %vm1036_vm4, %v1545_v61 }
 0x5af   : > { %v8224_v39 = vpop.eup %8223  ;;  %7764 = vmatpush3.msra.mxu0 %v1713_v11  ;;  %7765 = vmatprep.mubr.msk.f32.mxu0 %vm8339_vm2, %v8338_v9 }
 0x5b0   : > { %v2207_v22 = vpop.xlane.xlu1 %2206  ;;  %7773 = vmatprep.subr.mxu0 %v8338_v9  ;;  %v1711_v63 = vmul.f32 %v8224_v39, %v8857_v31  ;;  %v3688_v39 = vld [vmem:[%s8500_s1] sm:$0xff] }
 0x5b1   : > { %8229 = vrcp.f32 %v2207_v22  ;;  %v3689_v22 = vld [vmem:[%s8500_s1 + $0x8] sm:$0xff]  ;;  %s9687_s1 = smov 124  }
 0x5b2   : > { %7766 = vmatmul.mubr.msk.f32.vlgmr.msra.gmra.mrb[6].mxu0 %vm1036_vm4, %v1711_v63 }
 0x5b3   : > { %v8226_v40 = vpop.eup %8225  ;;  %7774 = vmatpush3.msra.mxu0 %v1879_v6  ;;  %7775 = vmatprep.mubr.msk.f32.mxu0 %vm8339_vm2, %v8338_v9 }
 0x5b4   : > { %v2412_v26 = vpop.xlane.xlu1 %2411  ;;  %7783 = vmatprep.subr.mxu0 %v8338_v9  ;;  %v1877_v25 = vmul.f32 %v8226_v40, %v8862_v36  ;;  %v8103_v40 = vpack.c.bf16 %v3689_v22, %v3688_v39 }
 0x5b5   : > { %8231 = vrcp.f32 %v2412_v26 }
 0x5b6   : > { %7776 = vmatmul.mubr.msk.f32.vlgmr.msra.gmra.mrb[8].mxu0 %vm1036_vm4, %v1877_v25  ;;  %8104 = vmatprep.subr.bf16.mxu1 %v8103_v40 }
 0x5b7   : > { %v8228_v43 = vpop.eup %8227  ;;  %7784 = vmatpush3.msra.mxu0 %v2045_v24  ;;  %7785 = vmatprep.mubr.msk.f32.mxu0 %vm8339_vm2, %v8338_v9 }
 0x5b8   : > { %v2578_v31 = vpop.xlane.xlu0 %2577  ;;  %v2043_v44 = vmul.f32 %v8228_v43, %v8867_v42  ;;  %7793 = vmatprep.subr.mxu0 %v8338_v9  ;;  %v2416_v46 = vpop.permute.xlu1 %2415  ;;  %8106 = vmatpush3.bf16.msra.mxu1 %v8103_v40 }
 0x5b9   : > { %8233 = vrcp.f32 %v2578_v31 }
 0x5ba   : > { %7786 = vmatmul.mubr.msk.f32.vlgmr.msra.gmra.mrb[10].mxu0 %vm1036_vm4, %v2043_v44 }
 0x5bb   : > { %v8230_v33 = vpop.eup %8229  ;;  %7795 = vmatprep.mubr.msk.f32.mxu0 %vm8339_vm2, %v8338_v9 }
 0x5bc   : > { %v2211_v36 = vpop.permute.xlu0 %2210  ;;  %v2209_v50 = vmul.f32 %v8230_v33, %v8871_v29  ;;  %v2582_v42 = vpop.permute.xlu1 %2581 }
 0x5bd   : > { %7794 = vmatpush3.msra.mxu0 %v2211_v36 }
 0x5be   : > { %7796 = vmatmul.mubr.msk.f32.vlgmr.msra.gmra.mrb[12].mxu0 %vm1036_vm4, %v2209_v50  ;;  %7803 = vmatprep.subr.mxu0 %v8338_v9 }
 0x5bf   : > { %v8232_v51 = vpop.eup %8231  ;;  %7804 = vmatpush3.msra.mxu0 %v2416_v46  ;;  %7805 = vmatprep.mubr.msk.f32.mxu0 %vm8339_vm2, %v8338_v9 }
 0x5c0   : > { %7813 = vmatprep.subr.mxu0 %v8338_v9  ;;  %v2414_v52 = vmul.f32 %v8232_v51, %v8875_v47  ;;  %v2748_v55 = vpop.permute.xlu1 %2747 }
 0x5c2   : > { %7806 = vmatmul.mubr.msk.f32.vlgmr.msra.gmra.mrb[14].mxu0 %vm1036_vm4, %v2414_v52 }
 0x5c3   : > { %v8234_v54 = vpop.eup %8233  ;;  %7814 = vmatpush3.msra.mxu0 %v2582_v42  ;;  %7815 = vmatprep.mubr.msk.f32.mxu0 %vm8339_vm2, %v8338_v9 }
 0x5c4   : > { %7823 = vmatprep.subr.mxu0 %v8338_v9  ;;  %v2580_v29 = vmul.f32 %v8234_v54, %v8879_v48  ;;  %v2914_v47 = vpop.permute.xlu1 %2913 }
 0x5c6   : > { %7816 = vmatmul.mubr.msk.f32.vlgmr.msra.gmra.mrb[16].mxu0 %vm1036_vm4, %v2580_v29 }
 0x5c7   : > { %7824 = vmatpush3.msra.mxu0 %v2748_v55  ;;  %7825 = vmatprep.mubr.msk.f32.mxu0 %vm8339_vm2, %v8338_v9 }
 0x5c8   : > { %7833 = vmatprep.subr.mxu0 %v8338_v9  ;;  %v3080_v56 = vpop.permute.xlu1 %3079 }
 0x5ed   : > { %v3076_v60 = vpop.xlane.xlu0 %3075 }
 0x5f1   : > { %v3574_v7 = vpop.xlane.xlu0 %3573 }
 0x5f5   : > { %v3246_v37 = vpop.permute.xlu0 %3245 }
 0x5f9   : > { %v2744_v58 = vpop.xlane.xlu1 %2743 }
 0x5fa   : > { %8235 = vrcp.f32 %v2744_v58 }
 0x5fd   : > { %v2910_v0 = vpop.xlane.xlu1 %2909 }
 0x5fe   : > { %8237 = vrcp.f32 %v2910_v0 }
 0x5ff   : > { %8239 = vrcp.f32 %v3076_v60 }
 0x601   : > { %v3242_v1 = vpop.xlane.xlu1 %3241 }
 0x602   : > { %8241 = vrcp.f32 %v3242_v1 }
 0x604   : > { %v8236_v14 = vpop.eup %8235 }
 0x605   : > { %v3408_v48 = vpop.xlane.xlu1 %3407  ;;  %v2746_v3 = vmul.f32 %v8236_v14, %v8909_v16 }
 0x606   : > { %8243 = vrcp.f32 %v3408_v48 }
 0x607   : > { %7826 = vmatmul.mubr.msk.f32.vlgmr.msra.gmra.mrb[18].mxu0 %vm1036_vm4, %v2746_v3  ;;  %8245 = vrcp.f32 %v3574_v7 }
 0x608   : > { %v8238_v4 = vpop.eup %8237  ;;  %7834 = vmatpush3.msra.mxu0 %v2914_v47  ;;  %7835 = vmatprep.mubr.msk.f32.mxu0 %vm8339_vm2, %v8338_v9 }
 0x609   : > { %7843 = vmatprep.subr.mxu0 %v8338_v9  ;;  %v2912_v8 = vmul.f32 %v8238_v4, %v8913_v19  ;;  %v8240_v10 = vpop.eup %8239  ;;  %v3412_v41 = vpop.permute.xlu1 %3411 }
 0x60a   : > { %v3078_v45 = vmul.f32 %v8240_v10, %v8899_v5 }
 0x60b   : > { %7836 = vmatmul.mubr.msk.f32.vlgmr.msra.gmra.mrb[20].mxu0 %vm1036_vm4, %v2912_v8 }
 0x60c   : > { %7844 = vmatpush3.msra.mxu0 %v3080_v56  ;;  %7845 = vmatprep.mubr.msk.f32.mxu0 %vm8339_vm2, %v8338_v9  ;;  %v8242_v57 = vpop.eup %8241 }
 0x60d   : > { %7853 = vmatprep.subr.mxu0 %v8338_v9  ;;  %v3244_v15 = vmul.f32 %v8242_v57, %v8917_v62  ;;  %v3578_v19 = vpop.permute.xlu1 %3577 }
 0x60f   : > { %7846 = vmatmul.mubr.msk.f32.vlgmr.msra.gmra.mrb[22].mxu0 %vm1036_vm4, %v3078_v45 }
 0x610   : > { %7854 = vmatpush3.msra.mxu0 %v3246_v37  ;;  %7855 = vmatprep.mubr.msk.f32.mxu0 %vm8339_vm2, %v8338_v9  ;;  %v8244_v16 = vpop.eup %8243 }
 0x611   : > { %7863 = vmatprep.subr.mxu0 %v8338_v9  ;;  %v3410_v5 = vmul.f32 %v8244_v16, %v8921_v2  ;;  %v8246_v49 = vpop.eup %8245 }
 0x612   : > { %v3576_v20 = vmul.f32 %v8246_v49, %v8904_v13 }
 0x613   : > { %7856 = vmatmul.mubr.msk.f32.vlgmr.msra.gmra.mrb[24].mxu0 %vm1036_vm4, %v3244_v15 }
 0x614   : > { %7864 = vmatpush3.msra.mxu0 %v3412_v41  ;;  %7865 = vmatprep.mubr.msk.f32.mxu0 %vm8339_vm2, %v8338_v9 }
 0x615   : > { %7873 = vmatprep.subr.mxu0 %v8338_v9 }
 0x617   : > { %7866 = vmatmul.mubr.msk.f32.vlgmr.msra.gmra.mrb[26].mxu0 %vm1036_vm4, %v3410_v5 }
 0x618   : > { %7874 = vmatpush3.msra.mxu0 %v3578_v19  ;;  %7875 = vmatprep.mubr.msk.f32.mxu0 %vm8339_vm2, %v8338_v9 }
 0x61b   : > { %7876 = vmatmul.mubr.msk.f32.vlgmr.msra.gmra.mrb[28].mxu0 %vm1036_vm4, %v3576_v20 }
 0x679   : > { %v1286_v62 = vpop.f32.mrb[0].mxu0 }
 0x67a   : > { %2287 = vrot.lane.b32.xlu1 %v1286_v62, %s8363_s18  ;;  %v7737_v53 = vpop.f32.mrb[1].mxu0 }
 0x67d   : > { %v1452_v23 = vpop.f32.mrb[2].mxu0 }
 0x67e   : > { %2291 = vrot.lane.b32.xlu1 %v1452_v23, %s8364_s0  ;;  %v7747_v2 = vpop.f32.mrb[3].mxu0 }
 0x67f   : > { %v8323_v2 = vld [vmem:[#allocation2 + $0x8] sm:$0xff] }
 0x681   : > { %v1618_v6 = vpop.f32.mrb[4].mxu0 }
 0x682   : > { %2295 = vrot.lane.b32.xlu1 %v1618_v6, %s9656_s20  ;;  %v7757_v24 = vpop.f32.mrb[5].mxu0 }
 0x683   : > { %v8324_v24 = vld [vmem:[#allocation2] sm:$0xff] }
 0x685   : > { %v1784_v11 = vpop.f32.mrb[6].mxu0 }
 0x686   : > { %2299 = vrot.lane.b32.xlu1 %v1784_v11, %s9654_s25  ;;  %v7767_v13 = vpop.f32.mrb[7].mxu0 }
 0x689   : > { %v1950_v27 = vpop.f32.mrb[8].mxu0 }
 0x68a   : > { %2303 = vrot.lane.b32.xlu1 %v1950_v27, %s9652_s27  ;;  %v7777_v28 = vpop.f32.mrb[9].mxu0 }
 0x68b   : > { %v3909_v28 = vld [vmem:[%s8518_s4] sm:$0xff] }
 0x68d   : > { %v2116_v30 = vpop.f32.mrb[10].mxu0 }
 0x68e   : > { %2307 = vrot.lane.b32.xlu1 %v2116_v30, %s9650_s21  ;;  %v7787_v17 = vpop.f32.mrb[11].mxu0  ;;  %v3910_v30 = vld [vmem:[%s8518_s4 + $0x8] sm:$0xff]  ;;  %s9690_s4 = smov 108  }
 0x68f   : > { %v863_v17 = vld [vmem:[%s9685_s8] sm:$0xff] }
 0x691   : > { %v2282_v32 = vpop.f32.mrb[12].mxu0 }
 0x692   : > { %v7797_v34 = vpop.f32.mrb[13].mxu0 }
 0x693   : > { %v864_v34 = vld [vmem:[%s9685_s8 + $0x8] sm:$0xff] }
 0x695   : > { %v2487_v35 = vpop.f32.mrb[14].mxu0 }
 0x696   : > { %v7807_v12 = vpop.f32.mrb[15].mxu0 }
 0x699   : > { %v2653_v21 = vpop.f32.mrb[16].mxu0 }
 0x69a   : > { %3654 = vrot.lane.b32.xlu1 %v2653_v21, %s8363_s18  ;;  %v7817_v38 = vpop.f32.mrb[17].mxu0 }
 0x69e   : > { %2311 = vrot.lane.b32.xlu1 %v2282_v32, %s9648_s30  ;;  %v8111_v32 = vpack.c.bf16 %v3910_v30, %v3909_v28 }
 0x6a0   : > { %8112 = vmatprep.subr.bf16.mxu1 %v8111_v32 }
 0x6da   : > { %v2819_v18 = vpop.f32.mrb[18].mxu0 }
 0x6db   : > { %3658 = vrot.lane.b32.xlu0 %v2819_v18, %s8364_s0  ;;  %v7827_v61 = vpop.f32.mrb[19].mxu0 }
 0x6de   : > { %v2985_v63 = vpop.f32.mrb[20].mxu0 }
 0x6df   : > { %3662 = vrot.lane.b32.xlu0 %v2985_v63, %s9656_s20  ;;  %v7837_v26 = vpop.f32.mrb[21].mxu0  ;;  %s9692_s20 = scalar_lea.vmem %s9609_s7, %s8487_s23 }
 0x6e0   : > { %v3819_v26 = vld [vmem:[%s8509_s16] sm:$0xff] }
 0x6e2   : > { %v3151_v25 = vpop.f32.mrb[22].mxu0 }
 0x6e3   : > { %3666 = vrot.lane.b32.xlu0 %v3151_v25, %s9654_s25  ;;  %v7847_v43 = vpop.f32.mrb[23].mxu0  ;;  %v3820_v25 = vld [vmem:[%s8509_s16 + $0x8] sm:$0xff]  ;;  %s9688_s16 = smov 122   ;;  %s9694_s25 = smov 106  }
 0x6e4   : > { %v8107_v43 = vpack.c.bf16 %v3820_v25, %v3819_v26 }
 0x6e6   : > { %v3317_v31 = vpop.f32.mrb[24].mxu0  ;;  %8108 = vmatprep.subr.bf16.mxu0 %v8107_v43 }
 0x6e7   : > { %3670 = vrot.lane.b32.xlu0 %v3317_v31, %s9652_s27  ;;  %v7857_v44 = vpop.f32.mrb[25].mxu0  ;;  %8110 = vmatpush3.bf16.msra.mxu0 %v8107_v43  ;;  %s9691_s27 = smov 102  }
 0x6e8   : > { %7899 = vmatprep.subr.mxu0 %v8338_v9 }
 0x6ea   : > { %v3483_v46 = vpop.f32.mrb[26].mxu0 }
 0x6eb   : > { %3674 = vrot.lane.b32.xlu0 %v3483_v46, %s9650_s21  ;;  %v7867_v33 = vpop.f32.mrb[27].mxu0  ;;  %s9686_s21 = scalar_lea.vmem %s9611_s9, %s8487_s23 }
 0x6ec   : > { %v2288_v36 = vpop.permute.xlu1 %2287  ;;  %v7470_v31 = vld [vmem:[%s9686_s21] ss:$0 sm:$0xff] }
 0x6ed   : > { %v2314_v47 = vsel %vm960_vm3, %v8766_v59, %v2288_v36 }
 0x6ee   : > { %v3649_v50 = vpop.f32.mrb[28].mxu0 }
 0x6ef   : > { %3678 = vrot.lane.b32.xlu1 %v3649_v50, %s9648_s30  ;;  %v7877_v51 = vpop.f32.mrb[29].mxu0  ;;  %s9684_s30 = scalar_lea.vmem %s9607_s5, %s8487_s23 }
 0x6f0   : > { %v2292_v42 = vpop.permute.xlu1 %2291  ;;  %v7464_v19 = vld [vmem:[%s9684_s30] ss:$0 sm:$0xff]  ;;  %s9689_s30 = smov 114  }
 0x6f1   : > { %v2316_v56 = vsel %vm2315_vm5, %v2314_v47, %v2292_v42  ;;  %v3807_v42 = vlaneseq }
 0x6f4   : > { %v2296_v52 = vpop.permute.xlu1 %2295 }
 0x6f5   : > { %v2318_v60 = vsel %vm2317_vm6, %v2316_v56, %v2296_v52 }
 0x6f8   : > { %v2300_v54 = vpop.permute.xlu1 %2299 }
 0x6f9   : > { %v2319_v1 = vsel %vm1036_vm4, %v2318_v60, %v2300_v54 }
 0x6fc   : > { %v2304_v29 = vpop.permute.xlu1 %2303 }
 0x6fd   : > { %v2321_v14 = vsel %vm2320_vm7, %v2319_v1, %v2304_v29 }
 0x700   : > { %v2308_v55 = vpop.permute.xlu1 %2307 }
 0x701   : > { %v2323_v48 = vsel %vm2322_vm8, %v2321_v14, %v2308_v55  ;;  %v9099_v55 = vshrl.u32 %v3807_v42, 7 }
 0x703   : > { %v3809_v56 = vsub.s32 0, %v9099_v55  ;;  %v3815_v60 = vsub.s32 1, %v9099_v55 }
 0x70c   : > { %v3655_v58 = vpop.permute.xlu1 %3654 }
 0x70d   : > { %v3681_v0 = vsel %vm960_vm3, %v2487_v35, %v3655_v58  ;;  %v865_v58 = vld [vmem:[%s8556_s24] sm:$0x3f] }
 0x710   : > { %v2312_v3 = vpop.permute.xlu1 %2311 }
 0x711   : > { %v2325_v59 = vsel %vm2324_vm9, %v2323_v48, %v2312_v3  ;;  %v3816_v48 = vrot.slane %v865_v58, %v3815_v60 }
 0x712   : > { %7882 = vmatprep.mubr.msk.f32.mxu1 %vm875_vm1, %v2325_v59 }
 0x74d   : > { %v3659_v4 = vpop.permute.xlu0 %3658 }
 0x74e   : > { %v3682_v45 = vsel %vm2315_vm5, %v3681_v0, %v3659_v4  ;;  %v3810_v0 = vrot.slane %v865_v58, %v3809_v56 }
 0x751   : > { %v3663_v7 = vpop.permute.xlu0 %3662 }
 0x752   : > { %v3683_v57 = vsel %vm2317_vm6, %v3682_v45, %v3663_v7  ;;  %v7467_v45 = vld [vmem:[%s9692_s20] ss:$0 sm:$0xff]  ;;  %s9693_s20 = smov 112  }
 0x755   : > { %v3667_v8 = vpop.permute.xlu0 %3666 }
 0x756   : > { %v3684_v41 = vsel %vm1036_vm4, %v3683_v57, %v3667_v8 }
 0x759   : > { %v3671_v10 = vpop.permute.xlu0 %3670 }
 0x75a   : > { %v3685_v15 = vsel %vm2320_vm7, %v3684_v41, %v3671_v10 }
 0x75d   : > { %v3675_v37 = vpop.permute.xlu0 %3674 }
 0x75e   : > { %v3686_v16 = vsel %vm2322_vm8, %v3685_v15, %v3675_v37 }
 0x761   : > { %v3679_v5 = vpop.permute.xlu1 %3678 }
 0x762   : > { %v3687_v49 = vsel %vm2324_vm9, %v3686_v16, %v3679_v5 }
 0x763   : > { %7883 = vmatmul.mubr.msk.f32.vlgmr.msra.gmra.mrb[36].mxu1 %vm875_vm1, %v3687_v49 }
 0x764   : > { %7896 = vmatprep.mubr.msk.f32.mxu1 %vm875_vm1, %v863_v17  ;;  %8114 = vmatpush3.bf16.msra.mxu1 %v8111_v32 }
 0x765   : > { %7904 = vmatprep.subr.mxu1 %v8338_v9 }
 0x767   : > { %7897 = vmatmul.mubr.msk.f32.vlgmr.msra.gmra.mrb[38].mxu1 %vm875_vm1, %v864_v34 }
 0x768   : > { %7906 = vmatprep.mubr.msk.f32.mxu1 %vm8339_vm2, %v8338_v9 }
 0x836   : > { %v7884_v20 = vpop.f32.mrb[36].mxu1 }
 0x837   : > { %v3775_v62 = vadd.f32 %v7884_v20, %v7464_v19  ;;  %v3769_v53 = vpop.f32.mrb[37].mxu1 }
 0x838   : > { %v3770_v23 = vadd.f32 %v7464_v19, %v3769_v53 }
 0x839   : > { %v3779_v6 = vadd.f32 %v8323_v2, %v3775_v62 }
 0x83a   : > { %v3778_v11 = vadd.f32 %v8324_v24, %v3770_v23  ;;  %v7898_v44 = vpop.f32.mrb[38].mxu1 }
 0x83b   : > { %v3783_v13 = vsel %vm875_vm1, %v3779_v6, 0.0  ;;  %v3990_v46 = vpop.f32.mrb[39].mxu1  ;;  %v9081_v36 = vadd.f32 %v7898_v44, %v7470_v31 }
 0x83c   : > { %3784 = vadd.xlane.f32.xlu1 %v3783_v13  ;;  %v3780_v27 = vsel %vm875_vm1, %v3778_v11, 0.0  ;;  %v9067_v33 = vadd.f32 %v7470_v31, %v3990_v46 }
 0x83d   : > { %3781 = vadd.xlane.f32.xlu0 %v3780_v27 }
 0x84d   : > { %4331 = vrot.lane.b32.xlu1 %v9067_v33, %s9687_s1 }
 0x8c9   : > { %v3785_v35 = vpop.xlane.xlu1 %3784 }
 0x8ca   : > { %v3788_v12 = vmul.f32 0.0625, %v3785_v35  ;;  %v3782_v21 = vpop.xlane.xlu0 %3781 }
 0x8cb   : > { %v3787_v38 = vmul.f32 0.0625, %v3782_v21 }
 0x8cc   : > { %v3790_v18 = vsub.f32 %v3779_v6, %v3788_v12 }
 0x8cd   : > { %v3789_v61 = vsub.f32 %v3778_v11, %v3787_v38  ;;  %v4332_v19 = vpop.permute.xlu1 %4331 }
 0x8ce   : > { %v3792_v63 = vmul.f32 %v3790_v18, %v3790_v18 }
 0x8cf   : > { %v3791_v39 = vmul.f32 %v3789_v61, %v3789_v61 }
 0x8d0   : > { %v3796_v40 = vsel %vm875_vm1, %v3792_v63, 0.0 }
 0x8d1   : > { %v3793_v22 = vsel %vm875_vm1, %v3791_v39, 0.0 }
 0x8d2   : > { %3794 = vadd.xlane.f32.xlu0 %v3793_v22 }
 0x8d6   : > { %3797 = vadd.xlane.f32.xlu0 %v3796_v40 }
 0x8ec   : > { %4165 = vrot.lane.b32.xlu0 %v9067_v33, %s8343_s2 }
 0x8f0   : > { %4497 = vrot.lane.b32.xlu0 %v9067_v33, %s9688_s16 }
 0x8f4   : > { %4663 = vrot.lane.b32.xlu0 %v9067_v33, %s8350_s10 }
 0x8f8   : > { %4829 = vrot.lane.b32.xlu0 %v9067_v33, %s8351_s26 }
 0x8fc   : > { %4995 = vrot.lane.b32.xlu0 %v9067_v33, %s8352_s29 }
 0x900   : > { %5161 = vrot.lane.b32.xlu0 %v9067_v33, %s9689_s30 }
 0x904   : > { %5526 = vrot.lane.b32.xlu0 %v9081_v36, %s8343_s2 }
 0x908   : > { %5692 = vrot.lane.b32.xlu0 %v9081_v36, %s9687_s1 }
 0x90c   : > { %5858 = vrot.lane.b32.xlu0 %v9081_v36, %s9688_s16 }
 0x910   : > { %6024 = vrot.lane.b32.xlu0 %v9081_v36, %s8350_s10 }
 0x914   : > { %6190 = vrot.lane.b32.xlu0 %v9081_v36, %s8351_s26 }
 0x918   : > { %6356 = vrot.lane.b32.xlu0 %v9081_v36, %s8352_s29 }
 0x91c   : > { %6522 = vrot.lane.b32.xlu0 %v9081_v36, %s9689_s30 }
 0x920   : > { %4253 = vrot.lane.b32.xlu0 %v9067_v33, %s8342_s22 }
 0x924   : > { %4419 = vrot.lane.b32.xlu0 %v9067_v33, %s9690_s4 }
 0x928   : > { %4751 = vrot.lane.b32.xlu0 %v9067_v33, %s8355_s28 }
 0x92c   : > { %4917 = vrot.lane.b32.xlu0 %v9067_v33, %s9691_s27 }
 0x95f   : > { %v3795_v50 = vpop.xlane.xlu0 %3794 }
 0x960   : > { %v3799_v51 = vmul.f32 0.0625, %v3795_v50 }
 0x962   : > { %v3801_v52 = vadd.f32 1e-05, %v3799_v51 }
 0x963   : > { %v3798_v54 = vpop.xlane.xlu0 %3797 }
 0x964   : > { %8247 = vrsqrt.f32 %v3801_v52  ;;  %v3800_v29 = vmul.f32 0.0625, %v3798_v54 }
 0x966   : > { %v3802_v47 = vadd.f32 1e-05, %v3800_v29 }
 0x967   : > { %v4166_v15 = vpop.permute.xlu0 %4165 }
 0x968   : > { %8249 = vrsqrt.f32 %v3802_v47 }
 0x96b   : > { %v4498_v5 = vpop.permute.xlu0 %4497 }
 0x96e   : > { %v8248_v1 = vpop.eup %8247 }
 0x96f   : > { %v3805_v14 = vmul.f32 %v8248_v1, %v3789_v61  ;;  %v4664_v49 = vpop.permute.xlu0 %4663 }
 0x971   : > { %v3811_v3 = vmul.f32 %v3810_v0, %v3805_v14 }
 0x972   : > { %v8250_v59 = vpop.eup %8249 }
 0x973   : > { %v3806_v4 = vmul.f32 %v8250_v59, %v3790_v18  ;;  %v9110_v7 = vadd.f32 %v3816_v48, %v3811_v3  ;;  %v4830_v20 = vpop.permute.xlu0 %4829 }
 0x975   : > { %v3812_v8 = vmul.f32 %v3810_v0, %v3806_v4  ;;  %7889 = vmatprep.mubr.msk.f32.mxu0 %vm875_vm1, %v9110_v7 }
 0x977   : > { %v9116_v10 = vadd.f32 %v3816_v48, %v3812_v8  ;;  %v4996_v23 = vpop.permute.xlu0 %4995 }
 0x979   : > { %7890 = vmatmul.mubr.msk.f32.vlgmr.msra.gmra.mrb[30].mxu0 %vm875_vm1, %v9116_v10 }
 0x97a   : > { %7900 = vmatpush3.xpose.msk.msra.mxu0 %vm960_vm3, %v9067_v33  ;;  %7901 = vmatprep.mubr.msk.f32.mxu0 %vm8339_vm2, %v8338_v9 }
 0x97b   : > { %7909 = vmatprep.subr.mxu0 %v8338_v9  ;;  %v5162_v6 = vpop.permute.xlu0 %5161 }
 0x97f   : > { %v5527_v13 = vpop.permute.xlu0 %5526 }
 0x983   : > { %v5693_v28 = vpop.permute.xlu0 %5692 }
 0x987   : > { %v5859_v32 = vpop.permute.xlu0 %5858 }
 0x98b   : > { %v6025_v35 = vpop.permute.xlu0 %6024 }
 0x98f   : > { %v6191_v38 = vpop.permute.xlu0 %6190 }
 0x993   : > { %v6357_v61 = vpop.permute.xlu0 %6356 }
 0x997   : > { %v6523_v63 = vpop.permute.xlu0 %6522 }
 0xa4c   : > { %v7891_v57 = vpop.f32.mrb[30].mxu0 }
 0xa4d   : > { %v3900_v37 = vpop.f32.mrb[31].mxu0  ;;  %v3906_v16 = vadd.f32 %v7891_v57, %v7467_v45 }
 0xa4e   : > { %v3901_v41 = vadd.f32 %v7467_v45, %v3900_v37 }
 0xa50   : > { %4163 = vrot.lane.b32.xlu1 %v3901_v41, %s8343_s2  ;;  %7902 = vmatmul.mubr.msk.f32.vlgmr.msra.gmra.mrb[32].mxu0 %vm960_vm3, %v3901_v41 }
 0xa51   : > { %7910 = vmatpush3.xpose.msk.msra.mxu0 %vm960_vm3, %v4166_v15  ;;  %7911 = vmatprep.mubr.msk.f32.mxu0 %vm8339_vm2, %v8338_v9 }
 0xa52   : > { %7919 = vmatprep.subr.mxu0 %v8338_v9 }
 0xa54   : > { %4329 = vrot.lane.b32.xlu1 %v3901_v41, %s9687_s1 }
 0xa58   : > { %4495 = vrot.lane.b32.xlu1 %v3901_v41, %s9688_s16 }
 0xa5c   : > { %4661 = vrot.lane.b32.xlu1 %v3901_v41, %s8350_s10 }
 0xa60   : > { %4827 = vrot.lane.b32.xlu1 %v3901_v41, %s8351_s26 }
 0xa64   : > { %4993 = vrot.lane.b32.xlu1 %v3901_v41, %s8352_s29 }
 0xa68   : > { %5159 = vrot.lane.b32.xlu1 %v3901_v41, %s9689_s30 }
 0xa6c   : > { %5524 = vrot.lane.b32.xlu1 %v3906_v16, %s8343_s2  ;;  %s9695_s2 = smov 100  }
 0xa70   : > { %5690 = vrot.lane.b32.xlu1 %v3906_v16, %s9687_s1  ;;  %s9701_s1 = smov 14  }
 0xa74   : > { %5856 = vrot.lane.b32.xlu1 %v3906_v16, %s9688_s16  ;;  %s9703_s16 = scalar_lea.vmem %s9615_s13, %s8487_s23 }
 0xa78   : > { %6022 = vrot.lane.b32.xlu1 %v3906_v16, %s8350_s10  ;;  %s9696_s10 = smov 98  }
 0xa7c   : > { %6188 = vrot.lane.b32.xlu1 %v3906_v16, %s8351_s26  ;;  %s9699_s26 = smov 10  }
 0xa80   : > { %6354 = vrot.lane.b32.xlu1 %v3906_v16, %s8352_s29  ;;  %s9700_s29 = smov 12  }
 0xa84   : > { %6520 = vrot.lane.b32.xlu1 %v3906_v16, %s9689_s30 }
 0xa88   : > { %4087 = vrot.lane.b32.xlu1 %v9067_v33, %s9693_s20 }
 0xa8c   : > { %4585 = vrot.lane.b32.xlu1 %v9067_v33, %s9694_s25 }
 0xac2   : > { %v4164_v62 = vpop.permute.xlu1 %4163 }
 0xac3   : > { %7912 = vmatmul.mubr.msk.f32.vlgmr.msra.gmra.mrb[34].mxu0 %vm960_vm3, %v4164_v62 }
 0xac4   : > { %7920 = vmatpush3.xpose.msk.msra.mxu0 %vm960_vm3, %v4332_v19  ;;  %7921 = vmatprep.mubr.msk.f32.mxu0 %vm8339_vm2, %v8338_v9 }
 0xac5   : > { %7929 = vmatprep.subr.mxu0 %v8338_v9 }
 0xac6   : > { %v4330_v53 = vpop.permute.xlu1 %4329 }
 0xac7   : > { %7922 = vmatmul.mubr.msk.f32.vlgmr.msra.gmra.mrb[36].mxu0 %vm960_vm3, %v4330_v53 }
 0xac8   : > { %7930 = vmatpush3.xpose.msk.msra.mxu0 %vm960_vm3, %v4498_v5  ;;  %7931 = vmatprep.mubr.msk.f32.mxu0 %vm8339_vm2, %v8338_v9 }
 0xac9   : > { %7939 = vmatprep.subr.mxu0 %v8338_v9 }
 0xaca   : > { %v4496_v2 = vpop.permute.xlu1 %4495 }
 0xacb   : > { %7932 = vmatmul.mubr.msk.f32.vlgmr.msra.gmra.mrb[38].mxu0 %vm960_vm3, %v4496_v2 }
 0xacc   : > { %7940 = vmatpush3.xpose.msk.msra.mxu0 %vm960_vm3, %v4664_v49  ;;  %7941 = vmatprep.mubr.msk.f32.mxu0 %vm8339_vm2, %v8338_v9 }
 0xacd   : > { %7949 = vmatprep.subr.mxu0 %v8338_v9 }
 0xace   : > { %v4662_v24 = vpop.permute.xlu1 %4661 }
 0xacf   : > { %7942 = vmatmul.mubr.msk.f32.vlgmr.msra.gmra.mrb[40].mxu0 %vm960_vm3, %v4662_v24 }
 0xad0   : > { %7950 = vmatpush3.xpose.msk.msra.mxu0 %vm960_vm3, %v4830_v20  ;;  %7951 = vmatprep.mubr.msk.f32.mxu0 %vm8339_vm2, %v8338_v9 }
 0xad1   : > { %7959 = vmatprep.subr.mxu0 %v8338_v9 }
 0xad2   : > { %v4828_v11 = vpop.permute.xlu1 %4827 }
 0xad3   : > { %7952 = vmatmul.mubr.msk.f32.vlgmr.msra.gmra.mrb[42].mxu0 %vm960_vm3, %v4828_v11 }
 0xad4   : > { %7960 = vmatpush3.xpose.msk.msra.mxu0 %vm960_vm3, %v4996_v23  ;;  %7961 = vmatprep.mubr.msk.f32.mxu0 %vm8339_vm2, %v8338_v9 }
 0xad5   : > { %7969 = vmatprep.subr.mxu0 %v8338_v9 }
 0xad6   : > { %v4994_v27 = vpop.permute.xlu1 %4993 }
 0xad7   : > { %7962 = vmatmul.mubr.msk.f32.vlgmr.msra.gmra.mrb[44].mxu0 %vm960_vm3, %v4994_v27 }
 0xad8   : > { %7970 = vmatpush3.xpose.msk.msra.mxu0 %vm960_vm3, %v5162_v6  ;;  %7971 = vmatprep.mubr.msk.f32.mxu0 %vm8339_vm2, %v8338_v9 }
 0xad9   : > { %7979 = vmatprep.subr.mxu0 %v8338_v9 }
 0xada   : > { %v5160_v30 = vpop.permute.xlu1 %5159 }
 0xadb   : > { %7972 = vmatmul.mubr.msk.f32.vlgmr.msra.gmra.mrb[46].mxu0 %vm960_vm3, %v5160_v30 }
 0xadc   : > { %7980 = vmatpush3.xpose.msk.msra.mxu0 %vm960_vm3, %v9081_v36  ;;  %7981 = vmatprep.mubr.msk.f32.mxu0 %vm8339_vm2, %v8338_v9 }
 0xadd   : > { %7989 = vmatprep.subr.mxu0 %v8338_v9 }
 0xade   : > { %v5525_v17 = vpop.permute.xlu1 %5524 }
 0xadf   : > { %7982 = vmatmul.mubr.msk.f32.vlgmr.msra.gmra.mrb[48].mxu0 %vm960_vm3, %v3906_v16 }
 0xae0   : > { %7990 = vmatpush3.xpose.msk.msra.mxu0 %vm960_vm3, %v5527_v13  ;;  %7991 = vmatprep.mubr.msk.f32.mxu0 %vm8339_vm2, %v8338_v9 }
 0xae1   : > { %7999 = vmatprep.subr.mxu0 %v8338_v9 }
 0xae2   : > { %v5691_v34 = vpop.permute.xlu1 %5690 }
 0xae3   : > { %7992 = vmatmul.mubr.msk.f32.vlgmr.msra.gmra.mrb[50].mxu0 %vm960_vm3, %v5525_v17 }
 0xae4   : > { %8000 = vmatpush3.xpose.msk.msra.mxu0 %vm960_vm3, %v5693_v28  ;;  %8001 = vmatprep.mubr.msk.f32.mxu0 %vm8339_vm2, %v8338_v9 }
 0xae5   : > { %8009 = vmatprep.subr.mxu0 %v8338_v9 }
 0xae6   : > { %v5857_v12 = vpop.permute.xlu1 %5856 }
 0xae7   : > { %8002 = vmatmul.mubr.msk.f32.vlgmr.msra.gmra.mrb[52].mxu0 %vm960_vm3, %v5691_v34 }
 0xae8   : > { %8010 = vmatpush3.xpose.msk.msra.mxu0 %vm960_vm3, %v5859_v32  ;;  %8011 = vmatprep.mubr.msk.f32.mxu0 %vm8339_vm2, %v8338_v9 }
 0xae9   : > { %8019 = vmatprep.subr.mxu0 %v8338_v9 }
 0xaea   : > { %v6023_v21 = vpop.permute.xlu1 %6022 }
 0xaeb   : > { %8012 = vmatmul.mubr.msk.f32.vlgmr.msra.gmra.mrb[54].mxu0 %vm960_vm3, %v5857_v12 }
 0xaec   : > { %8020 = vmatpush3.xpose.msk.msra.mxu0 %vm960_vm3, %v6025_v35  ;;  %8021 = vmatprep.mubr.msk.f32.mxu0 %vm8339_vm2, %v8338_v9 }
 0xaed   : > { %8029 = vmatprep.subr.mxu0 %v8338_v9 }
 0xaee   : > { %v6189_v18 = vpop.permute.xlu1 %6188 }
 0xaef   : > { %8022 = vmatmul.mubr.msk.f32.vlgmr.msra.gmra.mrb[56].mxu0 %vm960_vm3, %v6023_v21  ;;  %v9273_v21 = vpop.permute.xlu0 %4253 }
 0xaf0   : > { %8030 = vmatpush3.xpose.msk.msra.mxu0 %vm960_vm3, %v6191_v38  ;;  %8031 = vmatprep.mubr.msk.f32.mxu0 %vm8339_vm2, %v8338_v9 }
 0xaf1   : > { %8039 = vmatprep.subr.mxu0 %v8338_v9 }
 0xaf2   : > { %v6355_v39 = vpop.permute.xlu1 %6354 }
 0xaf3   : > { %8032 = vmatmul.mubr.msk.f32.vlgmr.msra.gmra.mrb[58].mxu0 %vm960_vm3, %v6189_v18 }
 0xaf4   : > { %8040 = vmatpush3.xpose.msk.msra.mxu0 %vm960_vm3, %v6357_v61  ;;  %8041 = vmatprep.mubr.msk.f32.mxu0 %vm8339_vm2, %v8338_v9  ;;  %v9275_v61 = vpop.permute.xlu0 %4419 }
 0xaf5   : > { %8049 = vmatprep.subr.mxu0 %v8338_v9 }
 0xaf6   : > { %v6521_v22 = vpop.permute.xlu1 %6520 }
 0xaf7   : > { %8042 = vmatmul.mubr.msk.f32.vlgmr.msra.gmra.mrb[60].mxu0 %vm960_vm3, %v6355_v39 }
 0xaf8   : > { %8050 = vmatpush3.xpose.msk.msra.mxu0 %vm960_vm3, %v6523_v63  ;;  %8051 = vmatprep.mubr.msk.f32.mxu0 %vm8339_vm2, %v8338_v9 }
 0xafa   : > { %v4088_v40 = vpop.permute.xlu1 %4087 }
 0xafb   : > { %7905 = vmatpush3.msra.mxu1 %v4088_v40  ;;  %8052 = vmatmul.mubr.msk.f32.vlgmr.msra.gmra.mrb[62].mxu0 %vm960_vm3, %v6521_v22 }
 0xafc   : > { %7914 = vmatprep.subr.mxu1 %v8338_v9 }
 0xb23   : > { %v4071_v26 = vpop.f32.mrb[32].mxu0 }
 0xb24   : > { %v9225_v25 = vmul.f32 0.70710677, %v4071_v26  ;;  %v7903_v43 = vpop.f32.mrb[33].mxu0  ;;  %v9277_v26 = vpop.permute.xlu0 %4751 }
 0xb26   : > { %v4076_v31 = vsel %vm1036_vm4, %v9225_v25, -inf }
 0xb27   : > { %4077 = vmax.xlane.f32.xlu0 %v4076_v31 }
 0xb28   : > { %v9283_v43 = vpop.permute.xlu0 %4917 }
 0xb96   : > { %v4237_v44 = vpop.f32.mrb[34].mxu0 }
 0xb97   : > { %v9229_v46 = vmul.f32 0.70710677, %v4237_v44  ;;  %v7913_v50 = vpop.f32.mrb[35].mxu0 }
 0xb99   : > { %v4242_v51 = vsel %vm1036_vm4, %v9229_v46, -inf }
 0xb9a   : > { %4243 = vmax.xlane.f32.xlu1 %v4242_v51  ;;  %v4403_v42 = vpop.f32.mrb[36].mxu0 }
 0xb9b   : > { %v9233_v52 = vmul.f32 0.70710677, %v4403_v42  ;;  %v7923_v54 = vpop.f32.mrb[37].mxu0 }
 0xb9d   : > { %v4408_v29 = vsel %vm1036_vm4, %v9233_v52, -inf }
 0xb9e   : > { %4409 = vmax.xlane.f32.xlu0 %v4408_v29  ;;  %v4569_v47 = vpop.f32.mrb[38].mxu0 }
 0xb9f   : > { %v9237_v56 = vmul.f32 0.70710677, %v4569_v47  ;;  %v7933_v58 = vpop.f32.mrb[39].mxu0 }
 0xba1   : > { %v4574_v60 = vsel %vm1036_vm4, %v9237_v56, -inf }
 0xba2   : > { %4575 = vmax.xlane.f32.xlu0 %v4574_v60  ;;  %v4735_v0 = vpop.f32.mrb[40].mxu0 }
 0xba3   : > { %v9241_v1 = vmul.f32 0.70710677, %v4735_v0  ;;  %v7943_v14 = vpop.f32.mrb[41].mxu0 }
 0xba4   : > { %v9306_v14 = vpop.permute.xlu1 %4585 }
 0xba5   : > { %v4740_v48 = vsel %vm1036_vm4, %v9241_v1, -inf }
 0xba6   : > { %4741 = vmax.xlane.f32.xlu0 %v4740_v48  ;;  %v4901_v3 = vpop.f32.mrb[42].mxu0 }
 0xba7   : > { %v9245_v59 = vmul.f32 0.70710677, %v4901_v3  ;;  %v7953_v4 = vpop.f32.mrb[43].mxu0 }
 0xba9   : > { %v4906_v8 = vsel %vm1036_vm4, %v9245_v59, -inf }
 0xbaa   : > { %4907 = vmax.xlane.f32.xlu1 %v4906_v8  ;;  %v5067_v45 = vpop.f32.mrb[44].mxu0 }
 0xbab   : > { %v9249_v57 = vmul.f32 0.70710677, %v5067_v45  ;;  %v7963_v37 = vpop.f32.mrb[45].mxu0 }
 0xbad   : > { %v5072_v41 = vsel %vm1036_vm4, %v9249_v57, -inf }
 0xbae   : > { %5073 = vmax.xlane.f32.xlu0 %v5072_v41  ;;  %v5233_v15 = vpop.f32.mrb[46].mxu0 }
 0xbaf   : > { %v9253_v16 = vmul.f32 0.70710677, %v5233_v15  ;;  %v7973_v5 = vpop.f32.mrb[47].mxu0 }
 0xbb1   : > { %v5238_v49 = vsel %vm1036_vm4, %v9253_v16, -inf }
 0xbb2   : > { %5239 = vmax.xlane.f32.xlu1 %v5238_v49  ;;  %v5432_v19 = vpop.f32.mrb[48].mxu0 }
 0xbb3   : > { %v9257_v20 = vmul.f32 0.70710677, %v5432_v19  ;;  %v7983_v62 = vpop.f32.mrb[49].mxu0 }
 0xbb4   : > { %v4078_v31 = vpop.xlane.xlu0 %4077 }
 0xbb5   : > { %v5437_v53 = vsel %vm1036_vm4, %v9257_v20, -inf  ;;  %v4079_v44 = vsub.f32 %v9225_v25, %v4078_v31 }
 0xbb6   : > { %5438 = vmax.xlane.f32.xlu0 %v5437_v53  ;;  %v5598_v23 = vpop.f32.mrb[50].mxu0 }
 0xbb7   : > { %v9261_v2 = vmul.f32 0.70710677, %v5598_v23  ;;  %v7993_v6 = vpop.f32.mrb[51].mxu0  ;;  %v4080_v50 = vmul.f32 1.442695, %v4079_v44 }
 0xbb9   : > { %v5603_v24 = vsel %vm1036_vm4, %v9261_v2, -inf  ;;  %8251 = vpow2.f32 %v4080_v50 }
 0xbba   : > { %5604 = vmax.xlane.f32.xlu1 %v5603_v24  ;;  %v5764_v11 = vpop.f32.mrb[52].mxu0 }
 0xbbb   : > { %v9265_v13 = vmul.f32 0.70710677, %v5764_v11  ;;  %v8003_v27 = vpop.f32.mrb[53].mxu0 }
 0xbbd   : > { %v5769_v28 = vsel %vm1036_vm4, %v9265_v13, -inf }
 0xbbe   : > { %5770 = vmax.xlane.f32.xlu0 %v5769_v28  ;;  %v5930_v30 = vpop.f32.mrb[54].mxu0 }
 0xbbf   : > { %v9269_v17 = vmul.f32 0.70710677, %v5930_v30  ;;  %v8013_v32 = vpop.f32.mrb[55].mxu0 }
 0xbc1   : > { %v5935_v34 = vsel %vm1036_vm4, %v9269_v17, -inf }
 0xbc2   : > { %5936 = vmax.xlane.f32.xlu1 %v5935_v34  ;;  %v6096_v35 = vpop.f32.mrb[56].mxu0 }
 0xbc3   : > { %v8023_v12 = vpop.f32.mrb[57].mxu0  ;;  %v9286_v51 = vpop.eup %8251  ;;  %v9288_v42 = vmul.f32 0.70710677, %v6096_v35 }
 0xbc4   : > { %v4082_v29 = vsel %vm1036_vm4, %v9286_v51, 0.0 }
 0xbc5   : > { %v6101_v25 = vsel %vm1036_vm4, %v9288_v42, -inf }
 0xbc6   : > { %v6262_v38 = vpop.f32.mrb[58].mxu0 }
 0xbc7   : > { %v8033_v18 = vpop.f32.mrb[59].mxu0  ;;  %v9290_v54 = vmul.f32 0.70710677, %v6262_v38 }
 0xbc9   : > { %v6267_v58 = vsel %vm1036_vm4, %v9290_v54, -inf }
 0xbca   : > { %v6428_v39 = vpop.f32.mrb[60].mxu0 }
 0xbcb   : > { %v8043_v22 = vpop.f32.mrb[61].mxu0  ;;  %v9294_v47 = vmul.f32 0.70710677, %v6428_v39 }
 0xbcd   : > { %v6433_v0 = vsel %vm1036_vm4, %v9294_v47, -inf }
 0xbce   : > { %v6594_v63 = vpop.f32.mrb[62].mxu0 }
 0xbcf   : > { %v8053_v40 = vpop.f32.mrb[63].mxu0 }
 0xbd3   : > { %5083 = vrot.lane.b32.xlu1 %v9067_v33, %s9695_s2 }
 0xbd4   : > { %5249 = vrot.lane.b32.xlu0 %v9067_v33, %s9696_s10  ;;  %v9296_v33 = vmul.f32 0.70710677, %v6594_v63 }
 0xbd6   : > { %v6599_v60 = vsel %vm1036_vm4, %v9296_v33, -inf }
 0xbf3   : > { %4083 = vadd.xlane.f32.xlu0 %v4082_v29 }
 0xbf7   : > { %6268 = vmax.xlane.f32.xlu1 %v6267_v58  ;;  %6102 = vmax.xlane.f32.xlu0 %v6101_v25 }
 0xbfb   : > { %6600 = vmax.xlane.f32.xlu1 %v6599_v60  ;;  %6434 = vmax.xlane.f32.xlu0 %v6433_v0 }
 0xc27   : > { %v4244_v48 = vpop.xlane.xlu1 %4243 }
 0xc28   : > { %v4245_v3 = vsub.f32 %v9229_v46, %v4244_v48 }
 0xc2a   : > { %v4246_v4 = vmul.f32 1.442695, %v4245_v3 }
 0xc2b   : > { %v4410_v8 = vpop.xlane.xlu0 %4409 }
 0xc2c   : > { %8253 = vpow2.f32 %v4246_v4  ;;  %v4411_v45 = vsub.f32 %v9233_v52, %v4410_v8 }
 0xc2e   : > { %v4412_v37 = vmul.f32 1.442695, %v4411_v45 }
 0xc2f   : > { %v4576_v41 = vpop.xlane.xlu0 %4575 }
 0xc30   : > { %8255 = vpow2.f32 %v4412_v37  ;;  %v4577_v15 = vsub.f32 %v9237_v56, %v4576_v41 }
 0xc32   : > { %v4578_v5 = vmul.f32 1.442695, %v4577_v15 }
 0xc33   : > { %v4742_v49 = vpop.xlane.xlu0 %4741 }
 0xc34   : > { %8257 = vpow2.f32 %v4578_v5  ;;  %v4743_v19 = vsub.f32 %v9241_v1, %v4742_v49 }
 0xc36   : > { %v9312_v62 = vpop.eup %8253  ;;  %v4744_v53 = vmul.f32 1.442695, %v4743_v19 }
 0xc37   : > { %v4908_v23 = vpop.xlane.xlu1 %4907  ;;  %v4248_v46 = vsel %vm1036_vm4, %v9312_v62, 0.0 }
 0xc38   : > { %8259 = vpow2.f32 %v4744_v53  ;;  %v4909_v52 = vsub.f32 %v9245_v59, %v4908_v23  ;;  %4249 = vadd.xlane.f32.xlu1 %v4248_v46 }
 0xc3a   : > { %v9317_v6 = vpop.eup %8255  ;;  %v4910_v24 = vmul.f32 1.442695, %v4909_v52 }
 0xc3b   : > { %v4414_v56 = vsel %vm1036_vm4, %v9317_v6, 0.0  ;;  %v5074_v32 = vpop.xlane.xlu0 %5073 }
 0xc3c   : > { %8261 = vpow2.f32 %v4910_v24  ;;  %4415 = vadd.xlane.f32.xlu0 %v4414_v56  ;;  %v5075_v39 = vsub.f32 %v9249_v57, %v5074_v32 }
 0xc3e   : > { %v9321_v1 = vpop.eup %8257  ;;  %v5076_v40 = vmul.f32 1.442695, %v5075_v39 }
 0xc3f   : > { %v4580_v11 = vsel %vm1036_vm4, %v9321_v1, 0.0  ;;  %v5240_v34 = vpop.xlane.xlu1 %5239 }
 0xc40   : > { %4581 = vadd.xlane.f32.xlu1 %v4580_v11  ;;  %v5241_v31 = vsub.f32 %v9253_v16, %v5240_v34 }
 0xc42   : > { %v9325_v27 = vpop.eup %8259  ;;  %v5242_v50 = vmul.f32 1.442695, %v5241_v31 }
 0xc43   : > { %v4746_v59 = vsel %vm1036_vm4, %v9325_v27, 0.0  ;;  %v5439_v35 = vpop.xlane.xlu0 %5438 }
 0xc44   : > { %4747 = vadd.xlane.f32.xlu0 %v4746_v59  ;;  %v5440_v38 = vsub.f32 %v9257_v20, %v5439_v35 }
 0xc46   : > { %v9329_v28 = vpop.eup %8261  ;;  %v5441_v22 = vmul.f32 1.442695, %v5440_v38 }
 0xc47   : > { %v4912_v30 = vsel %vm1036_vm4, %v9329_v28, 0.0  ;;  %v5605_v12 = vpop.xlane.xlu1 %5604 }
 0xc48   : > { %4913 = vadd.xlane.f32.xlu1 %v4912_v30  ;;  %8263 = vpow2.f32 %v5441_v22  ;;  %v5606_v29 = vsub.f32 %v9261_v2, %v5605_v12 }
 0xc49   : > { %8265 = vpow2.f32 %v5076_v40 }
 0xc4a   : > { %v5607_v25 = vmul.f32 1.442695, %v5606_v29 }
 0xc4b   : > { %v5771_v58 = vpop.xlane.xlu0 %5770 }
 0xc4c   : > { %v5772_v20 = vsub.f32 %v9265_v13, %v5771_v58 }
 0xc4e   : > { %v5773_v57 = vmul.f32 1.442695, %v5772_v20 }
 0xc4f   : > { %v5937_v18 = vpop.xlane.xlu1 %5936  ;;  %v9351_v0 = vpop.permute.xlu0 %5249 }
 0xc50   : > { %v5938_v63 = vsub.f32 %v9269_v17, %v5937_v18 }
 0xc52   : > { %v5939_v44 = vmul.f32 1.442695, %v5938_v63  ;;  %v9347_v60 = vpop.eup %8263 }
 0xc53   : > { %v9349_v17 = vpop.eup %8265  ;;  %v5443_v16 = vsel %vm1036_vm4, %v9347_v60, 0.0  ;;  %v9357_v2 = vpop.permute.xlu1 %5083 }
 0xc54   : > { %8267 = vpow2.f32 %v5939_v44  ;;  %v5078_v13 = vsel %vm1036_vm4, %v9349_v17, 0.0 }
 0xc55   : > { %8269 = vpow2.f32 %v5242_v50 }
 0xc56   : > { %8271 = vpow2.f32 %v5607_v25 }
 0xc57   : > { %8273 = vpow2.f32 %v5773_v57 }
 0xc59   : > { %5448 = vrot.lane.b32.xlu1 %v9081_v36, %s9693_s20 }
 0xc5a   : > { %5614 = vrot.lane.b32.xlu0 %v9081_v36, %s8342_s22  ;;  %s9697_s22 = smov 6  }
 0xc5e   : > { %5780 = vrot.lane.b32.xlu0 %v9081_v36, %s9690_s4  ;;  %v9355_v48 = vpop.eup %8267 }
 0xc5f   : > { %v5941_v4 = vsel %vm1036_vm4, %v9355_v48, 0.0  ;;  %v9363_v8 = vpop.eup %8269 }
 0xc60   : > { %v5244_v37 = vsel %vm1036_vm4, %v9363_v8, 0.0  ;;  %v9367_v41 = vpop.eup %8271 }
 0xc61   : > { %v5609_v19 = vsel %vm1036_vm4, %v9367_v41, 0.0  ;;  %v9372_v53 = vpop.eup %8273 }
 0xc62   : > { %5946 = vrot.lane.b32.xlu0 %v9081_v36, %s9694_s25  ;;  %v5775_v56 = vsel %vm1036_vm4, %v9372_v53, 0.0 }
 0xc7d   : > { %5444 = vadd.xlane.f32.xlu1 %v5443_v16 }
 0xc80   : > { %v4084_v3 = vpop.xlane.xlu0 %4083 }
 0xc81   : > { %8275 = vrcp.f32 %v4084_v3  ;;  %5079 = vadd.xlane.f32.xlu0 %v5078_v13  ;;  %5942 = vadd.xlane.f32.xlu1 %v5941_v4 }
 0xc84   : > { %v6269_v45 = vpop.xlane.xlu1 %6268 }
 0xc85   : > { %v6270_v15 = vsub.f32 %v9290_v54, %v6269_v45  ;;  %5245 = vadd.xlane.f32.xlu0 %v5244_v37 }
 0xc87   : > { %v6271_v5 = vmul.f32 1.442695, %v6270_v15 }
 0xc88   : > { %v6601_v49 = vpop.xlane.xlu1 %6600 }
 0xc89   : > { %8277 = vpow2.f32 %v6271_v5  ;;  %v6602_v23 = vsub.f32 %v9296_v33, %v6601_v49  ;;  %5610 = vadd.xlane.f32.xlu0 %v5609_v19 }
 0xc8b   : > { %v8276_v46 = vpop.eup %8275  ;;  %v6603_v52 = vmul.f32 1.442695, %v6602_v23 }
 0xc8c   : > { %v4086_v24 = vmul.f32 %v8276_v46, %v9286_v51 }
 0xc8d   : > { %8279 = vpow2.f32 %v6603_v52  ;;  %5776 = vadd.xlane.f32.xlu0 %v5775_v56 }
 0xc8e   : > { %7907 = vmatmul.mubr.msk.f32.vlgmr.msra.gmra.mrb[40].mxu1 %vm1036_vm4, %v4086_v24 }
 0xc8f   : > { %7915 = vmatpush3.msra.mxu1 %v9273_v21  ;;  %7916 = vmatprep.mubr.msk.f32.mxu1 %vm8339_vm2, %v8338_v9  ;;  %v6103_v21 = vpop.xlane.xlu0 %6102 }
 0xc90   : > { %7924 = vmatprep.subr.mxu1 %v8338_v9  ;;  %v6104_v59 = vsub.f32 %v9288_v42, %v6103_v21 }
 0xc92   : > { %v6105_v32 = vmul.f32 1.442695, %v6104_v59 }
 0xc93   : > { %v9383_v54 = vpop.eup %8277  ;;  %v6435_v30 = vpop.xlane.xlu0 %6434 }
 0xc94   : > { %v6273_v33 = vsel %vm1036_vm4, %v9383_v54, 0.0  ;;  %v6436_v34 = vsub.f32 %v9294_v47, %v6435_v30  ;;  %8281 = vpow2.f32 %v6105_v32 }
 0xc95   : > { %6274 = vadd.xlane.f32.xlu1 %v6273_v33 }
 0xc96   : > { %v6437_v35 = vmul.f32 1.442695, %v6436_v34 }
 0xc97   : > { %v9387_v51 = vpop.eup %8279 }
 0xc98   : > { %v6605_v11 = vsel %vm1036_vm4, %v9387_v51, 0.0  ;;  %8283 = vpow2.f32 %v6437_v35 }
 0xc99   : > { %6606 = vadd.xlane.f32.xlu1 %v6605_v11 }
 0xc9e   : > { %v9397_v12 = vpop.eup %8281 }
 0xc9f   : > { %v6107_v38 = vsel %vm1036_vm4, %v9397_v12, 0.0 }
 0xca2   : > { %v9401_v18 = vpop.eup %8283 }
 0xca3   : > { %6112 = vrot.lane.b32.xlu0 %v9081_v36, %s8355_s28  ;;  %v6439_v22 = vsel %vm1036_vm4, %v9401_v18, 0.0  ;;  %s9698_s28 = smov 8  }
 0xcaa   : > { %6278 = vrot.lane.b32.xlu1 %v9081_v36, %s9691_s27 }
 0xcc2   : > { %6108 = vadd.xlane.f32.xlu0 %v6107_v38 }
 0xcc5   : > { %v4250_v39 = vpop.xlane.xlu1 %4249 }
 0xcc6   : > { %8285 = vrcp.f32 %v4250_v39  ;;  %6440 = vadd.xlane.f32.xlu0 %v6439_v22 }
 0xcc9   : > { %v4416_v42 = vpop.xlane.xlu0 %4415 }
 0xcca   : > { %8287 = vrcp.f32 %v4416_v42 }
 0xccd   : > { %v4582_v47 = vpop.xlane.xlu1 %4581 }
 0xcce   : > { %8289 = vrcp.f32 %v4582_v47 }
 0xcd0   : > { %v8286_v63 = vpop.eup %8285 }
 0xcd1   : > { %v4252_v40 = vmul.f32 %v8286_v63, %v9312_v62  ;;  %v4748_v31 = vpop.xlane.xlu0 %4747 }
 0xcd2   : > { %8291 = vrcp.f32 %v4748_v31 }
 0xcd3   : > { %7917 = vmatmul.mubr.msk.f32.vlgmr.msra.gmra.mrb[42].mxu1 %vm1036_vm4, %v4252_v40 }
 0xcd4   : > { %v8288_v44 = vpop.eup %8287  ;;  %7925 = vmatpush3.msra.mxu1 %v9275_v61  ;;  %7926 = vmatprep.mubr.msk.f32.mxu1 %vm8339_vm2, %v8338_v9 }
 0xcd5   : > { %v4418_v50 = vmul.f32 %v8288_v44, %v9317_v6  ;;  %v4914_v29 = vpop.xlane.xlu1 %4913  ;;  %7934 = vmatprep.subr.mxu1 %v8338_v9 }
 0xcd6   : > { %8293 = vrcp.f32 %v4914_v29 }
 0xcd7   : > { %7927 = vmatmul.mubr.msk.f32.vlgmr.msra.gmra.mrb[44].mxu1 %vm1036_vm4, %v4418_v50 }
 0xcd8   : > { %v8290_v58 = vpop.eup %8289  ;;  %7935 = vmatpush3.msra.mxu1 %v9306_v14  ;;  %7936 = vmatprep.mubr.msk.f32.mxu1 %vm8339_vm2, %v8338_v9 }
 0xcd9   : > { %v4584_v62 = vmul.f32 %v8290_v58, %v9321_v1  ;;  %7944 = vmatprep.subr.mxu1 %v8338_v9  ;;  %v5449_v25 = vpop.permute.xlu1 %5448 }
 0xcdb   : > { %7937 = vmatmul.mubr.msk.f32.vlgmr.msra.gmra.mrb[46].mxu1 %vm1036_vm4, %v4584_v62 }
 0xcdc   : > { %v8292_v61 = vpop.eup %8291  ;;  %7945 = vmatpush3.msra.mxu1 %v9277_v26  ;;  %6444 = vrot.lane.b32.xlu0 %v9081_v36, %s9695_s2 }
 0xcdd   : > { %v4750_v6 = vmul.f32 %v8292_v61, %v9325_v27  ;;  %7946 = vmatprep.mubr.msk.f32.mxu1 %vm8339_vm2, %v8338_v9  ;;  %7954 = vmatprep.subr.mxu1 %v8338_v9 }
 0xcdf   : > { %7947 = vmatmul.mubr.msk.f32.vlgmr.msra.gmra.mrb[48].mxu1 %vm1036_vm4, %v4750_v6 }
 0xce0   : > { %v8294_v14 = vpop.eup %8293  ;;  %7955 = vmatpush3.msra.mxu1 %v9283_v43  ;;  %6610 = vrot.lane.b32.xlu0 %v9081_v36, %s9696_s10  ;;  %v5615_v43 = vpop.permute.xlu0 %5614 }
 0xce1   : > { %v4916_v26 = vmul.f32 %v8294_v14, %v9329_v28  ;;  %7956 = vmatprep.mubr.msk.f32.mxu1 %vm8339_vm2, %v8338_v9  ;;  %7964 = vmatprep.subr.mxu1 %v8338_v9 }
 0xce3   : > { %7957 = vmatmul.mubr.msk.f32.vlgmr.msra.gmra.mrb[50].mxu1 %vm1036_vm4, %v4916_v26 }
 0xce4   : > { %7965 = vmatpush3.msra.mxu1 %v9357_v2  ;;  %7966 = vmatprep.mubr.msk.f32.mxu1 %vm8339_vm2, %v8338_v9  ;;  %v5781_v1 = vpop.permute.xlu0 %5780 }
 0xce5   : > { %7974 = vmatprep.subr.mxu1 %v8338_v9 }
 0xce8   : > { %v5947_v27 = vpop.permute.xlu0 %5946 }
 0xd0a   : > { %v5445_v20 = vpop.xlane.xlu1 %5444 }
 0xd0e   : > { %v5080_v36 = vpop.xlane.xlu0 %5079  ;;  %v5943_v45 = vpop.xlane.xlu1 %5942 }
 0xd0f   : > { %8295 = vrcp.f32 %v5080_v36 }
 0xd12   : > { %v5246_v28 = vpop.xlane.xlu0 %5245 }
 0xd13   : > { %8297 = vrcp.f32 %v5246_v28 }
 0xd14   : > { %8299 = vrcp.f32 %v5445_v20 }
 0xd16   : > { %v5611_v57 = vpop.xlane.xlu0 %5610 }
 0xd17   : > { %8301 = vrcp.f32 %v5611_v57 }
 0xd19   : > { %v8296_v16 = vpop.eup %8295 }
 0xd1a   : > { %v5082_v2 = vmul.f32 %v8296_v16, %v9349_v17  ;;  %v5777_v3 = vpop.xlane.xlu0 %5776 }
 0xd1b   : > { %8303 = vrcp.f32 %v5777_v3 }
 0xd1c   : > { %7967 = vmatmul.mubr.msk.f32.vlgmr.msra.gmra.mrb[52].mxu1 %vm1036_vm4, %v5082_v2  ;;  %8305 = vrcp.f32 %v5943_v45 }
 0xd1d   : > { %v8298_v13 = vpop.eup %8297  ;;  %7975 = vmatpush3.msra.mxu1 %v9351_v0  ;;  %7976 = vmatprep.mubr.msk.f32.mxu1 %vm8339_vm2, %v8338_v9 }
 0xd1e   : > { %v5248_v4 = vmul.f32 %v8298_v13, %v9363_v8  ;;  %7984 = vmatprep.subr.mxu1 %v8338_v9  ;;  %v8300_v37 = vpop.eup %8299  ;;  %v6113_v49 = vpop.permute.xlu0 %6112 }
 0xd1f   : > { %v5447_v17 = vmul.f32 %v8300_v37, %v9347_v60 }
 0xd20   : > { %7977 = vmatmul.mubr.msk.f32.vlgmr.msra.gmra.mrb[54].mxu1 %vm1036_vm4, %v5248_v4 }
 0xd21   : > { %7985 = vmatpush3.msra.mxu1 %v5449_v25  ;;  %7986 = vmatprep.mubr.msk.f32.mxu1 %vm8339_vm2, %v8338_v9  ;;  %v8302_v8 = vpop.eup %8301 }
 0xd22   : > { %7994 = vmatprep.subr.mxu1 %v8338_v9  ;;  %v5613_v0 = vmul.f32 %v8302_v8, %v9367_v41  ;;  %v6275_v19 = vpop.xlane.xlu1 %6274 }
 0xd24   : > { %7987 = vmatmul.mubr.msk.f32.vlgmr.msra.gmra.mrb[56].mxu1 %vm1036_vm4, %v5447_v17 }
 0xd25   : > { %7995 = vmatpush3.msra.mxu1 %v5615_v43  ;;  %7996 = vmatprep.mubr.msk.f32.mxu1 %vm8339_vm2, %v8338_v9  ;;  %v8304_v15 = vpop.eup %8303 }
 0xd26   : > { %8004 = vmatprep.subr.mxu1 %v8338_v9  ;;  %v5779_v60 = vmul.f32 %v8304_v15, %v9372_v53  ;;  %v8306_v5 = vpop.eup %8305  ;;  %v6607_v46 = vpop.xlane.xlu1 %6606 }
 0xd27   : > { %v5945_v41 = vmul.f32 %v8306_v5, %v9355_v48 }
 0xd28   : > { %7997 = vmatmul.mubr.msk.f32.vlgmr.msra.gmra.mrb[58].mxu1 %vm1036_vm4, %v5613_v0 }
 0xd29   : > { %8005 = vmatpush3.msra.mxu1 %v5781_v1  ;;  %8006 = vmatprep.mubr.msk.f32.mxu1 %vm8339_vm2, %v8338_v9  ;;  %v6721_v1 = vld [vmem:[%s8527_s17] sm:$0xff] }
 0xd2a   : > { %8014 = vmatprep.subr.mxu1 %v8338_v9  ;;  %v6279_v56 = vpop.permute.xlu1 %6278 }
 0xd2c   : > { %8007 = vmatmul.mubr.msk.f32.vlgmr.msra.gmra.mrb[60].mxu1 %vm1036_vm4, %v5779_v60 }
 0xd2d   : > { %8015 = vmatpush3.msra.mxu1 %v5947_v27  ;;  %8016 = vmatprep.mubr.msk.f32.mxu1 %vm8339_vm2, %v8338_v9  ;;  %v6722_v27 = vld [vmem:[%s8527_s17 + $0x8] sm:$0xff] }
 0xd2e   : > { %8024 = vmatprep.subr.mxu1 %v8338_v9  ;;  %v8115_v36 = vpack.c.bf16 %v6722_v27, %v6721_v1  ;;  %v6945_v1 = vld [vmem:[%s8546_s19 + $0x10] sm:$0xff] }
 0xd30   : > { %8017 = vmatmul.mubr.msk.f32.vlgmr.msra.gmra.mrb[62].mxu1 %vm1036_vm4, %v5945_v41  ;;  %8116 = vmatprep.subr.bf16.mxu0 %v8115_v36 }
 0xd31   : > { %8025 = vmatpush3.msra.mxu1 %v6113_v49  ;;  %8026 = vmatprep.mubr.msk.f32.mxu1 %vm8339_vm2, %v8338_v9 }
 0xd32   : > { %8034 = vmatprep.subr.mxu1 %v8338_v9  ;;  %8118 = vmatpush3.bf16.msra.mxu0 %v8115_v36  ;;  %v6946_v36 = vld [vmem:[%s8546_s19 + $0x18] sm:$0xff] }
 0xd4f   : > { %v6109_v53 = vpop.xlane.xlu0 %6108 }
 0xd50   : > { %8307 = vrcp.f32 %v6109_v53 }
 0xd51   : > { %8309 = vrcp.f32 %v6275_v19 }
 0xd53   : > { %v6441_v23 = vpop.xlane.xlu0 %6440 }
 0xd54   : > { %8311 = vrcp.f32 %v6441_v23 }
 0xd55   : > { %8313 = vrcp.f32 %v6607_v46 }
 0xd57   : > { %v6445_v11 = vpop.permute.xlu0 %6444 }
 0xd5a   : > { %v8308_v52 = vpop.eup %8307 }
 0xd5b   : > { %v6111_v48 = vmul.f32 %v8308_v52, %v9397_v12  ;;  %v8310_v24 = vpop.eup %8309  ;;  %v6611_v35 = vpop.permute.xlu0 %6610 }
 0xd5c   : > { %v6277_v33 = vmul.f32 %v8310_v24, %v9383_v54 }
 0xd5d   : > { %8027 = vmatmul.mubr.msk.f32.vlgmr.msra.gmra.mrb[64].mxu1 %vm1036_vm4, %v6111_v48 }
 0xd5e   : > { %8035 = vmatpush3.msra.mxu1 %v6279_v56  ;;  %8036 = vmatprep.mubr.msk.f32.mxu1 %vm8339_vm2, %v8338_v9  ;;  %v8312_v21 = vpop.eup %8311 }
 0xd5f   : > { %8044 = vmatprep.subr.mxu1 %v8338_v9  ;;  %v6443_v32 = vmul.f32 %v8312_v21, %v9401_v18  ;;  %v8314_v34 = vpop.eup %8313 }
 0xd60   : > { %v6609_v54 = vmul.f32 %v8314_v34, %v9387_v51 }
 0xd61   : > { %v9476_v59 = vpop.f32.mrb[40].mxu1  ;;  %8037 = vmatmul.mubr.msk.f32.vlgmr.msra.gmra.mrb[66].mxu1 %vm1036_vm4, %v6277_v33 }
 0xd62   : > { %8045 = vmatpush3.msra.mxu1 %v6445_v11  ;;  %v7908_v30 = vpop.f32.mrb[41].mxu1  ;;  %8046 = vmatprep.mubr.msk.f32.mxu1 %vm8339_vm2, %v8338_v9 }
 0xd63   : > { %8054 = vmatprep.subr.mxu1 %v8338_v9 }
 0xd65   : > { %8047 = vmatmul.mubr.msk.f32.vlgmr.msra.gmra.mrb[68].mxu1 %vm1036_vm4, %v6443_v32 }
 0xd66   : > { %8055 = vmatpush3.msra.mxu1 %v6611_v35  ;;  %8056 = vmatprep.mubr.msk.f32.mxu1 %vm8339_vm2, %v8338_v9 }
 0xd69   : > { %8057 = vmatmul.mubr.msk.f32.vlgmr.msra.gmra.mrb[70].mxu1 %vm1036_vm4, %v6609_v54 }
 0xda6   : > { %v4325_v12 = vpop.f32.mrb[42].mxu1 }
 0xda7   : > { %v7918_v38 = vpop.f32.mrb[43].mxu1  ;;  %5326 = vrot.lane.b32.xlu0 %v4325_v12, %s8363_s18 }
 0xdaa   : > { %v4491_v39 = vpop.f32.mrb[44].mxu1 }
 0xdab   : > { %5330 = vrot.lane.b32.xlu0 %v4491_v39, %s8364_s0  ;;  %v7928_v18 = vpop.f32.mrb[45].mxu1 }
 0xdae   : > { %v4657_v22 = vpop.f32.mrb[46].mxu1 }
 0xdaf   : > { %5334 = vrot.lane.b32.xlu1 %v4657_v22, %s9697_s22  ;;  %v7938_v42 = vpop.f32.mrb[47].mxu1 }
 0xdb2   : > { %v4823_v47 = vpop.f32.mrb[48].mxu1 }
 0xdb3   : > { %5338 = vrot.lane.b32.xlu1 %v4823_v47, %s9698_s28  ;;  %v7948_v9 = vpop.f32.mrb[49].mxu1 }
 0xdb6   : > { %v4989_v63 = vpop.f32.mrb[50].mxu1 }
 0xdb7   : > { %5342 = vrot.lane.b32.xlu1 %v4989_v63, %s9699_s26  ;;  %v7958_v51 = vpop.f32.mrb[51].mxu1 }
 0xdef   : > { %v5155_v40 = vpop.f32.mrb[52].mxu1 }
 0xdf0   : > { %5346 = vrot.lane.b32.xlu1 %v5155_v40, %s9700_s29  ;;  %v7968_v31 = vpop.f32.mrb[53].mxu1 }
 0xdf3   : > { %v5321_v44 = vpop.f32.mrb[54].mxu1 }
 0xdf4   : > { %5350 = vrot.lane.b32.xlu1 %v5321_v44, %s9701_s1  ;;  %v7978_v50 = vpop.f32.mrb[55].mxu1 }
 0xdf7   : > { %v5520_v29 = vpop.f32.mrb[56].mxu1 }
 0xdf8   : > { %v7988_v58 = vpop.f32.mrb[57].mxu1 }
 0xdfb   : > { %v5686_v62 = vpop.f32.mrb[58].mxu1 }
 0xdfc   : > { %6687 = vrot.lane.b32.xlu0 %v5686_v62, %s8363_s18  ;;  %v7998_v61 = vpop.f32.mrb[59].mxu1 }
 0xdfd   : > { %v6851_v61 = vld [vmem:[%s8536_s3] sm:$0xff] }
 0xdff   : > { %v5852_v6 = vpop.f32.mrb[60].mxu1 }
 0xe00   : > { %6691 = vrot.lane.b32.xlu0 %v5852_v6, %s8364_s0  ;;  %v8008_v14 = vpop.f32.mrb[61].mxu1  ;;  %s9702_s0 = scalar_lea.vmem %s9613_s11, %s8487_s23  ;;  %v6852_v6 = vld [vmem:[%s8536_s3 + $0x8] sm:$0xff] }
 0xe01   : > { %v7521_v12 = vld [vmem:[%s9702_s0] ss:$0 sm:$0xff]  ;;  %v8119_v14 = vpack.c.bf16 %v6852_v6, %v6851_v61 }
 0xe03   : > { %v6018_v26 = vpop.f32.mrb[62].mxu1  ;;  %8120 = vmatprep.subr.bf16.mxu1 %v8119_v14 }
 0xe04   : > { %6695 = vrot.lane.b32.xlu0 %v6018_v26, %s9697_s22  ;;  %v8018_v43 = vpop.f32.mrb[63].mxu1  ;;  %8122 = vmatpush3.bf16.msra.mxu1 %v8119_v14  ;;  %v6943_v26 = vld [vmem:[%s8546_s19] sm:$0xff] }
 0xe05   : > { %v6944_v43 = vld [vmem:[%s8546_s19 + $0x8] sm:$0xff] }
 0xe06   : > { %v8123_v27 = vpack.c.bf16 %v6944_v43, %v6943_v26  ;;  %v7070_v26 = vsub.s32 4, %v9099_v55  ;;  %v7076_v43 = vsub.s32 5, %v9099_v55 }
 0xe08   : > { %8124 = vmatprep.subr.bf16.mxu0 %v8123_v27 }
 0xe19   : > { %v5327_v37 = vpop.permute.xlu0 %5326 }
 0xe1a   : > { %v5353_v0 = vsel %vm960_vm3, %v9476_v59, %v5327_v37  ;;  %v6841_v37 = vsub.s32 2, %v9099_v55 }
 0xe1d   : > { %v5331_v8 = vpop.permute.xlu0 %5330 }
 0xe1e   : > { %v5354_v15 = vsel %vm2315_vm5, %v5353_v0, %v5331_v8  ;;  %v9543_v8 = vld [vmem:[%s8556_s24] sm:$0x3f] }
 0xe1f   : > { %v6842_v0 = vrot.slane %v9543_v8, %v6841_v37 }
 0xe21   : > { %v5335_v4 = vpop.permute.xlu1 %5334 }
 0xe22   : > { %v5355_v5 = vsel %vm2317_vm6, %v5354_v15, %v5335_v4 }
 0xe25   : > { %v5339_v45 = vpop.permute.xlu1 %5338 }
 0xe26   : > { %v5356_v41 = vsel %vm1036_vm4, %v5355_v5, %v5339_v45 }
 0xe29   : > { %v5343_v17 = vpop.permute.xlu1 %5342 }
 0xe2a   : > { %v5357_v49 = vsel %vm2320_vm7, %v5356_v41, %v5343_v17  ;;  %v6847_v17 = vsub.s32 3, %v9099_v55 }
 0xe2c   : > { %v6848_v5 = vrot.slane %v9543_v8, %v6847_v17 }
 0xe30   : > { %v6184_v25 = vpop.f32.mrb[64].mxu1 }
 0xe31   : > { %6699 = vrot.lane.b32.xlu0 %v6184_v25, %s9698_s28  ;;  %v8028_v28 = vpop.f32.mrb[65].mxu1  ;;  %v8127_v25 = vpack.c.bf16 %v6946_v36, %v6945_v1  ;;  %v7071_v1 = vrot.slane %v9543_v8, %v7070_v26 }
 0xe32   : > { %v6947_v28 = vld [vmem:[%s8546_s19 + $0x20] sm:$0xff] }
 0xe34   : > { %v6350_v20 = vpop.f32.mrb[66].mxu1 }
 0xe35   : > { %6703 = vrot.lane.b32.xlu0 %v6350_v20, %s9699_s26  ;;  %v8038_v57 = vpop.f32.mrb[67].mxu1  ;;  %v6948_v20 = vld [vmem:[%s8546_s19 + $0x28] sm:$0xff] }
 0xe36   : > { %v8131_v57 = vpack.c.bf16 %v6948_v20, %v6947_v28 }
 0xe38   : > { %v6516_v16 = vpop.f32.mrb[68].mxu1 }
 0xe39   : > { %6707 = vrot.lane.b32.xlu0 %v6516_v16, %s9700_s29  ;;  %v8048_v2 = vpop.f32.mrb[69].mxu1 }
 0xe3c   : > { %v6682_v3 = vpop.f32.mrb[70].mxu1 }
 0xe3d   : > { %6711 = vrot.lane.b32.xlu1 %v6682_v3, %s9701_s1  ;;  %v8058_v13 = vpop.f32.mrb[71].mxu1 }
 0xe62   : > { %v5347_v60 = vpop.permute.xlu1 %5346 }
 0xe63   : > { %v5358_v19 = vsel %vm2322_vm8, %v5357_v49, %v5347_v60 }
 0xe66   : > { %v5351_v53 = vpop.permute.xlu1 %5350 }
 0xe67   : > { %v5359_v23 = vsel %vm2324_vm9, %v5358_v19, %v5351_v53 }
 0xe68   : > { %8063 = vmatprep.mubr.msk.f32.mxu0 %vm875_vm1, %v5359_v23 }
 0xe6e   : > { %v6688_v46 = vpop.permute.xlu0 %6687 }
 0xe6f   : > { %v6714_v33 = vsel %vm960_vm3, %v5520_v29, %v6688_v46 }
 0xe72   : > { %v6692_v52 = vpop.permute.xlu0 %6691 }
 0xe73   : > { %v6715_v11 = vsel %vm2315_vm5, %v6714_v33, %v6692_v52  ;;  %v6949_v52 = vld [vmem:[%s8546_s19 + $0x30] sm:$0xff] }
 0xe76   : > { %v6696_v48 = vpop.permute.xlu0 %6695 }
 0xe77   : > { %v6716_v21 = vsel %vm2317_vm6, %v6715_v11, %v6696_v48  ;;  %v6950_v48 = vld [vmem:[%s8546_s19 + $0x38] sm:$0xff]  ;;  %s9704_s19 = scalar_lea.vmem %s9617_s15, %s8487_s23  ;;  %s9705_s23 = sld [smem:[#allocation4_spill]] }
 0xe7d   : > { %p7530_p5 = scmp.ne.s32.totalorder %s9705_s23, 5 }
 0xe7e   : > { %s9706_s20 = sld [smem:[#allocation15_spill]] (!%p7530_p5)  ;;  %s9707_s28 = sld [smem:[#allocation14_spill]] (!%p7530_p5) }
 0xe7f   : > { %s9708_s18 = sld [smem:[#allocation16_spill]] (!%p7530_p5)  ;;  %s9709_s24 = sld [smem:[#allocation17_spill]] (!%p7530_p5) }
 0xea3   : > { %v6700_v24 = vpop.permute.xlu0 %6699 }
 0xea4   : > { %v6717_v30 = vsel %vm1036_vm4, %v6716_v21, %v6700_v24  ;;  %v8135_v24 = vpack.c.bf16 %v6950_v48, %v6949_v52 }
 0xea7   : > { %v6704_v56 = vpop.permute.xlu0 %6703 }
 0xea8   : > { %v6718_v32 = vsel %vm2320_vm7, %v6717_v30, %v6704_v56  ;;  %v7524_v56 = vld [vmem:[%s9703_s16] ss:$0 sm:$0xff] }
 0xeab   : > { %v6708_v59 = vpop.permute.xlu0 %6707 }
 0xeac   : > { %v6719_v34 = vsel %vm2322_vm8, %v6718_v32, %v6708_v59 }
 0xeaf   : > { %v6712_v35 = vpop.permute.xlu1 %6711 }
 0xeb0   : > { %v6720_v54 = vsel %vm2324_vm9, %v6719_v34, %v6712_v35  ;;  %v7527_v34 = vld [vmem:[%s9704_s19] ss:$0 sm:$0xff] }
 0xeb1   : > { %8064 = vmatmul.mubr.msk.f32.vlgmr.msra.gmra.mrb[64].mxu0 %vm875_vm1, %v6720_v54 }
 0xeb2   : > { %8126 = vmatpush3.bf16.msra.mxu0 %v8123_v27 }
 0xeb3   : > { %8128 = vmatprep.subr.bf16.mxu0 %v8127_v25 }
 0xeb6   : > { %8130 = vmatpush3.bf16.msra.mxu0 %v8127_v25  ;;  %v7077_v25 = vrot.slane %v9543_v8, %v7076_v43 }
 0xeb7   : > { %8132 = vmatprep.subr.bf16.mxu0 %v8131_v57 }
 0xeba   : > { %8134 = vmatpush3.bf16.msra.mxu0 %v8131_v57 }
 0xebb   : > { %8136 = vmatprep.subr.bf16.mxu0 %v8135_v24 }
 0xebe   : > { %8138 = vmatpush3.bf16.msra.mxu0 %v8135_v24 }
 0xf84   : > { %v8065_v38 = vpop.f32.mrb[64].mxu0 }
 0xf85   : > { %v6808_v39 = vadd.f32 %v8065_v38, %v7521_v12  ;;  %v6802_v18 = vpop.f32.mrb[65].mxu0 }
 0xf86   : > { %v6803_v22 = vadd.f32 %v7521_v12, %v6802_v18 }
 0xf87   : > { %v6812_v42 = vadd.f32 %v6808_v39, %v9116_v10 }
 0xf88   : > { %v6811_v47 = vadd.f32 %v6803_v22, %v9110_v7 }
 0xf89   : > { %v6816_v9 = vsel %vm875_vm1, %v6812_v42, 0.0 }
 0xf8a   : > { %6817 = vadd.xlane.f32.xlu1 %v6816_v9  ;;  %v6813_v63 = vsel %vm875_vm1, %v6811_v47, 0.0 }
 0xf8b   : > { %6814 = vadd.xlane.f32.xlu0 %v6813_v63 }
0x1017   : > { %v6818_v51 = vpop.xlane.xlu1 %6817 }
0x1018   : > { %v6820_v40 = vmul.f32 0.0625, %v6818_v51  ;;  %v6815_v31 = vpop.xlane.xlu0 %6814 }
0x1019   : > { %v6819_v44 = vmul.f32 0.0625, %v6815_v31 }
0x101a   : > { %v6822_v50 = vsub.f32 %v6812_v42, %v6820_v40 }
0x101b   : > { %v6821_v29 = vsub.f32 %v6811_v47, %v6819_v44 }
0x101c   : > { %v6824_v58 = vmul.f32 %v6822_v50, %v6822_v50 }
0x101d   : > { %v6823_v10 = vmul.f32 %v6821_v29, %v6821_v29 }
0x101e   : > { %v6828_v62 = vsel %vm875_vm1, %v6824_v58, 0.0 }
0x101f   : > { %v6825_v7 = vsel %vm875_vm1, %v6823_v10, 0.0 }
0x1020   : > { %6826 = vadd.xlane.f32.xlu0 %v6825_v7 }
0x1024   : > { %6829 = vadd.xlane.f32.xlu0 %v6828_v62 }
0x10ad   : > { %v6827_v16 = vpop.xlane.xlu0 %6826 }
0x10ae   : > { %v6831_v2 = vmul.f32 0.0625, %v6827_v16 }
0x10b0   : > { %v6833_v3 = vadd.f32 1e-05, %v6831_v2 }
0x10b1   : > { %v6830_v13 = vpop.xlane.xlu0 %6829 }
0x10b2   : > { %8315 = vrsqrt.f32 %v6833_v3  ;;  %v6832_v4 = vmul.f32 0.0625, %v6830_v13 }
0x10b4   : > { %v6834_v45 = vadd.f32 1e-05, %v6832_v4 }
0x10b6   : > { %8317 = vrsqrt.f32 %v6834_v45 }
0x10bc   : > { %v8316_v15 = vpop.eup %8315 }
0x10bd   : > { %v6837_v60 = vmul.f32 %v8316_v15, %v6821_v29 }
0x10bf   : > { %v6843_v41 = vmul.f32 %v6842_v0, %v6837_v60 }
0x10c0   : > { %v8318_v49 = vpop.eup %8317 }
0x10c1   : > { %v6838_v19 = vmul.f32 %v8318_v49, %v6822_v50  ;;  %v6849_v53 = vadd.f32 %v6848_v5, %v6843_v41  ;;  %v7126_v49 = vld [vmem:[%s9706_s20] sm:$0xff] (!%p7530_p5) }
0x10c3   : > { %v6844_v23 = vmul.f32 %v6842_v0, %v6838_v19  ;;  %8070 = vmatprep.mubr.msk.f32.mxu1 %vm875_vm1, %v6849_v53  ;;  %v7127_v19 = vld [vmem:[%s9706_s20 + $0x8] sm:$0xff] (!%p7530_p5) }
0x10c5   : > { %v6850_v46 = vadd.f32 %v6848_v5, %v6844_v23 }
0x10c7   : > { %8071 = vmatmul.mubr.msk.f32.vlgmr.msra.gmra.mrb[72].mxu1 %vm875_vm1, %v6850_v46 }
0x119a   : > { %v8072_v33 = vpop.f32.mrb[72].mxu1 }
0x119b   : > { %v6938_v11 = vadd.f32 %v8072_v33, %v7524_v56  ;;  %v6932_v21 = vpop.f32.mrb[73].mxu1 }
0x119c   : > { %v6933_v59 = vadd.f32 %v7524_v56, %v6932_v21 }
0x119d   : > { %v6942_v32 = vmax.f32 %v6938_v11, 0.0  ;;  %v7531_v11 = vld [vmem:[%s9707_s28] ss:$0 sm:$0xff] (!%p7530_p5) }
0x119e   : > { %v6941_v30 = vmax.f32 %v6933_v59, 0.0  ;;  %v7532_v59 = vld [vmem:[%s9707_s28 + $0x1] ss:$0 sm:$0xff] (!%p7530_p5) }
0x11a0   : > { %8089 = vmatprep.mubr.msk.f32.mxu0 %vm6958_vm10, %v6941_v30 }
0x11a1   : > { %8090 = vmatmul.mubr.msk.f32.vlgmr.msra.gmra.mrb[66].mxu0 %vm6958_vm10, %v6942_v32 }
0x1274   : > { %v8091_v35 = vpop.f32.mrb[66].mxu0 }
0x1275   : > { %v7037_v54 = vadd.f32 %v8091_v35, %v7527_v34  ;;  %v7031_v12 = vpop.f32.mrb[67].mxu0 }
0x1276   : > { %v7032_v38 = vadd.f32 %v7527_v34, %v7031_v12 }
0x1277   : > { %v7041_v39 = vadd.f32 %v7037_v54, %v6850_v46 }
0x1278   : > { %v7040_v18 = vadd.f32 %v7032_v38, %v6849_v53  ;;  %v8139_v53 = vpack.c.bf16 (!%p7530_p5), %v7127_v19, %v7126_v49  ;;  %v7533_v38 = vld [vmem:[%s9708_s18] ss:$0 sm:$0xff] (!%p7530_p5) }
0x1279   : > { %v7045_v22 = vsel %vm875_vm1, %v7041_v39, 0.0 }
0x127a   : > { %7046 = vadd.xlane.f32.xlu0 %v7045_v22  ;;  %v7042_v42 = vsel %vm875_vm1, %v7040_v18, 0.0  ;;  %8140 = vmatprep.subr.bf16.mxu0 (!%p7530_p5), %v8139_v53 }
0x127b   : > { %7043 = vadd.xlane.f32.xlu1 %v7042_v42  ;;  %8142 = vmatpush3.bf16.msra.mxu0 (!%p7530_p5), %v8139_v53 }
0x1307   : > { %v7047_v47 = vpop.xlane.xlu0 %7046 }
0x1308   : > { %v7049_v9 = vmul.f32 0.0625, %v7047_v47  ;;  %v7044_v63 = vpop.xlane.xlu1 %7043 }
0x1309   : > { %v7048_v51 = vmul.f32 0.0625, %v7044_v63 }
0x130a   : > { %v7051_v40 = vsub.f32 %v7041_v39, %v7049_v9 }
0x130b   : > { %v7050_v31 = vsub.f32 %v7040_v18, %v7048_v51 }
0x130c   : > { %v7053_v44 = vmul.f32 %v7051_v40, %v7051_v40 }
0x130d   : > { %v7052_v50 = vmul.f32 %v7050_v31, %v7050_v31 }
0x130e   : > { %v7057_v29 = vsel %vm875_vm1, %v7053_v44, 0.0 }
0x130f   : > { %7058 = vadd.xlane.f32.xlu0 %v7057_v29  ;;  %v7054_v10 = vsel %vm875_vm1, %v7052_v50, 0.0 }
0x1310   : > { %7055 = vadd.xlane.f32.xlu1 %v7054_v10 }
0x139c   : > { %v7059_v7 = vpop.xlane.xlu0 %7058 }
0x139d   : > { %v7061_v58 = vmul.f32 0.0625, %v7059_v7  ;;  %v7056_v62 = vpop.xlane.xlu1 %7055 }
0x139e   : > { %v7060_v61 = vmul.f32 0.0625, %v7056_v62 }
0x139f   : > { %v7063_v6 = vadd.f32 1e-05, %v7061_v58 }
0x13a0   : > { %v7062_v14 = vadd.f32 1e-05, %v7060_v61 }
0x13a1   : > { %8319 = vrsqrt.f32 %v7063_v6 }
0x13a2   : > { %8321 = vrsqrt.f32 %v7062_v14 }
0x13ab   : > { %v8320_v27 = vpop.eup %8319 }
0x13ac   : > { %v8322_v36 = vpop.eup %8321  ;;  %v7067_v28 = vmul.f32 %v8320_v27, %v7051_v40 }
0x13ad   : > { %v7066_v20 = vmul.f32 %v8322_v36, %v7050_v31  ;;  %7085 = sbr.rel (%p7530_p5) target bundleno = 5576 (0x15c8), region = 108 }
0x13ae   : > { %v7073_v57 = vmul.f32 %v7071_v1, %v7067_v28 }
0x13af   : > { %v7072_v16 = vmul.f32 %v7071_v1, %v7066_v20 }
0x13b0   : > { %v7079_v2 = vadd.f32 %v7077_v25, %v7073_v57 }
0x13b1   : > { %v7078_v3 = vadd.f32 %v7077_v25, %v7072_v16 }
0x13b2   : > { %7081 = vst.msk [vmem:[#allocation2 + $0x8] sm:$0xff] %vm875_vm1, %v7079_v2  ;;  %v7091_v13 = vsel (!%p7530_p5), %vm875_vm1, %v7079_v2, 0.0 }
0x13b3   : > { %7080 = vst.msk [vmem:[#allocation2] sm:$0xff] %vm875_vm1, %v7078_v3  ;;  %v7088_v55 = vsel (!%p7530_p5), %vm875_vm1, %v7078_v3, 0.0 }
0x13b4   : > { %7089 = vadd.xlane.f32.xlu0 %v7088_v55 }
0x13b8   : > { %7092 = vadd.xlane.f32.xlu0 %v7091_v13 }
0x1441   : > { %v7090_v4 = vpop.xlane.xlu0 %7089 }
0x1442   : > { %v7094_v45 = vmul.f32 0.0625, %v7090_v4 }
0x1444   : > { %v7096_v37 = vsub.f32 %v7078_v3, %v7094_v45 }
0x1445   : > { %v7093_v17 = vpop.xlane.xlu0 %7092 }
0x1446   : > { %v7095_v8 = vmul.f32 0.0625, %v7093_v17  ;;  %v7098_v0 = vmul.f32 %v7096_v37, %v7096_v37 }
0x1448   : > { %v7097_v15 = vsub.f32 %v7079_v2, %v7095_v8  ;;  %v7100_v60 = vsel %vm875_vm1, %v7098_v0, 0.0 }
0x1449   : > { %7101 = vadd.xlane.f32.xlu1 %v7100_v60 }
0x144a   : > { %v7099_v5 = vmul.f32 %v7097_v15, %v7097_v15 }
0x144c   : > { %v7103_v41 = vsel %vm875_vm1, %v7099_v5, 0.0 }
0x144d   : > { %7104 = vadd.xlane.f32.xlu1 %v7103_v41 }
0x14d6   : > { %v7102_v23 = vpop.xlane.xlu1 %7101 }
0x14d7   : > { %v7106_v46 = vmul.f32 0.0625, %v7102_v23 }
0x14d9   : > { %v7108_v52 = vadd.f32 1e-05, %v7106_v46 }
0x14da   : > { %v7105_v48 = vpop.xlane.xlu1 %7104 }
0x14db   : > { %8326 = vrsqrt.f32 %v7108_v52  ;;  %v7107_v24 = vmul.f32 0.0625, %v7105_v48 }
0x14dd   : > { %v7109_v56 = vadd.f32 1e-05, %v7107_v24 }
0x14df   : > { %8328 = vrsqrt.f32 %v7109_v56 }
0x14e5   : > { %v8327_v33 = vpop.eup %8326 }
0x14e6   : > { %v7112_v21 = vmul.f32 %v8327_v33, %v7096_v37 }
0x14e8   : > { %v7118_v30 = vmul.f32 %v7531_v11, %v7112_v21 }
0x14e9   : > { %v8329_v32 = vpop.eup %8328 }
0x14ea   : > { %v7113_v34 = vmul.f32 %v8329_v32, %v7097_v15  ;;  %v7124_v35 = vadd.f32 %v7532_v59, %v7118_v30 }
0x14ec   : > { %v7119_v54 = vmul.f32 %v7531_v11, %v7113_v34  ;;  %8096 = vmatprep.mubr.msk.f32.mxu0 %vm875_vm1, %v7124_v35 }
0x14ee   : > { %v7125_v12 = vadd.f32 %v7532_v59, %v7119_v54 }
0x14f0   : > { %8097 = vmatmul.mubr.msk.f32.vlgmr.msra.gmra.mrb[0].mxu0 %vm875_vm1, %v7125_v12 }
0x15c3   : > { %v8098_v39 = vpop.f32.mrb[0].mxu0 }
0x15c4   : > { %v7213_v18 = vadd.f32 %v8098_v39, %v7533_v38  ;;  %v7207_v22 = vpop.f32.mrb[1].mxu0 }
0x15c5   : > { %v7208_v42 = vadd.f32 %v7533_v38, %v7207_v22 }
0x15c6   : > { %7217 = vst [vmem:[%s9709_s24 + $0x8] sm:$0xff] %v7213_v18 }
0x15c7   : > { %7216 = vst [vmem:[%s9709_s24] sm:$0xff] %v7208_v42 }
0x15c8 PF: > { %s9710_s4 = sld [smem:[#allocation3_spill]] }
0x15ce   : > { %s30_s1 = sadd.s32 1, %s9710_s4  }
0x15cf   : > { %p27_p6 = scmp.ge.s32.totalorder %s30_s1, 8  }
0x15d1   :  { %29 = sbr.rel (!%p27_p6) target bundleno = 14 (0xe), region = 176 }

</bundles_post_ra>
